<compile_context>
chip_gen: v5e
topology: v5e:2x2
jax: 0.10.0
libtpu: 0.0.40
codegen_flags: <defaults>
</compile_context>

<pallas_src>
import functools
import math

import jax
import jax.numpy as jnp
from jax.experimental import pallas as pl
from jax.experimental.pallas import tpu as pltpu


def _round_up(n, m):
    return ((n + m - 1) // m) * m


def _cdiv(a, b):
    return -(-a // b)


def _default_fold():
    """Fold factor: 4 -> 128 lanes (fills v5e/v4 128x128 MXU); 8 -> 256 lanes (v6e/v7x)."""
    try:
        kind = jax.devices()[0].device_kind.lower()
    except Exception:
        return 4
    for tag in ("v2", "v3", "v4", "v5"):
        if tag in kind:
            return 4
    return 8


def _block_diag(w, fold):
    """(..., fin, fout) -> (..., fold*fin, fold*fout): `fold` copies of w on the diagonal."""
    if fold == 1:
        return w
    eye = jnp.eye(fold, dtype=w.dtype)
    bd = jnp.einsum("ij,...ab->...iajb", eye, w)
    return bd.reshape(*w.shape[:-2], fold * w.shape[-2], fold * w.shape[-1])


def _tile_bias(b, fold):
    """(..., 1, fout) -> (..., 1, fold*fout)."""
    if fold == 1:
        return b
    return jnp.tile(b, (1,) * (b.ndim - 1) + (fold,))


def _ae_kernel(x_ref,
               w_in_e, b_in_e, w_hid_e, b_hid_e, w_lat, b_lat,
               w_in_d, b_in_d, w_hid_d, b_hid_d, w_out, b_out,
               out_ref, *, n_hidden, compute_dtype):
    """Fused autoencoder forward for one lane-folded (TBf, fold*D) batch tile.

    Weights are pre-transposed to (in, out) and block-diagonally replicated
    `fold` times, so y = h @ W_fold + b_fold computes `fold` independent batch
    rows per folded row.  Matmul inputs are `compute_dtype` (bf16 on the fast
    path); MXU accumulation is always f32; bias add / ReLU stay f32.
    """

    def dense(h, w, b, act):
        y = jnp.dot(h.astype(compute_dtype), w,
                    preferred_element_type=jnp.float32) + b
        return jnp.maximum(y, 0.0) if act else y

    # x is already stored in compute_dtype -> no f32 round-trip before the MXU.
    h = dense(x_ref[...], w_in_e[...], b_in_e[...], act=True)

    # ---- Encoder: ReLU after every layer EXCEPT the final latent projection.
    for i in range(n_hidden):                  # static unroll (n_hidden = 9)
        h = dense(h, w_hid_e[i], b_hid_e[i], act=True)
    z = dense(h, w_lat[...], b_lat[...], act=False)

    # ---- Decoder: ReLU after every layer INCLUDING the output layer.
    h = dense(z, w_in_d[...], b_in_d[...], act=True)
    for i in range(n_hidden):
        h = dense(h, w_hid_d[i], b_hid_d[i], act=True)
    out_ref[...] = dense(h, w_out[...], b_out[...], act=True).astype(out_ref.dtype)


def init_params(key, d_in, layer_size, latent_dim, n_hidden=9):
    """He-normal weights (stored transposed as (in, out)) + small uniform biases."""
    # TODO(synk): PyTorch nn.Linear default init is Kaiming-uniform; kept He-normal
    # here (irrelevant to kernel semantics/performance).

    def linear(k, fan_in, fan_out):
        kw, kb = jax.random.split(k)
        w = jax.random.normal(kw, (fan_in, fan_out), jnp.float32) * math.sqrt(2.0 / fan_in)
        b = (jax.random.uniform(kb, (1, fan_out), jnp.float32) - 0.5) * (2.0 / math.sqrt(fan_in))
        return w, b

    keys = jax.random.split(key, 2 * (n_hidden + 2))
    ki = iter(keys)

    p = {}
    p["w_in_e"], p["b_in_e"] = linear(next(ki), d_in, layer_size)
    whe, bhe = zip(*[linear(next(ki), layer_size, layer_size) for _ in range(n_hidden)])
    p["w_hid_e"], p["b_hid_e"] = jnp.stack(whe), jnp.stack(bhe)
    p["w_lat"], p["b_lat"] = linear(next(ki), layer_size, latent_dim)
    p["w_in_d"], p["b_in_d"] = linear(next(ki), latent_dim, layer_size)
    whd, bhd = zip(*[linear(next(ki), layer_size, layer_size) for _ in range(n_hidden)])
    p["w_hid_d"], p["b_hid_d"] = jnp.stack(whd), jnp.stack(bhd)
    p["w_out"], p["b_out"] = linear(next(ki), layer_size, d_in)
    return p


def ae_forward(x, params, *, n_hidden=9, block_b=1024, use_bf16=True,
               bf16_out=None, fold=None):
    """Full autoencoder forward.  x: (B, ...) with prod(...) == dx*dy.  Returns (B, D)."""
    x2 = x.reshape(x.shape[0], -1).astype(jnp.float32)
    B, D = x2.shape
    L = params["w_in_e"].shape[1]
    Z = params["w_lat"].shape[1]

    if fold is None:
        fold = _default_fold()
    if bf16_out is None:
        bf16_out = use_bf16
    compute_dtype = jnp.bfloat16 if use_bf16 else jnp.float32
    out_dtype = jnp.bfloat16 if (use_bf16 and bf16_out) else jnp.float32

    # ---- Batch-tile selection.  Folded rows come in multiples of 16 sublanes,
    # so the batch-row granularity is 16*fold.  TB is picked as a multiple of the
    # granularity that divides the (minimally padded) batch -> jnp.pad only ever
    # adds < 16*fold rows, never a full tile.
    row_gran = 16 * fold
    Bp = _round_up(B, row_gran)
    tb_cap = max(row_gran, _round_up(min(block_b, Bp), row_gran))
    if Bp >= 2 * row_gran:                      # v7x megacore: prefer >= 2 grid steps
        tb_cap = min(tb_cap, _round_up(_cdiv(Bp, 2), row_gran))
    TB = row_gran
    for t in range(tb_cap, row_gran - 1, -row_gran):
        if Bp % t == 0:
            TB = t
            break

    if Bp != B:
        x2 = jnp.pad(x2, ((0, Bp - B), (0, 0)))  # padded rows sliced off below

    # Lane-fold: view `fold` consecutive batch rows as one (fold*D)-lane row.
    x_in = x2.reshape(Bp // fold, fold * D).astype(compute_dtype)

    cast = lambda a: a.astype(compute_dtype)
    bd = lambda w: _block_diag(cast(w), fold)    # weights: cast + block-diag replicate
    tb = lambda b: _tile_bias(b, fold)           # biases stay f32 (VPU math in f32)
    operands = (
        x_in,
        bd(params["w_in_e"]), tb(params["b_in_e"]),
        bd(params["w_hid_e"]), tb(params["b_hid_e"]),
        bd(params["w_lat"]), tb(params["b_lat"]),
        bd(params["w_in_d"]), tb(params["b_in_d"]),
        bd(params["w_hid_d"]), tb(params["b_hid_d"]),
        bd(params["w_out"]), tb(params["b_out"]),
    )

    Df, Lf, Zf = fold * D, fold * L, fold * Z
    TBf = TB // fold

    # Weights/biases: full-array blocks with constant index_maps -> DMAed once and
    # kept resident in VMEM across every batch tile.
    res2 = lambda shape: pl.BlockSpec(shape, lambda i: (0, 0))
    res3 = lambda shape: pl.BlockSpec(shape, lambda i: (0, 0, 0))
    in_specs = [
        pl.BlockSpec((TBf, Df), lambda i: (i, 0)),      # x: tiled over folded batch rows
        res2((Df, Lf)), res2((1, Lf)),
        res3((n_hidden, Lf, Lf)), res3((n_hidden, 1, Lf)),
        res2((Lf, Zf)), res2((1, Zf)),
        res2((Zf, Lf)), res2((1, Lf)),
        res3((n_hidden, Lf, Lf)), res3((n_hidden, 1, Lf)),
        res2((Lf, Df)), res2((1, Df)),
    ]
    out_specs = pl.BlockSpec((TBf, Df), lambda i: (i, 0))

    flops = int(2 * Bp * fold * (2 * D * L + 2 * n_hidden * L * L + 2 * L * Z))
    bytes_accessed = int(
        x_in.size * x_in.dtype.itemsize
        + Bp * D * jnp.dtype(out_dtype).itemsize
        + sum(o.size * o.dtype.itemsize for o in operands[1:]))

    out = pl.pallas_call(
        functools.partial(_ae_kernel, n_hidden=n_hidden, compute_dtype=compute_dtype),
        out_shape=jax.ShapeDtypeStruct((Bp // fold, Df), out_dtype),
        grid=(Bp // TB,),
        in_specs=in_specs,
        out_specs=out_specs,
        compiler_params=pltpu.CompilerParams(
            dimension_semantics=("parallel",),           # batch tiles split over TCs
            vmem_limit_bytes=32 * 1024 * 1024),
        cost_estimate=pl.CostEstimate(flops=flops, transcendentals=0,
                                      bytes_accessed=bytes_accessed),
    )(*operands)
    return out.reshape(Bp, D)[:B]


def _reference_forward(x, params, *, n_hidden=9, compute_dtype=jnp.float32):
    """Pure-JAX reference with the exact module semantics (activation = ReLU)."""
    x = x.reshape(x.shape[0], -1).astype(jnp.float32)

    def dense(h, w, b, act):
        y = jnp.dot(h.astype(compute_dtype), w.astype(compute_dtype),
                    preferred_element_type=jnp.float32) + b
        return jnp.maximum(y, 0.0) if act else y

    h = dense(x, params["w_in_e"], params["b_in_e"], True)
    for i in range(n_hidden):
        h = dense(h, params["w_hid_e"][i], params["b_hid_e"][i], True)
    z = dense(h, params["w_lat"], params["b_lat"], False)
    h = dense(z, params["w_in_d"], params["b_in_d"], True)
    for i in range(n_hidden):
        h = dense(h, params["w_hid_d"][i], params["b_hid_d"][i], True)
    return dense(h, params["w_out"], params["b_out"], True)


if __name__ == "__main__":
    # Small shapes consistent with the module:
    #   no_channels=1, dx=dy=16 -> D=256, layer_size=32, latent_dim=8, batch=2.
    B = 2
    no_channels = 1
    dx = dy = 16
    layer_size = 32
    latent_dim = 8
    n_hidden = 9            # nine Linear(L, L) hidden layers per encoder/decoder

    key = jax.random.PRNGKey(0)
    k_x, k_p = jax.random.split(key)
    x = jax.random.uniform(k_x, (B, no_channels, dx, dy), jnp.float32)
    params = init_params(k_p, dx * dy, layer_size, latent_dim, n_hidden)

    # Pure-f32 path (f32 output), checked tightly against the f32 reference.
    out_f32 = jax.block_until_ready(
        ae_forward(x, params, n_hidden=n_hidden, use_bf16=False))
    ref_f32 = _reference_forward(x, params, n_hidden=n_hidden,
                                 compute_dtype=jnp.float32)
    assert out_f32.shape == (B, dx * dy)
    assert out_f32.dtype == jnp.float32
    assert jnp.allclose(out_f32, ref_f32, atol=1e-4, rtol=1e-4), "f32 mismatch"

    # Fast bf16-input / f32-accumulate / bf16-output path (default), checked
    # against a reference applying the same bf16 casts at the matmul inputs
    # (tolerance covers the final bf16 output rounding).
    out_bf16 = jax.block_until_ready(
        ae_forward(x, params, n_hidden=n_hidden, use_bf16=True))
    ref_bf16 = _reference_forward(x, params, n_hidden=n_hidden,
                                  compute_dtype=jnp.bfloat16)
    assert out_bf16.shape == (B, dx * dy)
    assert jnp.allclose(out_bf16.astype(jnp.float32), ref_bf16,
                        atol=2e-2, rtol=2e-2), "bf16 mismatch"

    print("KERNEL_OK")
</pallas_src>

<mosaic_0001>
module attributes {stable_mosaic.version = 11 : i64} {
  func.func @_ae_kernel(%arg0: i32, %arg1: memref<16x2048xf32, #tpu.memory_space<vmem>>, %arg2: memref<2048x256xf32, #tpu.memory_space<vmem>>, %arg3: memref<1x256xf32, #tpu.memory_space<vmem>>, %arg4: memref<9x256x256xf32, #tpu.memory_space<vmem>>, %arg5: memref<9x1x256xf32, #tpu.memory_space<vmem>>, %arg6: memref<256x64xf32, #tpu.memory_space<vmem>>, %arg7: memref<1x64xf32, #tpu.memory_space<vmem>>, %arg8: memref<64x256xf32, #tpu.memory_space<vmem>>, %arg9: memref<1x256xf32, #tpu.memory_space<vmem>>, %arg10: memref<9x256x256xf32, #tpu.memory_space<vmem>>, %arg11: memref<9x1x256xf32, #tpu.memory_space<vmem>>, %arg12: memref<256x2048xf32, #tpu.memory_space<vmem>>, %arg13: memref<1x2048xf32, #tpu.memory_space<vmem>>, %arg14: memref<16x2048xf32, #tpu.memory_space<vmem>>) attributes {dimension_semantics = [#tpu.dimension_semantics<parallel>], iteration_bounds = array<i64: 1>, scalar_prefetch = 0 : i64, scratch_operands = 0 : i64, tpu.core_type = #tpu.core_type<tc>, window_params = [{transform_indices = @transform_0, window_bounds = array<i64: 16, 2048>}, {pipeline_mode = #tpu.pipeline_mode<synchronous>, transform_indices = @transform_1, window_bounds = array<i64: 2048, 256>}, {pipeline_mode = #tpu.pipeline_mode<synchronous>, transform_indices = @transform_2, window_bounds = array<i64: 1, 256>}, {pipeline_mode = #tpu.pipeline_mode<synchronous>, transform_indices = @transform_3, window_bounds = array<i64: 9, 256, 256>}, {pipeline_mode = #tpu.pipeline_mode<synchronous>, transform_indices = @transform_4, window_bounds = array<i64: 9, 1, 256>}, {pipeline_mode = #tpu.pipeline_mode<synchronous>, transform_indices = @transform_5, window_bounds = array<i64: 256, 64>}, {pipeline_mode = #tpu.pipeline_mode<synchronous>, transform_indices = @transform_6, window_bounds = array<i64: 1, 64>}, {pipeline_mode = #tpu.pipeline_mode<synchronous>, transform_indices = @transform_7, window_bounds = array<i64: 64, 256>}, {pipeline_mode = #tpu.pipeline_mode<synchronous>, transform_indices = @transform_8, window_bounds = array<i64: 1, 256>}, {pipeline_mode = #tpu.pipeline_mode<synchronous>, transform_indices = @transform_9, window_bounds = array<i64: 9, 256, 256>}, {pipeline_mode = #tpu.pipeline_mode<synchronous>, transform_indices = @transform_10, window_bounds = array<i64: 9, 1, 256>}, {pipeline_mode = #tpu.pipeline_mode<synchronous>, transform_indices = @transform_11, window_bounds = array<i64: 256, 2048>}, {pipeline_mode = #tpu.pipeline_mode<synchronous>, transform_indices = @transform_12, window_bounds = array<i64: 1, 2048>}, {transform_indices = @transform_13, window_bounds = array<i64: 16, 2048>}]} {
    %c0 = arith.constant 0 : index
    %c0_0 = arith.constant 0 : index
    %0 = vector.load %arg1[%c0, %c0_0] : memref<16x2048xf32, #tpu.memory_space<vmem>>, vector<16x2048xf32>
    %c0_1 = arith.constant 0 : index
    %c0_2 = arith.constant 0 : index
    %1 = vector.load %arg2[%c0_1, %c0_2] : memref<2048x256xf32, #tpu.memory_space<vmem>>, vector<2048x256xf32>
    %c0_3 = arith.constant 0 : index
    %c0_4 = arith.constant 0 : index
    %2 = vector.load %arg3[%c0_3, %c0_4] : memref<1x256xf32, #tpu.memory_space<vmem>>, vector<1x256xf32>
    %cst = arith.constant dense<0.000000e+00> : vector<16x256xf32>
    %3 = tpu.matmul %0, %1, %cst {dimension_numbers = #tpu.dot_dimension_numbers<[1], [0], [0], [1], [0, 0, 1, 1], [], []>} : vector<16x2048xf32>, vector<2048x256xf32>, vector<16x256xf32> -> vector<16x256xf32>
    %4 = vector.broadcast %2 : vector<1x256xf32> to vector<16x256xf32>
    %5 = arith.addf %3, %4 : vector<16x256xf32>
    %cst_5 = arith.constant 0.000000e+00 : f32
    %6 = vector.broadcast %cst_5 : f32 to vector<16x256xf32>
    %7 = arith.maximumf %5, %6 : vector<16x256xf32>
    %c0_6 = arith.constant 0 : index
    %c0_7 = arith.constant 0 : index
    %c0_8 = arith.constant 0 : index
    %8 = vector.load %arg4[%c0_6, %c0_7, %c0_8] : memref<9x256x256xf32, #tpu.memory_space<vmem>>, vector<1x256x256xf32>
    %9 = vector.shape_cast %8 : vector<1x256x256xf32> to vector<256x256xf32>
    %c0_9 = arith.constant 0 : index
    %c0_10 = arith.constant 0 : index
    %c0_11 = arith.constant 0 : index
    %10 = vector.load %arg5[%c0_9, %c0_10, %c0_11] : memref<9x1x256xf32, #tpu.memory_space<vmem>>, vector<1x1x256xf32>
    %11 = vector.shape_cast %10 : vector<1x1x256xf32> to vector<1x256xf32>
    %cst_12 = arith.constant dense<0.000000e+00> : vector<16x256xf32>
    %12 = tpu.matmul %7, %9, %cst_12 {dimension_numbers = #tpu.dot_dimension_numbers<[1], [0], [0], [1], [0, 0, 1, 1], [], []>} : vector<16x256xf32>, vector<256x256xf32>, vector<16x256xf32> -> vector<16x256xf32>
    %13 = vector.broadcast %11 : vector<1x256xf32> to vector<16x256xf32>
    %14 = arith.addf %12, %13 : vector<16x256xf32>
    %cst_13 = arith.constant 0.000000e+00 : f32
    %15 = vector.broadcast %cst_13 : f32 to vector<16x256xf32>
    %16 = arith.maximumf %14, %15 : vector<16x256xf32>
    %c1 = arith.constant 1 : index
    %c0_14 = arith.constant 0 : index
    %c0_15 = arith.constant 0 : index
    %17 = vector.load %arg4[%c1, %c0_14, %c0_15] : memref<9x256x256xf32, #tpu.memory_space<vmem>>, vector<1x256x256xf32>
    %18 = vector.shape_cast %17 : vector<1x256x256xf32> to vector<256x256xf32>
    %c1_16 = arith.constant 1 : index
    %c0_17 = arith.constant 0 : index
    %c0_18 = arith.constant 0 : index
    %19 = vector.load %arg5[%c1_16, %c0_17, %c0_18] : memref<9x1x256xf32, #tpu.memory_space<vmem>>, vector<1x1x256xf32>
    %20 = vector.shape_cast %19 : vector<1x1x256xf32> to vector<1x256xf32>
    %cst_19 = arith.constant dense<0.000000e+00> : vector<16x256xf32>
    %21 = tpu.matmul %16, %18, %cst_19 {dimension_numbers = #tpu.dot_dimension_numbers<[1], [0], [0], [1], [0, 0, 1, 1], [], []>} : vector<16x256xf32>, vector<256x256xf32>, vector<16x256xf32> -> vector<16x256xf32>
    %22 = vector.broadcast %20 : vector<1x256xf32> to vector<16x256xf32>
    %23 = arith.addf %21, %22 : vector<16x256xf32>
    %cst_20 = arith.constant 0.000000e+00 : f32
    %24 = vector.broadcast %cst_20 : f32 to vector<16x256xf32>
    %25 = arith.maximumf %23, %24 : vector<16x256xf32>
    %c2 = arith.constant 2 : index
    %c0_21 = arith.constant 0 : index
    %c0_22 = arith.constant 0 : index
    %26 = vector.load %arg4[%c2, %c0_21, %c0_22] : memref<9x256x256xf32, #tpu.memory_space<vmem>>, vector<1x256x256xf32>
    %27 = vector.shape_cast %26 : vector<1x256x256xf32> to vector<256x256xf32>
    %c2_23 = arith.constant 2 : index
    %c0_24 = arith.constant 0 : index
    %c0_25 = arith.constant 0 : index
    %28 = vector.load %arg5[%c2_23, %c0_24, %c0_25] : memref<9x1x256xf32, #tpu.memory_space<vmem>>, vector<1x1x256xf32>
    %29 = vector.shape_cast %28 : vector<1x1x256xf32> to vector<1x256xf32>
    %cst_26 = arith.constant dense<0.000000e+00> : vector<16x256xf32>
    %30 = tpu.matmul %25, %27, %cst_26 {dimension_numbers = #tpu.dot_dimension_numbers<[1], [0], [0], [1], [0, 0, 1, 1], [], []>} : vector<16x256xf32>, vector<256x256xf32>, vector<16x256xf32> -> vector<16x256xf32>
    %31 = vector.broadcast %29 : vector<1x256xf32> to vector<16x256xf32>
    %32 = arith.addf %30, %31 : vector<16x256xf32>
    %cst_27 = arith.constant 0.000000e+00 : f32
    %33 = vector.broadcast %cst_27 : f32 to vector<16x256xf32>
    %34 = arith.maximumf %32, %33 : vector<16x256xf32>
    %c3 = arith.constant 3 : index
    %c0_28 = arith.constant 0 : index
    %c0_29 = arith.constant 0 : index
    %35 = vector.load %arg4[%c3, %c0_28, %c0_29] : memref<9x256x256xf32, #tpu.memory_space<vmem>>, vector<1x256x256xf32>
    %36 = vector.shape_cast %35 : vector<1x256x256xf32> to vector<256x256xf32>
    %c3_30 = arith.constant 3 : index
    %c0_31 = arith.constant 0 : index
    %c0_32 = arith.constant 0 : index
    %37 = vector.load %arg5[%c3_30, %c0_31, %c0_32] : memref<9x1x256xf32, #tpu.memory_space<vmem>>, vector<1x1x256xf32>
    %38 = vector.shape_cast %37 : vector<1x1x256xf32> to vector<1x256xf32>
    %cst_33 = arith.constant dense<0.000000e+00> : vector<16x256xf32>
    %39 = tpu.matmul %34, %36, %cst_33 {dimension_numbers = #tpu.dot_dimension_numbers<[1], [0], [0], [1], [0, 0, 1, 1], [], []>} : vector<16x256xf32>, vector<256x256xf32>, vector<16x256xf32> -> vector<16x256xf32>
    %40 = vector.broadcast %38 : vector<1x256xf32> to vector<16x256xf32>
    %41 = arith.addf %39, %40 : vector<16x256xf32>
    %cst_34 = arith.constant 0.000000e+00 : f32
    %42 = vector.broadcast %cst_34 : f32 to vector<16x256xf32>
    %43 = arith.maximumf %41, %42 : vector<16x256xf32>
    %c4 = arith.constant 4 : index
    %c0_35 = arith.constant 0 : index
    %c0_36 = arith.constant 0 : index
    %44 = vector.load %arg4[%c4, %c0_35, %c0_36] : memref<9x256x256xf32, #tpu.memory_space<vmem>>, vector<1x256x256xf32>
    %45 = vector.shape_cast %44 : vector<1x256x256xf32> to vector<256x256xf32>
    %c4_37 = arith.constant 4 : index
    %c0_38 = arith.constant 0 : index
    %c0_39 = arith.constant 0 : index
    %46 = vector.load %arg5[%c4_37, %c0_38, %c0_39] : memref<9x1x256xf32, #tpu.memory_space<vmem>>, vector<1x1x256xf32>
    %47 = vector.shape_cast %46 : vector<1x1x256xf32> to vector<1x256xf32>
    %cst_40 = arith.constant dense<0.000000e+00> : vector<16x256xf32>
    %48 = tpu.matmul %43, %45, %cst_40 {dimension_numbers = #tpu.dot_dimension_numbers<[1], [0], [0], [1], [0, 0, 1, 1], [], []>} : vector<16x256xf32>, vector<256x256xf32>, vector<16x256xf32> -> vector<16x256xf32>
    %49 = vector.broadcast %47 : vector<1x256xf32> to vector<16x256xf32>
    %50 = arith.addf %48, %49 : vector<16x256xf32>
    %cst_41 = arith.constant 0.000000e+00 : f32
    %51 = vector.broadcast %cst_41 : f32 to vector<16x256xf32>
    %52 = arith.maximumf %50, %51 : vector<16x256xf32>
    %c5 = arith.constant 5 : index
    %c0_42 = arith.constant 0 : index
    %c0_43 = arith.constant 0 : index
    %53 = vector.load %arg4[%c5, %c0_42, %c0_43] : memref<9x256x256xf32, #tpu.memory_space<vmem>>, vector<1x256x256xf32>
    %54 = vector.shape_cast %53 : vector<1x256x256xf32> to vector<256x256xf32>
    %c5_44 = arith.constant 5 : index
    %c0_45 = arith.constant 0 : index
    %c0_46 = arith.constant 0 : index
    %55 = vector.load %arg5[%c5_44, %c0_45, %c0_46] : memref<9x1x256xf32, #tpu.memory_space<vmem>>, vector<1x1x256xf32>
    %56 = vector.shape_cast %55 : vector<1x1x256xf32> to vector<1x256xf32>
    %cst_47 = arith.constant dense<0.000000e+00> : vector<16x256xf32>
    %57 = tpu.matmul %52, %54, %cst_47 {dimension_numbers = #tpu.dot_dimension_numbers<[1], [0], [0], [1], [0, 0, 1, 1], [], []>} : vector<16x256xf32>, vector<256x256xf32>, vector<16x256xf32> -> vector<16x256xf32>
    %58 = vector.broadcast %56 : vector<1x256xf32> to vector<16x256xf32>
    %59 = arith.addf %57, %58 : vector<16x256xf32>
    %cst_48 = arith.constant 0.000000e+00 : f32
    %60 = vector.broadcast %cst_48 : f32 to vector<16x256xf32>
    %61 = arith.maximumf %59, %60 : vector<16x256xf32>
    %c6 = arith.constant 6 : index
    %c0_49 = arith.constant 0 : index
    %c0_50 = arith.constant 0 : index
    %62 = vector.load %arg4[%c6, %c0_49, %c0_50] : memref<9x256x256xf32, #tpu.memory_space<vmem>>, vector<1x256x256xf32>
    %63 = vector.shape_cast %62 : vector<1x256x256xf32> to vector<256x256xf32>
    %c6_51 = arith.constant 6 : index
    %c0_52 = arith.constant 0 : index
    %c0_53 = arith.constant 0 : index
    %64 = vector.load %arg5[%c6_51, %c0_52, %c0_53] : memref<9x1x256xf32, #tpu.memory_space<vmem>>, vector<1x1x256xf32>
    %65 = vector.shape_cast %64 : vector<1x1x256xf32> to vector<1x256xf32>
    %cst_54 = arith.constant dense<0.000000e+00> : vector<16x256xf32>
    %66 = tpu.matmul %61, %63, %cst_54 {dimension_numbers = #tpu.dot_dimension_numbers<[1], [0], [0], [1], [0, 0, 1, 1], [], []>} : vector<16x256xf32>, vector<256x256xf32>, vector<16x256xf32> -> vector<16x256xf32>
    %67 = vector.broadcast %65 : vector<1x256xf32> to vector<16x256xf32>
    %68 = arith.addf %66, %67 : vector<16x256xf32>
    %cst_55 = arith.constant 0.000000e+00 : f32
    %69 = vector.broadcast %cst_55 : f32 to vector<16x256xf32>
    %70 = arith.maximumf %68, %69 : vector<16x256xf32>
    %c7 = arith.constant 7 : index
    %c0_56 = arith.constant 0 : index
    %c0_57 = arith.constant 0 : index
    %71 = vector.load %arg4[%c7, %c0_56, %c0_57] : memref<9x256x256xf32, #tpu.memory_space<vmem>>, vector<1x256x256xf32>
    %72 = vector.shape_cast %71 : vector<1x256x256xf32> to vector<256x256xf32>
    %c7_58 = arith.constant 7 : index
    %c0_59 = arith.constant 0 : index
    %c0_60 = arith.constant 0 : index
    %73 = vector.load %arg5[%c7_58, %c0_59, %c0_60] : memref<9x1x256xf32, #tpu.memory_space<vmem>>, vector<1x1x256xf32>
    %74 = vector.shape_cast %73 : vector<1x1x256xf32> to vector<1x256xf32>
    %cst_61 = arith.constant dense<0.000000e+00> : vector<16x256xf32>
    %75 = tpu.matmul %70, %72, %cst_61 {dimension_numbers = #tpu.dot_dimension_numbers<[1], [0], [0], [1], [0, 0, 1, 1], [], []>} : vector<16x256xf32>, vector<256x256xf32>, vector<16x256xf32> -> vector<16x256xf32>
    %76 = vector.broadcast %74 : vector<1x256xf32> to vector<16x256xf32>
    %77 = arith.addf %75, %76 : vector<16x256xf32>
    %cst_62 = arith.constant 0.000000e+00 : f32
    %78 = vector.broadcast %cst_62 : f32 to vector<16x256xf32>
    %79 = arith.maximumf %77, %78 : vector<16x256xf32>
    %c8 = arith.constant 8 : index
    %c0_63 = arith.constant 0 : index
    %c0_64 = arith.constant 0 : index
    %80 = vector.load %arg4[%c8, %c0_63, %c0_64] : memref<9x256x256xf32, #tpu.memory_space<vmem>>, vector<1x256x256xf32>
    %81 = vector.shape_cast %80 : vector<1x256x256xf32> to vector<256x256xf32>
    %c8_65 = arith.constant 8 : index
    %c0_66 = arith.constant 0 : index
    %c0_67 = arith.constant 0 : index
    %82 = vector.load %arg5[%c8_65, %c0_66, %c0_67] : memref<9x1x256xf32, #tpu.memory_space<vmem>>, vector<1x1x256xf32>
    %83 = vector.shape_cast %82 : vector<1x1x256xf32> to vector<1x256xf32>
    %cst_68 = arith.constant dense<0.000000e+00> : vector<16x256xf32>
    %84 = tpu.matmul %79, %81, %cst_68 {dimension_numbers = #tpu.dot_dimension_numbers<[1], [0], [0], [1], [0, 0, 1, 1], [], []>} : vector<16x256xf32>, vector<256x256xf32>, vector<16x256xf32> -> vector<16x256xf32>
    %85 = vector.broadcast %83 : vector<1x256xf32> to vector<16x256xf32>
    %86 = arith.addf %84, %85 : vector<16x256xf32>
    %cst_69 = arith.constant 0.000000e+00 : f32
    %87 = vector.broadcast %cst_69 : f32 to vector<16x256xf32>
    %88 = arith.maximumf %86, %87 : vector<16x256xf32>
    %c0_70 = arith.constant 0 : index
    %c0_71 = arith.constant 0 : index
    %89 = vector.load %arg6[%c0_70, %c0_71] : memref<256x64xf32, #tpu.memory_space<vmem>>, vector<256x64xf32>
    %c0_72 = arith.constant 0 : index
    %c0_73 = arith.constant 0 : index
    %90 = vector.load %arg7[%c0_72, %c0_73] : memref<1x64xf32, #tpu.memory_space<vmem>>, vector<1x64xf32>
    %cst_74 = arith.constant dense<0.000000e+00> : vector<16x64xf32>
    %91 = tpu.matmul %88, %89, %cst_74 {dimension_numbers = #tpu.dot_dimension_numbers<[1], [0], [0], [1], [0, 0, 1, 1], [], []>} : vector<16x256xf32>, vector<256x64xf32>, vector<16x64xf32> -> vector<16x64xf32>
    %92 = vector.broadcast %90 : vector<1x64xf32> to vector<16x64xf32>
    %93 = arith.addf %91, %92 : vector<16x64xf32>
    %c0_75 = arith.constant 0 : index
    %c0_76 = arith.constant 0 : index
    %94 = vector.load %arg8[%c0_75, %c0_76] : memref<64x256xf32, #tpu.memory_space<vmem>>, vector<64x256xf32>
    %c0_77 = arith.constant 0 : index
    %c0_78 = arith.constant 0 : index
    %95 = vector.load %arg9[%c0_77, %c0_78] : memref<1x256xf32, #tpu.memory_space<vmem>>, vector<1x256xf32>
    %cst_79 = arith.constant dense<0.000000e+00> : vector<16x256xf32>
    %96 = tpu.matmul %93, %94, %cst_79 {dimension_numbers = #tpu.dot_dimension_numbers<[1], [0], [0], [1], [0, 0, 1, 1], [], []>} : vector<16x64xf32>, vector<64x256xf32>, vector<16x256xf32> -> vector<16x256xf32>
    %97 = vector.broadcast %95 : vector<1x256xf32> to vector<16x256xf32>
    %98 = arith.addf %96, %97 : vector<16x256xf32>
    %cst_80 = arith.constant 0.000000e+00 : f32
    %99 = vector.broadcast %cst_80 : f32 to vector<16x256xf32>
    %100 = arith.maximumf %98, %99 : vector<16x256xf32>
    %c0_81 = arith.constant 0 : index
    %c0_82 = arith.constant 0 : index
    %c0_83 = arith.constant 0 : index
    %101 = vector.load %arg10[%c0_81, %c0_82, %c0_83] : memref<9x256x256xf32, #tpu.memory_space<vmem>>, vector<1x256x256xf32>
    %102 = vector.shape_cast %101 : vector<1x256x256xf32> to vector<256x256xf32>
    %c0_84 = arith.constant 0 : index
    %c0_85 = arith.constant 0 : index
    %c0_86 = arith.constant 0 : index
    %103 = vector.load %arg11[%c0_84, %c0_85, %c0_86] : memref<9x1x256xf32, #tpu.memory_space<vmem>>, vector<1x1x256xf32>
    %104 = vector.shape_cast %103 : vector<1x1x256xf32> to vector<1x256xf32>
    %cst_87 = arith.constant dense<0.000000e+00> : vector<16x256xf32>
    %105 = tpu.matmul %100, %102, %cst_87 {dimension_numbers = #tpu.dot_dimension_numbers<[1], [0], [0], [1], [0, 0, 1, 1], [], []>} : vector<16x256xf32>, vector<256x256xf32>, vector<16x256xf32> -> vector<16x256xf32>
    %106 = vector.broadcast %104 : vector<1x256xf32> to vector<16x256xf32>
    %107 = arith.addf %105, %106 : vector<16x256xf32>
    %cst_88 = arith.constant 0.000000e+00 : f32
    %108 = vector.broadcast %cst_88 : f32 to vector<16x256xf32>
    %109 = arith.maximumf %107, %108 : vector<16x256xf32>
    %c1_89 = arith.constant 1 : index
    %c0_90 = arith.constant 0 : index
    %c0_91 = arith.constant 0 : index
    %110 = vector.load %arg10[%c1_89, %c0_90, %c0_91] : memref<9x256x256xf32, #tpu.memory_space<vmem>>, vector<1x256x256xf32>
    %111 = vector.shape_cast %110 : vector<1x256x256xf32> to vector<256x256xf32>
    %c1_92 = arith.constant 1 : index
    %c0_93 = arith.constant 0 : index
    %c0_94 = arith.constant 0 : index
    %112 = vector.load %arg11[%c1_92, %c0_93, %c0_94] : memref<9x1x256xf32, #tpu.memory_space<vmem>>, vector<1x1x256xf32>
    %113 = vector.shape_cast %112 : vector<1x1x256xf32> to vector<1x256xf32>
    %cst_95 = arith.constant dense<0.000000e+00> : vector<16x256xf32>
    %114 = tpu.matmul %109, %111, %cst_95 {dimension_numbers = #tpu.dot_dimension_numbers<[1], [0], [0], [1], [0, 0, 1, 1], [], []>} : vector<16x256xf32>, vector<256x256xf32>, vector<16x256xf32> -> vector<16x256xf32>
    %115 = vector.broadcast %113 : vector<1x256xf32> to vector<16x256xf32>
    %116 = arith.addf %114, %115 : vector<16x256xf32>
    %cst_96 = arith.constant 0.000000e+00 : f32
    %117 = vector.broadcast %cst_96 : f32 to vector<16x256xf32>
    %118 = arith.maximumf %116, %117 : vector<16x256xf32>
    %c2_97 = arith.constant 2 : index
    %c0_98 = arith.constant 0 : index
    %c0_99 = arith.constant 0 : index
    %119 = vector.load %arg10[%c2_97, %c0_98, %c0_99] : memref<9x256x256xf32, #tpu.memory_space<vmem>>, vector<1x256x256xf32>
    %120 = vector.shape_cast %119 : vector<1x256x256xf32> to vector<256x256xf32>
    %c2_100 = arith.constant 2 : index
    %c0_101 = arith.constant 0 : index
    %c0_102 = arith.constant 0 : index
    %121 = vector.load %arg11[%c2_100, %c0_101, %c0_102] : memref<9x1x256xf32, #tpu.memory_space<vmem>>, vector<1x1x256xf32>
    %122 = vector.shape_cast %121 : vector<1x1x256xf32> to vector<1x256xf32>
    %cst_103 = arith.constant dense<0.000000e+00> : vector<16x256xf32>
    %123 = tpu.matmul %118, %120, %cst_103 {dimension_numbers = #tpu.dot_dimension_numbers<[1], [0], [0], [1], [0, 0, 1, 1], [], []>} : vector<16x256xf32>, vector<256x256xf32>, vector<16x256xf32> -> vector<16x256xf32>
    %124 = vector.broadcast %122 : vector<1x256xf32> to vector<16x256xf32>
    %125 = arith.addf %123, %124 : vector<16x256xf32>
    %cst_104 = arith.constant 0.000000e+00 : f32
    %126 = vector.broadcast %cst_104 : f32 to vector<16x256xf32>
    %127 = arith.maximumf %125, %126 : vector<16x256xf32>
    %c3_105 = arith.constant 3 : index
    %c0_106 = arith.constant 0 : index
    %c0_107 = arith.constant 0 : index
    %128 = vector.load %arg10[%c3_105, %c0_106, %c0_107] : memref<9x256x256xf32, #tpu.memory_space<vmem>>, vector<1x256x256xf32>
    %129 = vector.shape_cast %128 : vector<1x256x256xf32> to vector<256x256xf32>
    %c3_108 = arith.constant 3 : index
    %c0_109 = arith.constant 0 : index
    %c0_110 = arith.constant 0 : index
    %130 = vector.load %arg11[%c3_108, %c0_109, %c0_110] : memref<9x1x256xf32, #tpu.memory_space<vmem>>, vector<1x1x256xf32>
    %131 = vector.shape_cast %130 : vector<1x1x256xf32> to vector<1x256xf32>
    %cst_111 = arith.constant dense<0.000000e+00> : vector<16x256xf32>
    %132 = tpu.matmul %127, %129, %cst_111 {dimension_numbers = #tpu.dot_dimension_numbers<[1], [0], [0], [1], [0, 0, 1, 1], [], []>} : vector<16x256xf32>, vector<256x256xf32>, vector<16x256xf32> -> vector<16x256xf32>
    %133 = vector.broadcast %131 : vector<1x256xf32> to vector<16x256xf32>
    %134 = arith.addf %132, %133 : vector<16x256xf32>
    %cst_112 = arith.constant 0.000000e+00 : f32
    %135 = vector.broadcast %cst_112 : f32 to vector<16x256xf32>
    %136 = arith.maximumf %134, %135 : vector<16x256xf32>
    %c4_113 = arith.constant 4 : index
    %c0_114 = arith.constant 0 : index
    %c0_115 = arith.constant 0 : index
    %137 = vector.load %arg10[%c4_113, %c0_114, %c0_115] : memref<9x256x256xf32, #tpu.memory_space<vmem>>, vector<1x256x256xf32>
    %138 = vector.shape_cast %137 : vector<1x256x256xf32> to vector<256x256xf32>
    %c4_116 = arith.constant 4 : index
    %c0_117 = arith.constant 0 : index
    %c0_118 = arith.constant 0 : index
    %139 = vector.load %arg11[%c4_116, %c0_117, %c0_118] : memref<9x1x256xf32, #tpu.memory_space<vmem>>, vector<1x1x256xf32>
    %140 = vector.shape_cast %139 : vector<1x1x256xf32> to vector<1x256xf32>
    %cst_119 = arith.constant dense<0.000000e+00> : vector<16x256xf32>
    %141 = tpu.matmul %136, %138, %cst_119 {dimension_numbers = #tpu.dot_dimension_numbers<[1], [0], [0], [1], [0, 0, 1, 1], [], []>} : vector<16x256xf32>, vector<256x256xf32>, vector<16x256xf32> -> vector<16x256xf32>
    %142 = vector.broadcast %140 : vector<1x256xf32> to vector<16x256xf32>
    %143 = arith.addf %141, %142 : vector<16x256xf32>
    %cst_120 = arith.constant 0.000000e+00 : f32
    %144 = vector.broadcast %cst_120 : f32 to vector<16x256xf32>
    %145 = arith.maximumf %143, %144 : vector<16x256xf32>
    %c5_121 = arith.constant 5 : index
    %c0_122 = arith.constant 0 : index
    %c0_123 = arith.constant 0 : index
    %146 = vector.load %arg10[%c5_121, %c0_122, %c0_123] : memref<9x256x256xf32, #tpu.memory_space<vmem>>, vector<1x256x256xf32>
    %147 = vector.shape_cast %146 : vector<1x256x256xf32> to vector<256x256xf32>
    %c5_124 = arith.constant 5 : index
    %c0_125 = arith.constant 0 : index
    %c0_126 = arith.constant 0 : index
    %148 = vector.load %arg11[%c5_124, %c0_125, %c0_126] : memref<9x1x256xf32, #tpu.memory_space<vmem>>, vector<1x1x256xf32>
    %149 = vector.shape_cast %148 : vector<1x1x256xf32> to vector<1x256xf32>
    %cst_127 = arith.constant dense<0.000000e+00> : vector<16x256xf32>
    %150 = tpu.matmul %145, %147, %cst_127 {dimension_numbers = #tpu.dot_dimension_numbers<[1], [0], [0], [1], [0, 0, 1, 1], [], []>} : vector<16x256xf32>, vector<256x256xf32>, vector<16x256xf32> -> vector<16x256xf32>
    %151 = vector.broadcast %149 : vector<1x256xf32> to vector<16x256xf32>
    %152 = arith.addf %150, %151 : vector<16x256xf32>
    %cst_128 = arith.constant 0.000000e+00 : f32
    %153 = vector.broadcast %cst_128 : f32 to vector<16x256xf32>
    %154 = arith.maximumf %152, %153 : vector<16x256xf32>
    %c6_129 = arith.constant 6 : index
    %c0_130 = arith.constant 0 : index
    %c0_131 = arith.constant 0 : index
    %155 = vector.load %arg10[%c6_129, %c0_130, %c0_131] : memref<9x256x256xf32, #tpu.memory_space<vmem>>, vector<1x256x256xf32>
    %156 = vector.shape_cast %155 : vector<1x256x256xf32> to vector<256x256xf32>
    %c6_132 = arith.constant 6 : index
    %c0_133 = arith.constant 0 : index
    %c0_134 = arith.constant 0 : index
    %157 = vector.load %arg11[%c6_132, %c0_133, %c0_134] : memref<9x1x256xf32, #tpu.memory_space<vmem>>, vector<1x1x256xf32>
    %158 = vector.shape_cast %157 : vector<1x1x256xf32> to vector<1x256xf32>
    %cst_135 = arith.constant dense<0.000000e+00> : vector<16x256xf32>
    %159 = tpu.matmul %154, %156, %cst_135 {dimension_numbers = #tpu.dot_dimension_numbers<[1], [0], [0], [1], [0, 0, 1, 1], [], []>} : vector<16x256xf32>, vector<256x256xf32>, vector<16x256xf32> -> vector<16x256xf32>
    %160 = vector.broadcast %158 : vector<1x256xf32> to vector<16x256xf32>
    %161 = arith.addf %159, %160 : vector<16x256xf32>
    %cst_136 = arith.constant 0.000000e+00 : f32
    %162 = vector.broadcast %cst_136 : f32 to vector<16x256xf32>
    %163 = arith.maximumf %161, %162 : vector<16x256xf32>
    %c7_137 = arith.constant 7 : index
    %c0_138 = arith.constant 0 : index
    %c0_139 = arith.constant 0 : index
    %164 = vector.load %arg10[%c7_137, %c0_138, %c0_139] : memref<9x256x256xf32, #tpu.memory_space<vmem>>, vector<1x256x256xf32>
    %165 = vector.shape_cast %164 : vector<1x256x256xf32> to vector<256x256xf32>
    %c7_140 = arith.constant 7 : index
    %c0_141 = arith.constant 0 : index
    %c0_142 = arith.constant 0 : index
    %166 = vector.load %arg11[%c7_140, %c0_141, %c0_142] : memref<9x1x256xf32, #tpu.memory_space<vmem>>, vector<1x1x256xf32>
    %167 = vector.shape_cast %166 : vector<1x1x256xf32> to vector<1x256xf32>
    %cst_143 = arith.constant dense<0.000000e+00> : vector<16x256xf32>
    %168 = tpu.matmul %163, %165, %cst_143 {dimension_numbers = #tpu.dot_dimension_numbers<[1], [0], [0], [1], [0, 0, 1, 1], [], []>} : vector<16x256xf32>, vector<256x256xf32>, vector<16x256xf32> -> vector<16x256xf32>
    %169 = vector.broadcast %167 : vector<1x256xf32> to vector<16x256xf32>
    %170 = arith.addf %168, %169 : vector<16x256xf32>
    %cst_144 = arith.constant 0.000000e+00 : f32
    %171 = vector.broadcast %cst_144 : f32 to vector<16x256xf32>
    %172 = arith.maximumf %170, %171 : vector<16x256xf32>
    %c8_145 = arith.constant 8 : index
    %c0_146 = arith.constant 0 : index
    %c0_147 = arith.constant 0 : index
    %173 = vector.load %arg10[%c8_145, %c0_146, %c0_147] : memref<9x256x256xf32, #tpu.memory_space<vmem>>, vector<1x256x256xf32>
    %174 = vector.shape_cast %173 : vector<1x256x256xf32> to vector<256x256xf32>
    %c8_148 = arith.constant 8 : index
    %c0_149 = arith.constant 0 : index
    %c0_150 = arith.constant 0 : index
    %175 = vector.load %arg11[%c8_148, %c0_149, %c0_150] : memref<9x1x256xf32, #tpu.memory_space<vmem>>, vector<1x1x256xf32>
    %176 = vector.shape_cast %175 : vector<1x1x256xf32> to vector<1x256xf32>
    %cst_151 = arith.constant dense<0.000000e+00> : vector<16x256xf32>
    %177 = tpu.matmul %172, %174, %cst_151 {dimension_numbers = #tpu.dot_dimension_numbers<[1], [0], [0], [1], [0, 0, 1, 1], [], []>} : vector<16x256xf32>, vector<256x256xf32>, vector<16x256xf32> -> vector<16x256xf32>
    %178 = vector.broadcast %176 : vector<1x256xf32> to vector<16x256xf32>
    %179 = arith.addf %177, %178 : vector<16x256xf32>
    %cst_152 = arith.constant 0.000000e+00 : f32
    %180 = vector.broadcast %cst_152 : f32 to vector<16x256xf32>
    %181 = arith.maximumf %179, %180 : vector<16x256xf32>
    %c0_153 = arith.constant 0 : index
    %c0_154 = arith.constant 0 : index
    %182 = vector.load %arg12[%c0_153, %c0_154] : memref<256x2048xf32, #tpu.memory_space<vmem>>, vector<256x2048xf32>
    %c0_155 = arith.constant 0 : index
    %c0_156 = arith.constant 0 : index
    %183 = vector.load %arg13[%c0_155, %c0_156] : memref<1x2048xf32, #tpu.memory_space<vmem>>, vector<1x2048xf32>
    %cst_157 = arith.constant dense<0.000000e+00> : vector<16x2048xf32>
    %184 = tpu.matmul %181, %182, %cst_157 {dimension_numbers = #tpu.dot_dimension_numbers<[1], [0], [0], [1], [0, 0, 1, 1], [], []>} : vector<16x256xf32>, vector<256x2048xf32>, vector<16x2048xf32> -> vector<16x2048xf32>
    %185 = vector.broadcast %183 : vector<1x2048xf32> to vector<16x2048xf32>
    %186 = arith.addf %184, %185 : vector<16x2048xf32>
    %cst_158 = arith.constant 0.000000e+00 : f32
    %187 = vector.broadcast %cst_158 : f32 to vector<16x2048xf32>
    %188 = arith.maximumf %186, %187 : vector<16x2048xf32>
    %c0_159 = arith.constant 0 : index
    %c0_160 = arith.constant 0 : index
    %189 = vector.load %arg14[%c0_159, %c0_160] : memref<16x2048xf32, #tpu.memory_space<vmem>>, vector<16x2048xf32>
    tpu.vector_store %arg14[%c0_159, %c0_160], %188 {strides = array<i32>} : memref<16x2048xf32, #tpu.memory_space<vmem>>, vector<16x2048xf32>,
    return
  }
  func.func @transform_0(%arg0: i32) -> (i32, i32) {
    %c0_i32 = arith.constant 0 : i32
    %c0_i32_0 = arith.constant 0 : i32
    return %arg0, %c0_i32 : i32, i32
  }
  func.func @transform_1(%arg0: i32) -> (i32, i32) {
    %c0_i32 = arith.constant 0 : i32
    %c0_i32_0 = arith.constant 0 : i32
    %c0_i32_1 = arith.constant 0 : i32
    return %c0_i32, %c0_i32_0 : i32, i32
  }
  func.func @transform_2(%arg0: i32) -> (i32, i32) {
    %c0_i32 = arith.constant 0 : i32
    %c0_i32_0 = arith.constant 0 : i32
    %c0_i32_1 = arith.constant 0 : i32
    return %c0_i32, %c0_i32_0 : i32, i32
  }
  func.func @transform_3(%arg0: i32) -> (i32, i32, i32) {
    %c0_i32 = arith.constant 0 : i32
    %c0_i32_0 = arith.constant 0 : i32
    %c0_i32_1 = arith.constant 0 : i32
    %c0_i32_2 = arith.constant 0 : i32
    return %c0_i32, %c0_i32_0, %c0_i32_1 : i32, i32, i32
  }
  func.func @transform_4(%arg0: i32) -> (i32, i32, i32) {
    %c0_i32 = arith.constant 0 : i32
    %c0_i32_0 = arith.constant 0 : i32
    %c0_i32_1 = arith.constant 0 : i32
    %c0_i32_2 = arith.constant 0 : i32
    return %c0_i32, %c0_i32_0, %c0_i32_1 : i32, i32, i32
  }
  func.func @transform_5(%arg0: i32) -> (i32, i32) {
    %c0_i32 = arith.constant 0 : i32
    %c0_i32_0 = arith.constant 0 : i32
    %c0_i32_1 = arith.constant 0 : i32
    return %c0_i32, %c0_i32_0 : i32, i32
  }
  func.func @transform_6(%arg0: i32) -> (i32, i32) {
    %c0_i32 = arith.constant 0 : i32
    %c0_i32_0 = arith.constant 0 : i32
    %c0_i32_1 = arith.constant 0 : i32
    return %c0_i32, %c0_i32_0 : i32, i32
  }
  func.func @transform_7(%arg0: i32) -> (i32, i32) {
    %c0_i32 = arith.constant 0 : i32
    %c0_i32_0 = arith.constant 0 : i32
    %c0_i32_1 = arith.constant 0 : i32
    return %c0_i32, %c0_i32_0 : i32, i32
  }
  func.func @transform_8(%arg0: i32) -> (i32, i32) {
    %c0_i32 = arith.constant 0 : i32
    %c0_i32_0 = arith.constant 0 : i32
    %c0_i32_1 = arith.constant 0 : i32
    return %c0_i32, %c0_i32_0 : i32, i32
  }
  func.func @transform_9(%arg0: i32) -> (i32, i32, i32) {
    %c0_i32 = arith.constant 0 : i32
    %c0_i32_0 = arith.constant 0 : i32
    %c0_i32_1 = arith.constant 0 : i32
    %c0_i32_2 = arith.constant 0 : i32
    return %c0_i32, %c0_i32_0, %c0_i32_1 : i32, i32, i32
  }
  func.func @transform_10(%arg0: i32) -> (i32, i32, i32) {
    %c0_i32 = arith.constant 0 : i32
    %c0_i32_0 = arith.constant 0 : i32
    %c0_i32_1 = arith.constant 0 : i32
    %c0_i32_2 = arith.constant 0 : i32
    return %c0_i32, %c0_i32_0, %c0_i32_1 : i32, i32, i32
  }
  func.func @transform_11(%arg0: i32) -> (i32, i32) {
    %c0_i32 = arith.constant 0 : i32
    %c0_i32_0 = arith.constant 0 : i32
    %c0_i32_1 = arith.constant 0 : i32
    return %c0_i32, %c0_i32_0 : i32, i32
  }
  func.func @transform_12(%arg0: i32) -> (i32, i32) {
    %c0_i32 = arith.constant 0 : i32
    %c0_i32_0 = arith.constant 0 : i32
    %c0_i32_1 = arith.constant 0 : i32
    return %c0_i32, %c0_i32_0 : i32, i32
  }
  func.func @transform_13(%arg0: i32) -> (i32, i32) {
    %c0_i32 = arith.constant 0 : i32
    %c0_i32_0 = arith.constant 0 : i32
    return %arg0, %c0_i32 : i32, i32
  }
}

</mosaic_0001>

<bundles_post_ra>
// kernel: tpu_custom_call.1
= control target key start
LH: loop header
LB: loop body
LE: loop exit
PB: predicated region body
PF: predicated region fallthrough
CT: control target
= control target key end

     0   :  { %18 = vsyncpa [#allocation3], 0  ;;  %s6911_s0 = inlined_call_operand.hbm [shape: f32[16,2048], index: 0, kind: input, shape index: {}]   ;;  %s6912_s1 = inlined_call_operand.hbm [shape: f32[2048,256], index: 1, kind: input, shape index: {}]   ;;  %s6913_s2 = inlined_call_operand.hbm [shape: f32[1,256], index: 2, kind: input, shape index: {}]   ;;  %s6914_s3 = inlined_call_operand.hbm [shape: f32[9,256,256], index: 3, kind: input, shape index: {}]   ;;  %s6915_s4 = inlined_call_operand.hbm [shape: f32[9,1,256], index: 4, kind: input, shape index: {}]   ;;  %s6916_s5 = inlined_call_operand.vmem [shape: f32[256,64], index: 5, kind: input, shape index: {}]   ;;  %s6917_s6 = inlined_call_operand.hbm [shape: f32[1,64], index: 6, kind: input, shape index: {}]   ;;  %s6918_s7 = inlined_call_operand.hbm [shape: f32[64,256], index: 7, kind: input, shape index: {}]   ;;  %s6919_s8 = inlined_call_operand.hbm [shape: f32[1,256], index: 8, kind: input, shape index: {}]   ;;  %s6920_s9 = inlined_call_operand.hbm [shape: f32[9,256,256], index: 9, kind: input, shape index: {}]   ;;  %s6921_s10 = inlined_call_operand.hbm [shape: f32[9,1,256], index: 10, kind: input, shape index: {}]   ;;  %s6922_s11 = inlined_call_operand.hbm [shape: f32[256,2048], index: 11, kind: input, shape index: {}]   ;;  %s6923_s12 = inlined_call_operand.hbm [shape: f32[1,2048], index: 12, kind: input, shape index: {}]   ;;  %s6924_s13 = inlined_call_operand.hbm [shape: f32[16,2048], index: 13, kind: output, shape index: {}]  }
   0x1   :  { %19 = vsyncpa [#allocation6], 0 }
   0x2   :  { %20 = vsyncpa [#allocation9], 0 }
   0x3   :  { %21 = vsyncpa [#allocation12], 0 }
   0x4   :  { %22 = vsyncpa [#allocation15], 0 }
   0x5   :  { %23 = vsyncpa [#allocation18], 0 }
   0x6   :  { %24 = vsyncpa [#allocation21], 0  ;;  %s43_s27 = sshll.u32 %s6912_s1, 4  ;;  %s44_s27 = int_to_ptr.hbm [resolvable:$true] %s43_s27 }
   0x7   :  { %25 = vsyncpa [#allocation4], 0  ;;  %s6452_s28 = smov [#allocation5]   ;;  %s67_s15 = sshll.u32 %s6914_s3, 4  ;;  %s68_s15 = int_to_ptr.hbm [resolvable:$true] %s67_s15 }
   0x8   :  { %s45_s29 = sshll.u32 %s6452_s28, 4  ;;  %s6453_s16 = smov 256   ;;  %s46_s29 = int_to_ptr.vmem [resolvable:$true] %s45_s29 }
   0x9   :  { %s6454_s17 = smov 16   ;;  %s6455_s18 = smov [#allocation8]  }
   0xa   :  { %51 = dma.hbm_to_vmem [thread:$0]  %s44_s27, 65536, %s46_s29, [#allocation6], %s6453_s16, %s6453_s16, %s6454_s17  }
   0xb   :  { %s69_s19 = sshll.u32 %s6455_s18, 4  ;;  %s96_s21 = sshll.u32 %s6917_s6, 4  ;;  %s70_s19 = int_to_ptr.vmem [resolvable:$true] %s69_s19  ;;  %s97_s21 = int_to_ptr.hbm [resolvable:$true] %s96_s21 }
   0xc   :  { %75 = dma.hbm_to_vmem [thread:$0]  %s68_s15, 73728, %s70_s19, [#allocation9], %s6453_s16, %s6453_s16, %s6454_s17  }
   0xd   :  { %s120_s23 = sshll.u32 %s6919_s8, 4  ;;  %s6456_s24 = smov [#allocation11]   ;;  %s121_s23 = int_to_ptr.hbm [resolvable:$true] %s120_s23 }
   0xe   :  { %s98_s25 = sshll.u32 %s6456_s24, 4  ;;  %s6457_s26 = smov [#allocation14]   ;;  %s99_s25 = int_to_ptr.vmem [resolvable:$true] %s98_s25 }
   0xf   :  { %101 = dma.hbm_to_vmem [thread:$0]  %s97_s21, 16, %s99_s25, [#allocation12]  }
  0x10   :  { %s122_s27 = sshll.u32 %s6457_s26, 4  ;;  %s143_s29 = sshll.u32 %s6921_s10, 4  ;;  %s123_s27 = int_to_ptr.vmem [resolvable:$true] %s122_s27  ;;  %s144_s29 = int_to_ptr.hbm [resolvable:$true] %s143_s29 }
  0x11   :  { %125 = dma.hbm_to_vmem [thread:$0]  %s121_s23, 32, %s123_s27, [#allocation15]  }
  0x12   :  { %s6458_s30 = smov [#allocation17]   ;;  %s30_s8 = sshll.u32 %s6911_s0, 4  ;;  %s31_s8 = int_to_ptr.hbm [resolvable:$true] %s30_s8 }
  0x13   :  { %s145_s14 = sshll.u32 %s6458_s30, 4  ;;  %s6459_s19 = smov 32   ;;  %s146_s14 = int_to_ptr.vmem [resolvable:$true] %s145_s14 }
  0x14   :  { %s6460_s20 = smov 2   ;;  %s6461_s1 = smov [#allocation2]  }
  0x15   :  { %151 = dma.hbm_to_vmem [thread:$0]  %s144_s29, 288, %s146_s14, [#allocation18], %s6459_s19, %s6459_s19, %s6460_s20  }
  0x16   :  { %s32_s21 = sshll.u32 %s6461_s1, 4  ;;  %s6462_s3 = smov 2048   ;;  %s33_s21 = int_to_ptr.vmem [resolvable:$true] %s32_s21 }
  0x17   :  { %s6463_s22 = smov 128   ;;  %s57_s24 = sshll.u32 %s6913_s2, 4  ;;  %s58_s24 = int_to_ptr.hbm [resolvable:$true] %s57_s24 }
  0x18   :  { %38 = dma.hbm_to_vmem [thread:$0]  %s31_s8, 4096, %s33_s21, [#allocation3], %s6462_s3, %s6462_s3, %s6463_s22  }
  0x19   :  { %s6464_s25 = smov [#allocation7]   ;;  %s80_s6 = sshll.u32 %s6915_s4, 4  ;;  %s81_s6 = int_to_ptr.hbm [resolvable:$true] %s80_s6 }
  0x1a   :  { %s59_s0 = sshll.u32 %s6464_s25, 4  ;;  %s6465_s28 = smov [#allocation10]   ;;  %s60_s0 = int_to_ptr.vmem [resolvable:$true] %s59_s0 }
  0x1b   :  { %62 = dma.hbm_to_vmem [thread:$0]  %s58_s24, 32, %s60_s0, [#allocation6]  }
  0x1c   :  { %s82_s29 = sshll.u32 %s6465_s28, 4  ;;  %s106_s15 = sshll.u32 %s6918_s7, 4  ;;  %s83_s29 = int_to_ptr.vmem [resolvable:$true] %s82_s29  ;;  %s107_s15 = int_to_ptr.hbm [resolvable:$true] %s106_s15 }
  0x1d   :  { %88 = dma.hbm_to_vmem [thread:$0]  %s81_s6, 288, %s83_s29, [#allocation9], %s6459_s19, %s6459_s19, %s6460_s20  }
  0x1e   :  { %s130_s8 = sshll.u32 %s6920_s9, 4  ;;  %s6466_s1 = smov [#allocation13]   ;;  %s131_s8 = int_to_ptr.hbm [resolvable:$true] %s130_s8 }
  0x1f   :  { %s108_s21 = sshll.u32 %s6466_s1, 4  ;;  %s6467_s4 = smov [#allocation16]   ;;  %s109_s21 = int_to_ptr.vmem [resolvable:$true] %s108_s21 }
  0x20   :  { %114 = dma.hbm_to_vmem [thread:$0]  %s107_s15, 2048, %s109_s21, [#allocation12], %s6453_s16, %s6453_s16, %s6454_s17  }
  0x21   :  { %s132_s10 = sshll.u32 %s6467_s4, 4  ;;  %s156_s7 = sshll.u32 %s6922_s11, 4  ;;  %s133_s10 = int_to_ptr.vmem [resolvable:$true] %s132_s10  ;;  %s157_s7 = int_to_ptr.hbm [resolvable:$true] %s156_s7 }
  0x22   :  { %138 = dma.hbm_to_vmem [thread:$0]  %s131_s8, 73728, %s133_s10, [#allocation15], %s6453_s16, %s6453_s16, %s6454_s17  }
  0x23   :  { %s170_s20 = sshll.u32 %s6923_s12, 4  ;;  %s6468_s25 = smov [#allocation19]   ;;  %s171_s20 = int_to_ptr.hbm [resolvable:$true] %s170_s20 }
  0x24   :  { %s158_s0 = sshll.u32 %s6468_s25, 4  ;;  %s6469_s26 = smov [#allocation20]   ;;  %s159_s0 = int_to_ptr.vmem [resolvable:$true] %s158_s0 }
  0x25   :  { %164 = dma.hbm_to_vmem [thread:$0]  %s157_s7, 65536, %s159_s0, [#allocation18], %s6462_s3, %s6462_s3, %s6463_s22  }
  0x26   :  { %s172_s11 = sshll.u32 %s6469_s26, 4  ;;  %s173_s11 = int_to_ptr.vmem [resolvable:$true] %s172_s11 }
  0x27   :  { %175 = dma.hbm_to_vmem [thread:$0]  %s171_s20, 256, %s173_s11, [#allocation21]  }
  0x28   :  { %6436 = dma.done.wait [#allocation3], 4096  }
  0x29   :  { %6437 = vsyncadd [#allocation3], 4294963200 }
  0x2a   :  { %6438 = dma.done.wait [#allocation6], 65568  }
  0x2b   :  { %6439 = vsyncadd [#allocation6], 4294901728 }
  0x2c   :  { %6440 = dma.done.wait [#allocation9], 74016  }
  0x2d   :  { %6441 = vsyncadd [#allocation9], 4294893280 }
  0x2e   :  { %6442 = dma.done.wait [#allocation12], 2064  }
  0x2f   :  { %6443 = vsyncadd [#allocation12], 4294965232 }
  0x30   :  { %6444 = dma.done.wait [#allocation15], 73760  }
  0x31   :  { %6445 = vsyncadd [#allocation15], 4294893536 }
  0x32   :  { %6446 = dma.done.wait [#allocation18], 65824  }
  0x33   :  { %6447 = vsyncadd [#allocation18], 4294901472 }
  0x34   :  { %6448 = dma.done.wait [#allocation21], 256  }
  0x35   :  { %6449 = vsyncadd [#allocation21], 4294967040  ;;  %v286_v0 = vld [vmem:[#allocation5 + $0xf0] sm:$0xff]  ;;  %v284_v2 = vld [vmem:[#allocation5 + $0xe0] sm:$0xff]  ;;  %vm3128_vm0 = vcmask 523264   ;;  %s6049_s1 = sshll.u32 %s6924_s13, 4  ;;  %s6050_s1 = int_to_ptr.hbm [resolvable:$true] %s6049_s1 }
  0x36   :  { %v350_v1 = vld [vmem:[#allocation5 + $0x2f0] sm:$0xff]  ;;  %774 = vmatpush.msra.mxu0 %v286_v0  ;;  %v348_v4 = vld [vmem:[#allocation5 + $0x2e0] sm:$0xff] }
  0x37   :  { %820 = vmatpush.msra.mxu2 %v350_v1  ;;  %v318_v3 = vld [vmem:[#allocation5 + $0x1f0] sm:$0xff]  ;;  %v316_v7 = vld [vmem:[#allocation5 + $0x1e0] sm:$0xff] }
  0x38   :  { %v382_v5 = vld [vmem:[#allocation5 + $0x3f0] sm:$0xff]  ;;  %797 = vmatpush.msra.mxu1 %v318_v3  ;;  %775 = vmatpush.msra.mxu0 %v284_v2  ;;  %v380_v9 = vld [vmem:[#allocation5 + $0x3e0] sm:$0xff] }
  0x39   :  { %843 = vmatpush.msra.mxu3 %v382_v5  ;;  %v282_v6 = vld [vmem:[#allocation5 + $0xd0] sm:$0xff]  ;;  %821 = vmatpush.msra.mxu2 %v348_v4  ;;  %v280_v11 = vld [vmem:[#allocation5 + $0xc0] sm:$0xff] }
  0x3a   :  { %v346_v8 = vld [vmem:[#allocation5 + $0x2d0] sm:$0xff]  ;;  %798 = vmatpush.msra.mxu1 %v316_v7  ;;  %v344_v12 = vld [vmem:[#allocation5 + $0x2c0] sm:$0xff]  ;;  %776 = vmatpush.msra.mxu0 %v282_v6 }
  0x3b   :  { %v314_v10 = vld [vmem:[#allocation5 + $0x1d0] sm:$0xff]  ;;  %844 = vmatpush.msra.mxu3 %v380_v9  ;;  %822 = vmatpush.msra.mxu2 %v346_v8  ;;  %v312_v14 = vld [vmem:[#allocation5 + $0x1c0] sm:$0xff] }
  0x3c   :  { %v378_v13 = vld [vmem:[#allocation5 + $0x3d0] sm:$0xff]  ;;  %v376_v15 = vld [vmem:[#allocation5 + $0x3c0] sm:$0xff]  ;;  %799 = vmatpush.msra.mxu1 %v314_v10  ;;  %777 = vmatpush.msra.mxu0 %v280_v11 }
  0x3d   :  { %845 = vmatpush.msra.mxu3 %v378_v13  ;;  %v278_v16 = vld [vmem:[#allocation5 + $0xb0] sm:$0xff]  ;;  %823 = vmatpush.msra.mxu2 %v344_v12  ;;  %v276_v20 = vld [vmem:[#allocation5 + $0xa0] sm:$0xff] }
  0x3e   :  { %v342_v17 = vld [vmem:[#allocation5 + $0x2b0] sm:$0xff]  ;;  %800 = vmatpush.msra.mxu1 %v312_v14  ;;  %v340_v21 = vld [vmem:[#allocation5 + $0x2a0] sm:$0xff]  ;;  %778 = vmatpush.msra.mxu0 %v278_v16 }
  0x3f   :  { %v310_v18 = vld [vmem:[#allocation5 + $0x1b0] sm:$0xff]  ;;  %846 = vmatpush.msra.mxu3 %v376_v15  ;;  %824 = vmatpush.msra.mxu2 %v342_v17  ;;  %v308_v22 = vld [vmem:[#allocation5 + $0x1a0] sm:$0xff] }
  0x40   :  { %v374_v19 = vld [vmem:[#allocation5 + $0x3b0] sm:$0xff]  ;;  %v372_v23 = vld [vmem:[#allocation5 + $0x3a0] sm:$0xff]  ;;  %801 = vmatpush.msra.mxu1 %v310_v18  ;;  %779 = vmatpush.msra.mxu0 %v276_v20 }
  0x41   :  { %847 = vmatpush.msra.mxu3 %v374_v19  ;;  %v274_v24 = vld [vmem:[#allocation5 + $0x90] sm:$0xff]  ;;  %825 = vmatpush.msra.mxu2 %v340_v21  ;;  %v272_v28 = vld [vmem:[#allocation5 + $0x80] sm:$0xff] }
  0x42   :  { %v338_v25 = vld [vmem:[#allocation5 + $0x290] sm:$0xff]  ;;  %802 = vmatpush.msra.mxu1 %v308_v22  ;;  %v336_v29 = vld [vmem:[#allocation5 + $0x280] sm:$0xff]  ;;  %780 = vmatpush.msra.mxu0 %v274_v24 }
  0x43   :  { %v306_v26 = vld [vmem:[#allocation5 + $0x190] sm:$0xff]  ;;  %848 = vmatpush.msra.mxu3 %v372_v23  ;;  %826 = vmatpush.msra.mxu2 %v338_v25  ;;  %v304_v30 = vld [vmem:[#allocation5 + $0x180] sm:$0xff] }
  0x44   :  { %v370_v27 = vld [vmem:[#allocation5 + $0x390] sm:$0xff]  ;;  %v368_v31 = vld [vmem:[#allocation5 + $0x380] sm:$0xff]  ;;  %803 = vmatpush.msra.mxu1 %v306_v26  ;;  %781 = vmatpush.msra.mxu0 %v272_v28 }
  0x45   :  { %849 = vmatpush.msra.mxu3 %v370_v27  ;;  %v270_v32 = vld [vmem:[#allocation5 + $0x70] sm:$0xff]  ;;  %827 = vmatpush.msra.mxu2 %v336_v29  ;;  %v268_v36 = vld [vmem:[#allocation5 + $0x60] sm:$0xff] }
  0x46   :  { %v334_v33 = vld [vmem:[#allocation5 + $0x270] sm:$0xff]  ;;  %804 = vmatpush.msra.mxu1 %v304_v30  ;;  %v332_v37 = vld [vmem:[#allocation5 + $0x260] sm:$0xff]  ;;  %782 = vmatpush.msra.mxu0 %v270_v32 }
  0x47   :  { %v302_v34 = vld [vmem:[#allocation5 + $0x170] sm:$0xff]  ;;  %850 = vmatpush.msra.mxu3 %v368_v31  ;;  %828 = vmatpush.msra.mxu2 %v334_v33  ;;  %v300_v38 = vld [vmem:[#allocation5 + $0x160] sm:$0xff] }
  0x48   :  { %v366_v35 = vld [vmem:[#allocation5 + $0x370] sm:$0xff]  ;;  %v364_v39 = vld [vmem:[#allocation5 + $0x360] sm:$0xff]  ;;  %805 = vmatpush.msra.mxu1 %v302_v34  ;;  %783 = vmatpush.msra.mxu0 %v268_v36 }
  0x49   :  { %851 = vmatpush.msra.mxu3 %v366_v35  ;;  %v266_v40 = vld [vmem:[#allocation5 + $0x50] sm:$0xff]  ;;  %829 = vmatpush.msra.mxu2 %v332_v37  ;;  %v264_v44 = vld [vmem:[#allocation5 + $0x40] sm:$0xff] }
  0x4a   :  { %v330_v41 = vld [vmem:[#allocation5 + $0x250] sm:$0xff]  ;;  %806 = vmatpush.msra.mxu1 %v300_v38  ;;  %v328_v45 = vld [vmem:[#allocation5 + $0x240] sm:$0xff]  ;;  %784 = vmatpush.msra.mxu0 %v266_v40 }
  0x4b   :  { %v298_v42 = vld [vmem:[#allocation5 + $0x150] sm:$0xff]  ;;  %852 = vmatpush.msra.mxu3 %v364_v39  ;;  %830 = vmatpush.msra.mxu2 %v330_v41  ;;  %v296_v46 = vld [vmem:[#allocation5 + $0x140] sm:$0xff] }
  0x4c   :  { %v362_v43 = vld [vmem:[#allocation5 + $0x350] sm:$0xff]  ;;  %v360_v47 = vld [vmem:[#allocation5 + $0x340] sm:$0xff]  ;;  %807 = vmatpush.msra.mxu1 %v298_v42  ;;  %785 = vmatpush.msra.mxu0 %v264_v44 }
  0x4d   :  { %853 = vmatpush.msra.mxu3 %v362_v43  ;;  %v262_v48 = vld [vmem:[#allocation5 + $0x30] sm:$0xff]  ;;  %831 = vmatpush.msra.mxu2 %v328_v45  ;;  %v260_v52 = vld [vmem:[#allocation5 + $0x20] sm:$0xff] }
  0x4e   :  { %v326_v49 = vld [vmem:[#allocation5 + $0x230] sm:$0xff]  ;;  %808 = vmatpush.msra.mxu1 %v296_v46  ;;  %v324_v53 = vld [vmem:[#allocation5 + $0x220] sm:$0xff]  ;;  %786 = vmatpush.msra.mxu0 %v262_v48 }
  0x4f   :  { %v294_v50 = vld [vmem:[#allocation5 + $0x130] sm:$0xff]  ;;  %854 = vmatpush.msra.mxu3 %v360_v47  ;;  %832 = vmatpush.msra.mxu2 %v326_v49  ;;  %v292_v54 = vld [vmem:[#allocation5 + $0x120] sm:$0xff] }
  0x50   :  { %v358_v51 = vld [vmem:[#allocation5 + $0x330] sm:$0xff]  ;;  %v356_v55 = vld [vmem:[#allocation5 + $0x320] sm:$0xff]  ;;  %809 = vmatpush.msra.mxu1 %v294_v50  ;;  %787 = vmatpush.msra.mxu0 %v260_v52  ;;  %v227_v52 = vld [vmem:[#allocation2 + $0x18] sm:$0xff] }
  0x51   :  { %855 = vmatpush.msra.mxu3 %v358_v51  ;;  %v258_v56 = vld [vmem:[#allocation5 + $0x10] sm:$0xff]  ;;  %833 = vmatpush.msra.mxu2 %v324_v53  ;;  %v256_v60 = vld [vmem:[#allocation5] sm:$0xff] }
  0x52   :  { %v322_v57 = vld [vmem:[#allocation5 + $0x210] sm:$0xff]  ;;  %810 = vmatpush.msra.mxu1 %v292_v54  ;;  %v320_v61 = vld [vmem:[#allocation5 + $0x200] sm:$0xff]  ;;  %788 = vmatpush.msra.mxu0 %v258_v56 }
  0x53   :  { %v290_v58 = vld [vmem:[#allocation5 + $0x110] sm:$0xff]  ;;  %856 = vmatpush.msra.mxu3 %v356_v55  ;;  %834 = vmatpush.msra.mxu2 %v322_v57  ;;  %v288_v0 = vld [vmem:[#allocation5 + $0x100] sm:$0xff]  ;;  %v225_v57 = vld [vmem:[#allocation2 + $0x8] sm:$0xff] }
  0x54   :  { %v354_v59 = vld [vmem:[#allocation5 + $0x310] sm:$0xff]  ;;  %811 = vmatpush.msra.mxu1 %v290_v58  ;;  %v352_v1 = vld [vmem:[#allocation5 + $0x300] sm:$0xff]  ;;  %789 = vmatpush.msra.mxu0 %v256_v60 }
  0x55   :  { %v414_v62 = vld [vmem:[#allocation5 + $0x4f0] sm:$0xff]  ;;  %857 = vmatpush.msra.mxu3 %v354_v59  ;;  %835 = vmatpush.msra.mxu2 %v320_v61  ;;  %v412_v2 = vld [vmem:[#allocation5 + $0x4e0] sm:$0xff] }
  0x56   :  { %v478_v63 = vld [vmem:[#allocation5 + $0x6f0] sm:$0xff]  ;;  %866 = vmatpush.msrb.mxu0 %v414_v62  ;;  %v476_v4 = vld [vmem:[#allocation5 + $0x6e0] sm:$0xff]  ;;  %812 = vmatpush.msra.mxu1 %v288_v0 }
  0x57   :  { %v446_v3 = vld [vmem:[#allocation5 + $0x5f0] sm:$0xff]  ;;  %912 = vmatpush.msrb.mxu2 %v478_v63  ;;  %858 = vmatpush.msra.mxu3 %v352_v1  ;;  %v444_v7 = vld [vmem:[#allocation5 + $0x5e0] sm:$0xff] }
  0x58   :  { %v510_v5 = vld [vmem:[#allocation5 + $0x7f0] sm:$0xff]  ;;  %867 = vmatpush.msrb.mxu0 %v412_v2  ;;  %889 = vmatpush.msrb.mxu1 %v446_v3  ;;  %v508_v9 = vld [vmem:[#allocation5 + $0x7e0] sm:$0xff] }
  0x59   :  { %v410_v6 = vld [vmem:[#allocation5 + $0x4d0] sm:$0xff]  ;;  %913 = vmatpush.msrb.mxu2 %v476_v4  ;;  %935 = vmatpush.msrb.mxu3 %v510_v5  ;;  %v408_v10 = vld [vmem:[#allocation5 + $0x4c0] sm:$0xff] }
  0x5a   :  { %v474_v8 = vld [vmem:[#allocation5 + $0x6d0] sm:$0xff]  ;;  %868 = vmatpush.msrb.mxu0 %v410_v6  ;;  %890 = vmatpush.msrb.mxu1 %v444_v7  ;;  %v472_v12 = vld [vmem:[#allocation5 + $0x6c0] sm:$0xff] }
  0x5b   :  { %v442_v11 = vld [vmem:[#allocation5 + $0x5d0] sm:$0xff]  ;;  %914 = vmatpush.msrb.mxu2 %v474_v8  ;;  %936 = vmatpush.msrb.mxu3 %v508_v9  ;;  %v440_v15 = vld [vmem:[#allocation5 + $0x5c0] sm:$0xff]  ;;  %v243_v8 = vld [vmem:[#allocation2 + $0x98] sm:$0xff] }
  0x5c   :  { %v506_v13 = vld [vmem:[#allocation5 + $0x7d0] sm:$0xff]  ;;  %869 = vmatpush.msrb.mxu0 %v408_v10  ;;  %891 = vmatpush.msrb.mxu1 %v442_v11  ;;  %v504_v17 = vld [vmem:[#allocation5 + $0x7c0] sm:$0xff] }
  0x5d   :  { %v406_v14 = vld [vmem:[#allocation5 + $0x4b0] sm:$0xff]  ;;  %915 = vmatpush.msrb.mxu2 %v472_v12  ;;  %937 = vmatpush.msrb.mxu3 %v506_v13  ;;  %v404_v18 = vld [vmem:[#allocation5 + $0x4a0] sm:$0xff]  ;;  %v241_v13 = vld [vmem:[#allocation2 + $0x88] sm:$0xff] }
  0x5e   :  { %v470_v16 = vld [vmem:[#allocation5 + $0x6b0] sm:$0xff]  ;;  %870 = vmatpush.msrb.mxu0 %v406_v14  ;;  %892 = vmatpush.msrb.mxu1 %v440_v15  ;;  %v468_v20 = vld [vmem:[#allocation5 + $0x6a0] sm:$0xff] }
  0x5f   :  { %v438_v19 = vld [vmem:[#allocation5 + $0x5b0] sm:$0xff]  ;;  %916 = vmatpush.msrb.mxu2 %v470_v16  ;;  %938 = vmatpush.msrb.mxu3 %v504_v17  ;;  %v436_v23 = vld [vmem:[#allocation5 + $0x5a0] sm:$0xff] }
  0x60   :  { %v502_v21 = vld [vmem:[#allocation5 + $0x7b0] sm:$0xff]  ;;  %871 = vmatpush.msrb.mxu0 %v404_v18  ;;  %893 = vmatpush.msrb.mxu1 %v438_v19  ;;  %v500_v25 = vld [vmem:[#allocation5 + $0x7a0] sm:$0xff] }
  0x61   :  { %v402_v22 = vld [vmem:[#allocation5 + $0x490] sm:$0xff]  ;;  %917 = vmatpush.msrb.mxu2 %v468_v20  ;;  %939 = vmatpush.msrb.mxu3 %v502_v21  ;;  %v400_v26 = vld [vmem:[#allocation5 + $0x480] sm:$0xff] }
  0x62   :  { %v466_v24 = vld [vmem:[#allocation5 + $0x690] sm:$0xff]  ;;  %872 = vmatpush.msrb.mxu0 %v402_v22  ;;  %894 = vmatpush.msrb.mxu1 %v436_v23  ;;  %v464_v28 = vld [vmem:[#allocation5 + $0x680] sm:$0xff] }
  0x63   :  { %v434_v27 = vld [vmem:[#allocation5 + $0x590] sm:$0xff]  ;;  %918 = vmatpush.msrb.mxu2 %v466_v24  ;;  %940 = vmatpush.msrb.mxu3 %v500_v25  ;;  %v432_v31 = vld [vmem:[#allocation5 + $0x580] sm:$0xff] }
  0x64   :  { %v498_v29 = vld [vmem:[#allocation5 + $0x790] sm:$0xff]  ;;  %873 = vmatpush.msrb.mxu0 %v400_v26  ;;  %895 = vmatpush.msrb.mxu1 %v434_v27  ;;  %v496_v33 = vld [vmem:[#allocation5 + $0x780] sm:$0xff] }
  0x65   :  { %v398_v30 = vld [vmem:[#allocation5 + $0x470] sm:$0xff]  ;;  %919 = vmatpush.msrb.mxu2 %v464_v28  ;;  %941 = vmatpush.msrb.mxu3 %v498_v29  ;;  %v396_v34 = vld [vmem:[#allocation5 + $0x460] sm:$0xff]  ;;  %v231_v28 = vld [vmem:[#allocation2 + $0x38] sm:$0xff] }
  0x66   :  { %v462_v32 = vld [vmem:[#allocation5 + $0x670] sm:$0xff]  ;;  %874 = vmatpush.msrb.mxu0 %v398_v30  ;;  %896 = vmatpush.msrb.mxu1 %v432_v31  ;;  %v460_v36 = vld [vmem:[#allocation5 + $0x660] sm:$0xff] }
  0x67   :  { %v430_v35 = vld [vmem:[#allocation5 + $0x570] sm:$0xff]  ;;  %920 = vmatpush.msrb.mxu2 %v462_v32  ;;  %942 = vmatpush.msrb.mxu3 %v496_v33  ;;  %v428_v39 = vld [vmem:[#allocation5 + $0x560] sm:$0xff]  ;;  %v229_v33 = vld [vmem:[#allocation2 + $0x28] sm:$0xff] }
  0x68   :  { %v494_v37 = vld [vmem:[#allocation5 + $0x770] sm:$0xff]  ;;  %875 = vmatpush.msrb.mxu0 %v396_v34  ;;  %897 = vmatpush.msrb.mxu1 %v430_v35  ;;  %v492_v41 = vld [vmem:[#allocation5 + $0x760] sm:$0xff] }
  0x69   :  { %v394_v38 = vld [vmem:[#allocation5 + $0x450] sm:$0xff]  ;;  %921 = vmatpush.msrb.mxu2 %v460_v36  ;;  %943 = vmatpush.msrb.mxu3 %v494_v37  ;;  %v392_v42 = vld [vmem:[#allocation5 + $0x440] sm:$0xff] }
  0x6a   :  { %v458_v40 = vld [vmem:[#allocation5 + $0x650] sm:$0xff]  ;;  %876 = vmatpush.msrb.mxu0 %v394_v38  ;;  %898 = vmatpush.msrb.mxu1 %v428_v39  ;;  %v456_v44 = vld [vmem:[#allocation5 + $0x640] sm:$0xff] }
  0x6b   :  { %v426_v43 = vld [vmem:[#allocation5 + $0x550] sm:$0xff]  ;;  %922 = vmatpush.msrb.mxu2 %v458_v40  ;;  %944 = vmatpush.msrb.mxu3 %v492_v41  ;;  %v424_v48 = vld [vmem:[#allocation5 + $0x540] sm:$0xff] }
  0x6c   :  { %v490_v45 = vld [vmem:[#allocation5 + $0x750] sm:$0xff]  ;;  %877 = vmatpush.msrb.mxu0 %v392_v42  ;;  %899 = vmatpush.msrb.mxu1 %v426_v43  ;;  %v488_v50 = vld [vmem:[#allocation5 + $0x740] sm:$0xff] }
  0x6d   :  { %v226_v46 = vld [vmem:[#allocation2 + $0x10] sm:$0xff]  ;;  %923 = vmatpush.msrb.mxu2 %v456_v44  ;;  %945 = vmatpush.msrb.mxu3 %v490_v45  ;;  %v224_v51 = vld [vmem:[#allocation2] sm:$0xff] }
  0x6e   :  { %v390_v47 = vld [vmem:[#allocation5 + $0x430] sm:$0xff]  ;;  %836 = vmatmul.f32.vlgmr.msra.gmra.mxu2 %v226_v46  ;;  %v388_v53 = vld [vmem:[#allocation5 + $0x420] sm:$0xff]  ;;  %900 = vmatpush.msrb.mxu1 %v424_v48 }
  0x6f   :  { %v454_v49 = vld [vmem:[#allocation5 + $0x630] sm:$0xff]  ;;  %878 = vmatpush.msrb.mxu0 %v390_v47  ;;  %v452_v55 = vld [vmem:[#allocation5 + $0x620] sm:$0xff]  ;;  %946 = vmatpush.msrb.mxu3 %v488_v50 }
  0x70   :  { %924 = vmatpush.msrb.mxu2 %v454_v49  ;;  %v422_v54 = vld [vmem:[#allocation5 + $0x530] sm:$0xff]  ;;  %790 = vmatmul.f32.vlgmr.msra.gmra.mxu0 %v224_v51  ;;  %v420_v59 = vld [vmem:[#allocation5 + $0x520] sm:$0xff] }
  0x71   :  { %v486_v56 = vld [vmem:[#allocation5 + $0x730] sm:$0xff]  ;;  %859 = vmatmul.f32.vlgmr.msra.gmra.mxu3 %v227_v52  ;;  %879 = vmatpush.msrb.mxu0 %v388_v53  ;;  %v484_v61 = vld [vmem:[#allocation5 + $0x720] sm:$0xff] }
  0x72   :  { %v386_v58 = vld [vmem:[#allocation5 + $0x410] sm:$0xff]  ;;  %901 = vmatpush.msrb.mxu1 %v422_v54  ;;  %925 = vmatpush.msrb.mxu2 %v452_v55  ;;  %v384_v62 = vld [vmem:[#allocation5 + $0x400] sm:$0xff] }
  0x73   :  { %v450_v60 = vld [vmem:[#allocation5 + $0x610] sm:$0xff]  ;;  %947 = vmatpush.msrb.mxu3 %v486_v56  ;;  %813 = vmatmul.f32.vlgmr.msra.gmra.mxu1 %v225_v57  ;;  %v448_v0 = vld [vmem:[#allocation5 + $0x600] sm:$0xff] }
  0x74   :  { %v418_v63 = vld [vmem:[#allocation5 + $0x510] sm:$0xff]  ;;  %880 = vmatpush.msrb.mxu0 %v386_v58  ;;  %902 = vmatpush.msrb.mxu1 %v420_v59  ;;  %v416_v5 = vld [vmem:[#allocation5 + $0x500] sm:$0xff] }
  0x75   :  { %v482_v1 = vld [vmem:[#allocation5 + $0x710] sm:$0xff]  ;;  %926 = vmatpush.msrb.mxu2 %v450_v60  ;;  %948 = vmatpush.msrb.mxu3 %v484_v61  ;;  %v480_v6 = vld [vmem:[#allocation5 + $0x700] sm:$0xff] }
  0x76   :  { %v242_v2 = vld [vmem:[#allocation2 + $0x90] sm:$0xff]  ;;  %881 = vmatpush.msrb.mxu0 %v384_v62  ;;  %903 = vmatpush.msrb.mxu1 %v418_v63  ;;  %v240_v7 = vld [vmem:[#allocation2 + $0x80] sm:$0xff] }
  0x77   :  { %v542_v3 = vld [vmem:[#allocation5 + $0x8f0] sm:$0xff]  ;;  %927 = vmatpush.msrb.mxu2 %v448_v0  ;;  %949 = vmatpush.msrb.mxu3 %v482_v1  ;;  %v540_v9 = vld [vmem:[#allocation5 + $0x8e0] sm:$0xff]  ;;  %v245_v0 = vld [vmem:[#allocation2 + $0xa8] sm:$0xff] }
  0x78   :  { %v606_v4 = vld [vmem:[#allocation5 + $0xaf0] sm:$0xff]  ;;  %839 = vmatmul.f32.gmra.mxu2 %v242_v2  ;;  %958 = vmatpush.msra.mxu0 %v542_v3  ;;  %v604_v11 = vld [vmem:[#allocation5 + $0xae0] sm:$0xff]  ;;  %v247_v1 = vld [vmem:[#allocation2 + $0xb8] sm:$0xff] }
  0x79   :  { %1004 = vmatpush.msra.mxu2 %v606_v4  ;;  %904 = vmatpush.msrb.mxu1 %v416_v5  ;;  %v574_v10 = vld [vmem:[#allocation5 + $0x9f0] sm:$0xff]  ;;  %v572_v15 = vld [vmem:[#allocation5 + $0x9e0] sm:$0xff] }
  0x7a   :  { %950 = vmatpush.msrb.mxu3 %v480_v6  ;;  %793 = vmatmul.f32.gmra.mxu0 %v240_v7  ;;  %v638_v12 = vld [vmem:[#allocation5 + $0xbf0] sm:$0xff]  ;;  %v636_v17 = vld [vmem:[#allocation5 + $0xbe0] sm:$0xff] }
  0x7b   :  { %862 = vmatmul.f32.gmra.mxu3 %v243_v8  ;;  %959 = vmatpush.msra.mxu0 %v540_v9  ;;  %v538_v14 = vld [vmem:[#allocation5 + $0x8d0] sm:$0xff]  ;;  %v536_v18 = vld [vmem:[#allocation5 + $0x8c0] sm:$0xff] }
  0x7c   :  { %981 = vmatpush.msra.mxu1 %v574_v10  ;;  %1005 = vmatpush.msra.mxu2 %v604_v11  ;;  %v602_v16 = vld [vmem:[#allocation5 + $0xad0] sm:$0xff]  ;;  %v600_v20 = vld [vmem:[#allocation5 + $0xac0] sm:$0xff] }
  0x7d   :  { %1027 = vmatpush.msra.mxu3 %v638_v12  ;;  %816 = vmatmul.f32.gmra.mxu1 %v241_v13  ;;  %v570_v19 = vld [vmem:[#allocation5 + $0x9d0] sm:$0xff]  ;;  %v568_v24 = vld [vmem:[#allocation5 + $0x9c0] sm:$0xff] }
  0x7e   :  { %960 = vmatpush.msra.mxu0 %v538_v14  ;;  %982 = vmatpush.msra.mxu1 %v572_v15  ;;  %v634_v21 = vld [vmem:[#allocation5 + $0xbd0] sm:$0xff]  ;;  %v632_v26 = vld [vmem:[#allocation5 + $0xbc0] sm:$0xff] }
  0x7f   :  { %1006 = vmatpush.msra.mxu2 %v602_v16  ;;  %1028 = vmatpush.msra.mxu3 %v636_v17  ;;  %v230_v22 = vld [vmem:[#allocation2 + $0x30] sm:$0xff]  ;;  %v228_v27 = vld [vmem:[#allocation2 + $0x20] sm:$0xff] }
  0x80   :  { %v534_v23 = vld [vmem:[#allocation5 + $0x8b0] sm:$0xff]  ;;  %961 = vmatpush.msra.mxu0 %v536_v18  ;;  %983 = vmatpush.msra.mxu1 %v570_v19  ;;  %v532_v29 = vld [vmem:[#allocation5 + $0x8a0] sm:$0xff] }
  0x81   :  { %v598_v25 = vld [vmem:[#allocation5 + $0xab0] sm:$0xff]  ;;  %1007 = vmatpush.msra.mxu2 %v600_v20  ;;  %1029 = vmatpush.msra.mxu3 %v634_v21  ;;  %v596_v31 = vld [vmem:[#allocation5 + $0xaa0] sm:$0xff]  ;;  %v233_v20 = vld [vmem:[#allocation2 + $0x48] sm:$0xff] }
  0x82   :  { %928 = vmatmul.f32.vlgmr.msrb.gmra.mxu2 %v230_v22  ;;  %962 = vmatpush.msra.mxu0 %v534_v23  ;;  %v566_v30 = vld [vmem:[#allocation5 + $0x9b0] sm:$0xff]  ;;  %v564_v35 = vld [vmem:[#allocation5 + $0x9a0] sm:$0xff]  ;;  %v235_v21 = vld [vmem:[#allocation2 + $0x58] sm:$0xff] }
  0x83   :  { %984 = vmatpush.msra.mxu1 %v568_v24  ;;  %1008 = vmatpush.msra.mxu2 %v598_v25  ;;  %v630_v32 = vld [vmem:[#allocation5 + $0xbb0] sm:$0xff]  ;;  %v628_v37 = vld [vmem:[#allocation5 + $0xba0] sm:$0xff] }
  0x84   :  { %1030 = vmatpush.msra.mxu3 %v632_v26  ;;  %882 = vmatmul.f32.vlgmr.msrb.gmra.mxu0 %v228_v27  ;;  %v530_v34 = vld [vmem:[#allocation5 + $0x890] sm:$0xff]  ;;  %v528_v38 = vld [vmem:[#allocation5 + $0x880] sm:$0xff] }
  0x85   :  { %951 = vmatmul.f32.vlgmr.msrb.gmra.mxu3 %v231_v28  ;;  %963 = vmatpush.msra.mxu0 %v532_v29  ;;  %v594_v36 = vld [vmem:[#allocation5 + $0xa90] sm:$0xff]  ;;  %v592_v40 = vld [vmem:[#allocation5 + $0xa80] sm:$0xff] }
  0x86   :  { %985 = vmatpush.msra.mxu1 %v566_v30  ;;  %1009 = vmatpush.msra.mxu2 %v596_v31  ;;  %v562_v39 = vld [vmem:[#allocation5 + $0x990] sm:$0xff]  ;;  %v560_v43 = vld [vmem:[#allocation5 + $0x980] sm:$0xff] }
  0x87   :  { %1031 = vmatpush.msra.mxu3 %v630_v32  ;;  %905 = vmatmul.f32.vlgmr.msrb.gmra.mxu1 %v229_v33  ;;  %v626_v41 = vld [vmem:[#allocation5 + $0xb90] sm:$0xff]  ;;  %v624_v45 = vld [vmem:[#allocation5 + $0xb80] sm:$0xff] }
  0x88   :  { %964 = vmatpush.msra.mxu0 %v530_v34  ;;  %986 = vmatpush.msra.mxu1 %v564_v35  ;;  %v526_v42 = vld [vmem:[#allocation5 + $0x870] sm:$0xff]  ;;  %v524_v46 = vld [vmem:[#allocation5 + $0x860] sm:$0xff] }
  0x89   :  { %1010 = vmatpush.msra.mxu2 %v594_v36  ;;  %1032 = vmatpush.msra.mxu3 %v628_v37  ;;  %v590_v44 = vld [vmem:[#allocation5 + $0xa70] sm:$0xff]  ;;  %v588_v48 = vld [vmem:[#allocation5 + $0xa60] sm:$0xff] }
  0x8a   :  { %965 = vmatpush.msra.mxu0 %v528_v38  ;;  %987 = vmatpush.msra.mxu1 %v562_v39  ;;  %v558_v47 = vld [vmem:[#allocation5 + $0x970] sm:$0xff]  ;;  %v556_v51 = vld [vmem:[#allocation5 + $0x960] sm:$0xff] }
  0x8b   :  { %1011 = vmatpush.msra.mxu2 %v592_v40  ;;  %1033 = vmatpush.msra.mxu3 %v626_v41  ;;  %v622_v49 = vld [vmem:[#allocation5 + $0xb70] sm:$0xff]  ;;  %v620_v53 = vld [vmem:[#allocation5 + $0xb60] sm:$0xff]  ;;  %v251_v40 = vld [vmem:[#allocation2 + $0xd8] sm:$0xff] }
  0x8c   :  { %966 = vmatpush.msra.mxu0 %v526_v42  ;;  %988 = vmatpush.msra.mxu1 %v560_v43  ;;  %v522_v50 = vld [vmem:[#allocation5 + $0x850] sm:$0xff]  ;;  %v520_v54 = vld [vmem:[#allocation5 + $0x840] sm:$0xff] }
  0x8d   :  { %1012 = vmatpush.msra.mxu2 %v590_v44  ;;  %1034 = vmatpush.msra.mxu3 %v624_v45  ;;  %v586_v52 = vld [vmem:[#allocation5 + $0xa50] sm:$0xff]  ;;  %v584_v56 = vld [vmem:[#allocation5 + $0xa40] sm:$0xff]  ;;  %v249_v45 = vld [vmem:[#allocation2 + $0xc8] sm:$0xff] }
  0x8e   :  { %967 = vmatpush.msra.mxu0 %v524_v46  ;;  %989 = vmatpush.msra.mxu1 %v558_v47  ;;  %v554_v55 = vld [vmem:[#allocation5 + $0x950] sm:$0xff]  ;;  %v244_v58 = vld [vmem:[#allocation2 + $0xa0] sm:$0xff] }
  0x8f   :  { %1013 = vmatpush.msra.mxu2 %v588_v48  ;;  %1035 = vmatpush.msra.mxu3 %v622_v49  ;;  %v618_v57 = vld [vmem:[#allocation5 + $0xb50] sm:$0xff]  ;;  %v552_v61 = vld [vmem:[#allocation5 + $0x940] sm:$0xff] }
  0x90   :  { %968 = vmatpush.msra.mxu0 %v522_v50  ;;  %990 = vmatpush.msra.mxu1 %v556_v51  ;;  %v246_v59 = vld [vmem:[#allocation2 + $0xb0] sm:$0xff]  ;;  %v616_v63 = vld [vmem:[#allocation5 + $0xb40] sm:$0xff] }
  0x91   :  { %1014 = vmatpush.msra.mxu2 %v586_v52  ;;  %1036 = vmatpush.msra.mxu3 %v620_v53  ;;  %v518_v60 = vld [vmem:[#allocation5 + $0x830] sm:$0xff]  ;;  %v516_v2 = vld [vmem:[#allocation5 + $0x820] sm:$0xff] }
  0x92   :  { %969 = vmatpush.msra.mxu0 %v520_v54  ;;  %991 = vmatpush.msra.mxu1 %v554_v55  ;;  %v582_v62 = vld [vmem:[#allocation5 + $0xa30] sm:$0xff]  ;;  %v580_v4 = vld [vmem:[#allocation5 + $0xa20] sm:$0xff] }
  0x93   :  { %1015 = vmatpush.msra.mxu2 %v584_v56  ;;  %1037 = vmatpush.msra.mxu3 %v618_v57  ;;  %v550_v3 = vld [vmem:[#allocation5 + $0x930] sm:$0xff]  ;;  %v548_v7 = vld [vmem:[#allocation5 + $0x920] sm:$0xff] }
  0x94   :  { %885 = vmatmul.f32.gmra.mxu0 %v244_v58  ;;  %931 = vmatmul.f32.gmra.mxu2 %v246_v59  ;;  %v614_v5 = vld [vmem:[#allocation5 + $0xb30] sm:$0xff]  ;;  %v612_v9 = vld [vmem:[#allocation5 + $0xb20] sm:$0xff] }
  0x95   :  { %970 = vmatpush.msra.mxu0 %v518_v60  ;;  %992 = vmatpush.msra.mxu1 %v552_v61  ;;  %v514_v6 = vld [vmem:[#allocation5 + $0x810] sm:$0xff]  ;;  %v512_v10 = vld [vmem:[#allocation5 + $0x800] sm:$0xff] }
  0x96   :  { %1016 = vmatpush.msra.mxu2 %v582_v62  ;;  %1038 = vmatpush.msra.mxu3 %v616_v63  ;;  %v578_v8 = vld [vmem:[#allocation5 + $0xa10] sm:$0xff]  ;;  %v576_v12 = vld [vmem:[#allocation5 + $0xa00] sm:$0xff] }
  0x97   :  { %908 = vmatmul.f32.gmra.mxu1 %v245_v0  ;;  %954 = vmatmul.f32.gmra.mxu3 %v247_v1  ;;  %v546_v11 = vld [vmem:[#allocation5 + $0x910] sm:$0xff]  ;;  %v232_v14 = vld [vmem:[#allocation2 + $0x40] sm:$0xff] }
  0x98   :  { %971 = vmatpush.msra.mxu0 %v516_v2  ;;  %993 = vmatpush.msra.mxu1 %v550_v3  ;;  %v610_v13 = vld [vmem:[#allocation5 + $0xb10] sm:$0xff]  ;;  %v544_v18 = vld [vmem:[#allocation5 + $0x900] sm:$0xff] }
  0x99   :  { %1017 = vmatpush.msra.mxu2 %v580_v4  ;;  %1039 = vmatpush.msra.mxu3 %v614_v5  ;;  %v234_v15 = vld [vmem:[#allocation2 + $0x50] sm:$0xff]  ;;  %v608_v19 = vld [vmem:[#allocation5 + $0xb00] sm:$0xff] }
  0x9a   :  { %972 = vmatpush.msra.mxu0 %v514_v6  ;;  %994 = vmatpush.msra.mxu1 %v548_v7  ;;  %v670_v16 = vld [vmem:[#allocation5 + $0xcf0] sm:$0xff]  ;;  %v668_v22 = vld [vmem:[#allocation5 + $0xce0] sm:$0xff] }
  0x9b   :  { %1018 = vmatpush.msra.mxu2 %v578_v8  ;;  %1040 = vmatpush.msra.mxu3 %v612_v9  ;;  %v734_v17 = vld [vmem:[#allocation5 + $0xef0] sm:$0xff]  ;;  %v732_v24 = vld [vmem:[#allocation5 + $0xee0] sm:$0xff] }
  0x9c   :  { %973 = vmatpush.msra.mxu0 %v512_v10  ;;  %995 = vmatpush.msra.mxu1 %v546_v11  ;;  %v702_v23 = vld [vmem:[#allocation5 + $0xdf0] sm:$0xff]  ;;  %v700_v27 = vld [vmem:[#allocation5 + $0xde0] sm:$0xff] }
  0x9d   :  { %1019 = vmatpush.msra.mxu2 %v576_v12  ;;  %1041 = vmatpush.msra.mxu3 %v610_v13  ;;  %v766_v25 = vld [vmem:[#allocation5 + $0xff0] sm:$0xff]  ;;  %v764_v29 = vld [vmem:[#allocation5 + $0xfe0] sm:$0xff] }
  0x9e   :  { %974 = vmatmul.f32.vlgmr.msra.gmra.mxu0 %v232_v14  ;;  %1020 = vmatmul.f32.vlgmr.msra.gmra.mxu2 %v234_v15  ;;  %v666_v26 = vld [vmem:[#allocation5 + $0xcd0] sm:$0xff]  ;;  %v664_v30 = vld [vmem:[#allocation5 + $0xcc0] sm:$0xff] }
  0x9f   :  { %1050 = vmatpush.msrb.mxu0 %v670_v16  ;;  %1096 = vmatpush.msrb.mxu2 %v734_v17  ;;  %v730_v28 = vld [vmem:[#allocation5 + $0xed0] sm:$0xff]  ;;  %v728_v32 = vld [vmem:[#allocation5 + $0xec0] sm:$0xff] }
  0xa0   :  { %996 = vmatpush.msra.mxu1 %v544_v18  ;;  %1042 = vmatpush.msra.mxu3 %v608_v19  ;;  %v698_v31 = vld [vmem:[#allocation5 + $0xdd0] sm:$0xff]  ;;  %v696_v36 = vld [vmem:[#allocation5 + $0xdc0] sm:$0xff] }
  0xa1   :  { %997 = vmatmul.f32.vlgmr.msra.gmra.mxu1 %v233_v20  ;;  %1043 = vmatmul.f32.vlgmr.msra.gmra.mxu3 %v235_v21  ;;  %v762_v33 = vld [vmem:[#allocation5 + $0xfd0] sm:$0xff]  ;;  %v760_v38 = vld [vmem:[#allocation5 + $0xfc0] sm:$0xff] }
  0xa2   :  { %1051 = vmatpush.msrb.mxu0 %v668_v22  ;;  %1073 = vmatpush.msrb.mxu1 %v702_v23  ;;  %v250_v34 = vld [vmem:[#allocation2 + $0xd0] sm:$0xff]  ;;  %v248_v39 = vld [vmem:[#allocation2 + $0xc0] sm:$0xff] }
  0xa3   :  { %1097 = vmatpush.msrb.mxu2 %v732_v24  ;;  %1119 = vmatpush.msrb.mxu3 %v766_v25  ;;  %v662_v35 = vld [vmem:[#allocation5 + $0xcb0] sm:$0xff]  ;;  %v660_v41 = vld [vmem:[#allocation5 + $0xca0] sm:$0xff]  ;;  %v287_v24 = vld [vmem:[#allocation5 + $0xf8] sm:$0xff] }
  0xa4   :  { %1052 = vmatpush.msrb.mxu0 %v666_v26  ;;  %1074 = vmatpush.msrb.mxu1 %v700_v27  ;;  %v726_v37 = vld [vmem:[#allocation5 + $0xeb0] sm:$0xff]  ;;  %v724_v43 = vld [vmem:[#allocation5 + $0xea0] sm:$0xff]  ;;  %v351_v25 = vld [vmem:[#allocation5 + $0x2f8] sm:$0xff] }
  0xa5   :  { %1098 = vmatpush.msrb.mxu2 %v730_v28  ;;  %1120 = vmatpush.msrb.mxu3 %v764_v29  ;;  %v694_v42 = vld [vmem:[#allocation5 + $0xdb0] sm:$0xff]  ;;  %v692_v47 = vld [vmem:[#allocation5 + $0xda0] sm:$0xff]  ;;  %v237_v28 = vld [vmem:[#allocation2 + $0x68] sm:$0xff] }
  0xa6   :  { %1053 = vmatpush.msrb.mxu0 %v664_v30  ;;  %1075 = vmatpush.msrb.mxu1 %v698_v31  ;;  %v758_v44 = vld [vmem:[#allocation5 + $0xfb0] sm:$0xff]  ;;  %v756_v49 = vld [vmem:[#allocation5 + $0xfa0] sm:$0xff]  ;;  %v239_v29 = vld [vmem:[#allocation2 + $0x78] sm:$0xff] }
  0xa7   :  { %1099 = vmatpush.msrb.mxu2 %v728_v32  ;;  %1121 = vmatpush.msrb.mxu3 %v762_v33  ;;  %v658_v46 = vld [vmem:[#allocation5 + $0xc90] sm:$0xff]  ;;  %v656_v50 = vld [vmem:[#allocation5 + $0xc80] sm:$0xff]  ;;  %v285_v30 = vld [vmem:[#allocation5 + $0xe8] sm:$0xff] }
  0xa8   :  { %1023 = vmatmul.f32.gmra.mxu2 %v250_v34  ;;  %1054 = vmatpush.msrb.mxu0 %v662_v35  ;;  %v722_v48 = vld [vmem:[#allocation5 + $0xe90] sm:$0xff]  ;;  %v720_v52 = vld [vmem:[#allocation5 + $0xe80] sm:$0xff]  ;;  %v319_v31 = vld [vmem:[#allocation5 + $0x1f8] sm:$0xff] }
  0xa9   :  { %1076 = vmatpush.msrb.mxu1 %v696_v36  ;;  %1100 = vmatpush.msrb.mxu2 %v726_v37  ;;  %v690_v51 = vld [vmem:[#allocation5 + $0xd90] sm:$0xff]  ;;  %v688_v55 = vld [vmem:[#allocation5 + $0xd80] sm:$0xff]  ;;  %v349_v32 = vld [vmem:[#allocation5 + $0x2e8] sm:$0xff] }
  0xaa   :  { %1122 = vmatpush.msrb.mxu3 %v760_v38  ;;  %977 = vmatmul.f32.gmra.mxu0 %v248_v39  ;;  %v754_v53 = vld [vmem:[#allocation5 + $0xf90] sm:$0xff]  ;;  %v752_v57 = vld [vmem:[#allocation5 + $0xf80] sm:$0xff]  ;;  %v383_v33 = vld [vmem:[#allocation5 + $0x3f8] sm:$0xff] }
  0xab   :  { %1046 = vmatmul.f32.gmra.mxu3 %v251_v40  ;;  %1055 = vmatpush.msrb.mxu0 %v660_v41  ;;  %v654_v54 = vld [vmem:[#allocation5 + $0xc70] sm:$0xff]  ;;  %v652_v58 = vld [vmem:[#allocation5 + $0xc60] sm:$0xff]  ;;  %v283_v34 = vld [vmem:[#allocation5 + $0xd8] sm:$0xff] }
  0xac   :  { %1077 = vmatpush.msrb.mxu1 %v694_v42  ;;  %1101 = vmatpush.msrb.mxu2 %v724_v43  ;;  %v718_v56 = vld [vmem:[#allocation5 + $0xe70] sm:$0xff]  ;;  %v716_v60 = vld [vmem:[#allocation5 + $0xe60] sm:$0xff]  ;;  %v317_v35 = vld [vmem:[#allocation5 + $0x1e8] sm:$0xff] }
  0xad   :  { %1123 = vmatpush.msrb.mxu3 %v758_v44  ;;  %1000 = vmatmul.f32.gmra.mxu1 %v249_v45  ;;  %v686_v59 = vld [vmem:[#allocation5 + $0xd70] sm:$0xff]  ;;  %v684_v63 = vld [vmem:[#allocation5 + $0xd60] sm:$0xff]  ;;  %v347_v36 = vld [vmem:[#allocation5 + $0x2d8] sm:$0xff] }
  0xae   :  { %1056 = vmatpush.msrb.mxu0 %v658_v46  ;;  %1078 = vmatpush.msrb.mxu1 %v692_v47  ;;  %v750_v61 = vld [vmem:[#allocation5 + $0xf70] sm:$0xff]  ;;  %v748_v1 = vld [vmem:[#allocation5 + $0xf60] sm:$0xff]  ;;  %v381_v37 = vld [vmem:[#allocation5 + $0x3e8] sm:$0xff] }
  0xaf   :  { %1102 = vmatpush.msrb.mxu2 %v722_v48  ;;  %1124 = vmatpush.msrb.mxu3 %v756_v49  ;;  %v650_v62 = vld [vmem:[#allocation5 + $0xc50] sm:$0xff]  ;;  %v648_v2 = vld [vmem:[#allocation5 + $0xc40] sm:$0xff]  ;;  %v281_v38 = vld [vmem:[#allocation5 + $0xc8] sm:$0xff] }
  0xb0   :  { %1057 = vmatpush.msrb.mxu0 %v656_v50  ;;  %1079 = vmatpush.msrb.mxu1 %v690_v51  ;;  %v714_v0 = vld [vmem:[#allocation5 + $0xe50] sm:$0xff]  ;;  %v712_v4 = vld [vmem:[#allocation5 + $0xe40] sm:$0xff]  ;;  %v315_v39 = vld [vmem:[#allocation5 + $0x1d8] sm:$0xff] }
  0xb1   :  { %1103 = vmatpush.msrb.mxu2 %v720_v52  ;;  %1125 = vmatpush.msrb.mxu3 %v754_v53  ;;  %v682_v3 = vld [vmem:[#allocation5 + $0xd50] sm:$0xff]  ;;  %v680_v7 = vld [vmem:[#allocation5 + $0xd40] sm:$0xff]  ;;  %v345_v40 = vld [vmem:[#allocation5 + $0x2c8] sm:$0xff] }
  0xb2   :  { %1058 = vmatpush.msrb.mxu0 %v654_v54  ;;  %1080 = vmatpush.msrb.mxu1 %v688_v55  ;;  %v746_v5 = vld [vmem:[#allocation5 + $0xf50] sm:$0xff]  ;;  %v744_v9 = vld [vmem:[#allocation5 + $0xf40] sm:$0xff]  ;;  %v379_v41 = vld [vmem:[#allocation5 + $0x3d8] sm:$0xff] }
  0xb3   :  { %1104 = vmatpush.msrb.mxu2 %v718_v56  ;;  %1126 = vmatpush.msrb.mxu3 %v752_v57  ;;  %v646_v6 = vld [vmem:[#allocation5 + $0xc30] sm:$0xff]  ;;  %v644_v10 = vld [vmem:[#allocation5 + $0xc20] sm:$0xff]  ;;  %v279_v44 = vld [vmem:[#allocation5 + $0xb8] sm:$0xff] }
  0xb4   :  { %1059 = vmatpush.msrb.mxu0 %v652_v58  ;;  %1081 = vmatpush.msrb.mxu1 %v686_v59  ;;  %v710_v8 = vld [vmem:[#allocation5 + $0xe30] sm:$0xff]  ;;  %v708_v12 = vld [vmem:[#allocation5 + $0xe20] sm:$0xff]  ;;  %v313_v45 = vld [vmem:[#allocation5 + $0x1c8] sm:$0xff] }
  0xb5   :  { %1105 = vmatpush.msrb.mxu2 %v716_v60  ;;  %1127 = vmatpush.msrb.mxu3 %v750_v61  ;;  %v678_v11 = vld [vmem:[#allocation5 + $0xd30] sm:$0xff]  ;;  %v676_v15 = vld [vmem:[#allocation5 + $0xd20] sm:$0xff]  ;;  %v343_v46 = vld [vmem:[#allocation5 + $0x2b8] sm:$0xff] }
  0xb6   :  { %1060 = vmatpush.msrb.mxu0 %v650_v62  ;;  %1082 = vmatpush.msrb.mxu1 %v684_v63  ;;  %v742_v13 = vld [vmem:[#allocation5 + $0xf30] sm:$0xff]  ;;  %v740_v17 = vld [vmem:[#allocation5 + $0xf20] sm:$0xff]  ;;  %v377_v47 = vld [vmem:[#allocation5 + $0x3c8] sm:$0xff] }
  0xb7   :  { %1106 = vmatpush.msrb.mxu2 %v714_v0  ;;  %1128 = vmatpush.msrb.mxu3 %v748_v1  ;;  %v642_v14 = vld [vmem:[#allocation5 + $0xc10] sm:$0xff]  ;;  %v640_v18 = vld [vmem:[#allocation5 + $0xc00] sm:$0xff]  ;;  %v253_v48 = vld [vmem:[#allocation2 + $0xe8] sm:$0xff] }
  0xb8   :  { %1061 = vmatpush.msrb.mxu0 %v648_v2  ;;  %1083 = vmatpush.msrb.mxu1 %v682_v3  ;;  %v706_v16 = vld [vmem:[#allocation5 + $0xe10] sm:$0xff]  ;;  %v704_v20 = vld [vmem:[#allocation5 + $0xe00] sm:$0xff]  ;;  %v255_v49 = vld [vmem:[#allocation2 + $0xf8] sm:$0xff] }
  0xb9   :  { %1107 = vmatpush.msrb.mxu2 %v712_v4  ;;  %1129 = vmatpush.msrb.mxu3 %v746_v5  ;;  %v674_v19 = vld [vmem:[#allocation5 + $0xd10] sm:$0xff]  ;;  %v236_v22 = vld [vmem:[#allocation2 + $0x60] sm:$0xff]  ;;  %v277_v50 = vld [vmem:[#allocation5 + $0xa8] sm:$0xff] }
  0xba   :  { %1062 = vmatpush.msrb.mxu0 %v646_v6  ;;  %1084 = vmatpush.msrb.mxu1 %v680_v7  ;;  %v738_v21 = vld [vmem:[#allocation5 + $0xf10] sm:$0xff]  ;;  %v672_v26 = vld [vmem:[#allocation5 + $0xd00] sm:$0xff]  ;;  %v311_v51 = vld [vmem:[#allocation5 + $0x1b8] sm:$0xff] }
  0xbb   :  { %1108 = vmatpush.msrb.mxu2 %v710_v8  ;;  %1130 = vmatpush.msrb.mxu3 %v744_v9  ;;  %v238_v23 = vld [vmem:[#allocation2 + $0x70] sm:$0xff]  ;;  %v736_v27 = vld [vmem:[#allocation5 + $0xf00] sm:$0xff]  ;;  %v341_v52 = vld [vmem:[#allocation5 + $0x2a8] sm:$0xff] }
  0xbc   :  { %1063 = vmatpush.msrb.mxu0 %v644_v10  ;;  %1085 = vmatpush.msrb.mxu1 %v678_v11  ;;  %v252_v42 = vld [vmem:[#allocation2 + $0xe0] sm:$0xff]  ;;  %v254_v43 = vld [vmem:[#allocation2 + $0xf0] sm:$0xff]  ;;  %v375_v53 = vld [vmem:[#allocation5 + $0x3b8] sm:$0xff] }
  0xbd   :  { %1109 = vmatpush.msrb.mxu2 %v708_v12  ;;  %1131 = vmatpush.msrb.mxu3 %v742_v13  ;;  %v275_v54 = vld [vmem:[#allocation5 + $0x98] sm:$0xff]  ;;  %v309_v55 = vld [vmem:[#allocation5 + $0x1a8] sm:$0xff] }
  0xbe   :  { %1064 = vmatpush.msrb.mxu0 %v642_v14  ;;  %1086 = vmatpush.msrb.mxu1 %v676_v15  ;;  %v339_v56 = vld [vmem:[#allocation5 + $0x298] sm:$0xff]  ;;  %v373_v57 = vld [vmem:[#allocation5 + $0x3a8] sm:$0xff] }
  0xbf   :  { %1110 = vmatpush.msrb.mxu2 %v706_v16  ;;  %1132 = vmatpush.msrb.mxu3 %v740_v17  ;;  %v273_v58 = vld [vmem:[#allocation5 + $0x88] sm:$0xff]  ;;  %v307_v59 = vld [vmem:[#allocation5 + $0x198] sm:$0xff] }
  0xc0   :  { %1065 = vmatpush.msrb.mxu0 %v640_v18  ;;  %1087 = vmatpush.msrb.mxu1 %v674_v19  ;;  %v337_v60 = vld [vmem:[#allocation5 + $0x288] sm:$0xff]  ;;  %v371_v61 = vld [vmem:[#allocation5 + $0x398] sm:$0xff] }
  0xc1   :  { %1111 = vmatpush.msrb.mxu2 %v704_v20  ;;  %1133 = vmatpush.msrb.mxu3 %v738_v21  ;;  %v271_v62 = vld [vmem:[#allocation5 + $0x78] sm:$0xff]  ;;  %v305_v63 = vld [vmem:[#allocation5 + $0x188] sm:$0xff] }
  0xc2   :  { %1066 = vmatmul.f32.vlgmr.msrb.gmra.mxu0 %v236_v22  ;;  %1112 = vmatmul.f32.vlgmr.msrb.gmra.mxu2 %v238_v23  ;;  %v335_v0 = vld [vmem:[#allocation5 + $0x278] sm:$0xff]  ;;  %v369_v1 = vld [vmem:[#allocation5 + $0x388] sm:$0xff] }
  0xc3   :  { %1142 = vmatpush.msra.mxu0 %v287_v24  ;;  %1188 = vmatpush.msra.mxu2 %v351_v25  ;;  %v269_v2 = vld [vmem:[#allocation5 + $0x68] sm:$0xff]  ;;  %v303_v3 = vld [vmem:[#allocation5 + $0x178] sm:$0xff] }
  0xc4   :  { %1088 = vmatpush.msrb.mxu1 %v672_v26  ;;  %1134 = vmatpush.msrb.mxu3 %v736_v27  ;;  %v333_v4 = vld [vmem:[#allocation5 + $0x268] sm:$0xff]  ;;  %v367_v5 = vld [vmem:[#allocation5 + $0x378] sm:$0xff] }
  0xc5   :  { %1089 = vmatmul.f32.vlgmr.msrb.gmra.mxu1 %v237_v28  ;;  %1135 = vmatmul.f32.vlgmr.msrb.gmra.mxu3 %v239_v29  ;;  %v267_v6 = vld [vmem:[#allocation5 + $0x58] sm:$0xff]  ;;  %v301_v7 = vld [vmem:[#allocation5 + $0x168] sm:$0xff] }
  0xc6   :  { %1143 = vmatpush.msra.mxu0 %v285_v30  ;;  %1165 = vmatpush.msra.mxu1 %v319_v31  ;;  %v331_v8 = vld [vmem:[#allocation5 + $0x258] sm:$0xff]  ;;  %v365_v9 = vld [vmem:[#allocation5 + $0x368] sm:$0xff] }
  0xc7   :  { %1189 = vmatpush.msra.mxu2 %v349_v32  ;;  %1211 = vmatpush.msra.mxu3 %v383_v33  ;;  %v265_v10 = vld [vmem:[#allocation5 + $0x48] sm:$0xff]  ;;  %v299_v11 = vld [vmem:[#allocation5 + $0x158] sm:$0xff] }
  0xc8   :  { %1144 = vmatpush.msra.mxu0 %v283_v34  ;;  %1166 = vmatpush.msra.mxu1 %v317_v35  ;;  %v329_v12 = vld [vmem:[#allocation5 + $0x248] sm:$0xff]  ;;  %v363_v13 = vld [vmem:[#allocation5 + $0x358] sm:$0xff] }
  0xc9   :  { %1190 = vmatpush.msra.mxu2 %v347_v36  ;;  %1212 = vmatpush.msra.mxu3 %v381_v37  ;;  %v263_v14 = vld [vmem:[#allocation5 + $0x38] sm:$0xff]  ;;  %v297_v15 = vld [vmem:[#allocation5 + $0x148] sm:$0xff] }
  0xca   :  { %1145 = vmatpush.msra.mxu0 %v281_v38  ;;  %1167 = vmatpush.msra.mxu1 %v315_v39  ;;  %v327_v16 = vld [vmem:[#allocation5 + $0x238] sm:$0xff]  ;;  %v361_v17 = vld [vmem:[#allocation5 + $0x348] sm:$0xff] }
  0xcb   :  { %1191 = vmatpush.msra.mxu2 %v345_v40  ;;  %1213 = vmatpush.msra.mxu3 %v379_v41  ;;  %v261_v18 = vld [vmem:[#allocation5 + $0x28] sm:$0xff]  ;;  %v295_v19 = vld [vmem:[#allocation5 + $0x138] sm:$0xff] }
  0xcc   :  { %1069 = vmatmul.f32.gmra.mxu0 %v252_v42  ;;  %1115 = vmatmul.f32.gmra.mxu2 %v254_v43  ;;  %v325_v20 = vld [vmem:[#allocation5 + $0x228] sm:$0xff]  ;;  %v359_v21 = vld [vmem:[#allocation5 + $0x338] sm:$0xff] }
  0xcd   :  { %1146 = vmatpush.msra.mxu0 %v279_v44  ;;  %1168 = vmatpush.msra.mxu1 %v313_v45  ;;  %v259_v22 = vld [vmem:[#allocation5 + $0x18] sm:$0xff]  ;;  %v293_v23 = vld [vmem:[#allocation5 + $0x128] sm:$0xff] }
  0xce   :  { %1192 = vmatpush.msra.mxu2 %v343_v46  ;;  %1214 = vmatpush.msra.mxu3 %v377_v47  ;;  %v323_v24 = vld [vmem:[#allocation5 + $0x218] sm:$0xff]  ;;  %v357_v25 = vld [vmem:[#allocation5 + $0x328] sm:$0xff] }
  0xcf   :  { %1092 = vmatmul.f32.gmra.mxu1 %v253_v48  ;;  %1138 = vmatmul.f32.gmra.mxu3 %v255_v49  ;;  %v257_v26 = vld [vmem:[#allocation5 + $0x8] sm:$0xff]  ;;  %v291_v27 = vld [vmem:[#allocation5 + $0x118] sm:$0xff] }
  0xd0   :  { %1147 = vmatpush.msra.mxu0 %v277_v50  ;;  %1169 = vmatpush.msra.mxu1 %v311_v51  ;;  %v321_v28 = vld [vmem:[#allocation5 + $0x208] sm:$0xff]  ;;  %v355_v29 = vld [vmem:[#allocation5 + $0x318] sm:$0xff] }
  0xd1   :  { %1193 = vmatpush.msra.mxu2 %v341_v52  ;;  %1215 = vmatpush.msra.mxu3 %v375_v53  ;;  %v415_v30 = vld [vmem:[#allocation5 + $0x4f8] sm:$0xff]  ;;  %v289_v32 = vld [vmem:[#allocation5 + $0x108] sm:$0xff] }
  0xd2   :  { %1148 = vmatpush.msra.mxu0 %v275_v54  ;;  %1170 = vmatpush.msra.mxu1 %v309_v55  ;;  %v479_v31 = vld [vmem:[#allocation5 + $0x6f8] sm:$0xff]  ;;  %v353_v33 = vld [vmem:[#allocation5 + $0x308] sm:$0xff] }
  0xd3   :  { %1194 = vmatpush.msra.mxu2 %v339_v56  ;;  %1216 = vmatpush.msra.mxu3 %v373_v57  ;;  %v413_v34 = vld [vmem:[#allocation5 + $0x4e8] sm:$0xff]  ;;  %v447_v35 = vld [vmem:[#allocation5 + $0x5f8] sm:$0xff] }
  0xd4   :  { %1149 = vmatpush.msra.mxu0 %v273_v58  ;;  %1171 = vmatpush.msra.mxu1 %v307_v59  ;;  %v477_v36 = vld [vmem:[#allocation5 + $0x6e8] sm:$0xff]  ;;  %v511_v37 = vld [vmem:[#allocation5 + $0x7f8] sm:$0xff] }
  0xd5   :  { %1195 = vmatpush.msra.mxu2 %v337_v60  ;;  %1217 = vmatpush.msra.mxu3 %v371_v61  ;;  %v411_v38 = vld [vmem:[#allocation5 + $0x4d8] sm:$0xff]  ;;  %v445_v39 = vld [vmem:[#allocation5 + $0x5e8] sm:$0xff] }
  0xd6   :  { %1150 = vmatpush.msra.mxu0 %v271_v62  ;;  %1172 = vmatpush.msra.mxu1 %v305_v63  ;;  %v475_v40 = vld [vmem:[#allocation5 + $0x6d8] sm:$0xff]  ;;  %v509_v41 = vld [vmem:[#allocation5 + $0x7e8] sm:$0xff] }
  0xd7   :  { %1196 = vmatpush.msra.mxu2 %v335_v0  ;;  %1218 = vmatpush.msra.mxu3 %v369_v1  ;;  %v409_v42 = vld [vmem:[#allocation5 + $0x4c8] sm:$0xff]  ;;  %v443_v43 = vld [vmem:[#allocation5 + $0x5d8] sm:$0xff] }
  0xd8   :  { %1151 = vmatpush.msra.mxu0 %v269_v2  ;;  %1173 = vmatpush.msra.mxu1 %v303_v3  ;;  %v473_v44 = vld [vmem:[#allocation5 + $0x6c8] sm:$0xff]  ;;  %v507_v45 = vld [vmem:[#allocation5 + $0x7d8] sm:$0xff] }
  0xd9   :  { %1197 = vmatpush.msra.mxu2 %v333_v4  ;;  %1219 = vmatpush.msra.mxu3 %v367_v5  ;;  %v407_v46 = vld [vmem:[#allocation5 + $0x4b8] sm:$0xff]  ;;  %v441_v47 = vld [vmem:[#allocation5 + $0x5c8] sm:$0xff] }
  0xda   :  { %1152 = vmatpush.msra.mxu0 %v267_v6  ;;  %1174 = vmatpush.msra.mxu1 %v301_v7  ;;  %v471_v48 = vld [vmem:[#allocation5 + $0x6b8] sm:$0xff]  ;;  %v505_v49 = vld [vmem:[#allocation5 + $0x7c8] sm:$0xff] }
  0xdb   :  { %1198 = vmatpush.msra.mxu2 %v331_v8  ;;  %1220 = vmatpush.msra.mxu3 %v365_v9  ;;  %v405_v50 = vld [vmem:[#allocation5 + $0x4a8] sm:$0xff]  ;;  %v439_v51 = vld [vmem:[#allocation5 + $0x5b8] sm:$0xff] }
  0xdc   :  { %1153 = vmatpush.msra.mxu0 %v265_v10  ;;  %1175 = vmatpush.msra.mxu1 %v299_v11  ;;  %v469_v52 = vld [vmem:[#allocation5 + $0x6a8] sm:$0xff]  ;;  %v503_v53 = vld [vmem:[#allocation5 + $0x7b8] sm:$0xff] }
  0xdd   :  { %1199 = vmatpush.msra.mxu2 %v329_v12  ;;  %1221 = vmatpush.msra.mxu3 %v363_v13  ;;  %v403_v54 = vld [vmem:[#allocation5 + $0x498] sm:$0xff]  ;;  %v437_v55 = vld [vmem:[#allocation5 + $0x5a8] sm:$0xff] }
  0xde   :  { %1154 = vmatpush.msra.mxu0 %v263_v14  ;;  %1176 = vmatpush.msra.mxu1 %v297_v15  ;;  %v467_v56 = vld [vmem:[#allocation5 + $0x698] sm:$0xff]  ;;  %v501_v57 = vld [vmem:[#allocation5 + $0x7a8] sm:$0xff] }
  0xdf   :  { %1200 = vmatpush.msra.mxu2 %v327_v16  ;;  %1222 = vmatpush.msra.mxu3 %v361_v17  ;;  %v401_v58 = vld [vmem:[#allocation5 + $0x488] sm:$0xff]  ;;  %v435_v59 = vld [vmem:[#allocation5 + $0x598] sm:$0xff] }
  0xe0   :  { %1155 = vmatpush.msra.mxu0 %v261_v18  ;;  %1177 = vmatpush.msra.mxu1 %v295_v19  ;;  %v465_v60 = vld [vmem:[#allocation5 + $0x688] sm:$0xff]  ;;  %v499_v61 = vld [vmem:[#allocation5 + $0x798] sm:$0xff]  ;;  %v6092_v18 = vld [vmem:[#allocation2 + $0x10] sm:$0xff] }
  0xe1   :  { %1201 = vmatpush.msra.mxu2 %v325_v20  ;;  %1223 = vmatpush.msra.mxu3 %v359_v21  ;;  %v399_v62 = vld [vmem:[#allocation5 + $0x478] sm:$0xff]  ;;  %v433_v63 = vld [vmem:[#allocation5 + $0x588] sm:$0xff] }
  0xe2   :  { %1156 = vmatpush.msra.mxu0 %v259_v22  ;;  %1178 = vmatpush.msra.mxu1 %v293_v23  ;;  %v463_v0 = vld [vmem:[#allocation5 + $0x678] sm:$0xff]  ;;  %v497_v1 = vld [vmem:[#allocation5 + $0x788] sm:$0xff]  ;;  %v6093_v22 = vld [vmem:[#allocation2] sm:$0xff] }
  0xe3   :  { %1202 = vmatpush.msra.mxu2 %v323_v24  ;;  %1224 = vmatpush.msra.mxu3 %v357_v25  ;;  %v397_v2 = vld [vmem:[#allocation5 + $0x468] sm:$0xff]  ;;  %v431_v3 = vld [vmem:[#allocation5 + $0x578] sm:$0xff] }
  0xe4   :  { %1157 = vmatpush.msra.mxu0 %v257_v26  ;;  %1179 = vmatpush.msra.mxu1 %v291_v27  ;;  %v461_v4 = vld [vmem:[#allocation5 + $0x668] sm:$0xff]  ;;  %v495_v5 = vld [vmem:[#allocation5 + $0x778] sm:$0xff] }
  0xe5   :  { %1203 = vmatpush.msra.mxu2 %v321_v28  ;;  %1225 = vmatpush.msra.mxu3 %v355_v29  ;;  %v395_v6 = vld [vmem:[#allocation5 + $0x458] sm:$0xff]  ;;  %v429_v7 = vld [vmem:[#allocation5 + $0x568] sm:$0xff] }
  0xe6   :  { %1234 = vmatpush.msrb.mxu0 %v415_v30  ;;  %1180 = vmatpush.msra.mxu1 %v289_v32  ;;  %v459_v8 = vld [vmem:[#allocation5 + $0x658] sm:$0xff]  ;;  %v493_v9 = vld [vmem:[#allocation5 + $0x768] sm:$0xff] }
  0xe7   :  { %1280 = vmatpush.msrb.mxu2 %v479_v31  ;;  %1226 = vmatpush.msra.mxu3 %v353_v33  ;;  %v393_v10 = vld [vmem:[#allocation5 + $0x448] sm:$0xff]  ;;  %v427_v11 = vld [vmem:[#allocation5 + $0x558] sm:$0xff] }
  0xe8   :  { %1235 = vmatpush.msrb.mxu0 %v413_v34  ;;  %1257 = vmatpush.msrb.mxu1 %v447_v35  ;;  %v457_v12 = vld [vmem:[#allocation5 + $0x648] sm:$0xff]  ;;  %v491_v13 = vld [vmem:[#allocation5 + $0x758] sm:$0xff] }
  0xe9   :  { %1281 = vmatpush.msrb.mxu2 %v477_v36  ;;  %1303 = vmatpush.msrb.mxu3 %v511_v37  ;;  %v391_v14 = vld [vmem:[#allocation5 + $0x438] sm:$0xff]  ;;  %v425_v15 = vld [vmem:[#allocation5 + $0x548] sm:$0xff] }
  0xea   :  { %1236 = vmatpush.msrb.mxu0 %v411_v38  ;;  %1258 = vmatpush.msrb.mxu1 %v445_v39  ;;  %v455_v16 = vld [vmem:[#allocation5 + $0x638] sm:$0xff]  ;;  %v489_v17 = vld [vmem:[#allocation5 + $0x748] sm:$0xff]  ;;  %v6096_v38 = vld [vmem:[#allocation2 + $0x90] sm:$0xff] }
  0xeb   :  { %1282 = vmatpush.msrb.mxu2 %v475_v40  ;;  %1304 = vmatpush.msrb.mxu3 %v509_v41  ;;  %v389_v19 = vld [vmem:[#allocation5 + $0x428] sm:$0xff]  ;;  %v423_v20 = vld [vmem:[#allocation5 + $0x538] sm:$0xff] }
  0xec   :  { %1237 = vmatpush.msrb.mxu0 %v409_v42  ;;  %1259 = vmatpush.msrb.mxu1 %v443_v43  ;;  %v453_v21 = vld [vmem:[#allocation5 + $0x628] sm:$0xff]  ;;  %v487_v23 = vld [vmem:[#allocation5 + $0x738] sm:$0xff]  ;;  %v6097_v42 = vld [vmem:[#allocation2 + $0x80] sm:$0xff] }
  0xed   :  { %1283 = vmatpush.msrb.mxu2 %v473_v44  ;;  %1305 = vmatpush.msrb.mxu3 %v507_v45  ;;  %v6094_v24 = vld [vmem:[#allocation2 + $0x18] sm:$0xff]  ;;  %v421_v26 = vld [vmem:[#allocation5 + $0x528] sm:$0xff] }
  0xee   :  { %1238 = vmatpush.msrb.mxu0 %v407_v46  ;;  %1260 = vmatpush.msrb.mxu1 %v441_v47  ;;  %v387_v25 = vld [vmem:[#allocation5 + $0x418] sm:$0xff]  ;;  %v485_v28 = vld [vmem:[#allocation5 + $0x728] sm:$0xff] }
  0xef   :  { %1284 = vmatpush.msrb.mxu2 %v471_v48  ;;  %1306 = vmatpush.msrb.mxu3 %v505_v49  ;;  %v451_v27 = vld [vmem:[#allocation5 + $0x618] sm:$0xff]  ;;  %v6095_v29 = vld [vmem:[#allocation2 + $0x8] sm:$0xff] }
  0xf0   :  { %1239 = vmatpush.msrb.mxu0 %v405_v50  ;;  %1261 = vmatpush.msrb.mxu1 %v439_v51  ;;  %v385_v30 = vld [vmem:[#allocation5 + $0x408] sm:$0xff]  ;;  %v419_v31 = vld [vmem:[#allocation5 + $0x518] sm:$0xff] }
  0xf1   :  { %1285 = vmatpush.msrb.mxu2 %v469_v52  ;;  %1307 = vmatpush.msrb.mxu3 %v503_v53  ;;  %v449_v32 = vld [vmem:[#allocation5 + $0x608] sm:$0xff]  ;;  %v483_v33 = vld [vmem:[#allocation5 + $0x718] sm:$0xff] }
  0xf2   :  { %1240 = vmatpush.msrb.mxu0 %v403_v54  ;;  %1262 = vmatpush.msrb.mxu1 %v437_v55  ;;  %v543_v34 = vld [vmem:[#allocation5 + $0x8f8] sm:$0xff]  ;;  %v417_v36 = vld [vmem:[#allocation5 + $0x508] sm:$0xff] }
  0xf3   :  { %1286 = vmatpush.msrb.mxu2 %v467_v56  ;;  %1308 = vmatpush.msrb.mxu3 %v501_v57  ;;  %v607_v35 = vld [vmem:[#allocation5 + $0xaf8] sm:$0xff]  ;;  %v481_v37 = vld [vmem:[#allocation5 + $0x708] sm:$0xff] }
  0xf4   :  { %1241 = vmatpush.msrb.mxu0 %v401_v58  ;;  %1263 = vmatpush.msrb.mxu1 %v435_v59  ;;  %v541_v39 = vld [vmem:[#allocation5 + $0x8e8] sm:$0xff]  ;;  %v575_v40 = vld [vmem:[#allocation5 + $0x9f8] sm:$0xff]  ;;  %v6100_v58 = vld [vmem:[#allocation2 + $0x30] sm:$0xff] }
  0xf5   :  { %1287 = vmatpush.msrb.mxu2 %v465_v60  ;;  %1309 = vmatpush.msrb.mxu3 %v499_v61  ;;  %v605_v41 = vld [vmem:[#allocation5 + $0xae8] sm:$0xff]  ;;  %v639_v43 = vld [vmem:[#allocation5 + $0xbf8] sm:$0xff] }
  0xf6   :  { %1242 = vmatpush.msrb.mxu0 %v399_v62  ;;  %1264 = vmatpush.msrb.mxu1 %v433_v63  ;;  %v6098_v44 = vld [vmem:[#allocation2 + $0x98] sm:$0xff]  ;;  %v573_v46 = vld [vmem:[#allocation5 + $0x9e8] sm:$0xff]  ;;  %v6101_v62 = vld [vmem:[#allocation2 + $0x20] sm:$0xff] }
  0xf7   :  { %1288 = vmatpush.msrb.mxu2 %v463_v0  ;;  %1310 = vmatpush.msrb.mxu3 %v497_v1  ;;  %v539_v45 = vld [vmem:[#allocation5 + $0x8d8] sm:$0xff]  ;;  %v637_v48 = vld [vmem:[#allocation5 + $0xbe8] sm:$0xff] }
  0xf8   :  { %1243 = vmatpush.msrb.mxu0 %v397_v2  ;;  %1265 = vmatpush.msrb.mxu1 %v431_v3  ;;  %v603_v47 = vld [vmem:[#allocation5 + $0xad8] sm:$0xff]  ;;  %v6099_v49 = vld [vmem:[#allocation2 + $0x88] sm:$0xff] }
  0xf9   :  { %1289 = vmatpush.msrb.mxu2 %v461_v4  ;;  %1311 = vmatpush.msrb.mxu3 %v495_v5  ;;  %v537_v50 = vld [vmem:[#allocation5 + $0x8c8] sm:$0xff]  ;;  %v571_v51 = vld [vmem:[#allocation5 + $0x9d8] sm:$0xff] }
  0xfa   :  { %1244 = vmatpush.msrb.mxu0 %v395_v6  ;;  %1266 = vmatpush.msrb.mxu1 %v429_v7  ;;  %v601_v52 = vld [vmem:[#allocation5 + $0xac8] sm:$0xff]  ;;  %v635_v53 = vld [vmem:[#allocation5 + $0xbd8] sm:$0xff] }
  0xfb   :  { %1290 = vmatpush.msrb.mxu2 %v459_v8  ;;  %1312 = vmatpush.msrb.mxu3 %v493_v9  ;;  %v535_v54 = vld [vmem:[#allocation5 + $0x8b8] sm:$0xff]  ;;  %v569_v55 = vld [vmem:[#allocation5 + $0x9c8] sm:$0xff] }
  0xfc   :  { %1245 = vmatpush.msrb.mxu0 %v393_v10  ;;  %1267 = vmatpush.msrb.mxu1 %v427_v11  ;;  %v599_v56 = vld [vmem:[#allocation5 + $0xab8] sm:$0xff]  ;;  %v633_v57 = vld [vmem:[#allocation5 + $0xbc8] sm:$0xff] }
  0xfd   :  { %1291 = vmatpush.msrb.mxu2 %v457_v12  ;;  %1313 = vmatpush.msrb.mxu3 %v491_v13  ;;  %v533_v59 = vld [vmem:[#allocation5 + $0x8a8] sm:$0xff]  ;;  %v567_v60 = vld [vmem:[#allocation5 + $0x9b8] sm:$0xff] }
  0xfe   :  { %1204 = vmatmul.f32.vlgmr.msra.gmra.mxu2 %v6092_v18  ;;  %1246 = vmatpush.msrb.mxu0 %v391_v14  ;;  %v597_v61 = vld [vmem:[#allocation5 + $0xaa8] sm:$0xff]  ;;  %v631_v63 = vld [vmem:[#allocation5 + $0xbb8] sm:$0xff] }
  0xff   :  { %1268 = vmatpush.msrb.mxu1 %v425_v15  ;;  %1292 = vmatpush.msrb.mxu2 %v455_v16  ;;  %v6102_v0 = vld [vmem:[#allocation2 + $0x38] sm:$0xff]  ;;  %v565_v2 = vld [vmem:[#allocation5 + $0x9a8] sm:$0xff] }
 0x100   :  { %1314 = vmatpush.msrb.mxu3 %v489_v17  ;;  %1158 = vmatmul.f32.vlgmr.msra.gmra.mxu0 %v6093_v22  ;;  %v531_v1 = vld [vmem:[#allocation5 + $0x898] sm:$0xff]  ;;  %v629_v4 = vld [vmem:[#allocation5 + $0xba8] sm:$0xff] }
 0x101   :  { %1227 = vmatmul.f32.vlgmr.msra.gmra.mxu3 %v6094_v24  ;;  %1247 = vmatpush.msrb.mxu0 %v389_v19  ;;  %v595_v3 = vld [vmem:[#allocation5 + $0xa98] sm:$0xff]  ;;  %v6103_v5 = vld [vmem:[#allocation2 + $0x28] sm:$0xff] }
 0x102   :  { %1269 = vmatpush.msrb.mxu1 %v423_v20  ;;  %1293 = vmatpush.msrb.mxu2 %v453_v21  ;;  %v529_v6 = vld [vmem:[#allocation5 + $0x888] sm:$0xff]  ;;  %v563_v7 = vld [vmem:[#allocation5 + $0x998] sm:$0xff] }
 0x103   :  { %1315 = vmatpush.msrb.mxu3 %v487_v23  ;;  %1181 = vmatmul.f32.vlgmr.msra.gmra.mxu1 %v6095_v29  ;;  %v593_v8 = vld [vmem:[#allocation5 + $0xa88] sm:$0xff]  ;;  %v627_v9 = vld [vmem:[#allocation5 + $0xb98] sm:$0xff] }
 0x104   :  { %1248 = vmatpush.msrb.mxu0 %v387_v25  ;;  %1270 = vmatpush.msrb.mxu1 %v421_v26  ;;  %v527_v10 = vld [vmem:[#allocation5 + $0x878] sm:$0xff]  ;;  %v561_v11 = vld [vmem:[#allocation5 + $0x988] sm:$0xff] }
 0x105   :  { %1294 = vmatpush.msrb.mxu2 %v451_v27  ;;  %1316 = vmatpush.msrb.mxu3 %v485_v28  ;;  %v591_v12 = vld [vmem:[#allocation5 + $0xa78] sm:$0xff]  ;;  %v625_v13 = vld [vmem:[#allocation5 + $0xb88] sm:$0xff] }
 0x106   :  { %1249 = vmatpush.msrb.mxu0 %v385_v30  ;;  %1271 = vmatpush.msrb.mxu1 %v419_v31  ;;  %v525_v14 = vld [vmem:[#allocation5 + $0x868] sm:$0xff]  ;;  %v559_v15 = vld [vmem:[#allocation5 + $0x978] sm:$0xff]  ;;  %v6104_v30 = vld [vmem:[#allocation2 + $0xa0] sm:$0xff] }
 0x107   :  { %1295 = vmatpush.msrb.mxu2 %v449_v32  ;;  %1317 = vmatpush.msrb.mxu3 %v483_v33  ;;  %v589_v16 = vld [vmem:[#allocation5 + $0xa68] sm:$0xff]  ;;  %v623_v17 = vld [vmem:[#allocation5 + $0xb78] sm:$0xff]  ;;  %v6105_v31 = vld [vmem:[#allocation2 + $0xb0] sm:$0xff] }
 0x108   :  { %1207 = vmatmul.f32.gmra.mxu2 %v6096_v38  ;;  %1326 = vmatpush.msra.mxu0 %v543_v34  ;;  %v523_v18 = vld [vmem:[#allocation5 + $0x858] sm:$0xff]  ;;  %v557_v19 = vld [vmem:[#allocation5 + $0x968] sm:$0xff] }
 0x109   :  { %1372 = vmatpush.msra.mxu2 %v607_v35  ;;  %1272 = vmatpush.msrb.mxu1 %v417_v36  ;;  %v587_v20 = vld [vmem:[#allocation5 + $0xa58] sm:$0xff]  ;;  %v621_v21 = vld [vmem:[#allocation5 + $0xb68] sm:$0xff] }
 0x10a   :  { %1318 = vmatpush.msrb.mxu3 %v481_v37  ;;  %1161 = vmatmul.f32.gmra.mxu0 %v6097_v42  ;;  %v521_v22 = vld [vmem:[#allocation5 + $0x848] sm:$0xff]  ;;  %v555_v23 = vld [vmem:[#allocation5 + $0x958] sm:$0xff] }
 0x10b   :  { %1230 = vmatmul.f32.gmra.mxu3 %v6098_v44  ;;  %1327 = vmatpush.msra.mxu0 %v541_v39  ;;  %v585_v24 = vld [vmem:[#allocation5 + $0xa48] sm:$0xff]  ;;  %v619_v25 = vld [vmem:[#allocation5 + $0xb58] sm:$0xff] }
 0x10c   :  { %1349 = vmatpush.msra.mxu1 %v575_v40  ;;  %1373 = vmatpush.msra.mxu2 %v605_v41  ;;  %v519_v26 = vld [vmem:[#allocation5 + $0x838] sm:$0xff]  ;;  %v553_v27 = vld [vmem:[#allocation5 + $0x948] sm:$0xff]  ;;  %v6595_v40 = vpop.f32.mrf.mxu0 }
 0x10d   :  { %1395 = vmatpush.msra.mxu3 %v639_v43  ;;  %1184 = vmatmul.f32.gmra.mxu1 %v6099_v49  ;;  %v583_v28 = vld [vmem:[#allocation5 + $0xa38] sm:$0xff]  ;;  %v617_v29 = vld [vmem:[#allocation5 + $0xb48] sm:$0xff] }
 0x10e   :  { %1328 = vmatpush.msra.mxu0 %v539_v45  ;;  %1350 = vmatpush.msra.mxu1 %v573_v46  ;;  %v517_v32 = vld [vmem:[#allocation5 + $0x828] sm:$0xff]  ;;  %v551_v33 = vld [vmem:[#allocation5 + $0x938] sm:$0xff] }
 0x10f   :  { %1374 = vmatpush.msra.mxu2 %v603_v47  ;;  %1396 = vmatpush.msra.mxu3 %v637_v48  ;;  %v581_v34 = vld [vmem:[#allocation5 + $0xa28] sm:$0xff]  ;;  %v615_v35 = vld [vmem:[#allocation5 + $0xb38] sm:$0xff]  ;;  %v6597_v47 = vpop.f32.mrf.mxu1  ;;  %v6599_v48 = vpop.f32.mrf.mxu2 }
 0x110   :  { %1329 = vmatpush.msra.mxu0 %v537_v50  ;;  %1351 = vmatpush.msra.mxu1 %v571_v51  ;;  %v6106_v36 = vld [vmem:[#allocation2 + $0xa8] sm:$0xff]  ;;  %v6107_v37 = vld [vmem:[#allocation2 + $0xb8] sm:$0xff] }
 0x111   :  { %1375 = vmatpush.msra.mxu2 %v601_v52  ;;  %1397 = vmatpush.msra.mxu3 %v635_v53  ;;  %v515_v38 = vld [vmem:[#allocation5 + $0x818] sm:$0xff]  ;;  %v549_v39 = vld [vmem:[#allocation5 + $0x928] sm:$0xff]  ;;  %v6108_v53 = vld [vmem:[#allocation2 + $0x40] sm:$0xff] }
 0x112   :  { %1296 = vmatmul.f32.vlgmr.msrb.gmra.mxu2 %v6100_v58  ;;  %1330 = vmatpush.msra.mxu0 %v535_v54  ;;  %v579_v41 = vld [vmem:[#allocation5 + $0xa18] sm:$0xff]  ;;  %v613_v42 = vld [vmem:[#allocation5 + $0xb28] sm:$0xff]  ;;  %v6109_v54 = vld [vmem:[#allocation2 + $0x50] sm:$0xff] }
 0x113   :  { %1352 = vmatpush.msra.mxu1 %v569_v55  ;;  %1376 = vmatpush.msra.mxu2 %v599_v56  ;;  %v513_v43 = vld [vmem:[#allocation5 + $0x808] sm:$0xff]  ;;  %v547_v44 = vld [vmem:[#allocation5 + $0x918] sm:$0xff] }
 0x114   :  { %1398 = vmatpush.msra.mxu3 %v633_v57  ;;  %1250 = vmatmul.f32.vlgmr.msrb.gmra.mxu0 %v6101_v62  ;;  %v577_v45 = vld [vmem:[#allocation5 + $0xa08] sm:$0xff]  ;;  %v611_v46 = vld [vmem:[#allocation5 + $0xb18] sm:$0xff]  ;;  %v6601_v57 = vpop.f32.mrf.mxu3 }
 0x115   :  { %1319 = vmatmul.f32.vlgmr.msrb.gmra.mxu3 %v6102_v0  ;;  %1331 = vmatpush.msra.mxu0 %v533_v59  ;;  %v671_v49 = vld [vmem:[#allocation5 + $0xcf8] sm:$0xff]  ;;  %v545_v51 = vld [vmem:[#allocation5 + $0x908] sm:$0xff]  ;;  %v6603_v0 = vld [vmem:[#allocation7] sm:$0x3] }
 0x116   :  { %1353 = vmatpush.msra.mxu1 %v567_v60  ;;  %1377 = vmatpush.msra.mxu2 %v597_v61  ;;  %v735_v50 = vld [vmem:[#allocation5 + $0xef8] sm:$0xff]  ;;  %v609_v52 = vld [vmem:[#allocation5 + $0xb08] sm:$0xff] }
 0x117   :  { %1399 = vmatpush.msra.mxu3 %v631_v63  ;;  %1273 = vmatmul.f32.vlgmr.msrb.gmra.mxu1 %v6103_v5  ;;  %v669_v55 = vld [vmem:[#allocation5 + $0xce8] sm:$0xff]  ;;  %v703_v56 = vld [vmem:[#allocation5 + $0xdf8] sm:$0xff] }
 0x118   :  { %1332 = vmatpush.msra.mxu0 %v531_v1  ;;  %1354 = vmatpush.msra.mxu1 %v565_v2  ;;  %v733_v58 = vld [vmem:[#allocation5 + $0xee8] sm:$0xff]  ;;  %v767_v59 = vld [vmem:[#allocation5 + $0xff8] sm:$0xff]  ;;  %v794_v1 = vpop.f32.mrf.mxu0 }
 0x119   :  { %1378 = vmatpush.msra.mxu2 %v595_v3  ;;  %1400 = vmatpush.msra.mxu3 %v629_v4  ;;  %v6110_v60 = vld [vmem:[#allocation2 + $0x48] sm:$0xff]  ;;  %v6111_v61 = vld [vmem:[#allocation2 + $0x58] sm:$0xff] }
 0x11a   :  { %1333 = vmatpush.msra.mxu0 %v529_v6  ;;  %1355 = vmatpush.msra.mxu1 %v563_v7  ;;  %v667_v62 = vld [vmem:[#allocation5 + $0xcd8] sm:$0xff]  ;;  %v701_v63 = vld [vmem:[#allocation5 + $0xde8] sm:$0xff] }
 0x11b   :  { %1379 = vmatpush.msra.mxu2 %v593_v8  ;;  %1401 = vmatpush.msra.mxu3 %v627_v9  ;;  %v731_v2 = vld [vmem:[#allocation5 + $0xed8] sm:$0xff]  ;;  %v765_v3 = vld [vmem:[#allocation5 + $0xfe8] sm:$0xff]  ;;  %v770_v8 = vperm.slane %v6603_v0, 0 }
 0x11c   :  { %1334 = vmatpush.msra.mxu0 %v527_v10  ;;  %1356 = vmatpush.msra.mxu1 %v561_v11  ;;  %v665_v4 = vld [vmem:[#allocation5 + $0xcc8] sm:$0xff]  ;;  %v699_v5 = vld [vmem:[#allocation5 + $0xdd8] sm:$0xff]  ;;  %v817_v10 = vpop.f32.mrf.mxu1  ;;  %v6606_v11 = vpop.f32.mrf.mxu2 }
 0x11d   :  { %1380 = vmatpush.msra.mxu2 %v591_v12  ;;  %1402 = vmatpush.msra.mxu3 %v625_v13  ;;  %v729_v6 = vld [vmem:[#allocation5 + $0xec8] sm:$0xff]  ;;  %v763_v7 = vld [vmem:[#allocation5 + $0xfd8] sm:$0xff] }
 0x11e   :  { %1335 = vmatpush.msra.mxu0 %v525_v14  ;;  %1357 = vmatpush.msra.mxu1 %v559_v15  ;;  %v663_v9 = vld [vmem:[#allocation5 + $0xcb8] sm:$0xff]  ;;  %v697_v12 = vld [vmem:[#allocation5 + $0xdc8] sm:$0xff]  ;;  %v6112_v15 = vld [vmem:[#allocation2 + $0xd0] sm:$0xff] }
 0x11f   :  { %1381 = vmatpush.msra.mxu2 %v589_v16  ;;  %1403 = vmatpush.msra.mxu3 %v623_v17  ;;  %v727_v13 = vld [vmem:[#allocation5 + $0xeb8] sm:$0xff]  ;;  %v761_v14 = vld [vmem:[#allocation5 + $0xfc8] sm:$0xff]  ;;  %v792_v17 = vadd.f32 %v6595_v40, %v770_v8 }
 0x120   :  { %1336 = vmatpush.msra.mxu0 %v523_v18  ;;  %1358 = vmatpush.msra.mxu1 %v557_v19  ;;  %v661_v16 = vld [vmem:[#allocation5 + $0xca8] sm:$0xff]  ;;  %v695_v18 = vld [vmem:[#allocation5 + $0xdb8] sm:$0xff] }
 0x121   :  { %1382 = vmatpush.msra.mxu2 %v587_v20  ;;  %1404 = vmatpush.msra.mxu3 %v621_v21  ;;  %v725_v19 = vld [vmem:[#allocation5 + $0xea8] sm:$0xff]  ;;  %v6609_v20 = vpop.f32.mrf.mxu3  ;;  %v6113_v21 = vld [vmem:[#allocation2 + $0xc0] sm:$0xff]  ;;  %v719_v40 = vld [vmem:[#allocation5 + $0xe78] sm:$0xff] }
 0x122   :  { %1337 = vmatpush.msra.mxu0 %v521_v22  ;;  %1359 = vmatpush.msra.mxu1 %v555_v23  ;;  %v759_v22 = vld [vmem:[#allocation5 + $0xfb8] sm:$0xff] }
 0x123   :  { %1383 = vmatpush.msra.mxu2 %v585_v24  ;;  %1405 = vmatpush.msra.mxu3 %v619_v25  ;;  %v6114_v23 = vld [vmem:[#allocation2 + $0xd8] sm:$0xff]  ;;  %v693_v25 = vld [vmem:[#allocation5 + $0xda8] sm:$0xff] }
 0x124   :  { %1253 = vmatmul.f32.gmra.mxu0 %v6104_v30  ;;  %1299 = vmatmul.f32.gmra.mxu2 %v6105_v31  ;;  %v659_v24 = vld [vmem:[#allocation5 + $0xc98] sm:$0xff]  ;;  %v795_v30 = vadd.f32 %v794_v1, %v770_v8  ;;  %v6115_v31 = vld [vmem:[#allocation2 + $0xc8] sm:$0xff] }
 0x125   :  { %1338 = vmatpush.msra.mxu0 %v519_v26  ;;  %1360 = vmatpush.msra.mxu1 %v553_v27  ;;  %v6611_v26 = vpop.f32.mrf.mxu0  ;;  %v723_v27 = vld [vmem:[#allocation5 + $0xe98] sm:$0xff] }
 0x126   :  { %1384 = vmatpush.msra.mxu2 %v583_v28  ;;  %1406 = vmatpush.msra.mxu3 %v617_v29  ;;  %v757_v28 = vld [vmem:[#allocation5 + $0xfa8] sm:$0xff]  ;;  %v815_v29 = vadd.f32 %v6597_v47, %v792_v17  ;;  %v751_v47 = vld [vmem:[#allocation5 + $0xf78] sm:$0xff] }
 0x127   :  { %1276 = vmatmul.f32.gmra.mxu1 %v6106_v36  ;;  %1322 = vmatmul.f32.gmra.mxu3 %v6107_v37  ;;  %v655_v36 = vld [vmem:[#allocation5 + $0xc78] sm:$0xff]  ;;  %v689_v37 = vld [vmem:[#allocation5 + $0xd88] sm:$0xff] }
 0x128   :  { %1339 = vmatpush.msra.mxu0 %v517_v32  ;;  %1361 = vmatpush.msra.mxu1 %v551_v33  ;;  %v657_v32 = vld [vmem:[#allocation5 + $0xc88] sm:$0xff]  ;;  %v691_v33 = vld [vmem:[#allocation5 + $0xd98] sm:$0xff] }
 0x129   :  { %1385 = vmatpush.msra.mxu2 %v581_v34  ;;  %1407 = vmatpush.msra.mxu3 %v615_v35  ;;  %v721_v34 = vld [vmem:[#allocation5 + $0xe88] sm:$0xff]  ;;  %v755_v35 = vld [vmem:[#allocation5 + $0xf98] sm:$0xff] }
 0x12a   :  { %1340 = vmatpush.msra.mxu0 %v515_v38  ;;  %1362 = vmatpush.msra.mxu1 %v549_v39  ;;  %v6614_v38 = vpop.f32.mrf.mxu1  ;;  %v6616_v39 = vpop.f32.mrf.mxu2  ;;  %v743_v8 = vld [vmem:[#allocation5 + $0xf38] sm:$0xff] }
 0x12b   :  { %1386 = vmatpush.msra.mxu2 %v579_v41  ;;  %1408 = vmatpush.msra.mxu3 %v613_v42  ;;  %v753_v41 = vld [vmem:[#allocation5 + $0xf88] sm:$0xff]  ;;  %v838_v42 = vadd.f32 %v6599_v48, %v815_v29  ;;  %v675_v17 = vld [vmem:[#allocation5 + $0xd18] sm:$0xff]  ;;  %v6116_v29 = vld [vmem:[#allocation2 + $0x60] sm:$0xff] }
 0x12c   :  { %1341 = vmatpush.msra.mxu0 %v513_v43  ;;  %1363 = vmatpush.msra.mxu1 %v547_v44  ;;  %v818_v43 = vadd.f32 %v817_v10, %v795_v30  ;;  %v653_v44 = vld [vmem:[#allocation5 + $0xc68] sm:$0xff]  ;;  %v6117_v30 = vld [vmem:[#allocation2 + $0x70] sm:$0xff] }
 0x12d   :  { %1387 = vmatpush.msra.mxu2 %v577_v45  ;;  %1409 = vmatpush.msra.mxu3 %v611_v46  ;;  %v687_v45 = vld [vmem:[#allocation5 + $0xd78] sm:$0xff]  ;;  %v717_v46 = vld [vmem:[#allocation5 + $0xe68] sm:$0xff] }
 0x12e   :  { %1342 = vmatmul.f32.vlgmr.msra.gmra.mxu0 %v6108_v53  ;;  %1388 = vmatmul.f32.vlgmr.msra.gmra.mxu2 %v6109_v54  ;;  %v715_v53 = vld [vmem:[#allocation5 + $0xe58] sm:$0xff]  ;;  %v749_v48 = vld [vmem:[#allocation5 + $0xf68] sm:$0xff]  ;;  %v861_v54 = vadd.f32 %v6601_v57, %v838_v42 }
 0x12f   :  { %1418 = vmatpush.msrb.mxu0 %v671_v49  ;;  %1464 = vmatpush.msrb.mxu2 %v735_v50  ;;  %v651_v49 = vld [vmem:[#allocation5 + $0xc58] sm:$0xff]  ;;  %v685_v50 = vld [vmem:[#allocation5 + $0xd68] sm:$0xff] }
 0x130   :  { %1364 = vmatpush.msra.mxu1 %v545_v51  ;;  %1410 = vmatpush.msra.mxu3 %v609_v52  ;;  %v6619_v51 = vpop.f32.mrf.mxu3  ;;  %v886_v52 = vpop.f32.mrf.mxu0  ;;  %v745_v57 = vld [vmem:[#allocation5 + $0xf48] sm:$0xff] }
 0x131   :  { %1365 = vmatmul.f32.vlgmr.msra.gmra.mxu1 %v6110_v60  ;;  %1411 = vmatmul.f32.vlgmr.msra.gmra.mxu3 %v6111_v61  ;;  %v747_v60 = vld [vmem:[#allocation5 + $0xf58] sm:$0xff]  ;;  %v677_v10 = vld [vmem:[#allocation5 + $0xd28] sm:$0xff] }
 0x132   :  { %1419 = vmatpush.msrb.mxu0 %v669_v55  ;;  %1441 = vmatpush.msrb.mxu1 %v703_v56  ;;  %v841_v55 = vadd.f32 %v6606_v11, %v818_v43  ;;  %v649_v56 = vld [vmem:[#allocation5 + $0xc48] sm:$0xff]  ;;  %v647_v61 = vld [vmem:[#allocation5 + $0xc38] sm:$0xff]  ;;  %v932_v1 = vpop.f32.mrf.mxu2 }
 0x133   :  { %1465 = vmatpush.msrb.mxu2 %v733_v58  ;;  %1487 = vmatpush.msrb.mxu3 %v767_v59  ;;  %v683_v58 = vld [vmem:[#allocation5 + $0xd58] sm:$0xff]  ;;  %v713_v59 = vld [vmem:[#allocation5 + $0xe48] sm:$0xff] }
 0x134   :  { %1420 = vmatpush.msrb.mxu0 %v667_v62  ;;  %1442 = vmatpush.msrb.mxu1 %v701_v63  ;;  %v681_v62 = vld [vmem:[#allocation5 + $0xd48] sm:$0xff]  ;;  %v909_v63 = vpop.f32.mrf.mxu1 }
 0x135   :  { %1466 = vmatpush.msrb.mxu2 %v731_v2  ;;  %1488 = vmatpush.msrb.mxu3 %v765_v3  ;;  %v711_v2 = vld [vmem:[#allocation5 + $0xe38] sm:$0xff]  ;;  %v864_v3 = vadd.f32 %v6609_v20, %v841_v55  ;;  %v1538_v42 = vld [vmem:[#allocation8 + $0xc0] sm:$0xff]  ;;  %v1539_v43 = vld [vmem:[#allocation8 + $0xc8] sm:$0xff] }
 0x136   :  { %1421 = vmatpush.msrb.mxu0 %v665_v4  ;;  %1443 = vmatpush.msrb.mxu1 %v699_v5  ;;  %v884_v4 = vadd.f32 %v6611_v26, %v861_v54  ;;  %v645_v5 = vld [vmem:[#allocation5 + $0xc28] sm:$0xff]  ;;  %v739_v20 = vld [vmem:[#allocation5 + $0xf18] sm:$0xff] }
 0x137   :  { %1467 = vmatpush.msrb.mxu2 %v729_v6  ;;  %1489 = vmatpush.msrb.mxu3 %v763_v7  ;;  %v679_v6 = vld [vmem:[#allocation5 + $0xd38] sm:$0xff]  ;;  %v709_v7 = vld [vmem:[#allocation5 + $0xe28] sm:$0xff] }
 0x138   :  { %1391 = vmatmul.f32.gmra.mxu2 %v6112_v15  ;;  %1422 = vmatpush.msrb.mxu0 %v663_v9  ;;  %v643_v9 = vld [vmem:[#allocation5 + $0xc18] sm:$0xff]  ;;  %v955_v11 = vpop.f32.mrf.mxu3  ;;  %v887_v15 = vadd.f32 %v886_v52, %v864_v3  ;;  %v737_v26 = vld [vmem:[#allocation5 + $0xf08] sm:$0xff] }
 0x139   :  { %1444 = vmatpush.msrb.mxu1 %v697_v12  ;;  %1468 = vmatpush.msrb.mxu2 %v727_v13  ;;  %v707_v12 = vld [vmem:[#allocation5 + $0xe18] sm:$0xff]  ;;  %v741_v13 = vld [vmem:[#allocation5 + $0xf28] sm:$0xff] }
 0x13a   :  { %1490 = vmatpush.msrb.mxu3 %v761_v14  ;;  %1345 = vmatmul.f32.gmra.mxu0 %v6113_v21  ;;  %v907_v14 = vadd.f32 %v6614_v38, %v884_v4  ;;  %v1544_v21 = vld [vmem:[#allocation8 + $0xf0] sm:$0xff]  ;;  %v1541_v38 = vld [vmem:[#allocation8 + $0xd8] sm:$0xff]  ;;  %v1534_v52 = vld [vmem:[#allocation8 + $0xa0] sm:$0xff] }
 0x13b   :  { %1414 = vmatmul.f32.gmra.mxu3 %v6114_v23  ;;  %1423 = vmatpush.msrb.mxu0 %v661_v16  ;;  %v641_v16 = vld [vmem:[#allocation5 + $0xc08] sm:$0xff]  ;;  %v1528_v3 = vld [vmem:[#allocation8 + $0x70] sm:$0xff]  ;;  %v1529_v4 = vld [vmem:[#allocation8 + $0x78] sm:$0xff] }
 0x13c   :  { %1445 = vmatpush.msrb.mxu1 %v695_v18  ;;  %1469 = vmatpush.msrb.mxu2 %v725_v19  ;;  %v975_v18 = vpop.f32.mrf.mxu0  ;;  %v705_v19 = vld [vmem:[#allocation5 + $0xe08] sm:$0xff]  ;;  %v930_v23 = vadd.f32 %v6616_v39, %v907_v14 }
 0x13d   :  { %1491 = vmatpush.msrb.mxu3 %v759_v22  ;;  %1368 = vmatmul.f32.gmra.mxu1 %v6115_v31  ;;  %v1545_v22 = vld [vmem:[#allocation8 + $0xf8] sm:$0xff]  ;;  %v1542_v31 = vld [vmem:[#allocation8 + $0xe0] sm:$0xff] }
 0x13e   :  { %1424 = vmatpush.msrb.mxu0 %v659_v24  ;;  %1446 = vmatpush.msrb.mxu1 %v693_v25  ;;  %v910_v24 = vadd.f32 %v909_v63, %v887_v15  ;;  %v673_v25 = vld [vmem:[#allocation5 + $0xd08] sm:$0xff] }
 0x13f   :  { %1470 = vmatpush.msrb.mxu2 %v723_v27  ;;  %1492 = vmatpush.msrb.mxu3 %v757_v28  ;;  %v998_v27 = vpop.f32.mrf.mxu1  ;;  %v1021_v28 = vpop.f32.mrf.mxu2  ;;  %v1531_v63 = vld [vmem:[#allocation8 + $0x88] sm:$0xff]  ;;  %v1522_v14 = vld [vmem:[#allocation8 + $0x40] sm:$0xff] }
 0x140   :  { %1425 = vmatpush.msrb.mxu0 %v657_v32  ;;  %1447 = vmatpush.msrb.mxu1 %v691_v33  ;;  %v1543_v32 = vld [vmem:[#allocation8 + $0xe8] sm:$0xff]  ;;  %v953_v33 = vadd.f32 %v6619_v51, %v930_v23  ;;  %v1044_v39 = vpop.f32.mrf.mxu3  ;;  %v1518_v23 = vld [vmem:[#allocation8 + $0x20] sm:$0xff] }
 0x141   :  { %1471 = vmatpush.msrb.mxu2 %v721_v34  ;;  %1493 = vmatpush.msrb.mxu3 %v755_v35  ;;  %v933_v34 = vadd.f32 %v932_v1, %v910_v24  ;;  %v6118_v35 = vld [vmem:[#allocation2 + $0x68] sm:$0xff]  ;;  %v6121_v51 = vld [vmem:[#allocation2 + $0xf0] sm:$0xff] }
 0x142   :  { %1426 = vmatpush.msrb.mxu0 %v655_v36  ;;  %1448 = vmatpush.msrb.mxu1 %v689_v37  ;;  %v6119_v36 = vld [vmem:[#allocation2 + $0x78] sm:$0xff]  ;;  %v1523_v15 = vld [vmem:[#allocation8 + $0x48] sm:$0xff] }
 0x143   :  { %1472 = vmatpush.msrb.mxu2 %v719_v40  ;;  %1494 = vmatpush.msrb.mxu3 %v753_v41  ;;  %v1540_v37 = vld [vmem:[#allocation8 + $0xd0] sm:$0xff]  ;;  %v976_v41 = vadd.f32 %v975_v18, %v953_v33  ;;  %v1519_v24 = vld [vmem:[#allocation8 + $0x28] sm:$0xff] }
 0x144   :  { %1427 = vmatpush.msrb.mxu0 %v653_v44  ;;  %1449 = vmatpush.msrb.mxu1 %v687_v45  ;;  %v978_v40 = vpop.f32.mrf.mxu0  ;;  %v956_v44 = vadd.f32 %v955_v11, %v933_v34  ;;  %v1536_v45 = vld [vmem:[#allocation8 + $0xb0] sm:$0xff] }
 0x145   :  { %1473 = vmatpush.msrb.mxu2 %v717_v46  ;;  %1495 = vmatpush.msrb.mxu3 %v751_v47  ;;  %v1537_v46 = vld [vmem:[#allocation8 + $0xb8] sm:$0xff]  ;;  %v1524_v11 = vld [vmem:[#allocation8 + $0x50] sm:$0xff] }
 0x146   :  { %1428 = vmatpush.msrb.mxu0 %v651_v49  ;;  %1450 = vmatpush.msrb.mxu1 %v685_v50  ;;  %v999_v49 = vadd.f32 %v998_v27, %v976_v41  ;;  %v6120_v50 = vld [vmem:[#allocation2 + $0xe0] sm:$0xff]  ;;  %v979_v55 = vadd.f32 %v978_v40, %v956_v44  ;;  %v1516_v27 = vld [vmem:[#allocation8 + $0x10] sm:$0xff]  ;;  %v1575_v44 = vld [vmem:[#allocation8 + $0x1e8] sm:$0xff] }
 0x147   :  { %1474 = vmatpush.msrb.mxu2 %v715_v53  ;;  %1496 = vmatpush.msrb.mxu3 %v749_v48  ;;  %v1001_v47 = vpop.f32.mrf.mxu1  ;;  %v1535_v53 = vld [vmem:[#allocation8 + $0xa8] sm:$0xff]  ;;  %v1024_v48 = vpop.f32.mrf.mxu2  ;;  %v1576_v40 = vld [vmem:[#allocation8 + $0x1f0] sm:$0xff]  ;;  %v1577_v41 = vld [vmem:[#allocation8 + $0x1f8] sm:$0xff] }
 0x148   :  { %1429 = vmatpush.msrb.mxu0 %v649_v56  ;;  %1451 = vmatpush.msrb.mxu1 %v683_v58  ;;  %v1022_v54 = vadd.f32 %v1021_v28, %v999_v49  ;;  %v6122_v56 = vld [vmem:[#allocation2 + $0xe8] sm:$0xff]  ;;  %v6123_v58 = vld [vmem:[#allocation2 + $0xf8] sm:$0xff]  ;;  %v1047_v1 = vpop.f32.mrf.mxu3 }
 0x149   :  { %1475 = vmatpush.msrb.mxu2 %v713_v59  ;;  %1497 = vmatpush.msrb.mxu3 %v747_v60  ;;  %v1532_v59 = vld [vmem:[#allocation8 + $0x90] sm:$0xff]  ;;  %v1533_v60 = vld [vmem:[#allocation8 + $0x98] sm:$0xff] }
 0x14a   :  { %1430 = vmatpush.msrb.mxu0 %v647_v61  ;;  %1452 = vmatpush.msrb.mxu1 %v681_v62  ;;  %v1530_v62 = vld [vmem:[#allocation8 + $0x80] sm:$0xff]  ;;  %v1517_v28 = vld [vmem:[#allocation8 + $0x18] sm:$0xff] }
 0x14b   :  { %1476 = vmatpush.msrb.mxu2 %v711_v2  ;;  %1498 = vmatpush.msrb.mxu3 %v745_v57  ;;  %v1045_v2 = vadd.f32 %v1044_v39, %v1022_v54  ;;  %v1002_v57 = vadd.f32 %v1001_v47, %v979_v55  ;;  %v1570_v47 = vld [vmem:[#allocation8 + $0x1c0] sm:$0xff]  ;;  %v1567_v55 = vld [vmem:[#allocation8 + $0x1a8] sm:$0xff] }
 0x14c   :  { %1431 = vmatpush.msrb.mxu0 %v645_v5  ;;  %1453 = vmatpush.msrb.mxu1 %v679_v6  ;;  %v1067_v61 = vpop.f32.mrf.mxu0  ;;  %v1566_v54 = vld [vmem:[#allocation8 + $0x1a0] sm:$0xff] }
 0x14d   :  { %1477 = vmatpush.msrb.mxu2 %v709_v7  ;;  %1499 = vmatpush.msrb.mxu3 %v743_v8  ;;  %v1068_v6 = vadd.f32 %v1067_v61, %v1045_v2  ;;  %v1526_v7 = vld [vmem:[#allocation8 + $0x60] sm:$0xff]  ;;  %v1527_v8 = vld [vmem:[#allocation8 + $0x68] sm:$0xff]  ;;  %v1561_v2 = vld [vmem:[#allocation8 + $0x178] sm:$0xff] }
 0x14e   :  { %1432 = vmatpush.msrb.mxu0 %v643_v9  ;;  %1454 = vmatpush.msrb.mxu1 %v677_v10  ;;  %v1025_v10 = vadd.f32 %v1024_v48, %v1002_v57  ;;  %v771_v48 = vperm.slane %v6603_v0, 1 }
 0x14f   :  { %1478 = vmatpush.msrb.mxu2 %v707_v12  ;;  %1500 = vmatpush.msrb.mxu3 %v741_v13  ;;  %v1090_v5 = vpop.f32.mrf.mxu1  ;;  %v1113_v9 = vpop.f32.mrf.mxu2  ;;  %v1525_v12 = vld [vmem:[#allocation8 + $0x58] sm:$0xff] }
 0x150   :  { %1433 = vmatpush.msrb.mxu0 %v641_v16  ;;  %1455 = vmatpush.msrb.mxu1 %v675_v17  ;;  %v1091_v13 = vadd.f32 %v1090_v5, %v1068_v6  ;;  %v1136_v17 = vpop.f32.mrf.mxu3  ;;  %v1048_v18 = vadd.f32 %v1047_v1, %v1025_v10  ;;  %v1560_v1 = vld [vmem:[#allocation8 + $0x170] sm:$0xff] }
 0x151   :  { %1479 = vmatpush.msrb.mxu2 %v705_v19  ;;  %1501 = vmatpush.msrb.mxu3 %v739_v20  ;;  %v1520_v20 = vld [vmem:[#allocation8 + $0x30] sm:$0xff] }
 0x152   :  { %1434 = vmatmul.f32.vlgmr.msrb.gmra.mxu0 %v6116_v29  ;;  %1480 = vmatmul.f32.vlgmr.msrb.gmra.mxu2 %v6117_v30  ;;  %v1114_v19 = vadd.f32 %v1113_v9, %v1091_v13  ;;  %v1559_v9 = vld [vmem:[#allocation8 + $0x168] sm:$0xff]  ;;  %v1557_v13 = vld [vmem:[#allocation8 + $0x158] sm:$0xff] }
 0x153   :  { %1584 = vmatpush.msra.mxu0 %v1544_v21  ;;  %1630 = vmatpush.msra.mxu2 %v1545_v22  ;;  %v1521_v21 = vld [vmem:[#allocation8 + $0x38] sm:$0xff] }
 0x154   :  { %1456 = vmatpush.msrb.mxu1 %v673_v25  ;;  %1502 = vmatpush.msrb.mxu3 %v737_v26  ;;  %v1070_v16 = vpop.f32.mrf.mxu0  ;;  %v1137_v26 = vadd.f32 %v1136_v17, %v1114_v19  ;;  %v1555_v17 = vld [vmem:[#allocation8 + $0x148] sm:$0xff] }
 0x155   :  { %1457 = vmatmul.f32.vlgmr.msrb.gmra.mxu1 %v6118_v35  ;;  %1503 = vmatmul.f32.vlgmr.msrb.gmra.mxu3 %v6119_v36  ;;  %v1071_v22 = vadd.f32 %v1070_v16, %v1048_v18  ;;  %v1554_v16 = vld [vmem:[#allocation8 + $0x140] sm:$0xff] }
 0x156   :  { %1585 = vmatpush.msra.mxu0 %v1542_v31  ;;  %1631 = vmatpush.msra.mxu2 %v1543_v32  ;;  %v1514_v31 = vld [vmem:[#allocation8] sm:$0xff]  ;;  %v1515_v32 = vld [vmem:[#allocation8 + $0x8] sm:$0xff]  ;;  %v1510_v33 = vmax.f32 %v1137_v26, 0.0 }
 0x157   :  { %v1093_v25 = vpop.f32.mrf.mxu1  ;;  %v1116_v29 = vpop.f32.mrf.mxu2  ;;  %1607 = vmatpush.msra.mxu1 %v1576_v40  ;;  %1653 = vmatpush.msra.mxu3 %v1577_v41 }
 0x158   :  { %1586 = vmatpush.msra.mxu0 %v1540_v37  ;;  %1632 = vmatpush.msra.mxu2 %v1541_v38  ;;  %v1094_v30 = vadd.f32 %v1093_v25, %v1071_v22  ;;  %v1139_v35 = vpop.f32.mrf.mxu3  ;;  %v1553_v22 = vld [vmem:[#allocation8 + $0x138] sm:$0xff]  ;;  %v1551_v25 = vld [vmem:[#allocation8 + $0x128] sm:$0xff] }
 0x159   :  { %1654 = vmatpush.msra.mxu3 %v1575_v44 }
 0x15a   :  { %1587 = vmatpush.msra.mxu0 %v1538_v42  ;;  %1633 = vmatpush.msra.mxu2 %v1539_v43  ;;  %v1117_v34 = vadd.f32 %v1116_v29, %v1094_v30  ;;  %v1574_v43 = vld [vmem:[#allocation8 + $0x1e0] sm:$0xff]  ;;  %v1549_v29 = vld [vmem:[#allocation8 + $0x118] sm:$0xff] }
 0x15b   :  { %1437 = vmatmul.f32.gmra.mxu0 %v6120_v50  ;;  %1483 = vmatmul.f32.gmra.mxu2 %v6121_v51  ;;  %v1571_v50 = vld [vmem:[#allocation8 + $0x1c8] sm:$0xff] }
 0x15c   :  { %1588 = vmatpush.msra.mxu0 %v1536_v45  ;;  %1634 = vmatpush.msra.mxu2 %v1537_v46  ;;  %v1140_v36 = vadd.f32 %v1139_v35, %v1117_v34  ;;  %v1572_v45 = vld [vmem:[#allocation8 + $0x1d0] sm:$0xff]  ;;  %v1573_v46 = vld [vmem:[#allocation8 + $0x1d8] sm:$0xff] }
 0x15d   :  { %1460 = vmatmul.f32.gmra.mxu1 %v6122_v56  ;;  %1506 = vmatmul.f32.gmra.mxu3 %v6123_v58  ;;  %v1564_v58 = vld [vmem:[#allocation8 + $0x190] sm:$0xff] }
 0x15e   :  { %1589 = vmatpush.msra.mxu0 %v1534_v52  ;;  %1635 = vmatpush.msra.mxu2 %v1535_v53  ;;  %v1512_v37 = vmax.f32 %v1140_v36, 0.0  ;;  %v1568_v52 = vld [vmem:[#allocation8 + $0x1b0] sm:$0xff]  ;;  %v1569_v53 = vld [vmem:[#allocation8 + $0x1b8] sm:$0xff] }
 0x15f   :  { %1608 = vmatpush.msra.mxu1 %v1574_v43  ;;  %1655 = vmatpush.msra.mxu3 %v1573_v46 }
 0x160   :  { %1590 = vmatpush.msra.mxu0 %v1532_v59  ;;  %1636 = vmatpush.msra.mxu2 %v1533_v60  ;;  %v1565_v59 = vld [vmem:[#allocation8 + $0x198] sm:$0xff] }
 0x161   :  { %1609 = vmatpush.msra.mxu1 %v1572_v45  ;;  %1656 = vmatpush.msra.mxu3 %v1571_v50 }
 0x162   :  { %1591 = vmatpush.msra.mxu0 %v1530_v62  ;;  %1637 = vmatpush.msra.mxu2 %v1531_v63  ;;  %v1562_v62 = vld [vmem:[#allocation8 + $0x180] sm:$0xff]  ;;  %v1563_v63 = vld [vmem:[#allocation8 + $0x188] sm:$0xff] }
 0x163   :  { %1610 = vmatpush.msra.mxu1 %v1570_v47  ;;  %1657 = vmatpush.msra.mxu3 %v1569_v53 }
 0x164   :  { %1592 = vmatpush.msra.mxu0 %v1528_v3  ;;  %1638 = vmatpush.msra.mxu2 %v1529_v4 }
 0x165   :  { %1611 = vmatpush.msra.mxu1 %v1568_v52  ;;  %1658 = vmatpush.msra.mxu3 %v1567_v55 }
 0x166   :  { %1593 = vmatpush.msra.mxu0 %v1526_v7  ;;  %1639 = vmatpush.msra.mxu2 %v1527_v8  ;;  %v1558_v8 = vld [vmem:[#allocation8 + $0x160] sm:$0xff] }
 0x167   :  { %1612 = vmatpush.msra.mxu1 %v1566_v54  ;;  %1659 = vmatpush.msra.mxu3 %v1565_v59 }
 0x168   :  { %1594 = vmatpush.msra.mxu0 %v1524_v11  ;;  %1640 = vmatpush.msra.mxu2 %v1525_v12  ;;  %v1556_v12 = vld [vmem:[#allocation8 + $0x150] sm:$0xff] }
 0x169   :  { %1613 = vmatpush.msra.mxu1 %v1564_v58  ;;  %1660 = vmatpush.msra.mxu3 %v1563_v63 }
 0x16a   :  { %1595 = vmatpush.msra.mxu0 %v1522_v14  ;;  %1641 = vmatpush.msra.mxu2 %v1523_v15 }
 0x16b   :  { %1614 = vmatpush.msra.mxu1 %v1562_v62  ;;  %1661 = vmatpush.msra.mxu3 %v1561_v2 }
 0x16c   :  { %1596 = vmatpush.msra.mxu0 %v1520_v20  ;;  %1642 = vmatpush.msra.mxu2 %v1521_v21  ;;  %v1552_v21 = vld [vmem:[#allocation8 + $0x130] sm:$0xff] }
 0x16d   :  { %1615 = vmatpush.msra.mxu1 %v1560_v1  ;;  %1662 = vmatpush.msra.mxu3 %v1559_v9 }
 0x16e   :  { %1597 = vmatpush.msra.mxu0 %v1518_v23  ;;  %1643 = vmatpush.msra.mxu2 %v1519_v24  ;;  %v1550_v24 = vld [vmem:[#allocation8 + $0x120] sm:$0xff] }
 0x16f   :  { %1616 = vmatpush.msra.mxu1 %v1558_v8  ;;  %1663 = vmatpush.msra.mxu3 %v1557_v13  ;;  %v1709_v8 = vld [vmem:[#allocation8 + $0x2e0] sm:$0xff]  ;;  %v1708_v13 = vld [vmem:[#allocation8 + $0x2d8] sm:$0xff] }
 0x170   :  { %1598 = vmatpush.msra.mxu0 %v1516_v27  ;;  %1644 = vmatpush.msra.mxu2 %v1517_v28  ;;  %v1548_v28 = vld [vmem:[#allocation8 + $0x110] sm:$0xff] }
 0x171   :  { %1617 = vmatpush.msra.mxu1 %v1556_v12  ;;  %1664 = vmatpush.msra.mxu3 %v1555_v17  ;;  %v1707_v12 = vld [vmem:[#allocation8 + $0x2d0] sm:$0xff]  ;;  %v1705_v17 = vld [vmem:[#allocation8 + $0x2c0] sm:$0xff] }
 0x172   :  { %1599 = vmatpush.msra.mxu0 %v1514_v31  ;;  %1645 = vmatpush.msra.mxu2 %v1515_v32  ;;  %v1546_v31 = vld [vmem:[#allocation8 + $0x100] sm:$0xff]  ;;  %v1547_v32 = vld [vmem:[#allocation8 + $0x108] sm:$0xff] }
 0x173   :  { %1600 = vmatmul.f32.vlgmr.msra.gmra.mxu0 %v1510_v33  ;;  %1646 = vmatmul.f32.vlgmr.msra.gmra.mxu2 %v1510_v33 }
 0x174   :  { %1618 = vmatpush.msra.mxu1 %v1554_v16  ;;  %1665 = vmatpush.msra.mxu3 %v1553_v22  ;;  %v1704_v22 = vld [vmem:[#allocation8 + $0x2b8] sm:$0xff] }
 0x176   :  { %1619 = vmatpush.msra.mxu1 %v1552_v21  ;;  %1666 = vmatpush.msra.mxu3 %v1551_v25  ;;  %v1703_v21 = vld [vmem:[#allocation8 + $0x2b0] sm:$0xff]  ;;  %v1701_v25 = vld [vmem:[#allocation8 + $0x2a0] sm:$0xff] }
 0x178   :  { %1620 = vmatpush.msra.mxu1 %v1550_v24  ;;  %1667 = vmatpush.msra.mxu3 %v1549_v29  ;;  %v1740_v24 = vld [vmem:[#allocation8 + $0x3d8] sm:$0xff]  ;;  %v1699_v29 = vld [vmem:[#allocation8 + $0x290] sm:$0xff] }
 0x17a   :  { %1621 = vmatpush.msra.mxu1 %v1548_v28  ;;  %1668 = vmatpush.msra.mxu3 %v1547_v32  ;;  %v1738_v28 = vld [vmem:[#allocation8 + $0x3c8] sm:$0xff]  ;;  %v1736_v32 = vld [vmem:[#allocation8 + $0x3b8] sm:$0xff] }
 0x17b   :  { %1603 = vmatmul.f32.gmra.mxu0 %v1512_v37  ;;  %1649 = vmatmul.f32.gmra.mxu2 %v1512_v37 }
 0x17c   :  { %1622 = vmatpush.msra.mxu1 %v1546_v31  ;;  %v1735_v31 = vld [vmem:[#allocation8 + $0x3b0] sm:$0xff] }
 0x17d   :  { %v1159_v38 = vpop.f32.mrf.mxu0 }
 0x17e   :  { %v1160_v60 = vadd.f32 %v1159_v38, %v771_v48 }
 0x180   :  { %v1182_v39 = vpop.f32.mrf.mxu1 }
 0x181   :  { %v1205_v42 = vpop.f32.mrf.mxu2  ;;  %v1183_v0 = vadd.f32 %v1182_v39, %v1160_v60 }
 0x183   :  { %v1206_v5 = vadd.f32 %v1205_v42, %v1183_v0 }
 0x184   :  { %v1228_v49 = vpop.f32.mrf.mxu3 }
 0x185   :  { %v1229_v11 = vadd.f32 %v1228_v49, %v1206_v5 }
 0x187   :  { %v1162_v51 = vpop.f32.mrf.mxu0 }
 0x188   :  { %v1163_v3 = vadd.f32 %v1162_v51, %v771_v48 }
 0x18a   :  { %v1185_v56 = vpop.f32.mrf.mxu1 }
 0x18b   :  { %v1208_v61 = vpop.f32.mrf.mxu2  ;;  %v1186_v7 = vadd.f32 %v1185_v56, %v1163_v3 }
 0x18d   :  { %v1209_v14 = vadd.f32 %v1208_v61, %v1186_v7  ;;  %v1712_v7 = vld [vmem:[#allocation8 + $0x2f8] sm:$0xff] }
 0x18e   :  { %v1231_v57 = vpop.f32.mrf.mxu3  ;;  %1798 = vmatpush.msrb.mxu2 %v1712_v7  ;;  %v1713_v7 = vld [vmem:[#allocation8 + $0x300] sm:$0xff] }
 0x18f   :  { %v1232_v23 = vadd.f32 %v1231_v57, %v1209_v14  ;;  %v1743_v14 = vld [vmem:[#allocation8 + $0x3f0] sm:$0xff] }
 0x190   :  { %1775 = vmatpush.msrb.mxu1 %v1743_v14  ;;  %v1876_v14 = vld [vmem:[#allocation8 + $0x4d8] sm:$0xff] }
 0x191   :  { %v1251_v4 = vpop.f32.mrf.mxu0 }
 0x192   :  { %v1252_v19 = vadd.f32 %v1251_v4, %v1229_v11 }
 0x194   :  { %v1274_v6 = vpop.f32.mrf.mxu1 }
 0x195   :  { %v1297_v10 = vpop.f32.mrf.mxu2  ;;  %v1275_v27 = vadd.f32 %v1274_v6, %v1252_v19  ;;  %v1711_v6 = vld [vmem:[#allocation8 + $0x2f0] sm:$0xff]  ;;  %v1741_v19 = vld [vmem:[#allocation8 + $0x3e0] sm:$0xff] }
 0x196   :  { %1752 = vmatpush.msrb.mxu0 %v1711_v6  ;;  %1776 = vmatpush.msrb.mxu1 %v1741_v19  ;;  %v1716_v6 = vld [vmem:[#allocation8 + $0x318] sm:$0xff]  ;;  %v1874_v19 = vld [vmem:[#allocation8 + $0x4c8] sm:$0xff] }
 0x197   :  { %v1298_v35 = vadd.f32 %v1297_v10, %v1275_v27  ;;  %v1710_v10 = vld [vmem:[#allocation8 + $0x2e8] sm:$0xff]  ;;  %v1737_v27 = vld [vmem:[#allocation8 + $0x3c0] sm:$0xff] }
 0x198   :  { %v1320_v18 = vpop.f32.mrf.mxu3  ;;  %1753 = vmatpush.msrb.mxu0 %v1709_v8  ;;  %1799 = vmatpush.msrb.mxu2 %v1710_v10  ;;  %v1714_v8 = vld [vmem:[#allocation8 + $0x308] sm:$0xff]  ;;  %v1880_v10 = vld [vmem:[#allocation8 + $0x4f8] sm:$0xff] }
 0x199   :  { %v1321_v38 = vadd.f32 %v1320_v18, %v1298_v35  ;;  %v1706_v18 = vld [vmem:[#allocation8 + $0x2c8] sm:$0xff]  ;;  %v1733_v35 = vld [vmem:[#allocation8 + $0x3a0] sm:$0xff] }
 0x19a   :  { %1754 = vmatpush.msrb.mxu0 %v1707_v12  ;;  %1800 = vmatpush.msrb.mxu2 %v1708_v13  ;;  %v1878_v12 = vld [vmem:[#allocation8 + $0x4e8] sm:$0xff]  ;;  %v1875_v13 = vld [vmem:[#allocation8 + $0x4d0] sm:$0xff] }
 0x19c   :  { %1755 = vmatpush.msrb.mxu0 %v1705_v17  ;;  %1801 = vmatpush.msrb.mxu2 %v1706_v18  ;;  %v1909_v17 = vld [vmem:[#allocation8 + $0x5e0] sm:$0xff] }
 0x19d   :  { %v1873_v18 = vld [vmem:[#allocation8 + $0x4c0] sm:$0xff] }
 0x19e   :  { %1756 = vmatpush.msrb.mxu0 %v1703_v21  ;;  %1802 = vmatpush.msrb.mxu2 %v1704_v22  ;;  %v6629_v21 = vld [vmem:[#allocation10] sm:$0x3]  ;;  %v1907_v22 = vld [vmem:[#allocation8 + $0x5d0] sm:$0xff] }
 0x1a0   :  { %1757 = vmatpush.msrb.mxu0 %v1701_v25  ;;  %v1872_v25 = vld [vmem:[#allocation8 + $0x4b8] sm:$0xff] }
 0x1a1   :  { %v1254_v15 = vpop.f32.mrf.mxu0 }
 0x1a2   :  { %v1255_v30 = vadd.f32 %v1254_v15, %v1232_v23  ;;  %v1744_v15 = vld [vmem:[#allocation8 + $0x3f8] sm:$0xff]  ;;  %v1739_v23 = vld [vmem:[#allocation8 + $0x3d0] sm:$0xff]  ;;  %1758 = vmatpush.msrb.mxu0 %v1699_v29  ;;  %v1580_v29 = vperm.slane %v6629_v21, 0 }
 0x1a3   :  { %1821 = vmatpush.msrb.mxu3 %v1744_v15  ;;  %1777 = vmatpush.msrb.mxu1 %v1739_v23  ;;  %v1911_v15 = vld [vmem:[#allocation8 + $0x5f0] sm:$0xff]  ;;  %v1908_v23 = vld [vmem:[#allocation8 + $0x5d8] sm:$0xff] }
 0x1a4   :  { %v1277_v20 = vpop.f32.mrf.mxu1 }
 0x1a5   :  { %v1278_v36 = vadd.f32 %v1277_v20, %v1255_v30  ;;  %v1742_v20 = vld [vmem:[#allocation8 + $0x3e8] sm:$0xff]  ;;  %v1700_v30 = vld [vmem:[#allocation8 + $0x298] sm:$0xff]  ;;  %1778 = vmatpush.msrb.mxu1 %v1737_v27  ;;  %v1905_v27 = vld [vmem:[#allocation8 + $0x5c0] sm:$0xff] }
 0x1a6   :  { %1822 = vmatpush.msrb.mxu3 %v1742_v20  ;;  %v1910_v20 = vld [vmem:[#allocation8 + $0x5e8] sm:$0xff] }
 0x1a7   :  { %v1300_v26 = vpop.f32.mrf.mxu2  ;;  %1779 = vmatpush.msrb.mxu1 %v1735_v31  ;;  %v1870_v31 = vld [vmem:[#allocation8 + $0x4a8] sm:$0xff] }
 0x1a8   :  { %v1301_v39 = vadd.f32 %v1300_v26, %v1278_v36  ;;  %v1702_v26 = vld [vmem:[#allocation8 + $0x2a8] sm:$0xff]  ;;  %1823 = vmatpush.msrb.mxu3 %v1740_v24  ;;  %v1871_v24 = vld [vmem:[#allocation8 + $0x4b0] sm:$0xff] }
 0x1a9   :  { %1803 = vmatpush.msrb.mxu2 %v1702_v26  ;;  %v1734_v36 = vld [vmem:[#allocation8 + $0x3a8] sm:$0xff]  ;;  %1780 = vmatpush.msrb.mxu1 %v1733_v35  ;;  %v1868_v35 = vld [vmem:[#allocation8 + $0x498] sm:$0xff] }
 0x1aa   :  { %v1323_v33 = vpop.f32.mrf.mxu3  ;;  %1824 = vmatpush.msrb.mxu3 %v1738_v28  ;;  %v1906_v28 = vld [vmem:[#allocation8 + $0x5c8] sm:$0xff] }
 0x1ab   :  { %v1343_v34 = vpop.f32.mrf.mxu0  ;;  %v1324_v43 = vadd.f32 %v1323_v33, %v1301_v39  ;;  %v1697_v33 = vld [vmem:[#allocation8 + $0x280] sm:$0xff]  ;;  %1804 = vmatpush.msrb.mxu2 %v1700_v30  ;;  %v1731_v39 = vld [vmem:[#allocation8 + $0x390] sm:$0xff] }
 0x1ac   :  { %v1344_v41 = vadd.f32 %v1343_v34, %v1321_v38  ;;  %v1698_v34 = vld [vmem:[#allocation8 + $0x288] sm:$0xff]  ;;  %1825 = vmatpush.msrb.mxu3 %v1736_v32  ;;  %v1696_v38 = vld [vmem:[#allocation8 + $0x278] sm:$0xff]  ;;  %1759 = vmatpush.msrb.mxu0 %v1697_v33  ;;  %v1869_v30 = vld [vmem:[#allocation8 + $0x4a0] sm:$0xff] }
 0x1ad   :  { %1805 = vmatpush.msrb.mxu2 %v1698_v34  ;;  %1781 = vmatpush.msrb.mxu1 %v1731_v39  ;;  %v1903_v32 = vld [vmem:[#allocation8 + $0x5b0] sm:$0xff]  ;;  %v1904_v33 = vld [vmem:[#allocation8 + $0x5b8] sm:$0xff]  ;;  %v1865_v39 = vld [vmem:[#allocation8 + $0x480] sm:$0xff] }
 0x1ae   :  { %v1366_v37 = vpop.f32.mrf.mxu1  ;;  %1826 = vmatpush.msrb.mxu3 %v1734_v36  ;;  %v1867_v34 = vld [vmem:[#allocation8 + $0x490] sm:$0xff]  ;;  %v1901_v36 = vld [vmem:[#allocation8 + $0x5a0] sm:$0xff] }
 0x1af   :  { %v1367_v45 = vadd.f32 %v1366_v37, %v1344_v41  ;;  %v1695_v37 = vld [vmem:[#allocation8 + $0x270] sm:$0xff]  ;;  %v1693_v41 = vld [vmem:[#allocation8 + $0x260] sm:$0xff]  ;;  %1806 = vmatpush.msrb.mxu2 %v1696_v38 }
 0x1b0   :  { %1760 = vmatpush.msrb.mxu0 %v1695_v37  ;;  %v1902_v37 = vld [vmem:[#allocation8 + $0x5a8] sm:$0xff] }
 0x1b1   :  { %v1389_v40 = vpop.f32.mrf.mxu2 }
 0x1b2   :  { %v1390_v46 = vadd.f32 %v1389_v40, %v1367_v45  ;;  %v1732_v40 = vld [vmem:[#allocation8 + $0x398] sm:$0xff]  ;;  %v1691_v45 = vld [vmem:[#allocation8 + $0x250] sm:$0xff]  ;;  %1761 = vmatpush.msrb.mxu0 %v1693_v41 }
 0x1b3   :  { %1827 = vmatpush.msrb.mxu3 %v1732_v40  ;;  %v1866_v40 = vld [vmem:[#allocation8 + $0x488] sm:$0xff] }
 0x1b4   :  { %v1412_v42 = vpop.f32.mrf.mxu3  ;;  %1762 = vmatpush.msrb.mxu0 %v1691_v45  ;;  %v1581_v45 = vperm.slane %v6629_v21, 1  ;;  %v1890_v21 = vld [vmem:[#allocation8 + $0x548] sm:$0xff] }
 0x1b5   :  { %v1413_v51 = vadd.f32 %v1412_v42, %v1390_v46  ;;  %v1694_v42 = vld [vmem:[#allocation8 + $0x268] sm:$0xff]  ;;  %v1692_v46 = vld [vmem:[#allocation8 + $0x258] sm:$0xff] }
 0x1b6   :  { %1807 = vmatpush.msrb.mxu2 %v1694_v42 }
 0x1b7   :  { %v1346_v44 = vpop.f32.mrf.mxu0 }
 0x1b8   :  { %v1347_v49 = vadd.f32 %v1346_v44, %v1324_v43  ;;  %v1729_v43 = vld [vmem:[#allocation8 + $0x380] sm:$0xff]  ;;  %v1730_v44 = vld [vmem:[#allocation8 + $0x388] sm:$0xff]  ;;  %1808 = vmatpush.msrb.mxu2 %v1692_v46 }
 0x1b9   :  { %1782 = vmatpush.msrb.mxu1 %v1729_v43  ;;  %1828 = vmatpush.msrb.mxu3 %v1730_v44  ;;  %v1899_v43 = vld [vmem:[#allocation8 + $0x590] sm:$0xff]  ;;  %v1900_v44 = vld [vmem:[#allocation8 + $0x598] sm:$0xff] }
 0x1ba   :  { %v1369_v47 = vpop.f32.mrf.mxu1 }
 0x1bb   :  { %v1392_v50 = vpop.f32.mrf.mxu2  ;;  %v1370_v52 = vadd.f32 %v1369_v47, %v1347_v49  ;;  %v1727_v47 = vld [vmem:[#allocation8 + $0x370] sm:$0xff]  ;;  %v1728_v49 = vld [vmem:[#allocation8 + $0x378] sm:$0xff] }
 0x1bc   :  { %1783 = vmatpush.msrb.mxu1 %v1727_v47  ;;  %1829 = vmatpush.msrb.mxu3 %v1728_v49  ;;  %v1863_v47 = vld [vmem:[#allocation8 + $0x470] sm:$0xff]  ;;  %v1864_v49 = vld [vmem:[#allocation8 + $0x478] sm:$0xff] }
 0x1bd   :  { %v1393_v56 = vadd.f32 %v1392_v50, %v1370_v52  ;;  %v1689_v50 = vld [vmem:[#allocation8 + $0x240] sm:$0xff] }
 0x1be   :  { %v1415_v48 = vpop.f32.mrf.mxu3  ;;  %v1725_v52 = vld [vmem:[#allocation8 + $0x360] sm:$0xff]  ;;  %1763 = vmatpush.msrb.mxu0 %v1689_v50 }
 0x1bf   :  { %v1416_v61 = vadd.f32 %v1415_v48, %v1393_v56  ;;  %v1687_v48 = vld [vmem:[#allocation8 + $0x230] sm:$0xff]  ;;  %1784 = vmatpush.msrb.mxu1 %v1725_v52  ;;  %v1862_v52 = vld [vmem:[#allocation8 + $0x468] sm:$0xff] }
 0x1c0   :  { %1764 = vmatpush.msrb.mxu0 %v1687_v48  ;;  %v1723_v56 = vld [vmem:[#allocation8 + $0x350] sm:$0xff] }
 0x1c1   :  { %1785 = vmatpush.msrb.mxu1 %v1723_v56 }
 0x1cf   :  { %v1435_v53 = vpop.f32.mrf.mxu0 }
 0x1d0   :  { %v1436_v54 = vadd.f32 %v1435_v53, %v1413_v51  ;;  %v1690_v51 = vld [vmem:[#allocation8 + $0x248] sm:$0xff] }
 0x1d1   :  { %v1726_v53 = vld [vmem:[#allocation8 + $0x368] sm:$0xff]  ;;  %1809 = vmatpush.msrb.mxu2 %v1690_v51  ;;  %v1861_v51 = vld [vmem:[#allocation8 + $0x460] sm:$0xff] }
 0x1d2   :  { %v1458_v55 = vpop.f32.mrf.mxu1  ;;  %1830 = vmatpush.msrb.mxu3 %v1726_v53 }
 0x1d3   :  { %v1459_v58 = vadd.f32 %v1458_v55, %v1436_v54  ;;  %v1688_v54 = vld [vmem:[#allocation8 + $0x238] sm:$0xff]  ;;  %v1685_v55 = vld [vmem:[#allocation8 + $0x220] sm:$0xff] }
 0x1d4   :  { %1810 = vmatpush.msrb.mxu2 %v1688_v54  ;;  %1765 = vmatpush.msrb.mxu0 %v1685_v55 }
 0x1d5   :  { %v1481_v59 = vpop.f32.mrf.mxu2 }
 0x1d6   :  { %v1482_v60 = vadd.f32 %v1481_v59, %v1459_v58  ;;  %v1686_v58 = vld [vmem:[#allocation8 + $0x228] sm:$0xff]  ;;  %v1724_v59 = vld [vmem:[#allocation8 + $0x358] sm:$0xff] }
 0x1d7   :  { %1811 = vmatpush.msrb.mxu2 %v1686_v58  ;;  %1831 = vmatpush.msrb.mxu3 %v1724_v59 }
 0x1d8   :  { %v1438_v62 = vpop.f32.mrf.mxu0  ;;  %v1504_v63 = vpop.f32.mrf.mxu3 }
 0x1d9   :  { %v1439_v1 = vadd.f32 %v1438_v62, %v1416_v61  ;;  %v1505_v2 = vadd.f32 %v1504_v63, %v1482_v60  ;;  %v1683_v60 = vld [vmem:[#allocation8 + $0x210] sm:$0xff]  ;;  %v1721_v61 = vld [vmem:[#allocation8 + $0x340] sm:$0xff]  ;;  %v1684_v62 = vld [vmem:[#allocation8 + $0x218] sm:$0xff] }
 0x1da   :  { %v1461_v0 = vpop.f32.mrf.mxu1  ;;  %1766 = vmatpush.msrb.mxu0 %v1683_v60  ;;  %1786 = vmatpush.msrb.mxu1 %v1721_v61  ;;  %v1722_v63 = vld [vmem:[#allocation8 + $0x348] sm:$0xff] }
 0x1db   :  { %v1511_v57 = vmax.f32 %v1505_v2, 0.0  ;;  %v1462_v3 = vadd.f32 %v1461_v0, %v1439_v1  ;;  %v1681_v1 = vld [vmem:[#allocation8 + $0x200] sm:$0xff]  ;;  %v1719_v2 = vld [vmem:[#allocation8 + $0x330] sm:$0xff]  ;;  %1812 = vmatpush.msrb.mxu2 %v1684_v62  ;;  %1832 = vmatpush.msrb.mxu3 %v1722_v63  ;;  %v1682_v0 = vld [vmem:[#allocation8 + $0x208] sm:$0xff] }
 0x1dc   :  { %1767 = vmatpush.msrb.mxu0 %v1681_v1  ;;  %1787 = vmatpush.msrb.mxu1 %v1719_v2 }
 0x1dd   :  { %1623 = vmatmul.f32.vlgmr.msra.gmra.mxu1 %v1511_v57  ;;  %1669 = vmatmul.f32.vlgmr.msra.gmra.mxu3 %v1511_v57  ;;  %v1720_v57 = vld [vmem:[#allocation8 + $0x338] sm:$0xff] }
 0x1de   :  { %v1484_v4 = vpop.f32.mrf.mxu2  ;;  %1813 = vmatpush.msrb.mxu2 %v1682_v0  ;;  %1833 = vmatpush.msrb.mxu3 %v1720_v57  ;;  %v1859_v57 = vld [vmem:[#allocation8 + $0x450] sm:$0xff] }
 0x1df   :  { %v1485_v5 = vadd.f32 %v1484_v4, %v1462_v3  ;;  %v1717_v3 = vld [vmem:[#allocation8 + $0x320] sm:$0xff]  ;;  %v1718_v4 = vld [vmem:[#allocation8 + $0x328] sm:$0xff] }
 0x1e0   :  { %v1507_v9 = vpop.f32.mrf.mxu3  ;;  %1788 = vmatpush.msrb.mxu1 %v1717_v3  ;;  %1834 = vmatpush.msrb.mxu3 %v1718_v4  ;;  %v1897_v3 = vld [vmem:[#allocation8 + $0x580] sm:$0xff]  ;;  %v1860_v4 = vld [vmem:[#allocation8 + $0x458] sm:$0xff] }
 0x1e1   :  { %v1508_v11 = vadd.f32 %v1507_v9, %v1485_v5  ;;  %v1715_v5 = vld [vmem:[#allocation8 + $0x310] sm:$0xff]  ;;  %1966 = vmatpush.msra.mxu2 %v1880_v10 }
 0x1e2   :  { %1789 = vmatpush.msrb.mxu1 %v1715_v5  ;;  %1835 = vmatpush.msrb.mxu3 %v1716_v6  ;;  %v1879_v9 = vld [vmem:[#allocation8 + $0x4f0] sm:$0xff]  ;;  %v1898_v5 = vld [vmem:[#allocation8 + $0x588] sm:$0xff]  ;;  %v1857_v6 = vld [vmem:[#allocation8 + $0x440] sm:$0xff] }
 0x1e3   :  { %v1513_v16 = vmax.f32 %v1508_v11, 0.0  ;;  %v1877_v11 = vld [vmem:[#allocation8 + $0x4e0] sm:$0xff]  ;;  %1920 = vmatpush.msra.mxu0 %v1879_v9  ;;  %1967 = vmatpush.msra.mxu2 %v1878_v12  ;;  %v1896_v9 = vld [vmem:[#allocation8 + $0x578] sm:$0xff]  ;;  %v1855_v10 = vld [vmem:[#allocation8 + $0x430] sm:$0xff] }
 0x1e4   :  { %1790 = vmatpush.msrb.mxu1 %v1713_v7  ;;  %1836 = vmatpush.msrb.mxu3 %v1714_v8  ;;  %v1895_v7 = vld [vmem:[#allocation8 + $0x570] sm:$0xff]  ;;  %v1858_v8 = vld [vmem:[#allocation8 + $0x448] sm:$0xff]  ;;  %v1856_v12 = vld [vmem:[#allocation8 + $0x438] sm:$0xff] }
 0x1e5   :  { %1626 = vmatmul.f32.gmra.mxu1 %v1513_v16  ;;  %1672 = vmatmul.f32.gmra.mxu3 %v1513_v16  ;;  %v1912_v16 = vld [vmem:[#allocation8 + $0x5f8] sm:$0xff] }
 0x1e6   :  { %1921 = vmatpush.msra.mxu0 %v1877_v11  ;;  %1943 = vmatpush.msra.mxu1 %v1911_v15  ;;  %v1893_v11 = vld [vmem:[#allocation8 + $0x560] sm:$0xff]  ;;  %v1891_v15 = vld [vmem:[#allocation8 + $0x550] sm:$0xff] }
 0x1e7   :  { %1989 = vmatpush.msra.mxu3 %v1912_v16  ;;  %1968 = vmatpush.msra.mxu2 %v1876_v14  ;;  %v1853_v14 = vld [vmem:[#allocation8 + $0x420] sm:$0xff]  ;;  %v1854_v16 = vld [vmem:[#allocation8 + $0x428] sm:$0xff] }
 0x1e8   :  { %1922 = vmatpush.msra.mxu0 %v1875_v13  ;;  %1944 = vmatpush.msra.mxu1 %v1909_v17  ;;  %v1894_v13 = vld [vmem:[#allocation8 + $0x568] sm:$0xff]  ;;  %v1892_v17 = vld [vmem:[#allocation8 + $0x558] sm:$0xff] }
 0x1e9   :  { %1990 = vmatpush.msra.mxu3 %v1910_v20  ;;  %1969 = vmatpush.msra.mxu2 %v1874_v19  ;;  %v1889_v19 = vld [vmem:[#allocation8 + $0x540] sm:$0xff]  ;;  %v1852_v20 = vld [vmem:[#allocation8 + $0x418] sm:$0xff] }
 0x1ea   :  { %1923 = vmatpush.msra.mxu0 %v1873_v18  ;;  %1945 = vmatpush.msra.mxu1 %v1907_v22  ;;  %v1851_v18 = vld [vmem:[#allocation8 + $0x410] sm:$0xff]  ;;  %v1849_v22 = vld [vmem:[#allocation8 + $0x400] sm:$0xff] }
 0x1eb   :  { %1991 = vmatpush.msra.mxu3 %v1908_v23  ;;  %1970 = vmatpush.msra.mxu2 %v1872_v25  ;;  %v1887_v23 = vld [vmem:[#allocation8 + $0x530] sm:$0xff]  ;;  %v1888_v25 = vld [vmem:[#allocation8 + $0x538] sm:$0xff] }
 0x1ec   :  { %1924 = vmatpush.msra.mxu0 %v1871_v24  ;;  %1946 = vmatpush.msra.mxu1 %v1905_v27  ;;  %v1850_v24 = vld [vmem:[#allocation8 + $0x408] sm:$0xff] }
 0x1ed   :  { %1992 = vmatpush.msra.mxu3 %v1906_v28  ;;  %1971 = vmatpush.msra.mxu2 %v1870_v31  ;;  %v1886_v27 = vld [vmem:[#allocation8 + $0x528] sm:$0xff]  ;;  %v1883_v28 = vld [vmem:[#allocation8 + $0x510] sm:$0xff] }
 0x1ee   :  { %1925 = vmatpush.msra.mxu0 %v1869_v30  ;;  %1947 = vmatpush.msra.mxu1 %v1903_v32  ;;  %v1881_v30 = vld [vmem:[#allocation8 + $0x500] sm:$0xff]  ;;  %v1882_v31 = vld [vmem:[#allocation8 + $0x508] sm:$0xff]  ;;  %v2047_v32 = vld [vmem:[#allocation8 + $0x6f0] sm:$0xff] }
 0x1ef   :  { %1993 = vmatpush.msra.mxu3 %v1904_v33  ;;  %1972 = vmatpush.msra.mxu2 %v1868_v35  ;;  %v2048_v33 = vld [vmem:[#allocation8 + $0x6f8] sm:$0xff]  ;;  %v2046_v35 = vld [vmem:[#allocation8 + $0x6e8] sm:$0xff] }
 0x1f0   :  { %v1601_v26 = vpop.f32.mrf.mxu0  ;;  %1926 = vmatpush.msra.mxu0 %v1867_v34  ;;  %1948 = vmatpush.msra.mxu1 %v1901_v36  ;;  %v2045_v34 = vld [vmem:[#allocation8 + $0x6e0] sm:$0xff]  ;;  %v2043_v36 = vld [vmem:[#allocation8 + $0x6d0] sm:$0xff] }
 0x1f1   :  { %v1602_v38 = vadd.f32 %v1601_v26, %v1580_v29  ;;  %1994 = vmatpush.msra.mxu3 %v1902_v37  ;;  %1973 = vmatpush.msra.mxu2 %v1866_v40  ;;  %v1885_v26 = vld [vmem:[#allocation8 + $0x520] sm:$0xff]  ;;  %v2044_v37 = vld [vmem:[#allocation8 + $0x6d8] sm:$0xff] }
 0x1f2   :  { %1927 = vmatpush.msra.mxu0 %v1865_v39  ;;  %1949 = vmatpush.msra.mxu1 %v1899_v43  ;;  %v2080_v39 = vld [vmem:[#allocation8 + $0x7f8] sm:$0xff]  ;;  %v2077_v40 = vld [vmem:[#allocation8 + $0x7e0] sm:$0xff]  ;;  %v2078_v43 = vld [vmem:[#allocation8 + $0x7e8] sm:$0xff] }
 0x1f3   :  { %1995 = vmatpush.msra.mxu3 %v1900_v44  ;;  %1974 = vmatpush.msra.mxu2 %v1864_v49  ;;  %v6633_v44 = vld [vmem:[#allocation10 + $0x2] sm:$0x3]  ;;  %v2040_v49 = vld [vmem:[#allocation8 + $0x6b8] sm:$0xff] }
 0x1f4   :  { %1928 = vmatpush.msra.mxu0 %v1863_v47  ;;  %1950 = vmatpush.msra.mxu1 %v1897_v3  ;;  %v2039_v47 = vld [vmem:[#allocation8 + $0x6b0] sm:$0xff]  ;;  %v2068_v3 = vld [vmem:[#allocation8 + $0x798] sm:$0xff] }
 0x1f5   :  { %1975 = vmatpush.msra.mxu2 %v1862_v52  ;;  %1996 = vmatpush.msra.mxu3 %v1898_v5  ;;  %v2074_v52 = vld [vmem:[#allocation8 + $0x7c8] sm:$0xff]  ;;  %v1749_v5 = vperm.slane %v6633_v44, 1 }
 0x1f6   :  { %v1647_v41 = vpop.f32.mrf.mxu2  ;;  %1929 = vmatpush.msra.mxu0 %v1861_v51  ;;  %1951 = vmatpush.msra.mxu1 %v1895_v7  ;;  %v2073_v51 = vld [vmem:[#allocation8 + $0x7c0] sm:$0xff]  ;;  %v2032_v7 = vld [vmem:[#allocation8 + $0x678] sm:$0xff] }
 0x1f7   :  { %v1648_v48 = vadd.f32 %v1647_v41, %v1581_v45  ;;  %1976 = vmatpush.msra.mxu2 %v1860_v4  ;;  %1997 = vmatpush.msra.mxu3 %v1896_v9  ;;  %v2041_v41 = vld [vmem:[#allocation8 + $0x6c0] sm:$0xff] }
 0x1f8   :  { %v1604_v53 = vpop.f32.mrf.mxu0  ;;  %1930 = vmatpush.msra.mxu0 %v1859_v57  ;;  %1952 = vmatpush.msra.mxu1 %v1893_v11  ;;  %v2067_v57 = vld [vmem:[#allocation8 + $0x790] sm:$0xff]  ;;  %v2029_v9 = vld [vmem:[#allocation8 + $0x660] sm:$0xff] }
 0x1f9   :  { %v1605_v55 = vadd.f32 %v1604_v53, %v1580_v29  ;;  %1977 = vmatpush.msra.mxu2 %v1858_v8  ;;  %1998 = vmatpush.msra.mxu3 %v1894_v13  ;;  %v1884_v29 = vld [vmem:[#allocation8 + $0x518] sm:$0xff]  ;;  %v1748_v53 = vperm.slane %v6633_v44, 0  ;;  %v2058_v44 = vld [vmem:[#allocation8 + $0x748] sm:$0xff] }
 0x1fa   :  { %1931 = vmatpush.msra.mxu0 %v1857_v6  ;;  %1953 = vmatpush.msra.mxu1 %v1891_v15  ;;  %v2031_v6 = vld [vmem:[#allocation8 + $0x670] sm:$0xff] }
 0x1fb   :  { %1978 = vmatpush.msra.mxu2 %v1856_v12  ;;  %1999 = vmatpush.msra.mxu3 %v1892_v17 }
 0x1fc   :  { %1932 = vmatpush.msra.mxu0 %v1855_v10  ;;  %1954 = vmatpush.msra.mxu1 %v1889_v19  ;;  %v2030_v10 = vld [vmem:[#allocation8 + $0x668] sm:$0xff] }
 0x1fd   :  { %1979 = vmatpush.msra.mxu2 %v1854_v16  ;;  %2000 = vmatpush.msra.mxu3 %v1890_v21 }
 0x1fe   :  { %v1650_v61 = vpop.f32.mrf.mxu2  ;;  %1933 = vmatpush.msra.mxu0 %v1853_v14  ;;  %1955 = vmatpush.msra.mxu1 %v1887_v23 }
 0x1ff   :  { %v1651_v63 = vadd.f32 %v1650_v61, %v1581_v45  ;;  %1980 = vmatpush.msra.mxu2 %v1852_v20  ;;  %2001 = vmatpush.msra.mxu3 %v1888_v25  ;;  %v2075_v45 = vld [vmem:[#allocation8 + $0x7d0] sm:$0xff]  ;;  %v2070_v61 = vld [vmem:[#allocation8 + $0x7a8] sm:$0xff] }
 0x200   :  { %1934 = vmatpush.msra.mxu0 %v1851_v18  ;;  %1956 = vmatpush.msra.mxu1 %v1885_v26  ;;  %v2027_v25 = vld [vmem:[#allocation8 + $0x650] sm:$0xff]  ;;  %v2065_v26 = vld [vmem:[#allocation8 + $0x780] sm:$0xff] }
 0x201   :  { %1981 = vmatpush.msra.mxu2 %v1850_v24  ;;  %2002 = vmatpush.msra.mxu3 %v1886_v27  ;;  %v2028_v27 = vld [vmem:[#allocation8 + $0x658] sm:$0xff] }
 0x202   :  { %1935 = vmatpush.msra.mxu0 %v1849_v22  ;;  %1957 = vmatpush.msra.mxu1 %v1883_v28  ;;  %v2066_v28 = vld [vmem:[#allocation8 + $0x788] sm:$0xff] }
 0x203   :  { %2003 = vmatpush.msra.mxu3 %v1884_v29  ;;  %v2025_v29 = vld [vmem:[#allocation8 + $0x640] sm:$0xff] }
 0x204   :  { %1958 = vmatpush.msra.mxu1 %v1881_v30  ;;  %v2063_v30 = vld [vmem:[#allocation8 + $0x770] sm:$0xff] }
 0x205   :  { %2004 = vmatpush.msra.mxu3 %v1882_v31  ;;  %v2026_v31 = vld [vmem:[#allocation8 + $0x648] sm:$0xff] }
 0x25a   :  { %v1624_v42 = vpop.f32.mrf.mxu1 }
 0x25b   :  { %v1625_v46 = vadd.f32 %v1624_v42, %v1602_v38  ;;  %v2079_v38 = vld [vmem:[#allocation8 + $0x7f0] sm:$0xff]  ;;  %v2042_v42 = vld [vmem:[#allocation8 + $0x6c8] sm:$0xff] }
 0x25d   :  { %v1676_v50 = vmax.f32 %v1625_v46, 0.0  ;;  %v2076_v46 = vld [vmem:[#allocation8 + $0x7d8] sm:$0xff] }
 0x25f   :  { %1768 = vmatmul.f32.vlgmr.msrb.gmra.mxu0 %v1676_v50  ;;  %1814 = vmatmul.f32.vlgmr.msrb.gmra.mxu2 %v1676_v50 }
 0x260   :  { %v1670_v54 = vpop.f32.mrf.mxu3  ;;  %2088 = vmatpush.msrb.mxu0 %v2047_v32  ;;  %2134 = vmatpush.msrb.mxu2 %v2048_v33  ;;  %v2064_v32 = vld [vmem:[#allocation8 + $0x778] sm:$0xff]  ;;  %v2023_v33 = vld [vmem:[#allocation8 + $0x630] sm:$0xff] }
 0x261   :  { %v1671_v56 = vadd.f32 %v1670_v54, %v1648_v48  ;;  %v2037_v48 = vld [vmem:[#allocation8 + $0x6a0] sm:$0xff]  ;;  %v2038_v54 = vld [vmem:[#allocation8 + $0x6a8] sm:$0xff] }
 0x262   :  { %v1627_v58 = vpop.f32.mrf.mxu1  ;;  %2089 = vmatpush.msrb.mxu0 %v2045_v34  ;;  %2135 = vmatpush.msrb.mxu2 %v2046_v35  ;;  %v2061_v34 = vld [vmem:[#allocation8 + $0x760] sm:$0xff]  ;;  %v2024_v35 = vld [vmem:[#allocation8 + $0x638] sm:$0xff] }
 0x263   :  { %v1677_v59 = vmax.f32 %v1671_v56, 0.0  ;;  %v1628_v60 = vadd.f32 %v1627_v58, %v1605_v55  ;;  %v2071_v55 = vld [vmem:[#allocation8 + $0x7b0] sm:$0xff]  ;;  %v2072_v56 = vld [vmem:[#allocation8 + $0x7b8] sm:$0xff] }
 0x264   :  { %2090 = vmatpush.msrb.mxu0 %v2043_v36  ;;  %2136 = vmatpush.msrb.mxu2 %v2044_v37  ;;  %v2035_v58 = vld [vmem:[#allocation8 + $0x690] sm:$0xff]  ;;  %v2062_v36 = vld [vmem:[#allocation8 + $0x768] sm:$0xff]  ;;  %v2021_v37 = vld [vmem:[#allocation8 + $0x620] sm:$0xff] }
 0x265   :  { %1791 = vmatmul.f32.vlgmr.msrb.gmra.mxu1 %v1677_v59  ;;  %1837 = vmatmul.f32.vlgmr.msrb.gmra.mxu3 %v1677_v59  ;;  %v1678_v62 = vmax.f32 %v1628_v60, 0.0  ;;  %v2036_v59 = vld [vmem:[#allocation8 + $0x698] sm:$0xff]  ;;  %v2069_v60 = vld [vmem:[#allocation8 + $0x7a0] sm:$0xff] }
 0x266   :  { %2111 = vmatpush.msrb.mxu1 %v2079_v38  ;;  %2157 = vmatpush.msrb.mxu3 %v2080_v39  ;;  %v2059_v38 = vld [vmem:[#allocation8 + $0x750] sm:$0xff]  ;;  %v2022_v39 = vld [vmem:[#allocation8 + $0x628] sm:$0xff] }
 0x267   :  { %1771 = vmatmul.f32.gmra.mxu0 %v1678_v62  ;;  %1817 = vmatmul.f32.gmra.mxu2 %v1678_v62 }
 0x268   :  { %v1673_v1 = vpop.f32.mrf.mxu3  ;;  %2112 = vmatpush.msrb.mxu1 %v2077_v40  ;;  %2158 = vmatpush.msrb.mxu3 %v2078_v43  ;;  %v2060_v40 = vld [vmem:[#allocation8 + $0x758] sm:$0xff] }
 0x269   :  { %v1674_v2 = vadd.f32 %v1673_v1, %v1651_v63  ;;  %2091 = vmatpush.msrb.mxu0 %v2041_v41  ;;  %2137 = vmatpush.msrb.mxu2 %v2042_v42  ;;  %v2033_v63 = vld [vmem:[#allocation8 + $0x680] sm:$0xff]  ;;  %v2034_v1 = vld [vmem:[#allocation8 + $0x688] sm:$0xff]  ;;  %v2019_v41 = vld [vmem:[#allocation8 + $0x610] sm:$0xff] }
 0x26a   :  { %2113 = vmatpush.msrb.mxu1 %v2075_v45  ;;  %2159 = vmatpush.msrb.mxu3 %v2076_v46  ;;  %v2057_v42 = vld [vmem:[#allocation8 + $0x740] sm:$0xff]  ;;  %v2020_v43 = vld [vmem:[#allocation8 + $0x618] sm:$0xff]  ;;  %v2055_v46 = vld [vmem:[#allocation8 + $0x730] sm:$0xff] }
 0x26b   :  { %v1679_v0 = vmax.f32 %v1674_v2, 0.0  ;;  %2092 = vmatpush.msrb.mxu0 %v2039_v47  ;;  %2138 = vmatpush.msrb.mxu2 %v2040_v49  ;;  %v2017_v45 = vld [vmem:[#allocation8 + $0x600] sm:$0xff]  ;;  %v2018_v47 = vld [vmem:[#allocation8 + $0x608] sm:$0xff]  ;;  %v2056_v49 = vld [vmem:[#allocation8 + $0x738] sm:$0xff] }
 0x26c   :  { %2114 = vmatpush.msrb.mxu1 %v2073_v51  ;;  %2160 = vmatpush.msrb.mxu3 %v2074_v52  ;;  %v2054_v51 = vld [vmem:[#allocation8 + $0x728] sm:$0xff]  ;;  %v2051_v52 = vld [vmem:[#allocation8 + $0x710] sm:$0xff] }
 0x26d   :  { %1794 = vmatmul.f32.gmra.mxu1 %v1679_v0  ;;  %1840 = vmatmul.f32.gmra.mxu3 %v1679_v0 }
 0x26e   :  { %2093 = vmatpush.msrb.mxu0 %v2037_v48  ;;  %2139 = vmatpush.msrb.mxu2 %v2038_v54  ;;  %v2049_v48 = vld [vmem:[#allocation8 + $0x700] sm:$0xff]  ;;  %v2050_v54 = vld [vmem:[#allocation8 + $0x708] sm:$0xff] }
 0x26f   :  { %2115 = vmatpush.msrb.mxu1 %v2071_v55  ;;  %2161 = vmatpush.msrb.mxu3 %v2072_v56  ;;  %v2215_v55 = vld [vmem:[#allocation8 + $0x8f0] sm:$0xff]  ;;  %v2216_v56 = vld [vmem:[#allocation8 + $0x8f8] sm:$0xff] }
 0x270   :  { %2094 = vmatpush.msrb.mxu0 %v2035_v58  ;;  %2140 = vmatpush.msrb.mxu2 %v2036_v59  ;;  %v2213_v58 = vld [vmem:[#allocation8 + $0x8e0] sm:$0xff]  ;;  %v2214_v59 = vld [vmem:[#allocation8 + $0x8e8] sm:$0xff] }
 0x271   :  { %2116 = vmatpush.msrb.mxu1 %v2069_v60  ;;  %2162 = vmatpush.msrb.mxu3 %v2070_v61  ;;  %v2211_v60 = vld [vmem:[#allocation8 + $0x8d0] sm:$0xff]  ;;  %v2212_v61 = vld [vmem:[#allocation8 + $0x8d8] sm:$0xff] }
 0x272   :  { %2095 = vmatpush.msrb.mxu0 %v2033_v63  ;;  %2141 = vmatpush.msrb.mxu2 %v2034_v1  ;;  %v2248_v63 = vld [vmem:[#allocation8 + $0x9f8] sm:$0xff]  ;;  %v2245_v1 = vld [vmem:[#allocation8 + $0x9e0] sm:$0xff] }
 0x273   :  { %2117 = vmatpush.msrb.mxu1 %v2067_v57  ;;  %2163 = vmatpush.msrb.mxu3 %v2068_v3  ;;  %v2246_v57 = vld [vmem:[#allocation8 + $0x9e8] sm:$0xff]  ;;  %v6637_v3 = vld [vmem:[#allocation10 + $0x4] sm:$0x3] }
 0x274   :  { %2096 = vmatpush.msrb.mxu0 %v2031_v6  ;;  %2142 = vmatpush.msrb.mxu2 %v2032_v7  ;;  %v2207_v6 = vld [vmem:[#allocation8 + $0x8b0] sm:$0xff]  ;;  %v2208_v7 = vld [vmem:[#allocation8 + $0x8b8] sm:$0xff] }
 0x275   :  { %2118 = vmatpush.msrb.mxu1 %v2065_v26  ;;  %2164 = vmatpush.msrb.mxu3 %v2066_v28  ;;  %v2236_v26 = vld [vmem:[#allocation8 + $0x998] sm:$0xff]  ;;  %v1917_v28 = vperm.slane %v6637_v3, 1 }
 0x276   :  { %2097 = vmatpush.msrb.mxu0 %v2029_v9  ;;  %2143 = vmatpush.msrb.mxu2 %v2030_v10  ;;  %v2241_v9 = vld [vmem:[#allocation8 + $0x9c0] sm:$0xff]  ;;  %v2242_v10 = vld [vmem:[#allocation8 + $0x9c8] sm:$0xff] }
 0x277   :  { %2119 = vmatpush.msrb.mxu1 %v2063_v30  ;;  %2165 = vmatpush.msrb.mxu3 %v2064_v32  ;;  %v2200_v30 = vld [vmem:[#allocation8 + $0x878] sm:$0xff]  ;;  %v2197_v32 = vld [vmem:[#allocation8 + $0x860] sm:$0xff] }
 0x278   :  { %2098 = vmatpush.msrb.mxu0 %v2027_v25  ;;  %2144 = vmatpush.msrb.mxu2 %v2028_v27  ;;  %v2235_v25 = vld [vmem:[#allocation8 + $0x990] sm:$0xff] }
 0x279   :  { %2120 = vmatpush.msrb.mxu1 %v2061_v34  ;;  %2166 = vmatpush.msrb.mxu3 %v2062_v36 }
 0x27a   :  { %2099 = vmatpush.msrb.mxu0 %v2025_v29  ;;  %2145 = vmatpush.msrb.mxu2 %v2026_v31  ;;  %v2199_v29 = vld [vmem:[#allocation8 + $0x870] sm:$0xff] }
 0x27b   :  { %2121 = vmatpush.msrb.mxu1 %v2059_v38  ;;  %2167 = vmatpush.msrb.mxu3 %v2060_v40 }
 0x27c   :  { %2100 = vmatpush.msrb.mxu0 %v2023_v33  ;;  %2146 = vmatpush.msrb.mxu2 %v2024_v35  ;;  %v2198_v33 = vld [vmem:[#allocation8 + $0x868] sm:$0xff] }
 0x27d   :  { %2122 = vmatpush.msrb.mxu1 %v2057_v42  ;;  %2168 = vmatpush.msrb.mxu3 %v2058_v44 }
 0x27e   :  { %2101 = vmatpush.msrb.mxu0 %v2021_v37  ;;  %2147 = vmatpush.msrb.mxu2 %v2022_v39 }
 0x27f   :  { %2123 = vmatpush.msrb.mxu1 %v2055_v46  ;;  %2169 = vmatpush.msrb.mxu3 %v2056_v49  ;;  %v2195_v49 = vld [vmem:[#allocation8 + $0x850] sm:$0xff] }
 0x280   :  { %2102 = vmatpush.msrb.mxu0 %v2019_v41  ;;  %2148 = vmatpush.msrb.mxu2 %v2020_v43 }
 0x281   :  { %2170 = vmatpush.msrb.mxu3 %v2054_v51  ;;  %v2196_v51 = vld [vmem:[#allocation8 + $0x858] sm:$0xff] }
 0x282   :  { %2103 = vmatpush.msrb.mxu0 %v2017_v45  ;;  %2149 = vmatpush.msrb.mxu2 %v2018_v47 }
 0x2dc   :  { %v1769_v50 = vpop.f32.mrf.mxu0 }
 0x2dd   :  { %v1770_v62 = vadd.f32 %v1769_v50, %v1748_v53  ;;  %v2053_v50 = vld [vmem:[#allocation8 + $0x720] sm:$0xff] }
 0x2de   :  { %2124 = vmatpush.msrb.mxu1 %v2053_v50  ;;  %v2233_v50 = vld [vmem:[#allocation8 + $0x980] sm:$0xff] }
 0x2e0   :  { %2125 = vmatpush.msrb.mxu1 %v2051_v52  ;;  %v2234_v52 = vld [vmem:[#allocation8 + $0x988] sm:$0xff] }
 0x2e2   :  { %v1792_v2 = vpop.f32.mrf.mxu1  ;;  %v1815_v0 = vpop.f32.mrf.mxu2  ;;  %2126 = vmatpush.msrb.mxu1 %v2049_v48  ;;  %v2231_v48 = vld [vmem:[#allocation8 + $0x970] sm:$0xff] }
 0x2e3   :  { %v1793_v4 = vadd.f32 %v1792_v2, %v1770_v62  ;;  %v1816_v12 = vadd.f32 %v1815_v0, %v1749_v5  ;;  %v2247_v62 = vld [vmem:[#allocation8 + $0x9f0] sm:$0xff]  ;;  %v2209_v2 = vld [vmem:[#allocation8 + $0x8c0] sm:$0xff]  ;;  %v2210_v0 = vld [vmem:[#allocation8 + $0x8c8] sm:$0xff] }
 0x2e4   :  { %v1772_v11 = vpop.f32.mrf.mxu0 }
 0x2e5   :  { %v1844_v8 = vmax.f32 %v1793_v4, 0.0  ;;  %v1773_v14 = vadd.f32 %v1772_v11, %v1748_v53  ;;  %v2052_v53 = vld [vmem:[#allocation8 + $0x718] sm:$0xff]  ;;  %v2243_v4 = vld [vmem:[#allocation8 + $0x9d0] sm:$0xff]  ;;  %v1916_v11 = vperm.slane %v6637_v3, 0  ;;  %v2226_v3 = vld [vmem:[#allocation8 + $0x948] sm:$0xff] }
 0x2e6   :  { %2171 = vmatpush.msrb.mxu3 %v2052_v53  ;;  %v2193_v53 = vld [vmem:[#allocation8 + $0x840] sm:$0xff] }
 0x2e7   :  { %1936 = vmatmul.f32.vlgmr.msra.gmra.mxu0 %v1844_v8  ;;  %1982 = vmatmul.f32.vlgmr.msra.gmra.mxu2 %v1844_v8 }
 0x2e8   :  { %v1838_v13 = vpop.f32.mrf.mxu3  ;;  %2172 = vmatpush.msrb.mxu3 %v2050_v54  ;;  %2256 = vmatpush.msra.mxu0 %v2215_v55  ;;  %v2194_v54 = vld [vmem:[#allocation8 + $0x848] sm:$0xff]  ;;  %v2232_v55 = vld [vmem:[#allocation8 + $0x978] sm:$0xff] }
 0x2e9   :  { %v1839_v15 = vadd.f32 %v1838_v13, %v1816_v12  ;;  %2302 = vmatpush.msra.mxu2 %v2216_v56  ;;  %v2205_v12 = vld [vmem:[#allocation8 + $0x8a0] sm:$0xff]  ;;  %v2206_v13 = vld [vmem:[#allocation8 + $0x8a8] sm:$0xff]  ;;  %v2191_v56 = vld [vmem:[#allocation8 + $0x830] sm:$0xff] }
 0x2ea   :  { %v1795_v16 = vpop.f32.mrf.mxu1  ;;  %v1818_v19 = vpop.f32.mrf.mxu2  ;;  %2257 = vmatpush.msra.mxu0 %v2213_v58  ;;  %v2229_v58 = vld [vmem:[#allocation8 + $0x960] sm:$0xff] }
 0x2eb   :  { %v1845_v17 = vmax.f32 %v1839_v15, 0.0  ;;  %v1796_v18 = vadd.f32 %v1795_v16, %v1773_v14  ;;  %v1819_v21 = vadd.f32 %v1818_v19, %v1749_v5  ;;  %2303 = vmatpush.msra.mxu2 %v2214_v59  ;;  %v2244_v5 = vld [vmem:[#allocation8 + $0x9d8] sm:$0xff]  ;;  %v2239_v14 = vld [vmem:[#allocation8 + $0x9b0] sm:$0xff]  ;;  %v2238_v19 = vld [vmem:[#allocation8 + $0x9a8] sm:$0xff] }
 0x2ec   :  { %2258 = vmatpush.msra.mxu0 %v2211_v60  ;;  %v2240_v15 = vld [vmem:[#allocation8 + $0x9b8] sm:$0xff]  ;;  %v2203_v16 = vld [vmem:[#allocation8 + $0x890] sm:$0xff]  ;;  %v2230_v60 = vld [vmem:[#allocation8 + $0x968] sm:$0xff] }
 0x2ed   :  { %1959 = vmatmul.f32.vlgmr.msra.gmra.mxu1 %v1845_v17  ;;  %2005 = vmatmul.f32.vlgmr.msra.gmra.mxu3 %v1845_v17  ;;  %v1846_v20 = vmax.f32 %v1796_v18, 0.0  ;;  %v2204_v17 = vld [vmem:[#allocation8 + $0x898] sm:$0xff]  ;;  %v2237_v18 = vld [vmem:[#allocation8 + $0x9a0] sm:$0xff] }
 0x2ee   :  { %2279 = vmatpush.msra.mxu1 %v2247_v62  ;;  %2325 = vmatpush.msra.mxu3 %v2248_v63  ;;  %v2192_v59 = vld [vmem:[#allocation8 + $0x838] sm:$0xff]  ;;  %v2227_v62 = vld [vmem:[#allocation8 + $0x950] sm:$0xff]  ;;  %v2190_v63 = vld [vmem:[#allocation8 + $0x828] sm:$0xff] }
 0x2ef   :  { %1939 = vmatmul.f32.gmra.mxu0 %v1846_v20  ;;  %1985 = vmatmul.f32.gmra.mxu2 %v1846_v20 }
 0x2f0   :  { %v1841_v22 = vpop.f32.mrf.mxu3  ;;  %2304 = vmatpush.msra.mxu2 %v2212_v61  ;;  %2280 = vmatpush.msra.mxu1 %v2245_v1  ;;  %v2189_v61 = vld [vmem:[#allocation8 + $0x820] sm:$0xff]  ;;  %v2228_v1 = vld [vmem:[#allocation8 + $0x958] sm:$0xff] }
 0x2f1   :  { %v1842_v23 = vadd.f32 %v1841_v22, %v1819_v21  ;;  %2326 = vmatpush.msra.mxu3 %v2246_v57  ;;  %2259 = vmatpush.msra.mxu0 %v2209_v2  ;;  %v2201_v21 = vld [vmem:[#allocation8 + $0x880] sm:$0xff]  ;;  %v2202_v22 = vld [vmem:[#allocation8 + $0x888] sm:$0xff]  ;;  %v2187_v2 = vld [vmem:[#allocation8 + $0x810] sm:$0xff] }
 0x2f2   :  { %2305 = vmatpush.msra.mxu2 %v2210_v0  ;;  %2281 = vmatpush.msra.mxu1 %v2243_v4  ;;  %v2225_v0 = vld [vmem:[#allocation8 + $0x940] sm:$0xff]  ;;  %v2188_v57 = vld [vmem:[#allocation8 + $0x818] sm:$0xff] }
 0x2f3   :  { %v1847_v24 = vmax.f32 %v1842_v23, 0.0  ;;  %2327 = vmatpush.msra.mxu3 %v2244_v5  ;;  %2260 = vmatpush.msra.mxu0 %v2207_v6  ;;  %v2185_v4 = vld [vmem:[#allocation8 + $0x800] sm:$0xff]  ;;  %v2223_v5 = vld [vmem:[#allocation8 + $0x930] sm:$0xff]  ;;  %v2186_v6 = vld [vmem:[#allocation8 + $0x808] sm:$0xff] }
 0x2f4   :  { %2306 = vmatpush.msra.mxu2 %v2208_v7  ;;  %2282 = vmatpush.msra.mxu1 %v2241_v9  ;;  %v2224_v7 = vld [vmem:[#allocation8 + $0x938] sm:$0xff]  ;;  %v2222_v9 = vld [vmem:[#allocation8 + $0x928] sm:$0xff] }
 0x2f5   :  { %1962 = vmatmul.f32.gmra.mxu1 %v1847_v24  ;;  %2008 = vmatmul.f32.gmra.mxu3 %v1847_v24 }
 0x2f6   :  { %2328 = vmatpush.msra.mxu3 %v2242_v10  ;;  %2261 = vmatpush.msra.mxu0 %v2205_v12  ;;  %v2219_v10 = vld [vmem:[#allocation8 + $0x910] sm:$0xff]  ;;  %v2217_v12 = vld [vmem:[#allocation8 + $0x900] sm:$0xff] }
 0x2f7   :  { %2307 = vmatpush.msra.mxu2 %v2206_v13  ;;  %2283 = vmatpush.msra.mxu1 %v2239_v14  ;;  %v2218_v13 = vld [vmem:[#allocation8 + $0x908] sm:$0xff]  ;;  %v2383_v14 = vld [vmem:[#allocation8 + $0xaf0] sm:$0xff] }
 0x2f8   :  { %2329 = vmatpush.msra.mxu3 %v2240_v15  ;;  %2262 = vmatpush.msra.mxu0 %v2203_v16  ;;  %v2384_v15 = vld [vmem:[#allocation8 + $0xaf8] sm:$0xff]  ;;  %v2381_v16 = vld [vmem:[#allocation8 + $0xae0] sm:$0xff] }
 0x2f9   :  { %2308 = vmatpush.msra.mxu2 %v2204_v17  ;;  %2284 = vmatpush.msra.mxu1 %v2237_v18  ;;  %v2382_v17 = vld [vmem:[#allocation8 + $0xae8] sm:$0xff]  ;;  %v2379_v18 = vld [vmem:[#allocation8 + $0xad0] sm:$0xff] }
 0x2fa   :  { %2330 = vmatpush.msra.mxu3 %v2238_v19  ;;  %2263 = vmatpush.msra.mxu0 %v2201_v21  ;;  %v2380_v19 = vld [vmem:[#allocation8 + $0xad8] sm:$0xff] }
 0x2fb   :  { %2309 = vmatpush.msra.mxu2 %v2202_v22  ;;  %2285 = vmatpush.msra.mxu1 %v2235_v25  ;;  %v2416_v21 = vld [vmem:[#allocation8 + $0xbf8] sm:$0xff]  ;;  %v2413_v22 = vld [vmem:[#allocation8 + $0xbe0] sm:$0xff]  ;;  %v2414_v25 = vld [vmem:[#allocation8 + $0xbe8] sm:$0xff] }
 0x2fc   :  { %2331 = vmatpush.msra.mxu3 %v2236_v26  ;;  %2264 = vmatpush.msra.mxu0 %v2199_v29  ;;  %v6641_v26 = vld [vmem:[#allocation10 + $0x6] sm:$0x3]  ;;  %v2375_v29 = vld [vmem:[#allocation8 + $0xab0] sm:$0xff] }
 0x2fd   :  { %2310 = vmatpush.msra.mxu2 %v2200_v30  ;;  %2286 = vmatpush.msra.mxu1 %v2233_v50  ;;  %v2376_v30 = vld [vmem:[#allocation8 + $0xab8] sm:$0xff] }
 0x2fe   :  { %2265 = vmatpush.msra.mxu0 %v2197_v32  ;;  %2332 = vmatpush.msra.mxu3 %v2234_v52  ;;  %v2409_v32 = vld [vmem:[#allocation8 + $0xbc0] sm:$0xff]  ;;  %v2404_v50 = vld [vmem:[#allocation8 + $0xb98] sm:$0xff]  ;;  %v2085_v52 = vperm.slane %v6641_v26, 1 }
 0x2ff   :  { %2311 = vmatpush.msra.mxu2 %v2198_v33  ;;  %2287 = vmatpush.msra.mxu1 %v2231_v48  ;;  %v2410_v33 = vld [vmem:[#allocation8 + $0xbc8] sm:$0xff]  ;;  %v2368_v48 = vld [vmem:[#allocation8 + $0xa78] sm:$0xff] }
 0x300   :  { %2266 = vmatpush.msra.mxu0 %v2195_v49  ;;  %2333 = vmatpush.msra.mxu3 %v2232_v55  ;;  %v2403_v49 = vld [vmem:[#allocation8 + $0xb90] sm:$0xff]  ;;  %v2365_v55 = vld [vmem:[#allocation8 + $0xa60] sm:$0xff] }
 0x301   :  { %2312 = vmatpush.msra.mxu2 %v2196_v51  ;;  %2288 = vmatpush.msra.mxu1 %v2229_v58 }
 0x302   :  { %2267 = vmatpush.msra.mxu0 %v2193_v53  ;;  %2334 = vmatpush.msra.mxu3 %v2230_v60  ;;  %v2367_v53 = vld [vmem:[#allocation8 + $0xa70] sm:$0xff] }
 0x303   :  { %2313 = vmatpush.msra.mxu2 %v2194_v54  ;;  %2289 = vmatpush.msra.mxu1 %v2227_v62 }
 0x304   :  { %2268 = vmatpush.msra.mxu0 %v2191_v56  ;;  %2335 = vmatpush.msra.mxu3 %v2228_v1  ;;  %v2366_v56 = vld [vmem:[#allocation8 + $0xa68] sm:$0xff] }
 0x305   :  { %2314 = vmatpush.msra.mxu2 %v2192_v59  ;;  %2290 = vmatpush.msra.mxu1 %v2225_v0 }
 0x306   :  { %2269 = vmatpush.msra.mxu0 %v2189_v61  ;;  %2336 = vmatpush.msra.mxu3 %v2226_v3 }
 0x307   :  { %2315 = vmatpush.msra.mxu2 %v2190_v63  ;;  %2291 = vmatpush.msra.mxu1 %v2223_v5 }
 0x308   :  { %2270 = vmatpush.msra.mxu0 %v2187_v2  ;;  %2337 = vmatpush.msra.mxu3 %v2224_v7  ;;  %v2363_v7 = vld [vmem:[#allocation8 + $0xa50] sm:$0xff] }
 0x309   :  { %2316 = vmatpush.msra.mxu2 %v2188_v57 }
 0x30a   :  { %2271 = vmatpush.msra.mxu0 %v2185_v4  ;;  %2338 = vmatpush.msra.mxu3 %v2222_v9  ;;  %v2364_v9 = vld [vmem:[#allocation8 + $0xa58] sm:$0xff] }
 0x30b   :  { %2317 = vmatpush.msra.mxu2 %v2186_v6 }
 0x364   :  { %v1937_v8 = vpop.f32.mrf.mxu0 }
 0x365   :  { %v1938_v20 = vadd.f32 %v1937_v8, %v1916_v11  ;;  %v2221_v8 = vld [vmem:[#allocation8 + $0x920] sm:$0xff] }
 0x366   :  { %2292 = vmatpush.msra.mxu1 %v2221_v8  ;;  %v2401_v8 = vld [vmem:[#allocation8 + $0xb80] sm:$0xff] }
 0x368   :  { %2293 = vmatpush.msra.mxu1 %v2219_v10  ;;  %v2402_v10 = vld [vmem:[#allocation8 + $0xb88] sm:$0xff] }
 0x36a   :  { %v1960_v23 = vpop.f32.mrf.mxu1  ;;  %v1983_v24 = vpop.f32.mrf.mxu2  ;;  %2294 = vmatpush.msra.mxu1 %v2217_v12  ;;  %v2399_v12 = vld [vmem:[#allocation8 + $0xb70] sm:$0xff] }
 0x36b   :  { %v1961_v27 = vadd.f32 %v1960_v23, %v1938_v20  ;;  %v1984_v35 = vadd.f32 %v1983_v24, %v1917_v28  ;;  %v2415_v20 = vld [vmem:[#allocation8 + $0xbf0] sm:$0xff]  ;;  %v2377_v23 = vld [vmem:[#allocation8 + $0xac0] sm:$0xff]  ;;  %v2378_v24 = vld [vmem:[#allocation8 + $0xac8] sm:$0xff] }
 0x36c   :  { %v1940_v34 = vpop.f32.mrf.mxu0 }
 0x36d   :  { %v2012_v31 = vmax.f32 %v1961_v27, 0.0  ;;  %v1941_v37 = vadd.f32 %v1940_v34, %v1916_v11  ;;  %v2220_v11 = vld [vmem:[#allocation8 + $0x918] sm:$0xff]  ;;  %v2411_v27 = vld [vmem:[#allocation8 + $0xbd0] sm:$0xff]  ;;  %v2084_v34 = vperm.slane %v6641_v26, 0  ;;  %v2394_v26 = vld [vmem:[#allocation8 + $0xb48] sm:$0xff] }
 0x36e   :  { %2339 = vmatpush.msra.mxu3 %v2220_v11  ;;  %v2361_v11 = vld [vmem:[#allocation8 + $0xa40] sm:$0xff] }
 0x36f   :  { %2104 = vmatmul.f32.vlgmr.msrb.gmra.mxu0 %v2012_v31  ;;  %2150 = vmatmul.f32.vlgmr.msrb.gmra.mxu2 %v2012_v31 }
 0x370   :  { %v2006_v36 = vpop.f32.mrf.mxu3  ;;  %2340 = vmatpush.msra.mxu3 %v2218_v13  ;;  %2424 = vmatpush.msrb.mxu0 %v2383_v14  ;;  %v2362_v13 = vld [vmem:[#allocation8 + $0xa48] sm:$0xff]  ;;  %v2400_v14 = vld [vmem:[#allocation8 + $0xb78] sm:$0xff] }
 0x371   :  { %v2007_v38 = vadd.f32 %v2006_v36, %v1984_v35  ;;  %2470 = vmatpush.msrb.mxu2 %v2384_v15  ;;  %v2373_v35 = vld [vmem:[#allocation8 + $0xaa0] sm:$0xff]  ;;  %v2374_v36 = vld [vmem:[#allocation8 + $0xaa8] sm:$0xff]  ;;  %v2359_v15 = vld [vmem:[#allocation8 + $0xa30] sm:$0xff] }
 0x372   :  { %v1963_v39 = vpop.f32.mrf.mxu1  ;;  %v1986_v42 = vpop.f32.mrf.mxu2  ;;  %2425 = vmatpush.msrb.mxu0 %v2381_v16  ;;  %v2397_v16 = vld [vmem:[#allocation8 + $0xb60] sm:$0xff] }
 0x373   :  { %v2013_v40 = vmax.f32 %v2007_v38, 0.0  ;;  %v1964_v41 = vadd.f32 %v1963_v39, %v1941_v37  ;;  %v1987_v44 = vadd.f32 %v1986_v42, %v1917_v28  ;;  %2471 = vmatpush.msrb.mxu2 %v2382_v17  ;;  %v2412_v28 = vld [vmem:[#allocation8 + $0xbd8] sm:$0xff]  ;;  %v2407_v37 = vld [vmem:[#allocation8 + $0xbb0] sm:$0xff]  ;;  %v2406_v42 = vld [vmem:[#allocation8 + $0xba8] sm:$0xff] }
 0x374   :  { %2426 = vmatpush.msrb.mxu0 %v2379_v18  ;;  %v2408_v38 = vld [vmem:[#allocation8 + $0xbb8] sm:$0xff]  ;;  %v2371_v39 = vld [vmem:[#allocation8 + $0xa90] sm:$0xff]  ;;  %v2398_v18 = vld [vmem:[#allocation8 + $0xb68] sm:$0xff] }
 0x375   :  { %2127 = vmatmul.f32.vlgmr.msrb.gmra.mxu1 %v2013_v40  ;;  %2173 = vmatmul.f32.vlgmr.msrb.gmra.mxu3 %v2013_v40  ;;  %v2014_v43 = vmax.f32 %v1964_v41, 0.0  ;;  %v2372_v40 = vld [vmem:[#allocation8 + $0xa98] sm:$0xff]  ;;  %v2405_v41 = vld [vmem:[#allocation8 + $0xba0] sm:$0xff] }
 0x376   :  { %2447 = vmatpush.msrb.mxu1 %v2415_v20  ;;  %2493 = vmatpush.msrb.mxu3 %v2416_v21  ;;  %v2360_v17 = vld [vmem:[#allocation8 + $0xa38] sm:$0xff]  ;;  %v2395_v20 = vld [vmem:[#allocation8 + $0xb50] sm:$0xff]  ;;  %v2358_v21 = vld [vmem:[#allocation8 + $0xa28] sm:$0xff] }
 0x377   :  { %2107 = vmatmul.f32.gmra.mxu0 %v2014_v43  ;;  %2153 = vmatmul.f32.gmra.mxu2 %v2014_v43 }
 0x378   :  { %v2009_v45 = vpop.f32.mrf.mxu3  ;;  %2472 = vmatpush.msrb.mxu2 %v2380_v19  ;;  %2448 = vmatpush.msrb.mxu1 %v2413_v22  ;;  %v2357_v19 = vld [vmem:[#allocation8 + $0xa20] sm:$0xff]  ;;  %v2396_v22 = vld [vmem:[#allocation8 + $0xb58] sm:$0xff] }
 0x379   :  { %v2010_v46 = vadd.f32 %v2009_v45, %v1987_v44  ;;  %2494 = vmatpush.msrb.mxu3 %v2414_v25  ;;  %2427 = vmatpush.msrb.mxu0 %v2377_v23  ;;  %v2369_v44 = vld [vmem:[#allocation8 + $0xa80] sm:$0xff]  ;;  %v2370_v45 = vld [vmem:[#allocation8 + $0xa88] sm:$0xff]  ;;  %v2355_v23 = vld [vmem:[#allocation8 + $0xa10] sm:$0xff] }
 0x37a   :  { %2473 = vmatpush.msrb.mxu2 %v2378_v24  ;;  %2449 = vmatpush.msrb.mxu1 %v2411_v27  ;;  %v2393_v24 = vld [vmem:[#allocation8 + $0xb40] sm:$0xff]  ;;  %v2356_v25 = vld [vmem:[#allocation8 + $0xa18] sm:$0xff] }
 0x37b   :  { %v2015_v47 = vmax.f32 %v2010_v46, 0.0  ;;  %2495 = vmatpush.msrb.mxu3 %v2412_v28  ;;  %2428 = vmatpush.msrb.mxu0 %v2375_v29  ;;  %v2353_v27 = vld [vmem:[#allocation8 + $0xa00] sm:$0xff]  ;;  %v2391_v28 = vld [vmem:[#allocation8 + $0xb30] sm:$0xff]  ;;  %v2354_v29 = vld [vmem:[#allocation8 + $0xa08] sm:$0xff] }
 0x37c   :  { %2474 = vmatpush.msrb.mxu2 %v2376_v30  ;;  %2450 = vmatpush.msrb.mxu1 %v2409_v32  ;;  %v2392_v30 = vld [vmem:[#allocation8 + $0xb38] sm:$0xff]  ;;  %v2390_v32 = vld [vmem:[#allocation8 + $0xb28] sm:$0xff] }
 0x37d   :  { %2130 = vmatmul.f32.gmra.mxu1 %v2015_v47  ;;  %2176 = vmatmul.f32.gmra.mxu3 %v2015_v47 }
 0x37e   :  { %2496 = vmatpush.msrb.mxu3 %v2410_v33  ;;  %2429 = vmatpush.msrb.mxu0 %v2373_v35  ;;  %v2387_v33 = vld [vmem:[#allocation8 + $0xb10] sm:$0xff]  ;;  %v2385_v35 = vld [vmem:[#allocation8 + $0xb00] sm:$0xff] }
 0x37f   :  { %2475 = vmatpush.msrb.mxu2 %v2374_v36  ;;  %2451 = vmatpush.msrb.mxu1 %v2407_v37  ;;  %v2386_v36 = vld [vmem:[#allocation8 + $0xb08] sm:$0xff]  ;;  %v2551_v37 = vld [vmem:[#allocation8 + $0xcf0] sm:$0xff] }
 0x380   :  { %2497 = vmatpush.msrb.mxu3 %v2408_v38  ;;  %2430 = vmatpush.msrb.mxu0 %v2371_v39  ;;  %v2552_v38 = vld [vmem:[#allocation8 + $0xcf8] sm:$0xff]  ;;  %v2549_v39 = vld [vmem:[#allocation8 + $0xce0] sm:$0xff] }
 0x381   :  { %2476 = vmatpush.msrb.mxu2 %v2372_v40  ;;  %2452 = vmatpush.msrb.mxu1 %v2405_v41  ;;  %v2550_v40 = vld [vmem:[#allocation8 + $0xce8] sm:$0xff]  ;;  %v2547_v41 = vld [vmem:[#allocation8 + $0xcd0] sm:$0xff] }
 0x382   :  { %2498 = vmatpush.msrb.mxu3 %v2406_v42  ;;  %2431 = vmatpush.msrb.mxu0 %v2369_v44  ;;  %v2548_v42 = vld [vmem:[#allocation8 + $0xcd8] sm:$0xff] }
 0x383   :  { %2477 = vmatpush.msrb.mxu2 %v2370_v45  ;;  %2453 = vmatpush.msrb.mxu1 %v2403_v49  ;;  %v2584_v44 = vld [vmem:[#allocation8 + $0xdf8] sm:$0xff]  ;;  %v2581_v45 = vld [vmem:[#allocation8 + $0xde0] sm:$0xff]  ;;  %v2582_v49 = vld [vmem:[#allocation8 + $0xde8] sm:$0xff] }
 0x384   :  { %2499 = vmatpush.msrb.mxu3 %v2404_v50  ;;  %2432 = vmatpush.msrb.mxu0 %v2367_v53  ;;  %v6645_v50 = vld [vmem:[#allocation10 + $0x8] sm:$0x3]  ;;  %v2543_v53 = vld [vmem:[#allocation8 + $0xcb0] sm:$0xff] }
 0x385   :  { %2478 = vmatpush.msrb.mxu2 %v2368_v48  ;;  %2454 = vmatpush.msrb.mxu1 %v2401_v8  ;;  %v2544_v48 = vld [vmem:[#allocation8 + $0xcb8] sm:$0xff] }
 0x386   :  { %2433 = vmatpush.msrb.mxu0 %v2365_v55  ;;  %2500 = vmatpush.msrb.mxu3 %v2402_v10  ;;  %v2577_v55 = vld [vmem:[#allocation8 + $0xdc0] sm:$0xff]  ;;  %v2572_v8 = vld [vmem:[#allocation8 + $0xd98] sm:$0xff]  ;;  %v2253_v10 = vperm.slane %v6645_v50, 1 }
 0x387   :  { %2479 = vmatpush.msrb.mxu2 %v2366_v56  ;;  %2455 = vmatpush.msrb.mxu1 %v2399_v12  ;;  %v2578_v56 = vld [vmem:[#allocation8 + $0xdc8] sm:$0xff]  ;;  %v2536_v12 = vld [vmem:[#allocation8 + $0xc78] sm:$0xff] }
 0x388   :  { %2434 = vmatpush.msrb.mxu0 %v2363_v7  ;;  %2501 = vmatpush.msrb.mxu3 %v2400_v14  ;;  %v2571_v7 = vld [vmem:[#allocation8 + $0xd90] sm:$0xff]  ;;  %v2533_v14 = vld [vmem:[#allocation8 + $0xc60] sm:$0xff] }
 0x389   :  { %2480 = vmatpush.msrb.mxu2 %v2364_v9  ;;  %2456 = vmatpush.msrb.mxu1 %v2397_v16 }
 0x38a   :  { %2435 = vmatpush.msrb.mxu0 %v2361_v11  ;;  %2502 = vmatpush.msrb.mxu3 %v2398_v18  ;;  %v2535_v11 = vld [vmem:[#allocation8 + $0xc70] sm:$0xff] }
 0x38b   :  { %2481 = vmatpush.msrb.mxu2 %v2362_v13  ;;  %2457 = vmatpush.msrb.mxu1 %v2395_v20 }
 0x38c   :  { %2436 = vmatpush.msrb.mxu0 %v2359_v15  ;;  %2503 = vmatpush.msrb.mxu3 %v2396_v22  ;;  %v2534_v15 = vld [vmem:[#allocation8 + $0xc68] sm:$0xff] }
 0x38d   :  { %2482 = vmatpush.msrb.mxu2 %v2360_v17  ;;  %2458 = vmatpush.msrb.mxu1 %v2393_v24 }
 0x38e   :  { %2437 = vmatpush.msrb.mxu0 %v2357_v19  ;;  %2504 = vmatpush.msrb.mxu3 %v2394_v26 }
 0x38f   :  { %2483 = vmatpush.msrb.mxu2 %v2358_v21  ;;  %2459 = vmatpush.msrb.mxu1 %v2391_v28 }
 0x390   :  { %2438 = vmatpush.msrb.mxu0 %v2355_v23  ;;  %2505 = vmatpush.msrb.mxu3 %v2392_v30  ;;  %v2531_v30 = vld [vmem:[#allocation8 + $0xc50] sm:$0xff] }
 0x391   :  { %2484 = vmatpush.msrb.mxu2 %v2356_v25 }
 0x392   :  { %2439 = vmatpush.msrb.mxu0 %v2353_v27  ;;  %2506 = vmatpush.msrb.mxu3 %v2390_v32  ;;  %v2532_v32 = vld [vmem:[#allocation8 + $0xc58] sm:$0xff] }
 0x393   :  { %2485 = vmatpush.msrb.mxu2 %v2354_v29 }
 0x3ec   :  { %v2105_v31 = vpop.f32.mrf.mxu0 }
 0x3ed   :  { %v2106_v43 = vadd.f32 %v2105_v31, %v2084_v34  ;;  %v2389_v31 = vld [vmem:[#allocation8 + $0xb20] sm:$0xff] }
 0x3ee   :  { %2460 = vmatpush.msrb.mxu1 %v2389_v31  ;;  %v2569_v31 = vld [vmem:[#allocation8 + $0xd80] sm:$0xff] }
 0x3f0   :  { %2461 = vmatpush.msrb.mxu1 %v2387_v33  ;;  %v2570_v33 = vld [vmem:[#allocation8 + $0xd88] sm:$0xff] }
 0x3f2   :  { %v2128_v46 = vpop.f32.mrf.mxu1  ;;  %v2151_v47 = vpop.f32.mrf.mxu2  ;;  %2462 = vmatpush.msrb.mxu1 %v2385_v35  ;;  %v2567_v35 = vld [vmem:[#allocation8 + $0xd70] sm:$0xff] }
 0x3f3   :  { %v2129_v51 = vadd.f32 %v2128_v46, %v2106_v43  ;;  %v2152_v59 = vadd.f32 %v2151_v47, %v2085_v52  ;;  %v2583_v43 = vld [vmem:[#allocation8 + $0xdf0] sm:$0xff]  ;;  %v2545_v46 = vld [vmem:[#allocation8 + $0xcc0] sm:$0xff]  ;;  %v2546_v47 = vld [vmem:[#allocation8 + $0xcc8] sm:$0xff] }
 0x3f4   :  { %v2108_v58 = vpop.f32.mrf.mxu0 }
 0x3f5   :  { %v2180_v54 = vmax.f32 %v2129_v51, 0.0  ;;  %v2109_v61 = vadd.f32 %v2108_v58, %v2084_v34  ;;  %v2388_v34 = vld [vmem:[#allocation8 + $0xb18] sm:$0xff]  ;;  %v2579_v51 = vld [vmem:[#allocation8 + $0xdd0] sm:$0xff]  ;;  %v2252_v58 = vperm.slane %v6645_v50, 0  ;;  %v2562_v50 = vld [vmem:[#allocation8 + $0xd48] sm:$0xff] }
 0x3f6   :  { %2507 = vmatpush.msrb.mxu3 %v2388_v34  ;;  %v2529_v34 = vld [vmem:[#allocation8 + $0xc40] sm:$0xff] }
 0x3f7   :  { %2272 = vmatmul.f32.vlgmr.msra.gmra.mxu0 %v2180_v54  ;;  %2318 = vmatmul.f32.vlgmr.msra.gmra.mxu2 %v2180_v54 }
 0x3f8   :  { %v2174_v60 = vpop.f32.mrf.mxu3  ;;  %2508 = vmatpush.msrb.mxu3 %v2386_v36  ;;  %2592 = vmatpush.msra.mxu0 %v2551_v37  ;;  %v2530_v36 = vld [vmem:[#allocation8 + $0xc48] sm:$0xff]  ;;  %v2568_v37 = vld [vmem:[#allocation8 + $0xd78] sm:$0xff] }
 0x3f9   :  { %v2175_v62 = vadd.f32 %v2174_v60, %v2152_v59  ;;  %2638 = vmatpush.msra.mxu2 %v2552_v38  ;;  %v2541_v59 = vld [vmem:[#allocation8 + $0xca0] sm:$0xff]  ;;  %v2542_v60 = vld [vmem:[#allocation8 + $0xca8] sm:$0xff]  ;;  %v2527_v38 = vld [vmem:[#allocation8 + $0xc30] sm:$0xff] }
 0x3fa   :  { %v2131_v63 = vpop.f32.mrf.mxu1  ;;  %v2154_v0 = vpop.f32.mrf.mxu2  ;;  %2593 = vmatpush.msra.mxu0 %v2549_v39  ;;  %v2565_v39 = vld [vmem:[#allocation8 + $0xd60] sm:$0xff] }
 0x3fb   :  { %v2181_v1 = vmax.f32 %v2175_v62, 0.0  ;;  %v2132_v2 = vadd.f32 %v2131_v63, %v2109_v61  ;;  %v2155_v3 = vadd.f32 %v2154_v0, %v2085_v52  ;;  %2639 = vmatpush.msra.mxu2 %v2550_v40  ;;  %v2580_v52 = vld [vmem:[#allocation8 + $0xdd8] sm:$0xff]  ;;  %v2575_v61 = vld [vmem:[#allocation8 + $0xdb0] sm:$0xff]  ;;  %v2574_v0 = vld [vmem:[#allocation8 + $0xda8] sm:$0xff] }
 0x3fc   :  { %2594 = vmatpush.msra.mxu0 %v2547_v41  ;;  %v2576_v62 = vld [vmem:[#allocation8 + $0xdb8] sm:$0xff]  ;;  %v2539_v63 = vld [vmem:[#allocation8 + $0xc90] sm:$0xff]  ;;  %v2566_v41 = vld [vmem:[#allocation8 + $0xd68] sm:$0xff] }
 0x3fd   :  { %v2182_v57 = vmax.f32 %v2132_v2, 0.0  ;;  %2295 = vmatmul.f32.vlgmr.msra.gmra.mxu1 %v2181_v1  ;;  %2341 = vmatmul.f32.vlgmr.msra.gmra.mxu3 %v2181_v1  ;;  %v2540_v1 = vld [vmem:[#allocation8 + $0xc98] sm:$0xff]  ;;  %v2573_v2 = vld [vmem:[#allocation8 + $0xda0] sm:$0xff] }
 0x3fe   :  { %2615 = vmatpush.msra.mxu1 %v2583_v43  ;;  %2661 = vmatpush.msra.mxu3 %v2584_v44  ;;  %v2528_v40 = vld [vmem:[#allocation8 + $0xc38] sm:$0xff]  ;;  %v2563_v43 = vld [vmem:[#allocation8 + $0xd50] sm:$0xff]  ;;  %v2526_v44 = vld [vmem:[#allocation8 + $0xc28] sm:$0xff] }
 0x3ff   :  { %2275 = vmatmul.f32.gmra.mxu0 %v2182_v57  ;;  %2321 = vmatmul.f32.gmra.mxu2 %v2182_v57 }
 0x400   :  { %v2177_v4 = vpop.f32.mrf.mxu3  ;;  %2640 = vmatpush.msra.mxu2 %v2548_v42  ;;  %2616 = vmatpush.msra.mxu1 %v2581_v45  ;;  %v2525_v42 = vld [vmem:[#allocation8 + $0xc20] sm:$0xff]  ;;  %v2564_v45 = vld [vmem:[#allocation8 + $0xd58] sm:$0xff] }
 0x401   :  { %v2178_v5 = vadd.f32 %v2177_v4, %v2155_v3  ;;  %2662 = vmatpush.msra.mxu3 %v2582_v49  ;;  %2595 = vmatpush.msra.mxu0 %v2545_v46  ;;  %v2537_v3 = vld [vmem:[#allocation8 + $0xc80] sm:$0xff]  ;;  %v2538_v4 = vld [vmem:[#allocation8 + $0xc88] sm:$0xff]  ;;  %v2523_v46 = vld [vmem:[#allocation8 + $0xc10] sm:$0xff] }
 0x402   :  { %2641 = vmatpush.msra.mxu2 %v2546_v47  ;;  %2617 = vmatpush.msra.mxu1 %v2579_v51  ;;  %v2561_v47 = vld [vmem:[#allocation8 + $0xd40] sm:$0xff]  ;;  %v2524_v49 = vld [vmem:[#allocation8 + $0xc18] sm:$0xff] }
 0x403   :  { %v2183_v6 = vmax.f32 %v2178_v5, 0.0  ;;  %2663 = vmatpush.msra.mxu3 %v2580_v52  ;;  %2596 = vmatpush.msra.mxu0 %v2543_v53  ;;  %v2521_v51 = vld [vmem:[#allocation8 + $0xc00] sm:$0xff]  ;;  %v2559_v52 = vld [vmem:[#allocation8 + $0xd30] sm:$0xff]  ;;  %v2522_v53 = vld [vmem:[#allocation8 + $0xc08] sm:$0xff] }
 0x404   :  { %2642 = vmatpush.msra.mxu2 %v2544_v48  ;;  %2618 = vmatpush.msra.mxu1 %v2577_v55  ;;  %v2560_v48 = vld [vmem:[#allocation8 + $0xd38] sm:$0xff]  ;;  %v2558_v55 = vld [vmem:[#allocation8 + $0xd28] sm:$0xff] }
 0x405   :  { %2298 = vmatmul.f32.gmra.mxu1 %v2183_v6  ;;  %2344 = vmatmul.f32.gmra.mxu3 %v2183_v6 }
 0x406   :  { %2664 = vmatpush.msra.mxu3 %v2578_v56  ;;  %2597 = vmatpush.msra.mxu0 %v2541_v59  ;;  %v2555_v56 = vld [vmem:[#allocation8 + $0xd10] sm:$0xff]  ;;  %v2553_v59 = vld [vmem:[#allocation8 + $0xd00] sm:$0xff] }
 0x407   :  { %2643 = vmatpush.msra.mxu2 %v2542_v60  ;;  %2619 = vmatpush.msra.mxu1 %v2575_v61  ;;  %v2554_v60 = vld [vmem:[#allocation8 + $0xd08] sm:$0xff]  ;;  %v2719_v61 = vld [vmem:[#allocation8 + $0xef0] sm:$0xff] }
 0x408   :  { %2665 = vmatpush.msra.mxu3 %v2576_v62  ;;  %2598 = vmatpush.msra.mxu0 %v2539_v63  ;;  %v2720_v62 = vld [vmem:[#allocation8 + $0xef8] sm:$0xff]  ;;  %v2717_v63 = vld [vmem:[#allocation8 + $0xee0] sm:$0xff] }
 0x409   :  { %2644 = vmatpush.msra.mxu2 %v2540_v1  ;;  %2620 = vmatpush.msra.mxu1 %v2573_v2  ;;  %v2718_v1 = vld [vmem:[#allocation8 + $0xee8] sm:$0xff]  ;;  %v2715_v2 = vld [vmem:[#allocation8 + $0xed0] sm:$0xff] }
 0x40a   :  { %2666 = vmatpush.msra.mxu3 %v2574_v0  ;;  %2599 = vmatpush.msra.mxu0 %v2537_v3  ;;  %v2716_v0 = vld [vmem:[#allocation8 + $0xed8] sm:$0xff] }
 0x40b   :  { %2645 = vmatpush.msra.mxu2 %v2538_v4  ;;  %2621 = vmatpush.msra.mxu1 %v2571_v7  ;;  %v2752_v3 = vld [vmem:[#allocation8 + $0xff8] sm:$0xff]  ;;  %v2749_v4 = vld [vmem:[#allocation8 + $0xfe0] sm:$0xff]  ;;  %v2750_v7 = vld [vmem:[#allocation8 + $0xfe8] sm:$0xff] }
 0x40c   :  { %2667 = vmatpush.msra.mxu3 %v2572_v8  ;;  %2600 = vmatpush.msra.mxu0 %v2535_v11  ;;  %v6649_v8 = vld [vmem:[#allocation10 + $0xa] sm:$0x3]  ;;  %v2711_v11 = vld [vmem:[#allocation8 + $0xeb0] sm:$0xff] }
 0x40d   :  { %2646 = vmatpush.msra.mxu2 %v2536_v12  ;;  %2622 = vmatpush.msra.mxu1 %v2569_v31  ;;  %v2712_v12 = vld [vmem:[#allocation8 + $0xeb8] sm:$0xff] }
 0x40e   :  { %2601 = vmatpush.msra.mxu0 %v2533_v14  ;;  %2668 = vmatpush.msra.mxu3 %v2570_v33  ;;  %v2745_v14 = vld [vmem:[#allocation8 + $0xfc0] sm:$0xff]  ;;  %v2740_v31 = vld [vmem:[#allocation8 + $0xf98] sm:$0xff]  ;;  %v2421_v33 = vperm.slane %v6649_v8, 1 }
 0x40f   :  { %2647 = vmatpush.msra.mxu2 %v2534_v15  ;;  %2623 = vmatpush.msra.mxu1 %v2567_v35  ;;  %v2746_v15 = vld [vmem:[#allocation8 + $0xfc8] sm:$0xff]  ;;  %v2704_v35 = vld [vmem:[#allocation8 + $0xe78] sm:$0xff] }
 0x410   :  { %2602 = vmatpush.msra.mxu0 %v2531_v30  ;;  %2669 = vmatpush.msra.mxu3 %v2568_v37  ;;  %v2739_v30 = vld [vmem:[#allocation8 + $0xf90] sm:$0xff]  ;;  %v2701_v37 = vld [vmem:[#allocation8 + $0xe60] sm:$0xff] }
 0x411   :  { %2648 = vmatpush.msra.mxu2 %v2532_v32  ;;  %2624 = vmatpush.msra.mxu1 %v2565_v39 }
 0x412   :  { %2603 = vmatpush.msra.mxu0 %v2529_v34  ;;  %2670 = vmatpush.msra.mxu3 %v2566_v41  ;;  %v2703_v34 = vld [vmem:[#allocation8 + $0xe70] sm:$0xff] }
 0x413   :  { %2649 = vmatpush.msra.mxu2 %v2530_v36  ;;  %2625 = vmatpush.msra.mxu1 %v2563_v43 }
 0x414   :  { %2604 = vmatpush.msra.mxu0 %v2527_v38  ;;  %2671 = vmatpush.msra.mxu3 %v2564_v45  ;;  %v2702_v38 = vld [vmem:[#allocation8 + $0xe68] sm:$0xff] }
 0x415   :  { %2650 = vmatpush.msra.mxu2 %v2528_v40  ;;  %2626 = vmatpush.msra.mxu1 %v2561_v47 }
 0x416   :  { %2605 = vmatpush.msra.mxu0 %v2525_v42  ;;  %2672 = vmatpush.msra.mxu3 %v2562_v50 }
 0x417   :  { %2651 = vmatpush.msra.mxu2 %v2526_v44  ;;  %2627 = vmatpush.msra.mxu1 %v2559_v52 }
 0x418   :  { %2606 = vmatpush.msra.mxu0 %v2523_v46  ;;  %2673 = vmatpush.msra.mxu3 %v2560_v48  ;;  %v2699_v48 = vld [vmem:[#allocation8 + $0xe50] sm:$0xff] }
 0x419   :  { %2652 = vmatpush.msra.mxu2 %v2524_v49 }
 0x41a   :  { %2607 = vmatpush.msra.mxu0 %v2521_v51  ;;  %2674 = vmatpush.msra.mxu3 %v2558_v55  ;;  %v2700_v55 = vld [vmem:[#allocation8 + $0xe58] sm:$0xff] }
 0x41b   :  { %2653 = vmatpush.msra.mxu2 %v2522_v53 }
 0x474   :  { %v2273_v54 = vpop.f32.mrf.mxu0 }
 0x475   :  { %v2274_v57 = vadd.f32 %v2273_v54, %v2252_v58  ;;  %v2557_v54 = vld [vmem:[#allocation8 + $0xd20] sm:$0xff] }
 0x476   :  { %2628 = vmatpush.msra.mxu1 %v2557_v54  ;;  %v2737_v54 = vld [vmem:[#allocation8 + $0xf80] sm:$0xff] }
 0x478   :  { %2629 = vmatpush.msra.mxu1 %v2555_v56  ;;  %v2738_v56 = vld [vmem:[#allocation8 + $0xf88] sm:$0xff] }
 0x47a   :  { %v2296_v5 = vpop.f32.mrf.mxu1  ;;  %v2319_v6 = vpop.f32.mrf.mxu2  ;;  %2630 = vmatpush.msra.mxu1 %v2553_v59  ;;  %v2735_v59 = vld [vmem:[#allocation8 + $0xf70] sm:$0xff] }
 0x47b   :  { %v2297_v9 = vadd.f32 %v2296_v5, %v2274_v57  ;;  %v2320_v17 = vadd.f32 %v2319_v6, %v2253_v10  ;;  %v2751_v57 = vld [vmem:[#allocation8 + $0xff0] sm:$0xff]  ;;  %v2713_v5 = vld [vmem:[#allocation8 + $0xec0] sm:$0xff]  ;;  %v2714_v6 = vld [vmem:[#allocation8 + $0xec8] sm:$0xff] }
 0x47c   :  { %v2276_v16 = vpop.f32.mrf.mxu0 }
 0x47d   :  { %v2348_v13 = vmax.f32 %v2297_v9, 0.0  ;;  %v2277_v19 = vadd.f32 %v2276_v16, %v2252_v58  ;;  %v2556_v58 = vld [vmem:[#allocation8 + $0xd18] sm:$0xff]  ;;  %v2747_v9 = vld [vmem:[#allocation8 + $0xfd0] sm:$0xff]  ;;  %v2420_v16 = vperm.slane %v6649_v8, 0  ;;  %v2730_v8 = vld [vmem:[#allocation8 + $0xf48] sm:$0xff] }
 0x47e   :  { %2675 = vmatpush.msra.mxu3 %v2556_v58  ;;  %v2697_v58 = vld [vmem:[#allocation8 + $0xe40] sm:$0xff] }
 0x47f   :  { %2440 = vmatmul.f32.vlgmr.msrb.gmra.mxu0 %v2348_v13  ;;  %2486 = vmatmul.f32.vlgmr.msrb.gmra.mxu2 %v2348_v13 }
 0x480   :  { %v2342_v18 = vpop.f32.mrf.mxu3  ;;  %2676 = vmatpush.msra.mxu3 %v2554_v60  ;;  %2760 = vmatpush.msrb.mxu0 %v2719_v61  ;;  %v2698_v60 = vld [vmem:[#allocation8 + $0xe48] sm:$0xff]  ;;  %v2736_v61 = vld [vmem:[#allocation8 + $0xf78] sm:$0xff] }
 0x481   :  { %v2343_v20 = vadd.f32 %v2342_v18, %v2320_v17  ;;  %2806 = vmatpush.msrb.mxu2 %v2720_v62  ;;  %v2709_v17 = vld [vmem:[#allocation8 + $0xea0] sm:$0xff]  ;;  %v2710_v18 = vld [vmem:[#allocation8 + $0xea8] sm:$0xff]  ;;  %v2695_v62 = vld [vmem:[#allocation8 + $0xe30] sm:$0xff] }
 0x482   :  { %v2299_v21 = vpop.f32.mrf.mxu1  ;;  %v2322_v24 = vpop.f32.mrf.mxu2  ;;  %2761 = vmatpush.msrb.mxu0 %v2717_v63  ;;  %v2733_v63 = vld [vmem:[#allocation8 + $0xf60] sm:$0xff] }
 0x483   :  { %v2349_v22 = vmax.f32 %v2343_v20, 0.0  ;;  %v2300_v23 = vadd.f32 %v2299_v21, %v2277_v19  ;;  %v2323_v26 = vadd.f32 %v2322_v24, %v2253_v10  ;;  %2807 = vmatpush.msrb.mxu2 %v2718_v1  ;;  %v2748_v10 = vld [vmem:[#allocation8 + $0xfd8] sm:$0xff]  ;;  %v2743_v19 = vld [vmem:[#allocation8 + $0xfb0] sm:$0xff]  ;;  %v2742_v24 = vld [vmem:[#allocation8 + $0xfa8] sm:$0xff] }
 0x484   :  { %2762 = vmatpush.msrb.mxu0 %v2715_v2  ;;  %v2744_v20 = vld [vmem:[#allocation8 + $0xfb8] sm:$0xff]  ;;  %v2707_v21 = vld [vmem:[#allocation8 + $0xe90] sm:$0xff]  ;;  %v2734_v2 = vld [vmem:[#allocation8 + $0xf68] sm:$0xff] }
 0x485   :  { %v2350_v25 = vmax.f32 %v2300_v23, 0.0  ;;  %2463 = vmatmul.f32.vlgmr.msrb.gmra.mxu1 %v2349_v22  ;;  %2509 = vmatmul.f32.vlgmr.msrb.gmra.mxu3 %v2349_v22  ;;  %v2708_v22 = vld [vmem:[#allocation8 + $0xe98] sm:$0xff]  ;;  %v2741_v23 = vld [vmem:[#allocation8 + $0xfa0] sm:$0xff] }
 0x486   :  { %2783 = vmatpush.msrb.mxu1 %v2751_v57  ;;  %2829 = vmatpush.msrb.mxu3 %v2752_v3  ;;  %v2696_v1 = vld [vmem:[#allocation8 + $0xe38] sm:$0xff]  ;;  %v2731_v57 = vld [vmem:[#allocation8 + $0xf50] sm:$0xff]  ;;  %v2694_v3 = vld [vmem:[#allocation8 + $0xe28] sm:$0xff] }
 0x487   :  { %2443 = vmatmul.f32.gmra.mxu0 %v2350_v25  ;;  %2489 = vmatmul.f32.gmra.mxu2 %v2350_v25 }
 0x488   :  { %v2345_v27 = vpop.f32.mrf.mxu3  ;;  %2808 = vmatpush.msrb.mxu2 %v2716_v0  ;;  %2784 = vmatpush.msrb.mxu1 %v2749_v4  ;;  %v2693_v0 = vld [vmem:[#allocation8 + $0xe20] sm:$0xff]  ;;  %v2732_v4 = vld [vmem:[#allocation8 + $0xf58] sm:$0xff] }
 0x489   :  { %v2346_v28 = vadd.f32 %v2345_v27, %v2323_v26  ;;  %2830 = vmatpush.msrb.mxu3 %v2750_v7  ;;  %2763 = vmatpush.msrb.mxu0 %v2713_v5  ;;  %v2705_v26 = vld [vmem:[#allocation8 + $0xe80] sm:$0xff]  ;;  %v2706_v27 = vld [vmem:[#allocation8 + $0xe88] sm:$0xff]  ;;  %v2691_v5 = vld [vmem:[#allocation8 + $0xe10] sm:$0xff] }
 0x48a   :  { %2809 = vmatpush.msrb.mxu2 %v2714_v6  ;;  %2785 = vmatpush.msrb.mxu1 %v2747_v9  ;;  %v2729_v6 = vld [vmem:[#allocation8 + $0xf40] sm:$0xff]  ;;  %v2692_v7 = vld [vmem:[#allocation8 + $0xe18] sm:$0xff] }
 0x48b   :  { %v2351_v29 = vmax.f32 %v2346_v28, 0.0  ;;  %2831 = vmatpush.msrb.mxu3 %v2748_v10  ;;  %2764 = vmatpush.msrb.mxu0 %v2711_v11  ;;  %v2689_v9 = vld [vmem:[#allocation8 + $0xe00] sm:$0xff]  ;;  %v2727_v10 = vld [vmem:[#allocation8 + $0xf30] sm:$0xff]  ;;  %v2690_v11 = vld [vmem:[#allocation8 + $0xe08] sm:$0xff] }
 0x48c   :  { %2810 = vmatpush.msrb.mxu2 %v2712_v12  ;;  %2786 = vmatpush.msrb.mxu1 %v2745_v14  ;;  %v2728_v12 = vld [vmem:[#allocation8 + $0xf38] sm:$0xff]  ;;  %v2726_v14 = vld [vmem:[#allocation8 + $0xf28] sm:$0xff] }
 0x48d   :  { %2466 = vmatmul.f32.gmra.mxu1 %v2351_v29  ;;  %2512 = vmatmul.f32.gmra.mxu3 %v2351_v29 }
 0x48e   :  { %2832 = vmatpush.msrb.mxu3 %v2746_v15  ;;  %2765 = vmatpush.msrb.mxu0 %v2709_v17  ;;  %v2723_v15 = vld [vmem:[#allocation8 + $0xf10] sm:$0xff]  ;;  %v2721_v17 = vld [vmem:[#allocation8 + $0xf00] sm:$0xff] }
 0x48f   :  { %2811 = vmatpush.msrb.mxu2 %v2710_v18  ;;  %2787 = vmatpush.msrb.mxu1 %v2743_v19  ;;  %v2722_v18 = vld [vmem:[#allocation8 + $0xf08] sm:$0xff]  ;;  %v2887_v19 = vld [vmem:[#allocation8 + $0x10f0] sm:$0xff] }
 0x490   :  { %2833 = vmatpush.msrb.mxu3 %v2744_v20  ;;  %2766 = vmatpush.msrb.mxu0 %v2707_v21  ;;  %v2888_v20 = vld [vmem:[#allocation8 + $0x10f8] sm:$0xff]  ;;  %v2885_v21 = vld [vmem:[#allocation8 + $0x10e0] sm:$0xff] }
 0x491   :  { %2812 = vmatpush.msrb.mxu2 %v2708_v22  ;;  %2788 = vmatpush.msrb.mxu1 %v2741_v23  ;;  %v2886_v22 = vld [vmem:[#allocation8 + $0x10e8] sm:$0xff]  ;;  %v2883_v23 = vld [vmem:[#allocation8 + $0x10d0] sm:$0xff] }
 0x492   :  { %2834 = vmatpush.msrb.mxu3 %v2742_v24  ;;  %2767 = vmatpush.msrb.mxu0 %v2705_v26  ;;  %v2884_v24 = vld [vmem:[#allocation8 + $0x10d8] sm:$0xff] }
 0x493   :  { %2813 = vmatpush.msrb.mxu2 %v2706_v27  ;;  %2789 = vmatpush.msrb.mxu1 %v2739_v30  ;;  %v2920_v26 = vld [vmem:[#allocation8 + $0x11f8] sm:$0xff]  ;;  %v2917_v27 = vld [vmem:[#allocation8 + $0x11e0] sm:$0xff]  ;;  %v2918_v30 = vld [vmem:[#allocation8 + $0x11e8] sm:$0xff] }
 0x494   :  { %2835 = vmatpush.msrb.mxu3 %v2740_v31  ;;  %2768 = vmatpush.msrb.mxu0 %v2703_v34  ;;  %v6653_v31 = vld [vmem:[#allocation10 + $0xc] sm:$0x3]  ;;  %v2879_v34 = vld [vmem:[#allocation8 + $0x10b0] sm:$0xff] }
 0x495   :  { %2814 = vmatpush.msrb.mxu2 %v2704_v35  ;;  %2790 = vmatpush.msrb.mxu1 %v2737_v54  ;;  %v2880_v35 = vld [vmem:[#allocation8 + $0x10b8] sm:$0xff] }
 0x496   :  { %2769 = vmatpush.msrb.mxu0 %v2701_v37  ;;  %2836 = vmatpush.msrb.mxu3 %v2738_v56  ;;  %v2913_v37 = vld [vmem:[#allocation8 + $0x11c0] sm:$0xff]  ;;  %v2908_v54 = vld [vmem:[#allocation8 + $0x1198] sm:$0xff]  ;;  %v2589_v56 = vperm.slane %v6653_v31, 1 }
 0x497   :  { %2815 = vmatpush.msrb.mxu2 %v2702_v38  ;;  %2791 = vmatpush.msrb.mxu1 %v2735_v59  ;;  %v2914_v38 = vld [vmem:[#allocation8 + $0x11c8] sm:$0xff]  ;;  %v2872_v59 = vld [vmem:[#allocation8 + $0x1078] sm:$0xff] }
 0x498   :  { %2770 = vmatpush.msrb.mxu0 %v2699_v48  ;;  %2837 = vmatpush.msrb.mxu3 %v2736_v61  ;;  %v2907_v48 = vld [vmem:[#allocation8 + $0x1190] sm:$0xff]  ;;  %v2869_v61 = vld [vmem:[#allocation8 + $0x1060] sm:$0xff] }
 0x499   :  { %2816 = vmatpush.msrb.mxu2 %v2700_v55  ;;  %2792 = vmatpush.msrb.mxu1 %v2733_v63 }
 0x49a   :  { %2771 = vmatpush.msrb.mxu0 %v2697_v58  ;;  %2838 = vmatpush.msrb.mxu3 %v2734_v2  ;;  %v2871_v58 = vld [vmem:[#allocation8 + $0x1070] sm:$0xff] }
 0x49b   :  { %2817 = vmatpush.msrb.mxu2 %v2698_v60  ;;  %2793 = vmatpush.msrb.mxu1 %v2731_v57 }
 0x49c   :  { %2772 = vmatpush.msrb.mxu0 %v2695_v62  ;;  %2839 = vmatpush.msrb.mxu3 %v2732_v4  ;;  %v2870_v62 = vld [vmem:[#allocation8 + $0x1068] sm:$0xff] }
 0x49d   :  { %2818 = vmatpush.msrb.mxu2 %v2696_v1  ;;  %2794 = vmatpush.msrb.mxu1 %v2729_v6 }
 0x49e   :  { %2773 = vmatpush.msrb.mxu0 %v2693_v0  ;;  %2840 = vmatpush.msrb.mxu3 %v2730_v8 }
 0x49f   :  { %2819 = vmatpush.msrb.mxu2 %v2694_v3  ;;  %2795 = vmatpush.msrb.mxu1 %v2727_v10 }
 0x4a0   :  { %2774 = vmatpush.msrb.mxu0 %v2691_v5  ;;  %2841 = vmatpush.msrb.mxu3 %v2728_v12  ;;  %v2867_v12 = vld [vmem:[#allocation8 + $0x1050] sm:$0xff] }
 0x4a1   :  { %2820 = vmatpush.msrb.mxu2 %v2692_v7 }
 0x4a2   :  { %2775 = vmatpush.msrb.mxu0 %v2689_v9  ;;  %2842 = vmatpush.msrb.mxu3 %v2726_v14  ;;  %v2868_v14 = vld [vmem:[#allocation8 + $0x1058] sm:$0xff] }
 0x4a3   :  { %2821 = vmatpush.msrb.mxu2 %v2690_v11 }
 0x4fc   :  { %v2441_v13 = vpop.f32.mrf.mxu0 }
 0x4fd   :  { %v2442_v25 = vadd.f32 %v2441_v13, %v2420_v16  ;;  %v2725_v13 = vld [vmem:[#allocation8 + $0xf20] sm:$0xff] }
 0x4fe   :  { %2796 = vmatpush.msrb.mxu1 %v2725_v13  ;;  %v2905_v13 = vld [vmem:[#allocation8 + $0x1180] sm:$0xff] }
 0x500   :  { %2797 = vmatpush.msrb.mxu1 %v2723_v15  ;;  %v2906_v15 = vld [vmem:[#allocation8 + $0x1188] sm:$0xff] }
 0x502   :  { %v2464_v28 = vpop.f32.mrf.mxu1  ;;  %v2487_v29 = vpop.f32.mrf.mxu2  ;;  %2798 = vmatpush.msrb.mxu1 %v2721_v17  ;;  %v2903_v17 = vld [vmem:[#allocation8 + $0x1170] sm:$0xff] }
 0x503   :  { %v2465_v32 = vadd.f32 %v2464_v28, %v2442_v25  ;;  %v2488_v40 = vadd.f32 %v2487_v29, %v2421_v33  ;;  %v2919_v25 = vld [vmem:[#allocation8 + $0x11f0] sm:$0xff]  ;;  %v2881_v28 = vld [vmem:[#allocation8 + $0x10c0] sm:$0xff]  ;;  %v2882_v29 = vld [vmem:[#allocation8 + $0x10c8] sm:$0xff] }
 0x504   :  { %v2444_v39 = vpop.f32.mrf.mxu0 }
 0x505   :  { %v2516_v36 = vmax.f32 %v2465_v32, 0.0  ;;  %v2445_v42 = vadd.f32 %v2444_v39, %v2420_v16  ;;  %v2724_v16 = vld [vmem:[#allocation8 + $0xf18] sm:$0xff]  ;;  %v2915_v32 = vld [vmem:[#allocation8 + $0x11d0] sm:$0xff]  ;;  %v2588_v39 = vperm.slane %v6653_v31, 0  ;;  %v2898_v31 = vld [vmem:[#allocation8 + $0x1148] sm:$0xff] }
 0x506   :  { %2843 = vmatpush.msrb.mxu3 %v2724_v16  ;;  %v2865_v16 = vld [vmem:[#allocation8 + $0x1040] sm:$0xff] }
 0x507   :  { %2608 = vmatmul.f32.vlgmr.msra.gmra.mxu0 %v2516_v36  ;;  %2654 = vmatmul.f32.vlgmr.msra.gmra.mxu2 %v2516_v36 }
 0x508   :  { %v2510_v41 = vpop.f32.mrf.mxu3  ;;  %2844 = vmatpush.msrb.mxu3 %v2722_v18  ;;  %2928 = vmatpush.msra.mxu0 %v2887_v19  ;;  %v2866_v18 = vld [vmem:[#allocation8 + $0x1048] sm:$0xff]  ;;  %v2904_v19 = vld [vmem:[#allocation8 + $0x1178] sm:$0xff] }
 0x509   :  { %v2511_v43 = vadd.f32 %v2510_v41, %v2488_v40  ;;  %2974 = vmatpush.msra.mxu2 %v2888_v20  ;;  %v2877_v40 = vld [vmem:[#allocation8 + $0x10a0] sm:$0xff]  ;;  %v2878_v41 = vld [vmem:[#allocation8 + $0x10a8] sm:$0xff]  ;;  %v2863_v20 = vld [vmem:[#allocation8 + $0x1030] sm:$0xff] }
 0x50a   :  { %v2467_v44 = vpop.f32.mrf.mxu1  ;;  %v2490_v47 = vpop.f32.mrf.mxu2  ;;  %2929 = vmatpush.msra.mxu0 %v2885_v21  ;;  %v2901_v21 = vld [vmem:[#allocation8 + $0x1160] sm:$0xff] }
 0x50b   :  { %v2517_v45 = vmax.f32 %v2511_v43, 0.0  ;;  %v2468_v46 = vadd.f32 %v2467_v44, %v2445_v42  ;;  %v2491_v50 = vadd.f32 %v2490_v47, %v2421_v33  ;;  %2975 = vmatpush.msra.mxu2 %v2886_v22  ;;  %v2916_v33 = vld [vmem:[#allocation8 + $0x11d8] sm:$0xff]  ;;  %v2911_v42 = vld [vmem:[#allocation8 + $0x11b0] sm:$0xff]  ;;  %v2910_v47 = vld [vmem:[#allocation8 + $0x11a8] sm:$0xff] }
 0x50c   :  { %2930 = vmatpush.msra.mxu0 %v2883_v23  ;;  %v2912_v43 = vld [vmem:[#allocation8 + $0x11b8] sm:$0xff]  ;;  %v2875_v44 = vld [vmem:[#allocation8 + $0x1090] sm:$0xff]  ;;  %v2902_v23 = vld [vmem:[#allocation8 + $0x1168] sm:$0xff] }
 0x50d   :  { %v2518_v49 = vmax.f32 %v2468_v46, 0.0  ;;  %2631 = vmatmul.f32.vlgmr.msra.gmra.mxu1 %v2517_v45  ;;  %2677 = vmatmul.f32.vlgmr.msra.gmra.mxu3 %v2517_v45  ;;  %v2876_v45 = vld [vmem:[#allocation8 + $0x1098] sm:$0xff]  ;;  %v2909_v46 = vld [vmem:[#allocation8 + $0x11a0] sm:$0xff] }
 0x50e   :  { %2951 = vmatpush.msra.mxu1 %v2919_v25  ;;  %2997 = vmatpush.msra.mxu3 %v2920_v26  ;;  %v2864_v22 = vld [vmem:[#allocation8 + $0x1038] sm:$0xff]  ;;  %v2899_v25 = vld [vmem:[#allocation8 + $0x1150] sm:$0xff]  ;;  %v2862_v26 = vld [vmem:[#allocation8 + $0x1028] sm:$0xff] }
 0x50f   :  { %2611 = vmatmul.f32.gmra.mxu0 %v2518_v49  ;;  %2657 = vmatmul.f32.gmra.mxu2 %v2518_v49 }
 0x510   :  { %v2513_v51 = vpop.f32.mrf.mxu3  ;;  %2976 = vmatpush.msra.mxu2 %v2884_v24  ;;  %2952 = vmatpush.msra.mxu1 %v2917_v27  ;;  %v2861_v24 = vld [vmem:[#allocation8 + $0x1020] sm:$0xff]  ;;  %v2900_v27 = vld [vmem:[#allocation8 + $0x1158] sm:$0xff] }
 0x511   :  { %v2514_v52 = vadd.f32 %v2513_v51, %v2491_v50  ;;  %2998 = vmatpush.msra.mxu3 %v2918_v30  ;;  %2931 = vmatpush.msra.mxu0 %v2881_v28  ;;  %v2873_v50 = vld [vmem:[#allocation8 + $0x1080] sm:$0xff]  ;;  %v2874_v51 = vld [vmem:[#allocation8 + $0x1088] sm:$0xff]  ;;  %v2859_v28 = vld [vmem:[#allocation8 + $0x1010] sm:$0xff] }
 0x512   :  { %2977 = vmatpush.msra.mxu2 %v2882_v29  ;;  %2953 = vmatpush.msra.mxu1 %v2915_v32  ;;  %v2897_v29 = vld [vmem:[#allocation8 + $0x1140] sm:$0xff]  ;;  %v2860_v30 = vld [vmem:[#allocation8 + $0x1018] sm:$0xff] }
 0x513   :  { %v2519_v53 = vmax.f32 %v2514_v52, 0.0  ;;  %2999 = vmatpush.msra.mxu3 %v2916_v33  ;;  %2932 = vmatpush.msra.mxu0 %v2879_v34  ;;  %v2857_v32 = vld [vmem:[#allocation8 + $0x1000] sm:$0xff]  ;;  %v2895_v33 = vld [vmem:[#allocation8 + $0x1130] sm:$0xff]  ;;  %v2858_v34 = vld [vmem:[#allocation8 + $0x1008] sm:$0xff] }
 0x514   :  { %2978 = vmatpush.msra.mxu2 %v2880_v35  ;;  %2954 = vmatpush.msra.mxu1 %v2913_v37  ;;  %v2896_v35 = vld [vmem:[#allocation8 + $0x1138] sm:$0xff]  ;;  %v2894_v37 = vld [vmem:[#allocation8 + $0x1128] sm:$0xff] }
 0x515   :  { %2634 = vmatmul.f32.gmra.mxu1 %v2519_v53  ;;  %2680 = vmatmul.f32.gmra.mxu3 %v2519_v53 }
 0x516   :  { %3000 = vmatpush.msra.mxu3 %v2914_v38  ;;  %2933 = vmatpush.msra.mxu0 %v2877_v40  ;;  %v2891_v38 = vld [vmem:[#allocation8 + $0x1110] sm:$0xff]  ;;  %v2889_v40 = vld [vmem:[#allocation8 + $0x1100] sm:$0xff] }
 0x517   :  { %2979 = vmatpush.msra.mxu2 %v2878_v41  ;;  %2955 = vmatpush.msra.mxu1 %v2911_v42  ;;  %v2890_v41 = vld [vmem:[#allocation8 + $0x1108] sm:$0xff]  ;;  %v3039_v42 = vld [vmem:[%s6916_s5 + $0x78] sm:$0xff] }
 0x518   :  { %3001 = vmatpush.msra.mxu3 %v2912_v43  ;;  %2934 = vmatpush.msra.mxu0 %v2875_v44  ;;  %v3038_v43 = vld [vmem:[%s6916_s5 + $0x70] sm:$0xff]  ;;  %v3055_v44 = vld [vmem:[%s6916_s5 + $0xf8] sm:$0xff] }
 0x519   :  { %2980 = vmatpush.msra.mxu2 %v2876_v45  ;;  %2956 = vmatpush.msra.mxu1 %v2909_v46  ;;  %v3037_v45 = vld [vmem:[%s6916_s5 + $0x68] sm:$0xff]  ;;  %v3054_v46 = vld [vmem:[%s6916_s5 + $0xf0] sm:$0xff] }
 0x51a   :  { %3002 = vmatpush.msra.mxu3 %v2910_v47  ;;  %2935 = vmatpush.msra.mxu0 %v2873_v50  ;;  %v3053_v47 = vld [vmem:[%s6916_s5 + $0xe8] sm:$0xff]  ;;  %v2754_v50 = vld [vmem:[#allocation10 + $0xe] sm:$0x3] }
 0x51b   :  { %2981 = vmatpush.msra.mxu2 %v2874_v51  ;;  %2957 = vmatpush.msra.mxu1 %v2907_v48  ;;  %v3052_v51 = vld [vmem:[%s6916_s5 + $0xe0] sm:$0xff]  ;;  %v3051_v48 = vld [vmem:[%s6916_s5 + $0xd8] sm:$0xff] }
 0x51c   :  { %3003 = vmatpush.msra.mxu3 %v2908_v54  ;;  %2936 = vmatpush.msra.mxu0 %v2871_v58  ;;  %v2756_v54 = vperm.slane %v2754_v50, 0  ;;  %v3033_v58 = vld [vmem:[%s6916_s5 + $0x48] sm:$0xff] }
 0x51d   :  { %2982 = vmatpush.msra.mxu2 %v2872_v59  ;;  %2958 = vmatpush.msra.mxu1 %v2905_v13  ;;  %v3049_v59 = vld [vmem:[%s6916_s5 + $0xc8] sm:$0xff] }
 0x51e   :  { %2937 = vmatpush.msra.mxu0 %v2869_v61  ;;  %3004 = vmatpush.msra.mxu3 %v2906_v15  ;;  %v3032_v61 = vld [vmem:[%s6916_s5 + $0x40] sm:$0xff] }
 0x51f   :  { %2983 = vmatpush.msra.mxu2 %v2870_v62  ;;  %2959 = vmatpush.msra.mxu1 %v2903_v17 }
 0x520   :  { %2938 = vmatpush.msra.mxu0 %v2867_v12  ;;  %3005 = vmatpush.msra.mxu3 %v2904_v19  ;;  %v3048_v19 = vld [vmem:[%s6916_s5 + $0xc0] sm:$0xff] }
 0x521   :  { %2984 = vmatpush.msra.mxu2 %v2868_v14  ;;  %2960 = vmatpush.msra.mxu1 %v2901_v21  ;;  %v3047_v21 = vld [vmem:[%s6916_s5 + $0xb8] sm:$0xff] }
 0x522   :  { %2939 = vmatpush.msra.mxu0 %v2865_v16  ;;  %3006 = vmatpush.msra.mxu3 %v2902_v23  ;;  %v3046_v23 = vld [vmem:[%s6916_s5 + $0xb0] sm:$0xff] }
 0x523   :  { %2985 = vmatpush.msra.mxu2 %v2866_v18  ;;  %2961 = vmatpush.msra.mxu1 %v2899_v25  ;;  %v3029_v18 = vld [vmem:[%s6916_s5 + $0x28] sm:$0xff] }
 0x524   :  { %2940 = vmatpush.msra.mxu0 %v2863_v20  ;;  %3007 = vmatpush.msra.mxu3 %v2900_v27  ;;  %v3028_v20 = vld [vmem:[%s6916_s5 + $0x20] sm:$0xff]  ;;  %v3045_v25 = vld [vmem:[%s6916_s5 + $0xa8] sm:$0xff] }
 0x525   :  { %2986 = vmatpush.msra.mxu2 %v2864_v22  ;;  %2962 = vmatpush.msra.mxu1 %v2897_v29  ;;  %v3027_v22 = vld [vmem:[%s6916_s5 + $0x18] sm:$0xff]  ;;  %v3044_v27 = vld [vmem:[%s6916_s5 + $0xa0] sm:$0xff] }
 0x526   :  { %2941 = vmatpush.msra.mxu0 %v2861_v24  ;;  %3008 = vmatpush.msra.mxu3 %v2898_v31  ;;  %v3026_v24 = vld [vmem:[%s6916_s5 + $0x10] sm:$0xff]  ;;  %v3043_v29 = vld [vmem:[%s6916_s5 + $0x98] sm:$0xff]  ;;  %v3041_v31 = vld [vmem:[%s6916_s5 + $0x88] sm:$0xff] }
 0x527   :  { %2987 = vmatpush.msra.mxu2 %v2862_v26  ;;  %2963 = vmatpush.msra.mxu1 %v2895_v33  ;;  %v3025_v26 = vld [vmem:[%s6916_s5 + $0x8] sm:$0xff] }
 0x528   :  { %2942 = vmatpush.msra.mxu0 %v2859_v28  ;;  %3009 = vmatpush.msra.mxu3 %v2896_v35  ;;  %v3024_v28 = vld [vmem:[%s6916_s5] sm:$0xff]  ;;  %v3118_v35 = vld [vmem:[#allocation13 + $0x60] sm:$0xff] }
 0x529   :  { %2988 = vmatpush.msra.mxu2 %v2860_v30  ;;  %v3042_v30 = vld [vmem:[%s6916_s5 + $0x90] sm:$0xff]  ;;  %v3120_v33 = vld [vmem:[#allocation13 + $0x70] sm:$0xff] }
 0x52a   :  { %2943 = vmatpush.msra.mxu0 %v2857_v32  ;;  %3010 = vmatpush.msra.mxu3 %v2894_v37  ;;  %v3040_v32 = vld [vmem:[%s6916_s5 + $0x80] sm:$0xff] }
 0x52b   :  { %2989 = vmatpush.msra.mxu2 %v2858_v34  ;;  %v3121_v34 = vld [vmem:[#allocation13 + $0x78] sm:$0xff]  ;;  %v3116_v37 = vld [vmem:[#allocation13 + $0x50] sm:$0xff] }
 0x584   :  { %v2609_v36 = vpop.f32.mrf.mxu0 }
 0x585   :  { %v2610_v49 = vadd.f32 %v2609_v36, %v2588_v39  ;;  %v2893_v36 = vld [vmem:[#allocation8 + $0x1120] sm:$0xff] }
 0x586   :  { %2964 = vmatpush.msra.mxu1 %v2893_v36  ;;  %v3119_v36 = vld [vmem:[#allocation13 + $0x68] sm:$0xff] }
 0x588   :  { %2965 = vmatpush.msra.mxu1 %v2891_v38  ;;  %v3117_v38 = vld [vmem:[#allocation13 + $0x58] sm:$0xff] }
 0x58a   :  { %v2632_v52 = vpop.f32.mrf.mxu1  ;;  %v2655_v53 = vpop.f32.mrf.mxu2  ;;  %2966 = vmatpush.msra.mxu1 %v2889_v40 }
 0x58b   :  { %v2633_v55 = vadd.f32 %v2632_v52, %v2610_v49  ;;  %v2656_v1 = vadd.f32 %v2655_v53, %v2589_v56  ;;  %v3036_v49 = vld [vmem:[%s6916_s5 + $0x60] sm:$0xff]  ;;  %v3035_v52 = vld [vmem:[%s6916_s5 + $0x58] sm:$0xff] }
 0x58c   :  { %v2612_v63 = vpop.f32.mrf.mxu0 }
 0x58d   :  { %v2684_v60 = vmax.f32 %v2633_v55, 0.0  ;;  %v2613_v0 = vadd.f32 %v2612_v63, %v2588_v39  ;;  %v2892_v39 = vld [vmem:[#allocation8 + $0x1118] sm:$0xff]  ;;  %v3034_v55 = vld [vmem:[%s6916_s5 + $0x50] sm:$0xff] }
 0x58e   :  { %3011 = vmatpush.msra.mxu3 %v2892_v39  ;;  %v2922_v39 = vld [vmem:[#allocation10 + $0x10] sm:$0x3] }
 0x58f   :  { %2776 = vmatmul.f32.vlgmr.msrb.gmra.mxu0 %v2684_v60  ;;  %2822 = vmatmul.f32.vlgmr.msrb.gmra.mxu2 %v2684_v60 }
 0x590   :  { %v2678_v2 = vpop.f32.mrf.mxu3  ;;  %3012 = vmatpush.msra.mxu3 %v2890_v41  ;;  %3060 = vmatpush.msrb.mxu0 %v3039_v42  ;;  %v2924_v41 = vperm.slane %v2922_v39, 0 }
 0x591   :  { %v2679_v57 = vadd.f32 %v2678_v2, %v2656_v1  ;;  %v2757_v2 = vperm.slane %v2754_v50, 1  ;;  %3143 = vmatpush.msrb.mxu2 %v3120_v33  ;;  %v3235_v33 = vld [vmem:[#allocation16 + $0x190] sm:$0xff] }
 0x592   :  { %v2635_v3 = vpop.f32.mrf.mxu1  ;;  %v2658_v6 = vpop.f32.mrf.mxu2  ;;  %3061 = vmatpush.msrb.mxu0 %v3038_v43 }
 0x593   :  { %v2685_v4 = vmax.f32 %v2679_v57, 0.0  ;;  %v2636_v5 = vadd.f32 %v2635_v3, %v2613_v0  ;;  %v2659_v8 = vadd.f32 %v2658_v6, %v2589_v56  ;;  %v3050_v56 = vld [vmem:[%s6916_s5 + $0xd0] sm:$0xff]  ;;  %v3031_v0 = vld [vmem:[%s6916_s5 + $0x38] sm:$0xff]  ;;  %3144 = vmatpush.msrb.mxu2 %v3118_v35 }
 0x594   :  { %3062 = vmatpush.msrb.mxu0 %v3037_v45  ;;  %v3030_v3 = vld [vmem:[%s6916_s5 + $0x30] sm:$0xff]  ;;  %s6470_s5 = smov [#allocation22]  }
 0x595   :  { %v2686_v7 = vmax.f32 %v2636_v5, 0.0  ;;  %2799 = vmatmul.f32.vlgmr.msrb.gmra.mxu1 %v2685_v4  ;;  %2845 = vmatmul.f32.vlgmr.msrb.gmra.mxu3 %v2685_v4  ;;  %v3236_v35 = vld [vmem:[#allocation16 + $0x198] sm:$0xff]  ;;  %s6047_s2 = sshll.u32 %s6470_s5, 4  ;;  %s6048_s2 = int_to_ptr.vmem [resolvable:$true] %s6047_s2 }
 0x596   :  { %3083 = vmatpush.msrb.mxu1 %v3055_v44  ;;  %3063 = vmatpush.msrb.mxu0 %v3036_v49 }
 0x597   :  { %2779 = vmatmul.f32.gmra.mxu0 %v2686_v7  ;;  %2825 = vmatmul.f32.gmra.mxu2 %v2686_v7 }
 0x598   :  { %v2681_v9 = vpop.f32.mrf.mxu3  ;;  %3084 = vmatpush.msrb.mxu1 %v3054_v46  ;;  %3064 = vmatpush.msrb.mxu0 %v3035_v52  ;;  %v2925_v46 = vperm.slane %v2922_v39, 1  ;;  %v3234_v39 = vld [vmem:[#allocation16 + $0x188] sm:$0xff] }
 0x599   :  { %v2682_v10 = vadd.f32 %v2681_v9, %v2659_v8  ;;  %3166 = vmatpush.msrb.mxu3 %v3121_v34  ;;  %3145 = vmatpush.msrb.mxu2 %v3116_v37  ;;  %v3204_v34 = vld [vmem:[#allocation16 + $0x98] sm:$0xff]  ;;  %v3233_v37 = vld [vmem:[#allocation16 + $0x180] sm:$0xff] }
 0x59a   :  { %3085 = vmatpush.msrb.mxu1 %v3053_v47  ;;  %3065 = vmatpush.msrb.mxu0 %v3034_v55 }
 0x59b   :  { %v2687_v11 = vmax.f32 %v2682_v10, 0.0  ;;  %3167 = vmatpush.msrb.mxu3 %v3119_v36  ;;  %v3201_v36 = vld [vmem:[#allocation16 + $0x80] sm:$0xff] }
 0x59c   :  { %3086 = vmatpush.msrb.mxu1 %v3052_v51  ;;  %3066 = vmatpush.msrb.mxu0 %v3033_v58 }
 0x59d   :  { %2802 = vmatmul.f32.gmra.mxu1 %v2687_v11  ;;  %2848 = vmatmul.f32.gmra.mxu3 %v2687_v11 }
 0x59e   :  { %3087 = vmatpush.msrb.mxu1 %v3051_v48  ;;  %3067 = vmatpush.msrb.mxu0 %v3032_v61 }
 0x59f   :  { %3168 = vmatpush.msrb.mxu3 %v3117_v38  ;;  %v3202_v38 = vld [vmem:[#allocation16 + $0x88] sm:$0xff] }
 0x5a0   :  { %3088 = vmatpush.msrb.mxu1 %v3050_v56  ;;  %3068 = vmatpush.msrb.mxu0 %v3031_v0  ;;  %v3113_v0 = vld [vmem:[#allocation13 + $0x38] sm:$0xff] }
 0x5a2   :  { %3089 = vmatpush.msrb.mxu1 %v3049_v59  ;;  %3069 = vmatpush.msrb.mxu0 %v3030_v3  ;;  %v3111_v3 = vld [vmem:[#allocation13 + $0x28] sm:$0xff] }
 0x5a4   :  { %3070 = vmatpush.msrb.mxu0 %v3029_v18  ;;  %3090 = vmatpush.msrb.mxu1 %v3048_v19  ;;  %v3212_v18 = vld [vmem:[#allocation16 + $0xd8] sm:$0xff] }
 0x5a5   :  { %v3244_v19 = vld [vmem:[#allocation16 + $0x1d8] sm:$0xff] }
 0x5a6   :  { %3071 = vmatpush.msrb.mxu0 %v3028_v20  ;;  %3091 = vmatpush.msrb.mxu1 %v3047_v21  ;;  %v3209_v20 = vld [vmem:[#allocation16 + $0xc0] sm:$0xff] }
 0x5a7   :  { %v3241_v21 = vld [vmem:[#allocation16 + $0x1c0] sm:$0xff] }
 0x5a8   :  { %3072 = vmatpush.msrb.mxu0 %v3027_v22  ;;  %3092 = vmatpush.msrb.mxu1 %v3046_v23  ;;  %v3210_v22 = vld [vmem:[#allocation16 + $0xc8] sm:$0xff] }
 0x5a9   :  { %v3242_v23 = vld [vmem:[#allocation16 + $0x1c8] sm:$0xff] }
 0x5aa   :  { %3073 = vmatpush.msrb.mxu0 %v3026_v24  ;;  %3093 = vmatpush.msrb.mxu1 %v3045_v25  ;;  %v3207_v24 = vld [vmem:[#allocation16 + $0xb0] sm:$0xff] }
 0x5ab   :  { %v3239_v25 = vld [vmem:[#allocation16 + $0x1b0] sm:$0xff] }
 0x5ac   :  { %3074 = vmatpush.msrb.mxu0 %v3025_v26  ;;  %3094 = vmatpush.msrb.mxu1 %v3044_v27  ;;  %v3208_v26 = vld [vmem:[#allocation16 + $0xb8] sm:$0xff] }
 0x5ad   :  { %v3240_v27 = vld [vmem:[#allocation16 + $0x1b8] sm:$0xff] }
 0x5ae   :  { %3075 = vmatpush.msrb.mxu0 %v3024_v28  ;;  %3095 = vmatpush.msrb.mxu1 %v3043_v29  ;;  %v3205_v28 = vld [vmem:[#allocation16 + $0xa0] sm:$0xff] }
 0x5af   :  { %v3237_v29 = vld [vmem:[#allocation16 + $0x1a0] sm:$0xff] }
 0x5b0   :  { %3096 = vmatpush.msrb.mxu1 %v3042_v30  ;;  %v3206_v30 = vld [vmem:[#allocation16 + $0xa8] sm:$0xff] }
 0x5b2   :  { %3097 = vmatpush.msrb.mxu1 %v3041_v31  ;;  %v3238_v31 = vld [vmem:[#allocation16 + $0x1a8] sm:$0xff] }
 0x5b4   :  { %3098 = vmatpush.msrb.mxu1 %v3040_v32  ;;  %v3203_v32 = vld [vmem:[#allocation16 + $0x90] sm:$0xff] }
 0x60c   :  { %v2777_v53 = vpop.f32.mrf.mxu0 }
 0x60d   :  { %v2778_v60 = vadd.f32 %v2777_v53, %v2756_v54 }
 0x612   :  { %v2800_v62 = vpop.f32.mrf.mxu1  ;;  %v2823_v63 = vpop.f32.mrf.mxu2 }
 0x613   :  { %v2801_v1 = vadd.f32 %v2800_v62, %v2778_v60  ;;  %v2824_v5 = vadd.f32 %v2823_v63, %v2757_v2  ;;  %v3114_v63 = vld [vmem:[#allocation13 + $0x40] sm:$0xff] }
 0x614   :  { %v2780_v4 = vpop.f32.mrf.mxu0  ;;  %3146 = vmatpush.msrb.mxu2 %v3114_v63  ;;  %v3223_v63 = vld [vmem:[#allocation16 + $0x130] sm:$0xff] }
 0x615   :  { %v2852_v57 = vmax.f32 %v2801_v1, 0.0  ;;  %v2781_v7 = vadd.f32 %v2780_v4, %v2756_v54  ;;  %v3115_v1 = vld [vmem:[#allocation13 + $0x48] sm:$0xff]  ;;  %v3108_v4 = vld [vmem:[#allocation13 + $0x10] sm:$0xff] }
 0x616   :  { %3169 = vmatpush.msrb.mxu3 %v3115_v1  ;;  %v3192_v1 = vld [vmem:[#allocation16 + $0x38] sm:$0xff] }
 0x617   :  { %2944 = vmatmul.f32.vlgmr.msra.gmra.mxu0 %v2852_v57  ;;  %2990 = vmatmul.f32.vlgmr.msra.gmra.mxu2 %v2852_v57  ;;  %v3110_v57 = vld [vmem:[#allocation13 + $0x20] sm:$0xff] }
 0x618   :  { %v2846_v6 = vpop.f32.mrf.mxu3  ;;  %3170 = vmatpush.msrb.mxu3 %v3113_v0 }
 0x619   :  { %v2847_v8 = vadd.f32 %v2846_v6, %v2824_v5  ;;  %v3109_v5 = vld [vmem:[#allocation13 + $0x18] sm:$0xff]  ;;  %v3106_v6 = vld [vmem:[#allocation13] sm:$0xff] }
 0x61a   :  { %v2803_v9 = vpop.f32.mrf.mxu1  ;;  %v2826_v12 = vpop.f32.mrf.mxu2  ;;  %3171 = vmatpush.msrb.mxu3 %v3111_v3 }
 0x61b   :  { %v2853_v10 = vmax.f32 %v2847_v8, 0.0  ;;  %v2804_v11 = vadd.f32 %v2803_v9, %v2781_v7  ;;  %v2827_v14 = vadd.f32 %v2826_v12, %v2757_v2  ;;  %v3112_v2 = vld [vmem:[#allocation13 + $0x30] sm:$0xff]  ;;  %v3107_v7 = vld [vmem:[#allocation13 + $0x8] sm:$0xff] }
 0x61c   :  { %3147 = vmatpush.msrb.mxu2 %v3112_v2  ;;  %3172 = vmatpush.msrb.mxu3 %v3109_v5  ;;  %v3215_v8 = vld [vmem:[#allocation16 + $0xf0] sm:$0xff]  ;;  %v3213_v12 = vld [vmem:[#allocation16 + $0xe0] sm:$0xff]  ;;  %v3224_v2 = vld [vmem:[#allocation16 + $0x138] sm:$0xff] }
 0x61d   :  { %v2854_v13 = vmax.f32 %v2804_v11, 0.0  ;;  %2967 = vmatmul.f32.vlgmr.msra.gmra.mxu1 %v2853_v10  ;;  %3013 = vmatmul.f32.vlgmr.msra.gmra.mxu3 %v2853_v10  ;;  %v3247_v9 = vld [vmem:[#allocation16 + $0x1f0] sm:$0xff]  ;;  %v3216_v10 = vld [vmem:[#allocation16 + $0xf8] sm:$0xff]  ;;  %v3189_v5 = vld [vmem:[#allocation16 + $0x20] sm:$0xff] }
 0x61e   :  { %3148 = vmatpush.msrb.mxu2 %v3110_v57  ;;  %3173 = vmatpush.msrb.mxu3 %v3107_v7  ;;  %v3248_v11 = vld [vmem:[#allocation16 + $0x1f8] sm:$0xff]  ;;  %v3190_v7 = vld [vmem:[#allocation16 + $0x28] sm:$0xff] }
 0x61f   :  { %2947 = vmatmul.f32.gmra.mxu0 %v2854_v13  ;;  %2993 = vmatmul.f32.gmra.mxu2 %v2854_v13  ;;  %v3245_v13 = vld [vmem:[#allocation16 + $0x1e0] sm:$0xff] }
 0x620   :  { %v2849_v15 = vpop.f32.mrf.mxu3  ;;  %3149 = vmatpush.msrb.mxu2 %v3108_v4  ;;  %3278 = vmatpush.msra.mxu3 %v3247_v9  ;;  %v3187_v9 = vld [vmem:[#allocation16 + $0x10] sm:$0xff] }
 0x621   :  { %v2850_v16 = vadd.f32 %v2849_v15, %v2827_v14  ;;  %3301 = vmatpush.msra.mxu0 %v3216_v10  ;;  %3324 = vmatpush.msra.mxu1 %v3248_v11  ;;  %v3214_v14 = vld [vmem:[#allocation16 + $0xe8] sm:$0xff]  ;;  %v3219_v10 = vld [vmem:[#allocation16 + $0x110] sm:$0xff]  ;;  %v3188_v11 = vld [vmem:[#allocation16 + $0x18] sm:$0xff] }
 0x622   :  { %3150 = vmatpush.msrb.mxu2 %v3106_v6  ;;  %v3246_v15 = vld [vmem:[#allocation16 + $0x1e8] sm:$0xff]  ;;  %3279 = vmatpush.msra.mxu3 %v3245_v13  ;;  %v3221_v6 = vld [vmem:[#allocation16 + $0x120] sm:$0xff] }
 0x623   :  { %v2855_v17 = vmax.f32 %v2850_v16, 0.0  ;;  %v3211_v16 = vld [vmem:[#allocation16 + $0xd0] sm:$0xff]  ;;  %3302 = vmatpush.msra.mxu0 %v3214_v14  ;;  %3325 = vmatpush.msra.mxu1 %v3246_v15  ;;  %v3185_v13 = vld [vmem:[#allocation16] sm:$0xff]  ;;  %v3186_v15 = vld [vmem:[#allocation16 + $0x8] sm:$0xff] }
 0x624   :  { %3255 = vmatpush.msra.mxu2 %v3215_v8  ;;  %v3222_v8 = vld [vmem:[#allocation16 + $0x128] sm:$0xff]  ;;  %v3217_v14 = vld [vmem:[#allocation16 + $0x100] sm:$0xff] }
 0x625   :  { %2970 = vmatmul.f32.gmra.mxu1 %v2855_v17  ;;  %3016 = vmatmul.f32.gmra.mxu3 %v2855_v17  ;;  %v3243_v17 = vld [vmem:[#allocation16 + $0x1d0] sm:$0xff] }
 0x626   :  { %3256 = vmatpush.msra.mxu2 %v3213_v12  ;;  %3280 = vmatpush.msra.mxu3 %v3243_v17  ;;  %v3220_v12 = vld [vmem:[#allocation16 + $0x118] sm:$0xff]  ;;  %v3414_v17 = vld [vmem:[#allocation16 + $0x3f0] sm:$0xff] }
 0x627   :  { %3303 = vmatpush.msra.mxu0 %v3212_v18  ;;  %3326 = vmatpush.msra.mxu1 %v3244_v19  ;;  %v3415_v18 = vld [vmem:[#allocation16 + $0x3f8] sm:$0xff]  ;;  %v3412_v19 = vld [vmem:[#allocation16 + $0x3e0] sm:$0xff] }
 0x628   :  { %3257 = vmatpush.msra.mxu2 %v3211_v16  ;;  %3281 = vmatpush.msra.mxu3 %v3241_v21  ;;  %v3218_v16 = vld [vmem:[#allocation16 + $0x108] sm:$0xff]  ;;  %v3410_v21 = vld [vmem:[#allocation16 + $0x3d0] sm:$0xff] }
 0x629   :  { %3304 = vmatpush.msra.mxu0 %v3210_v22  ;;  %3327 = vmatpush.msra.mxu1 %v3242_v23  ;;  %v3411_v22 = vld [vmem:[#allocation16 + $0x3d8] sm:$0xff]  ;;  %v3382_v23 = vld [vmem:[#allocation16 + $0x2f0] sm:$0xff] }
 0x62a   :  { %3258 = vmatpush.msra.mxu2 %v3209_v20  ;;  %3282 = vmatpush.msra.mxu3 %v3239_v25  ;;  %v3413_v20 = vld [vmem:[#allocation16 + $0x3e8] sm:$0xff]  ;;  %v3380_v25 = vld [vmem:[#allocation16 + $0x2e0] sm:$0xff] }
 0x62b   :  { %3305 = vmatpush.msra.mxu0 %v3208_v26  ;;  %3328 = vmatpush.msra.mxu1 %v3240_v27  ;;  %v3408_v26 = vld [vmem:[#allocation16 + $0x3c0] sm:$0xff]  ;;  %v3409_v27 = vld [vmem:[#allocation16 + $0x3c8] sm:$0xff] }
 0x62c   :  { %3259 = vmatpush.msra.mxu2 %v3207_v24  ;;  %3283 = vmatpush.msra.mxu3 %v3237_v29  ;;  %v3383_v24 = vld [vmem:[#allocation16 + $0x2f8] sm:$0xff]  ;;  %v3378_v29 = vld [vmem:[#allocation16 + $0x2d0] sm:$0xff] }
 0x62d   :  { %3306 = vmatpush.msra.mxu0 %v3206_v30  ;;  %3329 = vmatpush.msra.mxu1 %v3238_v31  ;;  %v3379_v30 = vld [vmem:[#allocation16 + $0x2d8] sm:$0xff]  ;;  %v3406_v31 = vld [vmem:[#allocation16 + $0x3b0] sm:$0xff] }
 0x62e   :  { %3260 = vmatpush.msra.mxu2 %v3205_v28  ;;  %3284 = vmatpush.msra.mxu3 %v3235_v33  ;;  %v3381_v28 = vld [vmem:[#allocation16 + $0x2e8] sm:$0xff]  ;;  %v3376_v33 = vld [vmem:[#allocation16 + $0x2c0] sm:$0xff] }
 0x62f   :  { %3307 = vmatpush.msra.mxu0 %v3204_v34  ;;  %3330 = vmatpush.msra.mxu1 %v3236_v35  ;;  %v3377_v34 = vld [vmem:[#allocation16 + $0x2c8] sm:$0xff]  ;;  %v3404_v35 = vld [vmem:[#allocation16 + $0x3a0] sm:$0xff] }
 0x630   :  { %3261 = vmatpush.msra.mxu2 %v3203_v32  ;;  %3285 = vmatpush.msra.mxu3 %v3233_v37  ;;  %v3407_v32 = vld [vmem:[#allocation16 + $0x3b8] sm:$0xff]  ;;  %v3374_v37 = vld [vmem:[#allocation16 + $0x2b0] sm:$0xff] }
 0x631   :  { %3308 = vmatpush.msra.mxu0 %v3202_v38  ;;  %3331 = vmatpush.msra.mxu1 %v3234_v39  ;;  %v3375_v38 = vld [vmem:[#allocation16 + $0x2b8] sm:$0xff]  ;;  %v3402_v39 = vld [vmem:[#allocation16 + $0x390] sm:$0xff] }
 0x632   :  { %3262 = vmatpush.msra.mxu2 %v3201_v36  ;;  %v3405_v36 = vld [vmem:[#allocation16 + $0x3a8] sm:$0xff] }
 0x694   :  { %v2945_v40 = vpop.f32.mrf.mxu0 }
 0x695   :  { %v2946_v42 = vadd.f32 %v2945_v40, %v2924_v41  ;;  %v3199_v40 = vld [vmem:[#allocation16 + $0x70] sm:$0xff] }
 0x696   :  { %3263 = vmatpush.msra.mxu2 %v3199_v40  ;;  %v3403_v40 = vld [vmem:[#allocation16 + $0x398] sm:$0xff] }
 0x69a   :  { %v2968_v43 = vpop.f32.mrf.mxu1  ;;  %v2991_v44 = vpop.f32.mrf.mxu2 }
 0x69b   :  { %v2969_v45 = vadd.f32 %v2968_v43, %v2946_v42  ;;  %v2992_v50 = vadd.f32 %v2991_v44, %v2925_v46  ;;  %v3200_v43 = vld [vmem:[#allocation16 + $0x78] sm:$0xff] }
 0x69c   :  { %v2948_v49 = vpop.f32.mrf.mxu0  ;;  %v3232_v44 = vld [vmem:[#allocation16 + $0x178] sm:$0xff]  ;;  %3309 = vmatpush.msra.mxu0 %v3200_v43 }
 0x69d   :  { %v3020_v47 = vmax.f32 %v2969_v45, 0.0  ;;  %v2949_v52 = vadd.f32 %v2948_v49, %v2924_v41  ;;  %v3231_v41 = vld [vmem:[#allocation16 + $0x170] sm:$0xff]  ;;  %v6091_v45 = vld [vmem:[#allocation11] ss:$0 sm:$0xff]  ;;  %v3198_v49 = vld [vmem:[#allocation16 + $0x68] sm:$0xff]  ;;  %3332 = vmatpush.msra.mxu1 %v3232_v44 }
 0x69e   :  { %3286 = vmatpush.msra.mxu3 %v3231_v41  ;;  %3310 = vmatpush.msra.mxu0 %v3198_v49  ;;  %v3372_v41 = vld [vmem:[#allocation16 + $0x2a0] sm:$0xff]  ;;  %v3122_v43 = vld [vmem:[#allocation14] sm:$0x3]  ;;  %v3398_v49 = vld [vmem:[#allocation16 + $0x370] sm:$0xff] }
 0x69f   :  { %3076 = vmatmul.f32.vlgmr.msrb.gmra.mxu0 %v3020_v47  ;;  %v3229_v47 = vld [vmem:[#allocation16 + $0x160] sm:$0xff] }
 0x6a0   :  { %v3014_v51 = vpop.f32.mrf.mxu3  ;;  %3287 = vmatpush.msra.mxu3 %v3229_v47  ;;  %v3400_v44 = vld [vmem:[#allocation16 + $0x380] sm:$0xff]  ;;  %v3371_v47 = vld [vmem:[#allocation16 + $0x298] sm:$0xff] }
 0x6a1   :  { %v3015_v53 = vadd.f32 %v3014_v51, %v2992_v50  ;;  %v3230_v50 = vld [vmem:[#allocation16 + $0x168] sm:$0xff]  ;;  %v3195_v51 = vld [vmem:[#allocation16 + $0x50] sm:$0xff] }
 0x6a2   :  { %v2971_v48 = vpop.f32.mrf.mxu1  ;;  %v2994_v56 = vpop.f32.mrf.mxu2  ;;  %3333 = vmatpush.msra.mxu1 %v3230_v50  ;;  %v3399_v50 = vld [vmem:[#allocation16 + $0x378] sm:$0xff] }
 0x6a3   :  { %v3021_v54 = vmax.f32 %v3015_v53, 0.0  ;;  %v2972_v55 = vadd.f32 %v2971_v48, %v2949_v52  ;;  %v2995_v59 = vadd.f32 %v2994_v56, %v2925_v46  ;;  %v3197_v46 = vld [vmem:[#allocation16 + $0x60] sm:$0xff]  ;;  %v3227_v52 = vld [vmem:[#allocation16 + $0x150] sm:$0xff]  ;;  %v3196_v53 = vld [vmem:[#allocation16 + $0x58] sm:$0xff] }
 0x6a4   :  { %3264 = vmatpush.msra.mxu2 %v3197_v46  ;;  %v3228_v48 = vld [vmem:[#allocation16 + $0x158] sm:$0xff]  ;;  %v3225_v56 = vld [vmem:[#allocation16 + $0x140] sm:$0xff]  ;;  %3288 = vmatpush.msra.mxu3 %v3227_v52  ;;  %v3370_v46 = vld [vmem:[#allocation16 + $0x290] sm:$0xff]  ;;  %v3125_v52 = vperm.slane %v3122_v43, 1 }
 0x6a5   :  { %v3022_v58 = vmax.f32 %v2972_v55, 0.0  ;;  %3099 = vmatmul.f32.vlgmr.msrb.gmra.mxu1 %v3021_v54  ;;  %v3193_v55 = vld [vmem:[#allocation16 + $0x40] sm:$0xff]  ;;  %3311 = vmatpush.msra.mxu0 %v3196_v53 }
 0x6a6   :  { %3265 = vmatpush.msra.mxu2 %v3195_v51  ;;  %3334 = vmatpush.msra.mxu1 %v3228_v48  ;;  %v3124_v51 = vperm.slane %v3122_v43, 0  ;;  %v3368_v53 = vld [vmem:[#allocation16 + $0x280] sm:$0xff]  ;;  %v3369_v48 = vld [vmem:[#allocation16 + $0x288] sm:$0xff] }
 0x6a7   :  { %3079 = vmatmul.f32.gmra.mxu0 %v3022_v58  ;;  %3289 = vmatpush.msra.mxu3 %v3225_v56  ;;  %v3366_v56 = vld [vmem:[#allocation16 + $0x270] sm:$0xff]  ;;  %v3549_v43 = vld [vmem:[#allocation16 + $0x4e8] sm:$0xff] }
 0x6a8   :  { %v3017_v60 = vpop.f32.mrf.mxu3  ;;  %3266 = vmatpush.msra.mxu2 %v3193_v55  ;;  %v3397_v55 = vld [vmem:[#allocation16 + $0x368] sm:$0xff] }
 0x6a9   :  { %v3018_v61 = vadd.f32 %v3017_v60, %v2995_v59  ;;  %v3194_v60 = vld [vmem:[#allocation16 + $0x48] sm:$0xff]  ;;  %3290 = vmatpush.msra.mxu3 %v3223_v63 }
 0x6aa   :  { %3312 = vmatpush.msra.mxu0 %v3194_v60 }
 0x6ab   :  { %v3023_v62 = vmax.f32 %v3018_v61, 0.0  ;;  %v3226_v61 = vld [vmem:[#allocation16 + $0x148] sm:$0xff]  ;;  %3291 = vmatpush.msra.mxu3 %v3221_v6 }
 0x6ac   :  { %3335 = vmatpush.msra.mxu1 %v3226_v61  ;;  %3313 = vmatpush.msra.mxu0 %v3192_v1  ;;  %v3394_v61 = vld [vmem:[#allocation16 + $0x350] sm:$0xff] }
 0x6ad   :  { %3102 = vmatmul.f32.gmra.mxu1 %v3023_v62  ;;  %v3191_v62 = vld [vmem:[#allocation16 + $0x30] sm:$0xff]  ;;  %3292 = vmatpush.msra.mxu3 %v3219_v10  ;;  %v3364_v10 = vld [vmem:[#allocation16 + $0x260] sm:$0xff] }
 0x6ae   :  { %3267 = vmatpush.msra.mxu2 %v3191_v62  ;;  %3336 = vmatpush.msra.mxu1 %v3224_v2  ;;  %v3395_v62 = vld [vmem:[#allocation16 + $0x358] sm:$0xff] }
 0x6af   :  { %3314 = vmatpush.msra.mxu0 %v3190_v7  ;;  %3293 = vmatpush.msra.mxu3 %v3217_v14  ;;  %v3362_v14 = vld [vmem:[#allocation16 + $0x250] sm:$0xff] }
 0x6b0   :  { %3268 = vmatpush.msra.mxu2 %v3189_v5  ;;  %3337 = vmatpush.msra.mxu1 %v3222_v8 }
 0x6b1   :  { %3315 = vmatpush.msra.mxu0 %v3188_v11  ;;  %v3390_v11 = vld [vmem:[#allocation16 + $0x330] sm:$0xff] }
 0x6b2   :  { %3269 = vmatpush.msra.mxu2 %v3187_v9  ;;  %3338 = vmatpush.msra.mxu1 %v3220_v12  ;;  %v3365_v12 = vld [vmem:[#allocation16 + $0x268] sm:$0xff] }
 0x6b3   :  { %3316 = vmatpush.msra.mxu0 %v3186_v15  ;;  %v3388_v15 = vld [vmem:[#allocation16 + $0x320] sm:$0xff] }
 0x6b4   :  { %3270 = vmatpush.msra.mxu2 %v3185_v13  ;;  %3339 = vmatpush.msra.mxu1 %v3218_v16  ;;  %v3391_v13 = vld [vmem:[#allocation16 + $0x338] sm:$0xff] }
 0x6b5   :  { %3469 = vmatpush.msrb.mxu0 %v3383_v24  ;;  %v3363_v16 = vld [vmem:[#allocation16 + $0x258] sm:$0xff] }
 0x6b6   :  { %3492 = vmatpush.msrb.mxu1 %v3415_v18  ;;  %v3360_v18 = vld [vmem:[#allocation16 + $0x240] sm:$0xff]  ;;  %v3359_v24 = vld [vmem:[#allocation16 + $0x238] sm:$0xff] }
 0x6b7   :  { %3470 = vmatpush.msrb.mxu0 %v3381_v28  ;;  %v3354_v28 = vld [vmem:[#allocation16 + $0x210] sm:$0xff] }
 0x6b8   :  { %3493 = vmatpush.msrb.mxu1 %v3413_v20  ;;  %v3361_v20 = vld [vmem:[#allocation16 + $0x248] sm:$0xff] }
 0x6b9   :  { %3471 = vmatpush.msrb.mxu0 %v3379_v30  ;;  %v3352_v30 = vld [vmem:[#allocation16 + $0x200] sm:$0xff] }
 0x6ba   :  { %3494 = vmatpush.msrb.mxu1 %v3411_v22  ;;  %v3358_v22 = vld [vmem:[#allocation16 + $0x230] sm:$0xff] }
 0x6bb   :  { %3472 = vmatpush.msrb.mxu0 %v3377_v34  ;;  %v3580_v34 = vld [vmem:[#allocation16 + $0x5e0] sm:$0xff] }
 0x6bc   :  { %3495 = vmatpush.msrb.mxu1 %v3409_v27  ;;  %v3357_v27 = vld [vmem:[#allocation16 + $0x228] sm:$0xff] }
 0x6bd   :  { %3473 = vmatpush.msrb.mxu0 %v3375_v38  ;;  %v3550_v38 = vld [vmem:[#allocation16 + $0x4f0] sm:$0xff] }
 0x6be   :  { %3496 = vmatpush.msrb.mxu1 %v3407_v32  ;;  %v3582_v32 = vld [vmem:[#allocation16 + $0x5f0] sm:$0xff] }
 0x6c0   :  { %3497 = vmatpush.msrb.mxu1 %v3405_v36  ;;  %v3578_v36 = vld [vmem:[#allocation16 + $0x5d0] sm:$0xff] }
 0x6c2   :  { %3498 = vmatpush.msrb.mxu1 %v3403_v40  ;;  %v3548_v40 = vld [vmem:[#allocation16 + $0x4e0] sm:$0xff] }
 0x71c   :  { %v3077_v42 = vpop.f32.mrf.mxu0 }
 0x71d   :  { %v3078_v54 = vadd.f32 %v6091_v45, %v3077_v42  ;;  %v3373_v42 = vld [vmem:[#allocation16 + $0x2a8] sm:$0xff] }
 0x71e   :  { %3474 = vmatpush.msrb.mxu0 %v3373_v42  ;;  %v3577_v42 = vld [vmem:[#allocation16 + $0x5c8] sm:$0xff] }
 0x720   :  { %3475 = vmatpush.msrb.mxu0 %v3371_v47  ;;  %v3574_v47 = vld [vmem:[#allocation16 + $0x5b0] sm:$0xff] }
 0x722   :  { %v3100_v58 = vpop.f32.mrf.mxu1  ;;  %3476 = vmatpush.msrb.mxu0 %v3369_v48 }
 0x723   :  { %v3101_v59 = vadd.f32 %v3100_v58, %v3078_v54  ;;  %v3396_v54 = vld [vmem:[#allocation16 + $0x360] sm:$0xff]  ;;  %v3367_v58 = vld [vmem:[#allocation16 + $0x278] sm:$0xff] }
 0x724   :  { %v3080_v0 = vpop.f32.mrf.mxu0  ;;  %3477 = vmatpush.msrb.mxu0 %v3367_v58  ;;  %v3571_v58 = vld [vmem:[#allocation16 + $0x598] sm:$0xff] }
 0x725   :  { %6068 = vmatmul.msk.f32.vlgmr.msrb.gmra.mxu2 %vm3128_vm0, %v3101_v59  ;;  %6070 = vmatmul.msk.f32.vlgmr.msrb.gmra.mxu3 %vm3128_vm0, %v3101_v59  ;;  %v3081_v57 = vadd.f32 %v6091_v45, %v3080_v0  ;;  %v3401_v45 = vld [vmem:[#allocation16 + $0x388] sm:$0xff] }
 0x726   :  { %3446 = vmatpush.msrb.mxu3 %v3414_v17  ;;  %3423 = vmatpush.msrb.mxu2 %v3382_v23  ;;  %v3389_v17 = vld [vmem:[#allocation16 + $0x328] sm:$0xff]  ;;  %v3384_v23 = vld [vmem:[#allocation16 + $0x300] sm:$0xff] }
 0x727   :  { %3499 = vmatpush.msrb.mxu1 %v3401_v45  ;;  %3478 = vmatpush.msrb.mxu0 %v3365_v12  ;;  %v3547_v45 = vld [vmem:[#allocation16 + $0x4d8] sm:$0xff] }
 0x728   :  { %3447 = vmatpush.msrb.mxu3 %v3412_v19  ;;  %3424 = vmatpush.msrb.mxu2 %v3380_v25  ;;  %v3386_v19 = vld [vmem:[#allocation16 + $0x310] sm:$0xff]  ;;  %v3385_v25 = vld [vmem:[#allocation16 + $0x308] sm:$0xff] }
 0x729   :  { %3500 = vmatpush.msrb.mxu1 %v3399_v50  ;;  %3479 = vmatpush.msrb.mxu0 %v3363_v16  ;;  %v3544_v50 = vld [vmem:[#allocation16 + $0x4c0] sm:$0xff] }
 0x72a   :  { %v3103_v3 = vpop.f32.mrf.mxu1  ;;  %3448 = vmatpush.msrb.mxu3 %v3410_v21  ;;  %3425 = vmatpush.msrb.mxu2 %v3378_v29  ;;  %v3387_v21 = vld [vmem:[#allocation16 + $0x318] sm:$0xff] }
 0x72b   :  { %v3104_v4 = vadd.f32 %v3103_v3, %v3081_v57  ;;  %3501 = vmatpush.msrb.mxu1 %v3397_v55  ;;  %v3392_v57 = vld [vmem:[#allocation16 + $0x340] sm:$0xff]  ;;  %v3393_v3 = vld [vmem:[#allocation16 + $0x348] sm:$0xff]  ;;  %3480 = vmatpush.msrb.mxu0 %v3361_v20  ;;  %v3355_v29 = vld [vmem:[#allocation16 + $0x218] sm:$0xff] }
 0x72c   :  { %3449 = vmatpush.msrb.mxu3 %v3408_v26  ;;  %3426 = vmatpush.msrb.mxu2 %v3376_v33  ;;  %v3356_v26 = vld [vmem:[#allocation16 + $0x220] sm:$0xff]  ;;  %v3583_v33 = vld [vmem:[#allocation16 + $0x5f8] sm:$0xff] }
 0x72d   :  { %6069 = vmatmul.msk.f32.gmra.mxu2 %vm3128_vm0, %v3104_v4  ;;  %6071 = vmatmul.msk.f32.gmra.mxu3 %vm3128_vm0, %v3104_v4  ;;  %v3543_v55 = vld [vmem:[#allocation16 + $0x4b8] sm:$0xff] }
 0x72e   :  { %3450 = vmatpush.msrb.mxu3 %v3406_v31  ;;  %3427 = vmatpush.msrb.mxu2 %v3374_v37  ;;  %v3353_v31 = vld [vmem:[#allocation16 + $0x208] sm:$0xff]  ;;  %v3579_v37 = vld [vmem:[#allocation16 + $0x5d8] sm:$0xff] }
 0x72f   :  { %3502 = vmatpush.msrb.mxu1 %v3395_v62  ;;  %3481 = vmatpush.msrb.mxu0 %v3359_v24  ;;  %v3565_v24 = vld [vmem:[#allocation16 + $0x568] sm:$0xff] }
 0x730   :  { %3451 = vmatpush.msrb.mxu3 %v3404_v35  ;;  %3428 = vmatpush.msrb.mxu2 %v3372_v41  ;;  %v3581_v35 = vld [vmem:[#allocation16 + $0x5e8] sm:$0xff]  ;;  %v3576_v41 = vld [vmem:[#allocation16 + $0x5c0] sm:$0xff] }
 0x731   :  { %3503 = vmatpush.msrb.mxu1 %v3393_v3  ;;  %3482 = vmatpush.msrb.mxu0 %v3357_v27  ;;  %v3567_v3 = vld [vmem:[#allocation16 + $0x578] sm:$0xff]  ;;  %v3537_v27 = vld [vmem:[#allocation16 + $0x488] sm:$0xff] }
 0x732   :  { %3452 = vmatpush.msrb.mxu3 %v3402_v39  ;;  %3429 = vmatpush.msrb.mxu2 %v3370_v46  ;;  %v3551_v39 = vld [vmem:[#allocation16 + $0x4f8] sm:$0xff]  ;;  %v3249_v46 = vld [vmem:[#allocation17] sm:$0x3] }
 0x733   :  { %3504 = vmatpush.msrb.mxu1 %v3391_v13  ;;  %3483 = vmatpush.msrb.mxu0 %v3355_v29  ;;  %v3252_v48 = vperm.slane %v3249_v46, 1  ;;  %v3534_v29 = vld [vmem:[#allocation16 + $0x470] sm:$0xff] }
 0x734   :  { %3453 = vmatpush.msrb.mxu3 %v3400_v44  ;;  %3430 = vmatpush.msrb.mxu2 %v3368_v53  ;;  %v3546_v44 = vld [vmem:[#allocation16 + $0x4d0] sm:$0xff]  ;;  %v3573_v53 = vld [vmem:[#allocation16 + $0x5a8] sm:$0xff] }
 0x735   :  { %3505 = vmatpush.msrb.mxu1 %v3389_v17  ;;  %3484 = vmatpush.msrb.mxu0 %v3353_v31  ;;  %v3535_v31 = vld [vmem:[#allocation16 + $0x478] sm:$0xff] }
 0x736   :  { %3454 = vmatpush.msrb.mxu3 %v3398_v49  ;;  %3431 = vmatpush.msrb.mxu2 %v3366_v56  ;;  %v3575_v49 = vld [vmem:[#allocation16 + $0x5b8] sm:$0xff]  ;;  %v3570_v56 = vld [vmem:[#allocation16 + $0x590] sm:$0xff] }
 0x737   :  { %3506 = vmatpush.msrb.mxu1 %v3387_v21  ;;  %v3538_v21 = vld [vmem:[#allocation16 + $0x490] sm:$0xff] }
 0x738   :  { %3455 = vmatpush.msrb.mxu3 %v3396_v54  ;;  %3432 = vmatpush.msrb.mxu2 %v3364_v10  ;;  %v3542_v54 = vld [vmem:[#allocation16 + $0x4b0] sm:$0xff] }
 0x739   :  { %3507 = vmatpush.msrb.mxu1 %v3385_v25  ;;  %v3536_v25 = vld [vmem:[#allocation16 + $0x480] sm:$0xff] }
 0x73a   :  { %3456 = vmatpush.msrb.mxu3 %v3394_v61  ;;  %3433 = vmatpush.msrb.mxu2 %v3362_v14 }
 0x73c   :  { %3457 = vmatpush.msrb.mxu3 %v3392_v57  ;;  %3434 = vmatpush.msrb.mxu2 %v3360_v18  ;;  %v3566_v57 = vld [vmem:[#allocation16 + $0x570] sm:$0xff] }
 0x73e   :  { %3458 = vmatpush.msrb.mxu3 %v3390_v11  ;;  %3435 = vmatpush.msrb.mxu2 %v3358_v22  ;;  %v3564_v22 = vld [vmem:[#allocation16 + $0x560] sm:$0xff] }
 0x740   :  { %3459 = vmatpush.msrb.mxu3 %v3388_v15  ;;  %3436 = vmatpush.msrb.mxu2 %v3356_v26  ;;  %v3562_v26 = vld [vmem:[#allocation16 + $0x550] sm:$0xff] }
 0x742   :  { %3460 = vmatpush.msrb.mxu3 %v3386_v19  ;;  %3437 = vmatpush.msrb.mxu2 %v3354_v28  ;;  %v3563_v28 = vld [vmem:[#allocation16 + $0x558] sm:$0xff] }
 0x744   :  { %3461 = vmatpush.msrb.mxu3 %v3384_v23  ;;  %3438 = vmatpush.msrb.mxu2 %v3352_v30  ;;  %v3539_v23 = vld [vmem:[#allocation16 + $0x498] sm:$0xff]  ;;  %v3560_v30 = vld [vmem:[#allocation16 + $0x540] sm:$0xff] }
 0x7a8   :  { %v3152_v59 = vpop.f32.mrf.mxu2  ;;  %v3175_v60 = vpop.f32.mrf.mxu3 }
 0x7a9   :  { %v3153_v63 = vadd.f32 %v3152_v59, %v3124_v51  ;;  %v3176_v1 = vadd.f32 %v3175_v60, %v3125_v52  ;;  %v3540_v59 = vld [vmem:[#allocation16 + $0x4a0] sm:$0xff]  ;;  %v3541_v60 = vld [vmem:[#allocation16 + $0x4a8] sm:$0xff] }
 0x7ab   :  { %v3181_v2 = vmax.f32 %v3153_v63, 0.0  ;;  %v3182_v0 = vmax.f32 %v3176_v1, 0.0  ;;  %v3568_v63 = vld [vmem:[#allocation16 + $0x580] sm:$0xff]  ;;  %v3569_v1 = vld [vmem:[#allocation16 + $0x588] sm:$0xff] }
 0x7ad   :  { %3271 = vmatmul.f32.vlgmr.msra.gmra.mxu2 %v3181_v2  ;;  %3294 = vmatmul.f32.vlgmr.msra.gmra.mxu3 %v3182_v0 }
 0x7ae   :  { %3317 = vmatmul.f32.vlgmr.msra.gmra.mxu0 %v3181_v2  ;;  %3340 = vmatmul.f32.vlgmr.msra.gmra.mxu1 %v3182_v0  ;;  %v3251_v0 = vperm.slane %v3249_v46, 0  ;;  %v3552_v46 = vld [vmem:[#allocation16 + $0x500] sm:$0xff] }
 0x7af   :  { %3614 = vmatpush.msra.mxu3 %v3582_v32  ;;  %3660 = vmatpush.msra.mxu1 %v3583_v33  ;;  %v3561_v32 = vld [vmem:[#allocation16 + $0x548] sm:$0xff]  ;;  %v3532_v33 = vld [vmem:[#allocation16 + $0x460] sm:$0xff] }
 0x7b0   :  { %v3155_v4 = vpop.f32.mrf.mxu2  ;;  %v3178_v5 = vpop.f32.mrf.mxu3  ;;  %3591 = vmatpush.msra.mxu2 %v3550_v38  ;;  %3637 = vmatpush.msra.mxu0 %v3551_v39  ;;  %v3556_v38 = vld [vmem:[#allocation16 + $0x520] sm:$0xff]  ;;  %v3531_v39 = vld [vmem:[#allocation16 + $0x458] sm:$0xff] }
 0x7b1   :  { %v3156_v6 = vadd.f32 %v3155_v4, %v3124_v51  ;;  %v3179_v7 = vadd.f32 %v3178_v5, %v3125_v52  ;;  %3615 = vmatpush.msra.mxu3 %v3580_v34  ;;  %3661 = vmatpush.msra.mxu1 %v3581_v35  ;;  %v3545_v51 = vld [vmem:[#allocation16 + $0x4c8] sm:$0xff]  ;;  %v3572_v52 = vld [vmem:[#allocation16 + $0x5a0] sm:$0xff]  ;;  %v3558_v34 = vld [vmem:[#allocation16 + $0x530] sm:$0xff] }
 0x7b2   :  { %3592 = vmatpush.msra.mxu2 %v3548_v40  ;;  %3638 = vmatpush.msra.mxu0 %v3549_v43  ;;  %v3533_v35 = vld [vmem:[#allocation16 + $0x468] sm:$0xff] }
 0x7b3   :  { %v3183_v8 = vmax.f32 %v3156_v6, 0.0  ;;  %v3184_v9 = vmax.f32 %v3179_v7, 0.0  ;;  %3616 = vmatpush.msra.mxu3 %v3578_v36  ;;  %3662 = vmatpush.msra.mxu1 %v3579_v37  ;;  %v3559_v36 = vld [vmem:[#allocation16 + $0x538] sm:$0xff]  ;;  %v3530_v37 = vld [vmem:[#allocation16 + $0x450] sm:$0xff]  ;;  %v3557_v40 = vld [vmem:[#allocation16 + $0x528] sm:$0xff] }
 0x7b4   :  { %3593 = vmatpush.msra.mxu2 %v3546_v44  ;;  %3639 = vmatpush.msra.mxu0 %v3547_v45  ;;  %v3529_v43 = vld [vmem:[#allocation16 + $0x448] sm:$0xff]  ;;  %v3555_v44 = vld [vmem:[#allocation16 + $0x518] sm:$0xff]  ;;  %v3526_v45 = vld [vmem:[#allocation16 + $0x430] sm:$0xff] }
 0x7b5   :  { %3274 = vmatmul.f32.gmra.mxu2 %v3183_v8  ;;  %3297 = vmatmul.f32.gmra.mxu3 %v3184_v9 }
 0x7b6   :  { %3320 = vmatmul.f32.gmra.mxu0 %v3183_v8  ;;  %3343 = vmatmul.f32.gmra.mxu1 %v3184_v9 }
 0x7b7   :  { %3617 = vmatpush.msra.mxu3 %v3576_v41  ;;  %3663 = vmatpush.msra.mxu1 %v3577_v42  ;;  %v3528_v41 = vld [vmem:[#allocation16 + $0x440] sm:$0xff]  ;;  %v3554_v42 = vld [vmem:[#allocation16 + $0x510] sm:$0xff] }
 0x7b8   :  { %3594 = vmatpush.msra.mxu2 %v3544_v50  ;;  %3640 = vmatpush.msra.mxu0 %v3545_v51  ;;  %v3524_v50 = vld [vmem:[#allocation16 + $0x420] sm:$0xff]  ;;  %v3525_v51 = vld [vmem:[#allocation16 + $0x428] sm:$0xff] }
 0x7b9   :  { %3618 = vmatpush.msra.mxu3 %v3574_v47  ;;  %3664 = vmatpush.msra.mxu1 %v3575_v49  ;;  %v3527_v47 = vld [vmem:[#allocation16 + $0x438] sm:$0xff]  ;;  %v3553_v49 = vld [vmem:[#allocation16 + $0x508] sm:$0xff] }
 0x7ba   :  { %3595 = vmatpush.msra.mxu2 %v3542_v54  ;;  %3641 = vmatpush.msra.mxu0 %v3543_v55  ;;  %v3521_v54 = vld [vmem:[#allocation16 + $0x408] sm:$0xff]  ;;  %v3750_v55 = vld [vmem:[#allocation16 + $0x7f0] sm:$0xff] }
 0x7bb   :  { %3619 = vmatpush.msra.mxu3 %v3572_v52  ;;  %3665 = vmatpush.msra.mxu1 %v3573_v53  ;;  %v3522_v52 = vld [vmem:[#allocation16 + $0x410] sm:$0xff]  ;;  %v3523_v53 = vld [vmem:[#allocation16 + $0x418] sm:$0xff] }
 0x7bc   :  { %3596 = vmatpush.msra.mxu2 %v3540_v59  ;;  %3642 = vmatpush.msra.mxu0 %v3541_v60  ;;  %v3749_v59 = vld [vmem:[#allocation16 + $0x7e8] sm:$0xff]  ;;  %v3746_v60 = vld [vmem:[#allocation16 + $0x7d0] sm:$0xff] }
 0x7bd   :  { %3620 = vmatpush.msra.mxu3 %v3570_v56  ;;  %3666 = vmatpush.msra.mxu1 %v3571_v58  ;;  %v3751_v56 = vld [vmem:[#allocation16 + $0x7f8] sm:$0xff]  ;;  %v3748_v58 = vld [vmem:[#allocation16 + $0x7e0] sm:$0xff] }
 0x7be   :  { %3597 = vmatpush.msra.mxu2 %v3538_v21  ;;  %3643 = vmatpush.msra.mxu0 %v3539_v23  ;;  %v3737_v23 = vld [vmem:[#allocation16 + $0x788] sm:$0xff] }
 0x7bf   :  { %3621 = vmatpush.msra.mxu3 %v3568_v63  ;;  %3667 = vmatpush.msra.mxu1 %v3569_v1  ;;  %v3719_v63 = vld [vmem:[#allocation16 + $0x6f8] sm:$0xff]  ;;  %v3716_v1 = vld [vmem:[#allocation16 + $0x6e0] sm:$0xff] }
 0x7c0   :  { %3598 = vmatpush.msra.mxu2 %v3536_v25  ;;  %3644 = vmatpush.msra.mxu0 %v3537_v27  ;;  %v3735_v27 = vld [vmem:[#allocation16 + $0x778] sm:$0xff] }
 0x7c1   :  { %3622 = vmatpush.msra.mxu3 %v3566_v57  ;;  %3668 = vmatpush.msra.mxu1 %v3567_v3  ;;  %v3717_v57 = vld [vmem:[#allocation16 + $0x6e8] sm:$0xff]  ;;  %v6757_v3 = vld [vmem:[#allocation17 + $0x2] sm:$0x3] }
 0x7c2   :  { %3599 = vmatpush.msra.mxu2 %v3534_v29  ;;  %3645 = vmatpush.msra.mxu0 %v3535_v31  ;;  %v3419_v25 = vperm.slane %v6757_v3, 0 }
 0x7c3   :  { %3623 = vmatpush.msra.mxu3 %v3564_v22  ;;  %3669 = vmatpush.msra.mxu1 %v3565_v24  ;;  %v3736_v22 = vld [vmem:[#allocation16 + $0x780] sm:$0xff] }
 0x7c4   :  { %3600 = vmatpush.msra.mxu2 %v3532_v33  ;;  %3646 = vmatpush.msra.mxu0 %v3533_v35 }
 0x7c5   :  { %3624 = vmatpush.msra.mxu3 %v3562_v26  ;;  %3670 = vmatpush.msra.mxu1 %v3563_v28  ;;  %v3734_v26 = vld [vmem:[#allocation16 + $0x770] sm:$0xff] }
 0x7c6   :  { %3601 = vmatpush.msra.mxu2 %v3530_v37  ;;  %3647 = vmatpush.msra.mxu0 %v3531_v39 }
 0x7c7   :  { %3625 = vmatpush.msra.mxu3 %v3560_v30  ;;  %3671 = vmatpush.msra.mxu1 %v3561_v32 }
 0x7c8   :  { %3602 = vmatpush.msra.mxu2 %v3528_v41  ;;  %3648 = vmatpush.msra.mxu0 %v3529_v43 }
 0x7c9   :  { %3626 = vmatpush.msra.mxu3 %v3558_v34  ;;  %3672 = vmatpush.msra.mxu1 %v3559_v36 }
 0x7ca   :  { %3603 = vmatpush.msra.mxu2 %v3526_v45  ;;  %3649 = vmatpush.msra.mxu0 %v3527_v47  ;;  %v3732_v45 = vld [vmem:[#allocation16 + $0x760] sm:$0xff]  ;;  %v3733_v47 = vld [vmem:[#allocation16 + $0x768] sm:$0xff] }
 0x7cb   :  { %3627 = vmatpush.msra.mxu3 %v3556_v38  ;;  %3673 = vmatpush.msra.mxu1 %v3557_v40 }
 0x7cc   :  { %3604 = vmatpush.msra.mxu2 %v3524_v50  ;;  %3650 = vmatpush.msra.mxu0 %v3525_v51  ;;  %v3730_v50 = vld [vmem:[#allocation16 + $0x750] sm:$0xff]  ;;  %v3705_v51 = vld [vmem:[#allocation16 + $0x688] sm:$0xff] }
 0x7cd   :  { %3628 = vmatpush.msra.mxu3 %v3554_v42  ;;  %3674 = vmatpush.msra.mxu1 %v3555_v44  ;;  %v3706_v44 = vld [vmem:[#allocation16 + $0x690] sm:$0xff] }
 0x7ce   :  { %3605 = vmatpush.msra.mxu2 %v3522_v52  ;;  %3651 = vmatpush.msra.mxu0 %v3523_v53  ;;  %v3731_v52 = vld [vmem:[#allocation16 + $0x758] sm:$0xff]  ;;  %v3702_v53 = vld [vmem:[#allocation16 + $0x670] sm:$0xff] }
 0x7cf   :  { %3629 = vmatpush.msra.mxu3 %v3552_v46  ;;  %3675 = vmatpush.msra.mxu1 %v3553_v49  ;;  %v3707_v46 = vld [vmem:[#allocation16 + $0x698] sm:$0xff]  ;;  %v3704_v49 = vld [vmem:[#allocation16 + $0x680] sm:$0xff] }
 0x7d0   :  { %3652 = vmatpush.msra.mxu0 %v3521_v54  ;;  %v3703_v54 = vld [vmem:[#allocation16 + $0x678] sm:$0xff] }
 0x82b   :  { %v3318_v61 = vpop.f32.mrf.mxu0  ;;  %v3341_v62 = vpop.f32.mrf.mxu1 }
 0x82c   :  { %v3319_v2 = vadd.f32 %v3318_v61, %v3252_v48  ;;  %v3747_v61 = vld [vmem:[#allocation16 + $0x7d8] sm:$0xff] }
 0x82e   :  { %v3342_v4 = vadd.f32 %v3341_v62, %v3319_v2  ;;  %v3718_v62 = vld [vmem:[#allocation16 + $0x6f0] sm:$0xff]  ;;  %v3744_v2 = vld [vmem:[#allocation16 + $0x7c0] sm:$0xff] }
 0x830   :  { %v3348_v5 = vmax.f32 %v3342_v4, 0.0  ;;  %v3272_v6 = vpop.f32.mrf.mxu2  ;;  %v3295_v7 = vpop.f32.mrf.mxu3  ;;  %v3714_v4 = vld [vmem:[#allocation16 + $0x6d0] sm:$0xff] }
 0x831   :  { %v3273_v8 = vadd.f32 %v3272_v6, %v3251_v0  ;;  %v3742_v6 = vld [vmem:[#allocation16 + $0x7b0] sm:$0xff] }
 0x832   :  { %3462 = vmatmul.f32.vlgmr.msrb.gmra.mxu3 %v3348_v5  ;;  %3508 = vmatmul.f32.vlgmr.msrb.gmra.mxu1 %v3348_v5  ;;  %v3715_v5 = vld [vmem:[#allocation16 + $0x6d8] sm:$0xff] }
 0x833   :  { %v3296_v9 = vadd.f32 %v3295_v7, %v3273_v8  ;;  %v3321_v10 = vpop.f32.mrf.mxu0  ;;  %v3344_v13 = vpop.f32.mrf.mxu1  ;;  %3782 = vmatpush.msrb.mxu3 %v3750_v55  ;;  %3828 = vmatpush.msrb.mxu1 %v3751_v56  ;;  %v3743_v7 = vld [vmem:[#allocation16 + $0x7b8] sm:$0xff]  ;;  %v3712_v8 = vld [vmem:[#allocation16 + $0x6c0] sm:$0xff]  ;;  %v3729_v55 = vld [vmem:[#allocation16 + $0x748] sm:$0xff] }
 0x834   :  { %v3322_v11 = vadd.f32 %v3321_v10, %v3252_v48  ;;  %v3520_v48 = vld [vmem:[#allocation16 + $0x400] sm:$0xff]  ;;  %v3420_v10 = vperm.slane %v6757_v3, 1  ;;  %v3723_v3 = vld [vmem:[#allocation16 + $0x718] sm:$0xff] }
 0x835   :  { %v3347_v12 = vmax.f32 %v3296_v9, 0.0  ;;  %3606 = vmatpush.msra.mxu2 %v3520_v48  ;;  %3783 = vmatpush.msrb.mxu3 %v3748_v58  ;;  %v3713_v9 = vld [vmem:[#allocation16 + $0x6c8] sm:$0xff]  ;;  %v3728_v48 = vld [vmem:[#allocation16 + $0x740] sm:$0xff]  ;;  %v3726_v58 = vld [vmem:[#allocation16 + $0x730] sm:$0xff] }
 0x836   :  { %v3345_v14 = vadd.f32 %v3344_v13, %v3322_v11  ;;  %3829 = vmatpush.msrb.mxu1 %v3749_v59  ;;  %v3740_v11 = vld [vmem:[#allocation16 + $0x7a0] sm:$0xff]  ;;  %v3710_v13 = vld [vmem:[#allocation16 + $0x6b0] sm:$0xff]  ;;  %v3701_v59 = vld [vmem:[#allocation16 + $0x668] sm:$0xff] }
 0x837   :  { %3439 = vmatmul.f32.vlgmr.msrb.gmra.mxu2 %v3347_v12  ;;  %3485 = vmatmul.f32.vlgmr.msrb.gmra.mxu0 %v3347_v12  ;;  %v3741_v12 = vld [vmem:[#allocation16 + $0x7a8] sm:$0xff]  ;;  %v3700_v56 = vld [vmem:[#allocation16 + $0x660] sm:$0xff] }
 0x838   :  { %v3350_v15 = vmax.f32 %v3345_v14, 0.0  ;;  %v3275_v16 = vpop.f32.mrf.mxu2  ;;  %v3298_v18 = vpop.f32.mrf.mxu3  ;;  %3759 = vmatpush.msrb.mxu2 %v3718_v62  ;;  %3805 = vmatpush.msrb.mxu0 %v3719_v63  ;;  %v3711_v14 = vld [vmem:[#allocation16 + $0x6b8] sm:$0xff]  ;;  %v3724_v62 = vld [vmem:[#allocation16 + $0x720] sm:$0xff] }
 0x839   :  { %v3276_v17 = vadd.f32 %v3275_v16, %v3251_v0  ;;  %v3745_v0 = vld [vmem:[#allocation16 + $0x7c8] sm:$0xff]  ;;  %3784 = vmatpush.msrb.mxu3 %v3746_v60  ;;  %3830 = vmatpush.msrb.mxu1 %v3747_v61  ;;  %v3739_v16 = vld [vmem:[#allocation16 + $0x798] sm:$0xff]  ;;  %v3698_v61 = vld [vmem:[#allocation16 + $0x650] sm:$0xff] }
 0x83a   :  { %3465 = vmatmul.f32.gmra.mxu3 %v3350_v15  ;;  %3511 = vmatmul.f32.gmra.mxu1 %v3350_v15  ;;  %v3738_v15 = vld [vmem:[#allocation16 + $0x790] sm:$0xff]  ;;  %v3727_v60 = vld [vmem:[#allocation16 + $0x738] sm:$0xff] }
 0x83b   :  { %v3299_v19 = vadd.f32 %v3298_v18, %v3276_v17  ;;  %3760 = vmatpush.msrb.mxu2 %v3716_v1  ;;  %3806 = vmatpush.msrb.mxu0 %v3717_v57  ;;  %v3699_v63 = vld [vmem:[#allocation16 + $0x658] sm:$0xff]  ;;  %v3725_v1 = vld [vmem:[#allocation16 + $0x728] sm:$0xff] }
 0x83c   :  { %3785 = vmatpush.msrb.mxu3 %v3744_v2  ;;  %3831 = vmatpush.msrb.mxu1 %v3745_v0  ;;  %v3696_v2 = vld [vmem:[#allocation16 + $0x640] sm:$0xff]  ;;  %v3722_v0 = vld [vmem:[#allocation16 + $0x710] sm:$0xff]  ;;  %v3697_v57 = vld [vmem:[#allocation16 + $0x648] sm:$0xff] }
 0x83d   :  { %v3349_v20 = vmax.f32 %v3299_v19, 0.0  ;;  %3761 = vmatpush.msrb.mxu2 %v3714_v4  ;;  %3807 = vmatpush.msrb.mxu0 %v3715_v5  ;;  %v3708_v19 = vld [vmem:[#allocation16 + $0x6a0] sm:$0xff]  ;;  %v3694_v4 = vld [vmem:[#allocation16 + $0x630] sm:$0xff] }
 0x83e   :  { %3786 = vmatpush.msrb.mxu3 %v3742_v6  ;;  %3832 = vmatpush.msrb.mxu1 %v3743_v7  ;;  %v3720_v5 = vld [vmem:[#allocation16 + $0x700] sm:$0xff]  ;;  %v3695_v6 = vld [vmem:[#allocation16 + $0x638] sm:$0xff]  ;;  %v3721_v7 = vld [vmem:[#allocation16 + $0x708] sm:$0xff] }
 0x83f   :  { %3442 = vmatmul.f32.gmra.mxu2 %v3349_v20  ;;  %3488 = vmatmul.f32.gmra.mxu0 %v3349_v20  ;;  %v3709_v20 = vld [vmem:[#allocation16 + $0x6a8] sm:$0xff] }
 0x840   :  { %3762 = vmatpush.msrb.mxu2 %v3712_v8  ;;  %3808 = vmatpush.msrb.mxu0 %v3713_v9  ;;  %v3692_v8 = vld [vmem:[#allocation16 + $0x620] sm:$0xff]  ;;  %v3693_v9 = vld [vmem:[#allocation16 + $0x628] sm:$0xff] }
 0x841   :  { %3787 = vmatpush.msrb.mxu3 %v3740_v11  ;;  %3833 = vmatpush.msrb.mxu1 %v3741_v12  ;;  %v3691_v11 = vld [vmem:[#allocation16 + $0x618] sm:$0xff]  ;;  %v3688_v12 = vld [vmem:[#allocation16 + $0x600] sm:$0xff] }
 0x842   :  { %3763 = vmatpush.msrb.mxu2 %v3710_v13  ;;  %3809 = vmatpush.msrb.mxu0 %v3711_v14  ;;  %v3689_v13 = vld [vmem:[#allocation16 + $0x608] sm:$0xff]  ;;  %v3918_v14 = vld [vmem:[#allocation16 + $0x9f0] sm:$0xff] }
 0x843   :  { %3788 = vmatpush.msrb.mxu3 %v3738_v15  ;;  %3834 = vmatpush.msrb.mxu1 %v3739_v16  ;;  %v3919_v15 = vld [vmem:[#allocation16 + $0x9f8] sm:$0xff]  ;;  %v3916_v16 = vld [vmem:[#allocation16 + $0x9e0] sm:$0xff] }
 0x844   :  { %3764 = vmatpush.msrb.mxu2 %v3708_v19  ;;  %3810 = vmatpush.msrb.mxu0 %v3709_v20  ;;  %v3915_v19 = vld [vmem:[#allocation16 + $0x9d8] sm:$0xff]  ;;  %v3886_v20 = vld [vmem:[#allocation16 + $0x8f0] sm:$0xff] }
 0x845   :  { %3789 = vmatpush.msrb.mxu3 %v3736_v22  ;;  %3835 = vmatpush.msrb.mxu1 %v3737_v23  ;;  %v3884_v22 = vld [vmem:[#allocation16 + $0x8e0] sm:$0xff] }
 0x846   :  { %3765 = vmatpush.msrb.mxu2 %v3706_v44  ;;  %3811 = vmatpush.msrb.mxu0 %v3707_v46  ;;  %v3912_v23 = vld [vmem:[#allocation16 + $0x9c0] sm:$0xff]  ;;  %v3905_v46 = vld [vmem:[#allocation16 + $0x988] sm:$0xff] }
 0x847   :  { %3790 = vmatpush.msrb.mxu3 %v3734_v26  ;;  %3836 = vmatpush.msrb.mxu1 %v3735_v27  ;;  %v6761_v26 = vld [vmem:[#allocation17 + $0x4] sm:$0x3]  ;;  %v3882_v27 = vld [vmem:[#allocation16 + $0x8d0] sm:$0xff] }
 0x848   :  { %3766 = vmatpush.msrb.mxu2 %v3704_v49  ;;  %3812 = vmatpush.msrb.mxu0 %v3705_v51  ;;  %v3587_v49 = vperm.slane %v6761_v26, 0  ;;  %v3903_v51 = vld [vmem:[#allocation16 + $0x978] sm:$0xff] }
 0x849   :  { %3791 = vmatpush.msrb.mxu3 %v3732_v45  ;;  %3837 = vmatpush.msrb.mxu1 %v3733_v47  ;;  %v3904_v45 = vld [vmem:[#allocation16 + $0x980] sm:$0xff] }
 0x84a   :  { %3767 = vmatpush.msrb.mxu2 %v3702_v53  ;;  %3813 = vmatpush.msrb.mxu0 %v3703_v54 }
 0x84b   :  { %3792 = vmatpush.msrb.mxu3 %v3730_v50  ;;  %3838 = vmatpush.msrb.mxu1 %v3731_v52  ;;  %v3902_v50 = vld [vmem:[#allocation16 + $0x970] sm:$0xff] }
 0x84c   :  { %3768 = vmatpush.msrb.mxu2 %v3700_v56  ;;  %3814 = vmatpush.msrb.mxu0 %v3701_v59 }
 0x84d   :  { %3793 = vmatpush.msrb.mxu3 %v3728_v48  ;;  %3839 = vmatpush.msrb.mxu1 %v3729_v55 }
 0x84e   :  { %3769 = vmatpush.msrb.mxu2 %v3698_v61  ;;  %3815 = vmatpush.msrb.mxu0 %v3699_v63 }
 0x84f   :  { %3794 = vmatpush.msrb.mxu3 %v3726_v58  ;;  %3840 = vmatpush.msrb.mxu1 %v3727_v60 }
 0x850   :  { %3770 = vmatpush.msrb.mxu2 %v3696_v2  ;;  %3816 = vmatpush.msrb.mxu0 %v3697_v57 }
 0x851   :  { %3795 = vmatpush.msrb.mxu3 %v3724_v62  ;;  %3841 = vmatpush.msrb.mxu1 %v3725_v1 }
 0x852   :  { %3771 = vmatpush.msrb.mxu2 %v3694_v4  ;;  %3817 = vmatpush.msrb.mxu0 %v3695_v6  ;;  %v3900_v4 = vld [vmem:[#allocation16 + $0x960] sm:$0xff]  ;;  %v3901_v6 = vld [vmem:[#allocation16 + $0x968] sm:$0xff] }
 0x853   :  { %3796 = vmatpush.msrb.mxu3 %v3722_v0  ;;  %3842 = vmatpush.msrb.mxu1 %v3723_v3  ;;  %v3874_v3 = vld [vmem:[#allocation16 + $0x890] sm:$0xff] }
 0x854   :  { %3772 = vmatpush.msrb.mxu2 %v3692_v8  ;;  %3818 = vmatpush.msrb.mxu0 %v3693_v9  ;;  %v3898_v8 = vld [vmem:[#allocation16 + $0x950] sm:$0xff]  ;;  %v3873_v9 = vld [vmem:[#allocation16 + $0x888] sm:$0xff] }
 0x855   :  { %3797 = vmatpush.msrb.mxu3 %v3720_v5  ;;  %3843 = vmatpush.msrb.mxu1 %v3721_v7  ;;  %v3875_v5 = vld [vmem:[#allocation16 + $0x898] sm:$0xff]  ;;  %v3872_v7 = vld [vmem:[#allocation16 + $0x880] sm:$0xff] }
 0x856   :  { %3819 = vmatpush.msrb.mxu0 %v3691_v11  ;;  %v3870_v11 = vld [vmem:[#allocation16 + $0x870] sm:$0xff] }
 0x858   :  { %3820 = vmatpush.msrb.mxu0 %v3689_v13  ;;  %v3871_v13 = vld [vmem:[#allocation16 + $0x878] sm:$0xff] }
 0x8af   :  { %v3509_v17 = vpop.f32.mrf.mxu1 }
 0x8b4   :  { %v3486_v18 = vpop.f32.mrf.mxu0 }
 0x8b5   :  { %v3487_v21 = vadd.f32 %v3486_v18, %v3420_v10  ;;  %v3463_v29 = vpop.f32.mrf.mxu3  ;;  %v3914_v18 = vld [vmem:[#allocation16 + $0x9d0] sm:$0xff] }
 0x8b7   :  { %v3510_v24 = vadd.f32 %v3509_v17, %v3487_v21  ;;  %v3512_v35 = vpop.f32.mrf.mxu1  ;;  %v3917_v17 = vld [vmem:[#allocation16 + $0x9e8] sm:$0xff]  ;;  %v3887_v21 = vld [vmem:[#allocation16 + $0x8f8] sm:$0xff] }
 0x8b9   :  { %v3516_v28 = vmax.f32 %v3510_v24, 0.0  ;;  %v3913_v24 = vld [vmem:[#allocation16 + $0x9c8] sm:$0xff] }
 0x8ba   :  { %v3440_v30 = vpop.f32.mrf.mxu2 }
 0x8bb   :  { %v3441_v31 = vadd.f32 %v3440_v30, %v3419_v25  ;;  %3630 = vmatmul.f32.vlgmr.msra.gmra.mxu3 %v3516_v28  ;;  %3676 = vmatmul.f32.vlgmr.msra.gmra.mxu1 %v3516_v28  ;;  %v3883_v28 = vld [vmem:[#allocation16 + $0x8d8] sm:$0xff] }
 0x8bc   :  { %v3489_v32 = vpop.f32.mrf.mxu0  ;;  %3950 = vmatpush.msra.mxu3 %v3918_v14  ;;  %3996 = vmatpush.msra.mxu1 %v3919_v15  ;;  %v3911_v30 = vld [vmem:[#allocation16 + $0x9b8] sm:$0xff]  ;;  %v3897_v14 = vld [vmem:[#allocation16 + $0x948] sm:$0xff]  ;;  %v3868_v15 = vld [vmem:[#allocation16 + $0x860] sm:$0xff] }
 0x8bd   :  { %v3464_v33 = vadd.f32 %v3463_v29, %v3441_v31  ;;  %v3490_v34 = vadd.f32 %v3489_v32, %v3420_v10  ;;  %v3466_v41 = vpop.f32.mrf.mxu3  ;;  %v3690_v10 = vld [vmem:[#allocation16 + $0x610] sm:$0xff]  ;;  %v3880_v31 = vld [vmem:[#allocation16 + $0x8c0] sm:$0xff]  ;;  %v3881_v32 = vld [vmem:[#allocation16 + $0x8c8] sm:$0xff] }
 0x8be   :  { %3773 = vmatpush.msrb.mxu2 %v3690_v10  ;;  %3951 = vmatpush.msra.mxu3 %v3916_v16  ;;  %v3910_v29 = vld [vmem:[#allocation16 + $0x9b0] sm:$0xff]  ;;  %v3899_v10 = vld [vmem:[#allocation16 + $0x958] sm:$0xff] }
 0x8bf   :  { %v3515_v36 = vmax.f32 %v3464_v33, 0.0  ;;  %v3513_v37 = vadd.f32 %v3512_v35, %v3490_v34  ;;  %3997 = vmatpush.msra.mxu1 %v3917_v17  ;;  %v3588_v33 = vperm.slane %v6761_v26, 1  ;;  %v3908_v34 = vld [vmem:[#allocation16 + $0x9a0] sm:$0xff]  ;;  %v3909_v35 = vld [vmem:[#allocation16 + $0x9a8] sm:$0xff]  ;;  %v3894_v16 = vld [vmem:[#allocation16 + $0x930] sm:$0xff] }
 0x8c0   :  { %3774 = vmatpush.msrb.mxu2 %v3688_v12  ;;  %3952 = vmatpush.msra.mxu3 %v3914_v18  ;;  %v3896_v12 = vld [vmem:[#allocation16 + $0x940] sm:$0xff]  ;;  %v3869_v17 = vld [vmem:[#allocation16 + $0x868] sm:$0xff]  ;;  %v3895_v18 = vld [vmem:[#allocation16 + $0x938] sm:$0xff] }
 0x8c1   :  { %3607 = vmatmul.f32.vlgmr.msra.gmra.mxu2 %v3515_v36  ;;  %3653 = vmatmul.f32.vlgmr.msra.gmra.mxu0 %v3515_v36  ;;  %v3518_v38 = vmax.f32 %v3513_v37, 0.0  ;;  %v3878_v36 = vld [vmem:[#allocation16 + $0x8b0] sm:$0xff]  ;;  %v3879_v37 = vld [vmem:[#allocation16 + $0x8b8] sm:$0xff] }
 0x8c2   :  { %v3443_v39 = vpop.f32.mrf.mxu2  ;;  %3927 = vmatpush.msra.mxu2 %v3886_v20  ;;  %3973 = vmatpush.msra.mxu0 %v3887_v21  ;;  %v3892_v20 = vld [vmem:[#allocation16 + $0x920] sm:$0xff]  ;;  %v3867_v21 = vld [vmem:[#allocation16 + $0x858] sm:$0xff] }
 0x8c3   :  { %v3444_v40 = vadd.f32 %v3443_v39, %v3419_v25  ;;  %3633 = vmatmul.f32.gmra.mxu3 %v3518_v38  ;;  %3679 = vmatmul.f32.gmra.mxu1 %v3518_v38  ;;  %v3885_v25 = vld [vmem:[#allocation16 + $0x8e8] sm:$0xff]  ;;  %v3906_v38 = vld [vmem:[#allocation16 + $0x990] sm:$0xff]  ;;  %v3907_v39 = vld [vmem:[#allocation16 + $0x998] sm:$0xff] }
 0x8c4   :  { %3998 = vmatpush.msra.mxu1 %v3915_v19  ;;  %3928 = vmatpush.msra.mxu2 %v3884_v22  ;;  %v3866_v19 = vld [vmem:[#allocation16 + $0x850] sm:$0xff]  ;;  %v3893_v22 = vld [vmem:[#allocation16 + $0x928] sm:$0xff]  ;;  %v3891_v26 = vld [vmem:[#allocation16 + $0x918] sm:$0xff] }
 0x8c5   :  { %v3467_v42 = vadd.f32 %v3466_v41, %v3444_v40  ;;  %3974 = vmatpush.msra.mxu0 %v3885_v25  ;;  %3953 = vmatpush.msra.mxu3 %v3912_v23  ;;  %v3864_v23 = vld [vmem:[#allocation16 + $0x840] sm:$0xff]  ;;  %v3865_v25 = vld [vmem:[#allocation16 + $0x848] sm:$0xff] }
 0x8c6   :  { %3999 = vmatpush.msra.mxu1 %v3913_v24  ;;  %3929 = vmatpush.msra.mxu2 %v3882_v27  ;;  %v3890_v24 = vld [vmem:[#allocation16 + $0x910] sm:$0xff] }
 0x8c7   :  { %v3517_v43 = vmax.f32 %v3467_v42, 0.0  ;;  %3975 = vmatpush.msra.mxu0 %v3883_v28  ;;  %3954 = vmatpush.msra.mxu3 %v3910_v29  ;;  %v3876_v42 = vld [vmem:[#allocation16 + $0x8a0] sm:$0xff]  ;;  %v3862_v27 = vld [vmem:[#allocation16 + $0x830] sm:$0xff]  ;;  %v3863_v29 = vld [vmem:[#allocation16 + $0x838] sm:$0xff] }
 0x8c8   :  { %4000 = vmatpush.msra.mxu1 %v3911_v30  ;;  %3930 = vmatpush.msra.mxu2 %v3880_v31  ;;  %v3888_v28 = vld [vmem:[#allocation16 + $0x900] sm:$0xff]  ;;  %v3889_v30 = vld [vmem:[#allocation16 + $0x908] sm:$0xff] }
 0x8c9   :  { %3610 = vmatmul.f32.gmra.mxu2 %v3517_v43  ;;  %3656 = vmatmul.f32.gmra.mxu0 %v3517_v43  ;;  %v3877_v43 = vld [vmem:[#allocation16 + $0x8a8] sm:$0xff]  ;;  %v3860_v31 = vld [vmem:[#allocation16 + $0x820] sm:$0xff] }
 0x8ca   :  { %3976 = vmatpush.msra.mxu0 %v3881_v32  ;;  %3955 = vmatpush.msra.mxu3 %v3908_v34  ;;  %v3861_v32 = vld [vmem:[#allocation16 + $0x828] sm:$0xff]  ;;  %v3859_v34 = vld [vmem:[#allocation16 + $0x818] sm:$0xff] }
 0x8cb   :  { %4001 = vmatpush.msra.mxu1 %v3909_v35  ;;  %3931 = vmatpush.msra.mxu2 %v3878_v36  ;;  %v3856_v35 = vld [vmem:[#allocation16 + $0x800] sm:$0xff]  ;;  %v3857_v36 = vld [vmem:[#allocation16 + $0x808] sm:$0xff] }
 0x8cc   :  { %3977 = vmatpush.msra.mxu0 %v3879_v37  ;;  %3956 = vmatpush.msra.mxu3 %v3906_v38  ;;  %v4086_v37 = vld [vmem:[#allocation16 + $0xbf0] sm:$0xff]  ;;  %v4087_v38 = vld [vmem:[#allocation16 + $0xbf8] sm:$0xff] }
 0x8cd   :  { %4002 = vmatpush.msra.mxu1 %v3907_v39  ;;  %3932 = vmatpush.msra.mxu2 %v3876_v42  ;;  %v4084_v39 = vld [vmem:[#allocation16 + $0xbe0] sm:$0xff]  ;;  %v4083_v42 = vld [vmem:[#allocation16 + $0xbd8] sm:$0xff] }
 0x8ce   :  { %3978 = vmatpush.msra.mxu0 %v3877_v43  ;;  %3957 = vmatpush.msra.mxu3 %v3904_v45  ;;  %v4054_v43 = vld [vmem:[#allocation16 + $0xaf0] sm:$0xff]  ;;  %v4052_v45 = vld [vmem:[#allocation16 + $0xae0] sm:$0xff] }
 0x8cf   :  { %4003 = vmatpush.msra.mxu1 %v3905_v46  ;;  %3933 = vmatpush.msra.mxu2 %v3874_v3  ;;  %v4080_v46 = vld [vmem:[#allocation16 + $0xbc0] sm:$0xff] }
 0x8d0   :  { %3958 = vmatpush.msra.mxu3 %v3902_v50  ;;  %3979 = vmatpush.msra.mxu0 %v3875_v5  ;;  %v6765_v50 = vld [vmem:[#allocation17 + $0x6] sm:$0x3]  ;;  %v4073_v5 = vld [vmem:[#allocation16 + $0xb88] sm:$0xff] }
 0x8d1   :  { %4004 = vmatpush.msra.mxu1 %v3903_v51  ;;  %3934 = vmatpush.msra.mxu2 %v3872_v7  ;;  %v4050_v51 = vld [vmem:[#allocation16 + $0xad0] sm:$0xff]  ;;  %v3755_v7 = vperm.slane %v6765_v50, 0 }
 0x8d2   :  { %3959 = vmatpush.msra.mxu3 %v3900_v4  ;;  %3980 = vmatpush.msra.mxu0 %v3873_v9  ;;  %v4072_v4 = vld [vmem:[#allocation16 + $0xb80] sm:$0xff]  ;;  %v4071_v9 = vld [vmem:[#allocation16 + $0xb78] sm:$0xff] }
 0x8d3   :  { %4005 = vmatpush.msra.mxu1 %v3901_v6  ;;  %3935 = vmatpush.msra.mxu2 %v3870_v11 }
 0x8d4   :  { %3960 = vmatpush.msra.mxu3 %v3898_v8  ;;  %3981 = vmatpush.msra.mxu0 %v3871_v13  ;;  %v4070_v8 = vld [vmem:[#allocation16 + $0xb70] sm:$0xff] }
 0x8d5   :  { %4006 = vmatpush.msra.mxu1 %v3899_v10  ;;  %3936 = vmatpush.msra.mxu2 %v3868_v15 }
 0x8d6   :  { %3961 = vmatpush.msra.mxu3 %v3896_v12  ;;  %3982 = vmatpush.msra.mxu0 %v3869_v17 }
 0x8d7   :  { %4007 = vmatpush.msra.mxu1 %v3897_v14  ;;  %3937 = vmatpush.msra.mxu2 %v3866_v19 }
 0x8d8   :  { %3962 = vmatpush.msra.mxu3 %v3894_v16  ;;  %3983 = vmatpush.msra.mxu0 %v3867_v21 }
 0x8d9   :  { %4008 = vmatpush.msra.mxu1 %v3895_v18  ;;  %3938 = vmatpush.msra.mxu2 %v3864_v23 }
 0x8da   :  { %3963 = vmatpush.msra.mxu3 %v3892_v20  ;;  %3984 = vmatpush.msra.mxu0 %v3865_v25 }
 0x8db   :  { %4009 = vmatpush.msra.mxu1 %v3893_v22  ;;  %3939 = vmatpush.msra.mxu2 %v3862_v27  ;;  %v4068_v27 = vld [vmem:[#allocation16 + $0xb60] sm:$0xff] }
 0x8dc   :  { %3964 = vmatpush.msra.mxu3 %v3890_v24  ;;  %3985 = vmatpush.msra.mxu0 %v3863_v29  ;;  %v4069_v29 = vld [vmem:[#allocation16 + $0xb68] sm:$0xff] }
 0x8dd   :  { %4010 = vmatpush.msra.mxu1 %v3891_v26  ;;  %3940 = vmatpush.msra.mxu2 %v3860_v31  ;;  %v4042_v26 = vld [vmem:[#allocation16 + $0xa90] sm:$0xff] }
 0x8de   :  { %3965 = vmatpush.msra.mxu3 %v3888_v28  ;;  %3986 = vmatpush.msra.mxu0 %v3861_v32  ;;  %v4043_v28 = vld [vmem:[#allocation16 + $0xa98] sm:$0xff]  ;;  %v4066_v31 = vld [vmem:[#allocation16 + $0xb50] sm:$0xff]  ;;  %v4041_v32 = vld [vmem:[#allocation16 + $0xa88] sm:$0xff] }
 0x8df   :  { %4011 = vmatpush.msra.mxu1 %v3889_v30  ;;  %v4040_v30 = vld [vmem:[#allocation16 + $0xa80] sm:$0xff] }
 0x8e0   :  { %3987 = vmatpush.msra.mxu0 %v3859_v34  ;;  %v4038_v34 = vld [vmem:[#allocation16 + $0xa70] sm:$0xff] }
 0x8e2   :  { %3988 = vmatpush.msra.mxu0 %v3857_v36  ;;  %v4039_v36 = vld [vmem:[#allocation16 + $0xa78] sm:$0xff] }
 0x938   :  { %v3677_v40 = vpop.f32.mrf.mxu1 }
 0x93e   :  { %v3654_v41 = vpop.f32.mrf.mxu0  ;;  %v3631_v53 = vpop.f32.mrf.mxu3 }
 0x93f   :  { %v3655_v44 = vadd.f32 %v3654_v41, %v3588_v33  ;;  %v4082_v41 = vld [vmem:[#allocation16 + $0xbd0] sm:$0xff] }
 0x940   :  { %v3680_v59 = vpop.f32.mrf.mxu1 }
 0x941   :  { %v3678_v47 = vadd.f32 %v3677_v40, %v3655_v44  ;;  %v4085_v40 = vld [vmem:[#allocation16 + $0xbe8] sm:$0xff]  ;;  %v4055_v44 = vld [vmem:[#allocation16 + $0xaf8] sm:$0xff] }
 0x943   :  { %v3684_v52 = vmax.f32 %v3678_v47, 0.0  ;;  %v4081_v47 = vld [vmem:[#allocation16 + $0xbc8] sm:$0xff] }
 0x944   :  { %v3608_v48 = vpop.f32.mrf.mxu2 }
 0x945   :  { %v3609_v54 = vadd.f32 %v3608_v48, %v3587_v49  ;;  %3798 = vmatmul.f32.vlgmr.msrb.gmra.mxu3 %v3684_v52  ;;  %3844 = vmatmul.f32.vlgmr.msrb.gmra.mxu1 %v3684_v52  ;;  %v4051_v52 = vld [vmem:[#allocation16 + $0xad8] sm:$0xff] }
 0x946   :  { %v3657_v55 = vpop.f32.mrf.mxu0  ;;  %v3634_v2 = vpop.f32.mrf.mxu3  ;;  %4118 = vmatpush.msrb.mxu3 %v4086_v37  ;;  %4164 = vmatpush.msrb.mxu1 %v4087_v38  ;;  %v4079_v48 = vld [vmem:[#allocation16 + $0xbb8] sm:$0xff]  ;;  %v4065_v37 = vld [vmem:[#allocation16 + $0xb48] sm:$0xff]  ;;  %v4036_v38 = vld [vmem:[#allocation16 + $0xa60] sm:$0xff] }
 0x947   :  { %v3632_v56 = vadd.f32 %v3631_v53, %v3609_v54  ;;  %v3658_v58 = vadd.f32 %v3657_v55, %v3588_v33  ;;  %v3858_v33 = vld [vmem:[#allocation16 + $0x810] sm:$0xff]  ;;  %v4048_v54 = vld [vmem:[#allocation16 + $0xac0] sm:$0xff]  ;;  %v4049_v55 = vld [vmem:[#allocation16 + $0xac8] sm:$0xff] }
 0x948   :  { %3941 = vmatpush.msra.mxu2 %v3858_v33  ;;  %4119 = vmatpush.msrb.mxu3 %v4084_v39  ;;  %v4078_v53 = vld [vmem:[#allocation16 + $0xbb0] sm:$0xff]  ;;  %v4067_v33 = vld [vmem:[#allocation16 + $0xb58] sm:$0xff] }
 0x949   :  { %v3683_v60 = vmax.f32 %v3632_v56, 0.0  ;;  %v3681_v61 = vadd.f32 %v3680_v59, %v3658_v58  ;;  %4165 = vmatpush.msrb.mxu1 %v4085_v40  ;;  %v3756_v56 = vperm.slane %v6765_v50, 1  ;;  %v4076_v58 = vld [vmem:[#allocation16 + $0xba0] sm:$0xff]  ;;  %v4077_v59 = vld [vmem:[#allocation16 + $0xba8] sm:$0xff]  ;;  %v4062_v39 = vld [vmem:[#allocation16 + $0xb30] sm:$0xff] }
 0x94a   :  { %3942 = vmatpush.msra.mxu2 %v3856_v35  ;;  %4120 = vmatpush.msrb.mxu3 %v4082_v41  ;;  %v4064_v35 = vld [vmem:[#allocation16 + $0xb40] sm:$0xff]  ;;  %v4037_v40 = vld [vmem:[#allocation16 + $0xa68] sm:$0xff]  ;;  %v4063_v41 = vld [vmem:[#allocation16 + $0xb38] sm:$0xff] }
 0x94b   :  { %3775 = vmatmul.f32.vlgmr.msrb.gmra.mxu2 %v3683_v60  ;;  %3821 = vmatmul.f32.vlgmr.msrb.gmra.mxu0 %v3683_v60  ;;  %v3686_v62 = vmax.f32 %v3681_v61, 0.0  ;;  %v4046_v60 = vld [vmem:[#allocation16 + $0xab0] sm:$0xff]  ;;  %v4047_v61 = vld [vmem:[#allocation16 + $0xab8] sm:$0xff] }
 0x94c   :  { %v3611_v63 = vpop.f32.mrf.mxu2  ;;  %4095 = vmatpush.msrb.mxu2 %v4054_v43  ;;  %4141 = vmatpush.msrb.mxu0 %v4055_v44  ;;  %v4060_v43 = vld [vmem:[#allocation16 + $0xb20] sm:$0xff]  ;;  %v4035_v44 = vld [vmem:[#allocation16 + $0xa58] sm:$0xff] }
 0x94d   :  { %v3612_v1 = vadd.f32 %v3611_v63, %v3587_v49  ;;  %3801 = vmatmul.f32.gmra.mxu3 %v3686_v62  ;;  %3847 = vmatmul.f32.gmra.mxu1 %v3686_v62  ;;  %v4053_v49 = vld [vmem:[#allocation16 + $0xae8] sm:$0xff]  ;;  %v4074_v62 = vld [vmem:[#allocation16 + $0xb90] sm:$0xff]  ;;  %v4075_v63 = vld [vmem:[#allocation16 + $0xb98] sm:$0xff] }
 0x94e   :  { %4166 = vmatpush.msrb.mxu1 %v4083_v42  ;;  %4096 = vmatpush.msrb.mxu2 %v4052_v45  ;;  %v4034_v42 = vld [vmem:[#allocation16 + $0xa50] sm:$0xff]  ;;  %v4061_v45 = vld [vmem:[#allocation16 + $0xb28] sm:$0xff]  ;;  %v4059_v50 = vld [vmem:[#allocation16 + $0xb18] sm:$0xff] }
 0x94f   :  { %v3635_v0 = vadd.f32 %v3634_v2, %v3612_v1  ;;  %4142 = vmatpush.msrb.mxu0 %v4053_v49  ;;  %4121 = vmatpush.msrb.mxu3 %v4080_v46  ;;  %v4032_v46 = vld [vmem:[#allocation16 + $0xa40] sm:$0xff]  ;;  %v4033_v49 = vld [vmem:[#allocation16 + $0xa48] sm:$0xff] }
 0x950   :  { %4167 = vmatpush.msrb.mxu1 %v4081_v47  ;;  %4097 = vmatpush.msrb.mxu2 %v4050_v51  ;;  %v4058_v47 = vld [vmem:[#allocation16 + $0xb10] sm:$0xff] }
 0x951   :  { %v3685_v57 = vmax.f32 %v3635_v0, 0.0  ;;  %4143 = vmatpush.msrb.mxu0 %v4051_v52  ;;  %4122 = vmatpush.msrb.mxu3 %v4078_v53  ;;  %v4044_v0 = vld [vmem:[#allocation16 + $0xaa0] sm:$0xff]  ;;  %v4030_v51 = vld [vmem:[#allocation16 + $0xa30] sm:$0xff]  ;;  %v4031_v53 = vld [vmem:[#allocation16 + $0xa38] sm:$0xff] }
 0x952   :  { %4168 = vmatpush.msrb.mxu1 %v4079_v48  ;;  %4098 = vmatpush.msrb.mxu2 %v4048_v54  ;;  %v4056_v52 = vld [vmem:[#allocation16 + $0xb00] sm:$0xff]  ;;  %v4057_v48 = vld [vmem:[#allocation16 + $0xb08] sm:$0xff] }
 0x953   :  { %3778 = vmatmul.f32.gmra.mxu2 %v3685_v57  ;;  %3824 = vmatmul.f32.gmra.mxu0 %v3685_v57  ;;  %v4045_v57 = vld [vmem:[#allocation16 + $0xaa8] sm:$0xff]  ;;  %v4028_v54 = vld [vmem:[#allocation16 + $0xa20] sm:$0xff] }
 0x954   :  { %4144 = vmatpush.msrb.mxu0 %v4049_v55  ;;  %4123 = vmatpush.msrb.mxu3 %v4076_v58  ;;  %v4029_v55 = vld [vmem:[#allocation16 + $0xa28] sm:$0xff]  ;;  %v4027_v58 = vld [vmem:[#allocation16 + $0xa18] sm:$0xff] }
 0x955   :  { %4169 = vmatpush.msrb.mxu1 %v4077_v59  ;;  %4099 = vmatpush.msrb.mxu2 %v4046_v60  ;;  %v4024_v59 = vld [vmem:[#allocation16 + $0xa00] sm:$0xff]  ;;  %v4025_v60 = vld [vmem:[#allocation16 + $0xa08] sm:$0xff] }
 0x956   :  { %4145 = vmatpush.msrb.mxu0 %v4047_v61  ;;  %4124 = vmatpush.msrb.mxu3 %v4074_v62  ;;  %v4254_v61 = vld [vmem:[#allocation16 + $0xdf0] sm:$0xff]  ;;  %v4255_v62 = vld [vmem:[#allocation16 + $0xdf8] sm:$0xff] }
 0x957   :  { %4170 = vmatpush.msrb.mxu1 %v4075_v63  ;;  %4100 = vmatpush.msrb.mxu2 %v4044_v0  ;;  %v4252_v63 = vld [vmem:[#allocation16 + $0xde0] sm:$0xff]  ;;  %v4251_v0 = vld [vmem:[#allocation16 + $0xdd8] sm:$0xff] }
 0x958   :  { %4146 = vmatpush.msrb.mxu0 %v4045_v57  ;;  %4125 = vmatpush.msrb.mxu3 %v4072_v4  ;;  %v4222_v57 = vld [vmem:[#allocation16 + $0xcf0] sm:$0xff]  ;;  %v4220_v4 = vld [vmem:[#allocation16 + $0xce0] sm:$0xff] }
 0x959   :  { %4171 = vmatpush.msrb.mxu1 %v4073_v5  ;;  %4101 = vmatpush.msrb.mxu2 %v4042_v26  ;;  %v4248_v5 = vld [vmem:[#allocation16 + $0xdc0] sm:$0xff] }
 0x95a   :  { %4126 = vmatpush.msrb.mxu3 %v4070_v8  ;;  %4147 = vmatpush.msrb.mxu0 %v4043_v28  ;;  %v6769_v8 = vld [vmem:[#allocation17 + $0x8] sm:$0x3] }
 0x95b   :  { %4172 = vmatpush.msrb.mxu1 %v4071_v9  ;;  %4102 = vmatpush.msrb.mxu2 %v4040_v30  ;;  %v4218_v9 = vld [vmem:[#allocation16 + $0xcd0] sm:$0xff]  ;;  %v4241_v28 = vld [vmem:[#allocation16 + $0xd88] sm:$0xff]  ;;  %v3923_v30 = vperm.slane %v6769_v8, 0 }
 0x95c   :  { %4127 = vmatpush.msrb.mxu3 %v4068_v27  ;;  %4148 = vmatpush.msrb.mxu0 %v4041_v32  ;;  %v4240_v27 = vld [vmem:[#allocation16 + $0xd80] sm:$0xff]  ;;  %v4239_v32 = vld [vmem:[#allocation16 + $0xd78] sm:$0xff] }
 0x95d   :  { %4173 = vmatpush.msrb.mxu1 %v4069_v29  ;;  %4103 = vmatpush.msrb.mxu2 %v4038_v34 }
 0x95e   :  { %4128 = vmatpush.msrb.mxu3 %v4066_v31  ;;  %4149 = vmatpush.msrb.mxu0 %v4039_v36  ;;  %v4238_v31 = vld [vmem:[#allocation16 + $0xd70] sm:$0xff] }
 0x95f   :  { %4174 = vmatpush.msrb.mxu1 %v4067_v33  ;;  %4104 = vmatpush.msrb.mxu2 %v4036_v38 }
 0x960   :  { %4129 = vmatpush.msrb.mxu3 %v4064_v35  ;;  %4150 = vmatpush.msrb.mxu0 %v4037_v40 }
 0x961   :  { %4175 = vmatpush.msrb.mxu1 %v4065_v37  ;;  %4105 = vmatpush.msrb.mxu2 %v4034_v42 }
 0x962   :  { %4130 = vmatpush.msrb.mxu3 %v4062_v39  ;;  %4151 = vmatpush.msrb.mxu0 %v4035_v44 }
 0x963   :  { %4176 = vmatpush.msrb.mxu1 %v4063_v41  ;;  %4106 = vmatpush.msrb.mxu2 %v4032_v46 }
 0x964   :  { %4131 = vmatpush.msrb.mxu3 %v4060_v43  ;;  %4152 = vmatpush.msrb.mxu0 %v4033_v49 }
 0x965   :  { %4177 = vmatpush.msrb.mxu1 %v4061_v45  ;;  %4107 = vmatpush.msrb.mxu2 %v4030_v51  ;;  %v4236_v51 = vld [vmem:[#allocation16 + $0xd60] sm:$0xff] }
 0x966   :  { %4132 = vmatpush.msrb.mxu3 %v4058_v47  ;;  %4153 = vmatpush.msrb.mxu0 %v4031_v53  ;;  %v4237_v53 = vld [vmem:[#allocation16 + $0xd68] sm:$0xff] }
 0x967   :  { %4178 = vmatpush.msrb.mxu1 %v4059_v50  ;;  %4108 = vmatpush.msrb.mxu2 %v4028_v54  ;;  %v4210_v50 = vld [vmem:[#allocation16 + $0xc90] sm:$0xff] }
 0x968   :  { %4133 = vmatpush.msrb.mxu3 %v4056_v52  ;;  %4154 = vmatpush.msrb.mxu0 %v4029_v55  ;;  %v4211_v52 = vld [vmem:[#allocation16 + $0xc98] sm:$0xff]  ;;  %v4234_v54 = vld [vmem:[#allocation16 + $0xd50] sm:$0xff]  ;;  %v4209_v55 = vld [vmem:[#allocation16 + $0xc88] sm:$0xff] }
 0x969   :  { %4179 = vmatpush.msrb.mxu1 %v4057_v48  ;;  %v4208_v48 = vld [vmem:[#allocation16 + $0xc80] sm:$0xff] }
 0x96a   :  { %4155 = vmatpush.msrb.mxu0 %v4027_v58  ;;  %v4206_v58 = vld [vmem:[#allocation16 + $0xc70] sm:$0xff] }
 0x96c   :  { %4156 = vmatpush.msrb.mxu0 %v4025_v60  ;;  %v4207_v60 = vld [vmem:[#allocation16 + $0xc78] sm:$0xff] }
 0x9c2   :  { %v3845_v1 = vpop.f32.mrf.mxu1 }
 0x9c8   :  { %v3822_v2 = vpop.f32.mrf.mxu0  ;;  %v3799_v11 = vpop.f32.mrf.mxu3 }
 0x9c9   :  { %v3823_v3 = vadd.f32 %v3822_v2, %v3756_v56  ;;  %v4250_v2 = vld [vmem:[#allocation16 + $0xdd0] sm:$0xff] }
 0x9ca   :  { %v3848_v17 = vpop.f32.mrf.mxu1 }
 0x9cb   :  { %v3846_v6 = vadd.f32 %v3845_v1, %v3823_v3  ;;  %v4253_v1 = vld [vmem:[#allocation16 + $0xde8] sm:$0xff]  ;;  %v4223_v3 = vld [vmem:[#allocation16 + $0xcf8] sm:$0xff] }
 0x9cd   :  { %v3852_v10 = vmax.f32 %v3846_v6, 0.0  ;;  %v4249_v6 = vld [vmem:[#allocation16 + $0xdc8] sm:$0xff] }
 0x9ce   :  { %v3776_v12 = vpop.f32.mrf.mxu2 }
 0x9cf   :  { %v3777_v13 = vadd.f32 %v3776_v12, %v3755_v7  ;;  %3966 = vmatmul.f32.vlgmr.msra.gmra.mxu3 %v3852_v10  ;;  %4012 = vmatmul.f32.vlgmr.msra.gmra.mxu1 %v3852_v10  ;;  %v4219_v10 = vld [vmem:[#allocation16 + $0xcd8] sm:$0xff] }
 0x9d0   :  { %v3825_v14 = vpop.f32.mrf.mxu0  ;;  %v3802_v23 = vpop.f32.mrf.mxu3  ;;  %4286 = vmatpush.msra.mxu3 %v4254_v61  ;;  %4332 = vmatpush.msra.mxu1 %v4255_v62  ;;  %v4247_v12 = vld [vmem:[#allocation16 + $0xdb8] sm:$0xff]  ;;  %v4233_v61 = vld [vmem:[#allocation16 + $0xd48] sm:$0xff]  ;;  %v4204_v62 = vld [vmem:[#allocation16 + $0xc60] sm:$0xff] }
 0x9d1   :  { %v3800_v15 = vadd.f32 %v3799_v11, %v3777_v13  ;;  %v3826_v16 = vadd.f32 %v3825_v14, %v3756_v56  ;;  %v4026_v56 = vld [vmem:[#allocation16 + $0xa10] sm:$0xff]  ;;  %v4216_v13 = vld [vmem:[#allocation16 + $0xcc0] sm:$0xff]  ;;  %v4217_v14 = vld [vmem:[#allocation16 + $0xcc8] sm:$0xff] }
 0x9d2   :  { %4109 = vmatpush.msrb.mxu2 %v4026_v56  ;;  %4287 = vmatpush.msra.mxu3 %v4252_v63  ;;  %v4246_v11 = vld [vmem:[#allocation16 + $0xdb0] sm:$0xff]  ;;  %v4235_v56 = vld [vmem:[#allocation16 + $0xd58] sm:$0xff] }
 0x9d3   :  { %v3851_v18 = vmax.f32 %v3800_v15, 0.0  ;;  %v3849_v19 = vadd.f32 %v3848_v17, %v3826_v16  ;;  %4333 = vmatpush.msra.mxu1 %v4253_v1  ;;  %v3924_v15 = vperm.slane %v6769_v8, 1  ;;  %v4244_v16 = vld [vmem:[#allocation16 + $0xda0] sm:$0xff]  ;;  %v4245_v17 = vld [vmem:[#allocation16 + $0xda8] sm:$0xff]  ;;  %v4230_v63 = vld [vmem:[#allocation16 + $0xd30] sm:$0xff] }
 0x9d4   :  { %4110 = vmatpush.msrb.mxu2 %v4024_v59  ;;  %4288 = vmatpush.msra.mxu3 %v4250_v2  ;;  %v4232_v59 = vld [vmem:[#allocation16 + $0xd40] sm:$0xff]  ;;  %v4205_v1 = vld [vmem:[#allocation16 + $0xc68] sm:$0xff]  ;;  %v4231_v2 = vld [vmem:[#allocation16 + $0xd38] sm:$0xff] }
 0x9d5   :  { %3943 = vmatmul.f32.vlgmr.msra.gmra.mxu2 %v3851_v18  ;;  %3989 = vmatmul.f32.vlgmr.msra.gmra.mxu0 %v3851_v18  ;;  %v3854_v20 = vmax.f32 %v3849_v19, 0.0  ;;  %v4214_v18 = vld [vmem:[#allocation16 + $0xcb0] sm:$0xff]  ;;  %v4215_v19 = vld [vmem:[#allocation16 + $0xcb8] sm:$0xff] }
 0x9d6   :  { %v3779_v21 = vpop.f32.mrf.mxu2  ;;  %4263 = vmatpush.msra.mxu2 %v4222_v57  ;;  %4309 = vmatpush.msra.mxu0 %v4223_v3  ;;  %v4228_v57 = vld [vmem:[#allocation16 + $0xd20] sm:$0xff]  ;;  %v4203_v3 = vld [vmem:[#allocation16 + $0xc58] sm:$0xff] }
 0x9d7   :  { %v3780_v22 = vadd.f32 %v3779_v21, %v3755_v7  ;;  %3969 = vmatmul.f32.gmra.mxu3 %v3854_v20  ;;  %4015 = vmatmul.f32.gmra.mxu1 %v3854_v20  ;;  %v4221_v7 = vld [vmem:[#allocation16 + $0xce8] sm:$0xff]  ;;  %v4242_v20 = vld [vmem:[#allocation16 + $0xd90] sm:$0xff]  ;;  %v4243_v21 = vld [vmem:[#allocation16 + $0xd98] sm:$0xff] }
 0x9d8   :  { %4334 = vmatpush.msra.mxu1 %v4251_v0  ;;  %4264 = vmatpush.msra.mxu2 %v4220_v4  ;;  %v4202_v0 = vld [vmem:[#allocation16 + $0xc50] sm:$0xff]  ;;  %v4229_v4 = vld [vmem:[#allocation16 + $0xd28] sm:$0xff]  ;;  %v4227_v8 = vld [vmem:[#allocation16 + $0xd18] sm:$0xff] }
 0x9d9   :  { %v3803_v24 = vadd.f32 %v3802_v23, %v3780_v22  ;;  %4310 = vmatpush.msra.mxu0 %v4221_v7  ;;  %4289 = vmatpush.msra.mxu3 %v4248_v5  ;;  %v4200_v5 = vld [vmem:[#allocation16 + $0xc40] sm:$0xff]  ;;  %v4201_v7 = vld [vmem:[#allocation16 + $0xc48] sm:$0xff] }
 0x9da   :  { %4335 = vmatpush.msra.mxu1 %v4249_v6  ;;  %4265 = vmatpush.msra.mxu2 %v4218_v9  ;;  %v4226_v6 = vld [vmem:[#allocation16 + $0xd10] sm:$0xff] }
 0x9db   :  { %v3853_v25 = vmax.f32 %v3803_v24, 0.0  ;;  %4311 = vmatpush.msra.mxu0 %v4219_v10  ;;  %4290 = vmatpush.msra.mxu3 %v4246_v11  ;;  %v4212_v24 = vld [vmem:[#allocation16 + $0xca0] sm:$0xff]  ;;  %v4198_v9 = vld [vmem:[#allocation16 + $0xc30] sm:$0xff]  ;;  %v4199_v11 = vld [vmem:[#allocation16 + $0xc38] sm:$0xff] }
 0x9dc   :  { %4336 = vmatpush.msra.mxu1 %v4247_v12  ;;  %4266 = vmatpush.msra.mxu2 %v4216_v13  ;;  %v4224_v10 = vld [vmem:[#allocation16 + $0xd00] sm:$0xff]  ;;  %v4225_v12 = vld [vmem:[#allocation16 + $0xd08] sm:$0xff] }
 0x9dd   :  { %3946 = vmatmul.f32.gmra.mxu2 %v3853_v25  ;;  %3992 = vmatmul.f32.gmra.mxu0 %v3853_v25  ;;  %v4213_v25 = vld [vmem:[#allocation16 + $0xca8] sm:$0xff]  ;;  %v4196_v13 = vld [vmem:[#allocation16 + $0xc20] sm:$0xff] }
 0x9de   :  { %4312 = vmatpush.msra.mxu0 %v4217_v14  ;;  %4291 = vmatpush.msra.mxu3 %v4244_v16  ;;  %v4197_v14 = vld [vmem:[#allocation16 + $0xc28] sm:$0xff]  ;;  %v4195_v16 = vld [vmem:[#allocation16 + $0xc18] sm:$0xff] }
 0x9df   :  { %4337 = vmatpush.msra.mxu1 %v4245_v17  ;;  %4267 = vmatpush.msra.mxu2 %v4214_v18  ;;  %v4192_v17 = vld [vmem:[#allocation16 + $0xc00] sm:$0xff]  ;;  %v4193_v18 = vld [vmem:[#allocation16 + $0xc08] sm:$0xff] }
 0x9e0   :  { %4313 = vmatpush.msra.mxu0 %v4215_v19  ;;  %4292 = vmatpush.msra.mxu3 %v4242_v20  ;;  %v4422_v19 = vld [vmem:[#allocation16 + $0xff0] sm:$0xff]  ;;  %v4423_v20 = vld [vmem:[#allocation16 + $0xff8] sm:$0xff] }
 0x9e1   :  { %4338 = vmatpush.msra.mxu1 %v4243_v21  ;;  %4268 = vmatpush.msra.mxu2 %v4212_v24  ;;  %v4420_v21 = vld [vmem:[#allocation16 + $0xfe0] sm:$0xff]  ;;  %v4419_v24 = vld [vmem:[#allocation16 + $0xfd8] sm:$0xff] }
 0x9e2   :  { %4314 = vmatpush.msra.mxu0 %v4213_v25  ;;  %4293 = vmatpush.msra.mxu3 %v4240_v27  ;;  %v4390_v25 = vld [vmem:[#allocation16 + $0xef0] sm:$0xff]  ;;  %v4388_v27 = vld [vmem:[#allocation16 + $0xee0] sm:$0xff] }
 0x9e3   :  { %4339 = vmatpush.msra.mxu1 %v4241_v28  ;;  %4269 = vmatpush.msra.mxu2 %v4210_v50  ;;  %v4416_v28 = vld [vmem:[#allocation16 + $0xfc0] sm:$0xff] }
 0x9e4   :  { %4294 = vmatpush.msra.mxu3 %v4238_v31  ;;  %4315 = vmatpush.msra.mxu0 %v4211_v52  ;;  %v6773_v31 = vld [vmem:[#allocation17 + $0xa] sm:$0x3] }
 0x9e5   :  { %4340 = vmatpush.msra.mxu1 %v4239_v32  ;;  %4270 = vmatpush.msra.mxu2 %v4208_v48  ;;  %v4386_v32 = vld [vmem:[#allocation16 + $0xed0] sm:$0xff]  ;;  %v4409_v52 = vld [vmem:[#allocation16 + $0xf88] sm:$0xff]  ;;  %v4091_v48 = vperm.slane %v6773_v31, 0 }
 0x9e6   :  { %4295 = vmatpush.msra.mxu3 %v4236_v51  ;;  %4316 = vmatpush.msra.mxu0 %v4209_v55  ;;  %v4408_v51 = vld [vmem:[#allocation16 + $0xf80] sm:$0xff]  ;;  %v4407_v55 = vld [vmem:[#allocation16 + $0xf78] sm:$0xff] }
 0x9e7   :  { %4341 = vmatpush.msra.mxu1 %v4237_v53  ;;  %4271 = vmatpush.msra.mxu2 %v4206_v58 }
 0x9e8   :  { %4296 = vmatpush.msra.mxu3 %v4234_v54  ;;  %4317 = vmatpush.msra.mxu0 %v4207_v60  ;;  %v4406_v54 = vld [vmem:[#allocation16 + $0xf70] sm:$0xff] }
 0x9e9   :  { %4342 = vmatpush.msra.mxu1 %v4235_v56  ;;  %4272 = vmatpush.msra.mxu2 %v4204_v62 }
 0x9ea   :  { %4297 = vmatpush.msra.mxu3 %v4232_v59  ;;  %4318 = vmatpush.msra.mxu0 %v4205_v1 }
 0x9eb   :  { %4343 = vmatpush.msra.mxu1 %v4233_v61  ;;  %4273 = vmatpush.msra.mxu2 %v4202_v0 }
 0x9ec   :  { %4298 = vmatpush.msra.mxu3 %v4230_v63  ;;  %4319 = vmatpush.msra.mxu0 %v4203_v3 }
 0x9ed   :  { %4344 = vmatpush.msra.mxu1 %v4231_v2  ;;  %4274 = vmatpush.msra.mxu2 %v4200_v5 }
 0x9ee   :  { %4299 = vmatpush.msra.mxu3 %v4228_v57  ;;  %4320 = vmatpush.msra.mxu0 %v4201_v7 }
 0x9ef   :  { %4345 = vmatpush.msra.mxu1 %v4229_v4  ;;  %4275 = vmatpush.msra.mxu2 %v4198_v9  ;;  %v4404_v9 = vld [vmem:[#allocation16 + $0xf60] sm:$0xff] }
 0x9f0   :  { %4300 = vmatpush.msra.mxu3 %v4226_v6  ;;  %4321 = vmatpush.msra.mxu0 %v4199_v11  ;;  %v4405_v11 = vld [vmem:[#allocation16 + $0xf68] sm:$0xff] }
 0x9f1   :  { %4346 = vmatpush.msra.mxu1 %v4227_v8  ;;  %4276 = vmatpush.msra.mxu2 %v4196_v13  ;;  %v4378_v8 = vld [vmem:[#allocation16 + $0xe90] sm:$0xff] }
 0x9f2   :  { %4301 = vmatpush.msra.mxu3 %v4224_v10  ;;  %4322 = vmatpush.msra.mxu0 %v4197_v14  ;;  %v4379_v10 = vld [vmem:[#allocation16 + $0xe98] sm:$0xff]  ;;  %v4402_v13 = vld [vmem:[#allocation16 + $0xf50] sm:$0xff]  ;;  %v4377_v14 = vld [vmem:[#allocation16 + $0xe88] sm:$0xff] }
 0x9f3   :  { %4347 = vmatpush.msra.mxu1 %v4225_v12  ;;  %v4376_v12 = vld [vmem:[#allocation16 + $0xe80] sm:$0xff] }
 0x9f4   :  { %4323 = vmatpush.msra.mxu0 %v4195_v16  ;;  %v4374_v16 = vld [vmem:[#allocation16 + $0xe70] sm:$0xff] }
 0x9f6   :  { %4324 = vmatpush.msra.mxu0 %v4193_v18  ;;  %v4375_v18 = vld [vmem:[#allocation16 + $0xe78] sm:$0xff] }
 0xa4c   :  { %v4013_v22 = vpop.f32.mrf.mxu1 }
 0xa52   :  { %v3990_v23 = vpop.f32.mrf.mxu0  ;;  %v3967_v34 = vpop.f32.mrf.mxu3 }
 0xa53   :  { %v3991_v26 = vadd.f32 %v3990_v23, %v3924_v15  ;;  %v4418_v23 = vld [vmem:[#allocation16 + $0xfd0] sm:$0xff] }
 0xa54   :  { %v4016_v40 = vpop.f32.mrf.mxu1 }
 0xa55   :  { %v4014_v29 = vadd.f32 %v4013_v22, %v3991_v26  ;;  %v4421_v22 = vld [vmem:[#allocation16 + $0xfe8] sm:$0xff]  ;;  %v4391_v26 = vld [vmem:[#allocation16 + $0xef8] sm:$0xff] }
 0xa57   :  { %v4020_v33 = vmax.f32 %v4014_v29, 0.0  ;;  %v4417_v29 = vld [vmem:[#allocation16 + $0xfc8] sm:$0xff] }
 0xa58   :  { %v3944_v35 = vpop.f32.mrf.mxu2 }
 0xa59   :  { %v3945_v36 = vadd.f32 %v3944_v35, %v3923_v30  ;;  %4134 = vmatmul.f32.vlgmr.msrb.gmra.mxu3 %v4020_v33  ;;  %4180 = vmatmul.f32.vlgmr.msrb.gmra.mxu1 %v4020_v33  ;;  %v4387_v33 = vld [vmem:[#allocation16 + $0xed8] sm:$0xff] }
 0xa5a   :  { %v3993_v37 = vpop.f32.mrf.mxu0  ;;  %v3970_v46 = vpop.f32.mrf.mxu3  ;;  %4454 = vmatpush.msrb.mxu3 %v4422_v19  ;;  %4500 = vmatpush.msrb.mxu1 %v4423_v20  ;;  %v4415_v35 = vld [vmem:[#allocation16 + $0xfb8] sm:$0xff]  ;;  %v4401_v19 = vld [vmem:[#allocation16 + $0xf48] sm:$0xff]  ;;  %v4372_v20 = vld [vmem:[#allocation16 + $0xe60] sm:$0xff] }
 0xa5b   :  { %v3968_v38 = vadd.f32 %v3967_v34, %v3945_v36  ;;  %v3994_v39 = vadd.f32 %v3993_v37, %v3924_v15  ;;  %v4194_v15 = vld [vmem:[#allocation16 + $0xc10] sm:$0xff]  ;;  %v4384_v36 = vld [vmem:[#allocation16 + $0xec0] sm:$0xff]  ;;  %v4385_v37 = vld [vmem:[#allocation16 + $0xec8] sm:$0xff] }
 0xa5c   :  { %4277 = vmatpush.msra.mxu2 %v4194_v15  ;;  %4455 = vmatpush.msrb.mxu3 %v4420_v21  ;;  %v4414_v34 = vld [vmem:[#allocation16 + $0xfb0] sm:$0xff]  ;;  %v4403_v15 = vld [vmem:[#allocation16 + $0xf58] sm:$0xff] }
 0xa5d   :  { %v4019_v41 = vmax.f32 %v3968_v38, 0.0  ;;  %v4017_v42 = vadd.f32 %v4016_v40, %v3994_v39  ;;  %4501 = vmatpush.msrb.mxu1 %v4421_v22  ;;  %v4092_v38 = vperm.slane %v6773_v31, 1  ;;  %v4412_v39 = vld [vmem:[#allocation16 + $0xfa0] sm:$0xff]  ;;  %v4413_v40 = vld [vmem:[#allocation16 + $0xfa8] sm:$0xff]  ;;  %v4398_v21 = vld [vmem:[#allocation16 + $0xf30] sm:$0xff] }
 0xa5e   :  { %4278 = vmatpush.msra.mxu2 %v4192_v17  ;;  %4456 = vmatpush.msrb.mxu3 %v4418_v23  ;;  %v4400_v17 = vld [vmem:[#allocation16 + $0xf40] sm:$0xff]  ;;  %v4373_v22 = vld [vmem:[#allocation16 + $0xe68] sm:$0xff]  ;;  %v4399_v23 = vld [vmem:[#allocation16 + $0xf38] sm:$0xff] }
 0xa5f   :  { %4111 = vmatmul.f32.vlgmr.msrb.gmra.mxu2 %v4019_v41  ;;  %4157 = vmatmul.f32.vlgmr.msrb.gmra.mxu0 %v4019_v41  ;;  %v4022_v43 = vmax.f32 %v4017_v42, 0.0  ;;  %v4382_v41 = vld [vmem:[#allocation16 + $0xeb0] sm:$0xff]  ;;  %v4383_v42 = vld [vmem:[#allocation16 + $0xeb8] sm:$0xff] }
 0xa60   :  { %v3947_v44 = vpop.f32.mrf.mxu2  ;;  %4431 = vmatpush.msrb.mxu2 %v4390_v25  ;;  %4477 = vmatpush.msrb.mxu0 %v4391_v26  ;;  %v4396_v25 = vld [vmem:[#allocation16 + $0xf20] sm:$0xff]  ;;  %v4371_v26 = vld [vmem:[#allocation16 + $0xe58] sm:$0xff] }
 0xa61   :  { %v3948_v45 = vadd.f32 %v3947_v44, %v3923_v30  ;;  %4137 = vmatmul.f32.gmra.mxu3 %v4022_v43  ;;  %4183 = vmatmul.f32.gmra.mxu1 %v4022_v43  ;;  %v4389_v30 = vld [vmem:[#allocation16 + $0xee8] sm:$0xff]  ;;  %v4410_v43 = vld [vmem:[#allocation16 + $0xf90] sm:$0xff]  ;;  %v4411_v44 = vld [vmem:[#allocation16 + $0xf98] sm:$0xff] }
 0xa62   :  { %4502 = vmatpush.msrb.mxu1 %v4419_v24  ;;  %4432 = vmatpush.msrb.mxu2 %v4388_v27  ;;  %v4370_v24 = vld [vmem:[#allocation16 + $0xe50] sm:$0xff]  ;;  %v4397_v27 = vld [vmem:[#allocation16 + $0xf28] sm:$0xff]  ;;  %v4395_v31 = vld [vmem:[#allocation16 + $0xf18] sm:$0xff] }
 0xa63   :  { %v3971_v47 = vadd.f32 %v3970_v46, %v3948_v45  ;;  %4478 = vmatpush.msrb.mxu0 %v4389_v30  ;;  %4457 = vmatpush.msrb.mxu3 %v4416_v28  ;;  %v4368_v28 = vld [vmem:[#allocation16 + $0xe40] sm:$0xff]  ;;  %v4369_v30 = vld [vmem:[#allocation16 + $0xe48] sm:$0xff] }
 0xa64   :  { %4503 = vmatpush.msrb.mxu1 %v4417_v29  ;;  %4433 = vmatpush.msrb.mxu2 %v4386_v32  ;;  %v4394_v29 = vld [vmem:[#allocation16 + $0xf10] sm:$0xff] }
 0xa65   :  { %v4021_v49 = vmax.f32 %v3971_v47, 0.0  ;;  %4479 = vmatpush.msrb.mxu0 %v4387_v33  ;;  %4458 = vmatpush.msrb.mxu3 %v4414_v34  ;;  %v4380_v47 = vld [vmem:[#allocation16 + $0xea0] sm:$0xff]  ;;  %v4366_v32 = vld [vmem:[#allocation16 + $0xe30] sm:$0xff]  ;;  %v4367_v34 = vld [vmem:[#allocation16 + $0xe38] sm:$0xff] }
 0xa66   :  { %4504 = vmatpush.msrb.mxu1 %v4415_v35  ;;  %4434 = vmatpush.msrb.mxu2 %v4384_v36  ;;  %v4392_v33 = vld [vmem:[#allocation16 + $0xf00] sm:$0xff]  ;;  %v4393_v35 = vld [vmem:[#allocation16 + $0xf08] sm:$0xff] }
 0xa67   :  { %4114 = vmatmul.f32.gmra.mxu2 %v4021_v49  ;;  %4160 = vmatmul.f32.gmra.mxu0 %v4021_v49  ;;  %v4381_v49 = vld [vmem:[#allocation16 + $0xea8] sm:$0xff]  ;;  %v4364_v36 = vld [vmem:[#allocation16 + $0xe20] sm:$0xff] }
 0xa68   :  { %4480 = vmatpush.msrb.mxu0 %v4385_v37  ;;  %4459 = vmatpush.msrb.mxu3 %v4412_v39  ;;  %v4365_v37 = vld [vmem:[#allocation16 + $0xe28] sm:$0xff]  ;;  %v4363_v39 = vld [vmem:[#allocation16 + $0xe18] sm:$0xff] }
 0xa69   :  { %4505 = vmatpush.msrb.mxu1 %v4413_v40  ;;  %4435 = vmatpush.msrb.mxu2 %v4382_v41  ;;  %v4360_v40 = vld [vmem:[#allocation16 + $0xe00] sm:$0xff]  ;;  %v4361_v41 = vld [vmem:[#allocation16 + $0xe08] sm:$0xff] }
 0xa6a   :  { %4481 = vmatpush.msrb.mxu0 %v4383_v42  ;;  %4460 = vmatpush.msrb.mxu3 %v4410_v43  ;;  %v4590_v42 = vld [vmem:[#allocation16 + $0x11f0] sm:$0xff]  ;;  %v4591_v43 = vld [vmem:[#allocation16 + $0x11f8] sm:$0xff] }
 0xa6b   :  { %4506 = vmatpush.msrb.mxu1 %v4411_v44  ;;  %4436 = vmatpush.msrb.mxu2 %v4380_v47  ;;  %v4588_v44 = vld [vmem:[#allocation16 + $0x11e0] sm:$0xff]  ;;  %v4587_v47 = vld [vmem:[#allocation16 + $0x11d8] sm:$0xff] }
 0xa6c   :  { %4482 = vmatpush.msrb.mxu0 %v4381_v49  ;;  %4461 = vmatpush.msrb.mxu3 %v4408_v51  ;;  %v4558_v49 = vld [vmem:[#allocation16 + $0x10f0] sm:$0xff]  ;;  %v4556_v51 = vld [vmem:[#allocation16 + $0x10e0] sm:$0xff] }
 0xa6d   :  { %4507 = vmatpush.msrb.mxu1 %v4409_v52  ;;  %4437 = vmatpush.msrb.mxu2 %v4378_v8  ;;  %v4584_v52 = vld [vmem:[#allocation16 + $0x11c0] sm:$0xff] }
 0xa6e   :  { %4462 = vmatpush.msrb.mxu3 %v4406_v54  ;;  %4483 = vmatpush.msrb.mxu0 %v4379_v10  ;;  %v6777_v54 = vld [vmem:[#allocation17 + $0xc] sm:$0x3] }
 0xa6f   :  { %4508 = vmatpush.msrb.mxu1 %v4407_v55  ;;  %4438 = vmatpush.msrb.mxu2 %v4376_v12  ;;  %v4554_v55 = vld [vmem:[#allocation16 + $0x10d0] sm:$0xff]  ;;  %v4577_v10 = vld [vmem:[#allocation16 + $0x1188] sm:$0xff]  ;;  %v4259_v12 = vperm.slane %v6777_v54, 0 }
 0xa70   :  { %4463 = vmatpush.msrb.mxu3 %v4404_v9  ;;  %4484 = vmatpush.msrb.mxu0 %v4377_v14  ;;  %v4576_v9 = vld [vmem:[#allocation16 + $0x1180] sm:$0xff]  ;;  %v4575_v14 = vld [vmem:[#allocation16 + $0x1178] sm:$0xff] }
 0xa71   :  { %4509 = vmatpush.msrb.mxu1 %v4405_v11  ;;  %4439 = vmatpush.msrb.mxu2 %v4374_v16 }
 0xa72   :  { %4464 = vmatpush.msrb.mxu3 %v4402_v13  ;;  %4485 = vmatpush.msrb.mxu0 %v4375_v18  ;;  %v4574_v13 = vld [vmem:[#allocation16 + $0x1170] sm:$0xff] }
 0xa73   :  { %4510 = vmatpush.msrb.mxu1 %v4403_v15  ;;  %4440 = vmatpush.msrb.mxu2 %v4372_v20 }
 0xa74   :  { %4465 = vmatpush.msrb.mxu3 %v4400_v17  ;;  %4486 = vmatpush.msrb.mxu0 %v4373_v22 }
 0xa75   :  { %4511 = vmatpush.msrb.mxu1 %v4401_v19  ;;  %4441 = vmatpush.msrb.mxu2 %v4370_v24 }
 0xa76   :  { %4466 = vmatpush.msrb.mxu3 %v4398_v21  ;;  %4487 = vmatpush.msrb.mxu0 %v4371_v26 }
 0xa77   :  { %4512 = vmatpush.msrb.mxu1 %v4399_v23  ;;  %4442 = vmatpush.msrb.mxu2 %v4368_v28 }
 0xa78   :  { %4467 = vmatpush.msrb.mxu3 %v4396_v25  ;;  %4488 = vmatpush.msrb.mxu0 %v4369_v30 }
 0xa79   :  { %4513 = vmatpush.msrb.mxu1 %v4397_v27  ;;  %4443 = vmatpush.msrb.mxu2 %v4366_v32  ;;  %v4572_v32 = vld [vmem:[#allocation16 + $0x1160] sm:$0xff] }
 0xa7a   :  { %4468 = vmatpush.msrb.mxu3 %v4394_v29  ;;  %4489 = vmatpush.msrb.mxu0 %v4367_v34  ;;  %v4573_v34 = vld [vmem:[#allocation16 + $0x1168] sm:$0xff] }
 0xa7b   :  { %4514 = vmatpush.msrb.mxu1 %v4395_v31  ;;  %4444 = vmatpush.msrb.mxu2 %v4364_v36  ;;  %v4546_v31 = vld [vmem:[#allocation16 + $0x1090] sm:$0xff] }
 0xa7c   :  { %4469 = vmatpush.msrb.mxu3 %v4392_v33  ;;  %4490 = vmatpush.msrb.mxu0 %v4365_v37  ;;  %v4547_v33 = vld [vmem:[#allocation16 + $0x1098] sm:$0xff]  ;;  %v4570_v36 = vld [vmem:[#allocation16 + $0x1150] sm:$0xff]  ;;  %v4545_v37 = vld [vmem:[#allocation16 + $0x1088] sm:$0xff] }
 0xa7d   :  { %4515 = vmatpush.msrb.mxu1 %v4393_v35  ;;  %v4544_v35 = vld [vmem:[#allocation16 + $0x1080] sm:$0xff] }
 0xa7e   :  { %4491 = vmatpush.msrb.mxu0 %v4363_v39  ;;  %v4542_v39 = vld [vmem:[#allocation16 + $0x1070] sm:$0xff] }
 0xa80   :  { %4492 = vmatpush.msrb.mxu0 %v4361_v41  ;;  %v4543_v41 = vld [vmem:[#allocation16 + $0x1078] sm:$0xff] }
 0xad6   :  { %v4181_v45 = vpop.f32.mrf.mxu1 }
 0xadc   :  { %v4158_v46 = vpop.f32.mrf.mxu0  ;;  %v4135_v58 = vpop.f32.mrf.mxu3 }
 0xadd   :  { %v4159_v50 = vadd.f32 %v4158_v46, %v4092_v38  ;;  %v4586_v46 = vld [vmem:[#allocation16 + $0x11d0] sm:$0xff] }
 0xade   :  { %v4184_v1 = vpop.f32.mrf.mxu1 }
 0xadf   :  { %v4182_v53 = vadd.f32 %v4181_v45, %v4159_v50  ;;  %v4589_v45 = vld [vmem:[#allocation16 + $0x11e8] sm:$0xff]  ;;  %v4559_v50 = vld [vmem:[#allocation16 + $0x10f8] sm:$0xff] }
 0xae1   :  { %v4188_v56 = vmax.f32 %v4182_v53, 0.0  ;;  %v4585_v53 = vld [vmem:[#allocation16 + $0x11c8] sm:$0xff] }
 0xae2   :  { %v4112_v59 = vpop.f32.mrf.mxu2 }
 0xae3   :  { %v4113_v60 = vadd.f32 %v4112_v59, %v4091_v48  ;;  %4302 = vmatmul.f32.vlgmr.msra.gmra.mxu3 %v4188_v56  ;;  %4348 = vmatmul.f32.vlgmr.msra.gmra.mxu1 %v4188_v56  ;;  %v4555_v56 = vld [vmem:[#allocation16 + $0x10d8] sm:$0xff] }
 0xae4   :  { %v4161_v61 = vpop.f32.mrf.mxu0  ;;  %v4138_v5 = vpop.f32.mrf.mxu3  ;;  %4622 = vmatpush.msra.mxu3 %v4590_v42  ;;  %4668 = vmatpush.msra.mxu1 %v4591_v43  ;;  %v4583_v59 = vld [vmem:[#allocation16 + $0x11b8] sm:$0xff]  ;;  %v4569_v42 = vld [vmem:[#allocation16 + $0x1148] sm:$0xff]  ;;  %v4540_v43 = vld [vmem:[#allocation16 + $0x1060] sm:$0xff] }
 0xae5   :  { %v4136_v62 = vadd.f32 %v4135_v58, %v4113_v60  ;;  %v4162_v63 = vadd.f32 %v4161_v61, %v4092_v38  ;;  %v4362_v38 = vld [vmem:[#allocation16 + $0xe10] sm:$0xff]  ;;  %v4552_v60 = vld [vmem:[#allocation16 + $0x10c0] sm:$0xff]  ;;  %v4553_v61 = vld [vmem:[#allocation16 + $0x10c8] sm:$0xff] }
 0xae6   :  { %4445 = vmatpush.msrb.mxu2 %v4362_v38  ;;  %4623 = vmatpush.msra.mxu3 %v4588_v44  ;;  %v4582_v58 = vld [vmem:[#allocation16 + $0x11b0] sm:$0xff]  ;;  %v4571_v38 = vld [vmem:[#allocation16 + $0x1158] sm:$0xff] }
 0xae7   :  { %v4187_v2 = vmax.f32 %v4136_v62, 0.0  ;;  %v4185_v0 = vadd.f32 %v4184_v1, %v4162_v63  ;;  %4669 = vmatpush.msra.mxu1 %v4589_v45  ;;  %v4260_v62 = vperm.slane %v6777_v54, 1  ;;  %v4580_v63 = vld [vmem:[#allocation16 + $0x11a0] sm:$0xff]  ;;  %v4581_v1 = vld [vmem:[#allocation16 + $0x11a8] sm:$0xff]  ;;  %v4566_v44 = vld [vmem:[#allocation16 + $0x1130] sm:$0xff] }
 0xae8   :  { %4446 = vmatpush.msrb.mxu2 %v4360_v40  ;;  %4624 = vmatpush.msra.mxu3 %v4586_v46  ;;  %v4568_v40 = vld [vmem:[#allocation16 + $0x1140] sm:$0xff]  ;;  %v4541_v45 = vld [vmem:[#allocation16 + $0x1068] sm:$0xff]  ;;  %v4567_v46 = vld [vmem:[#allocation16 + $0x1138] sm:$0xff] }
 0xae9   :  { %v4190_v57 = vmax.f32 %v4185_v0, 0.0  ;;  %4279 = vmatmul.f32.vlgmr.msra.gmra.mxu2 %v4187_v2  ;;  %4325 = vmatmul.f32.vlgmr.msra.gmra.mxu0 %v4187_v2  ;;  %v4550_v2 = vld [vmem:[#allocation16 + $0x10b0] sm:$0xff]  ;;  %v4551_v0 = vld [vmem:[#allocation16 + $0x10b8] sm:$0xff] }
 0xaea   :  { %v4115_v3 = vpop.f32.mrf.mxu2  ;;  %4599 = vmatpush.msra.mxu2 %v4558_v49  ;;  %4645 = vmatpush.msra.mxu0 %v4559_v50  ;;  %v4564_v49 = vld [vmem:[#allocation16 + $0x1120] sm:$0xff]  ;;  %v4539_v50 = vld [vmem:[#allocation16 + $0x1058] sm:$0xff] }
 0xaeb   :  { %v4116_v4 = vadd.f32 %v4115_v3, %v4091_v48  ;;  %4305 = vmatmul.f32.gmra.mxu3 %v4190_v57  ;;  %4351 = vmatmul.f32.gmra.mxu1 %v4190_v57  ;;  %v4557_v48 = vld [vmem:[#allocation16 + $0x10e8] sm:$0xff]  ;;  %v4578_v57 = vld [vmem:[#allocation16 + $0x1190] sm:$0xff]  ;;  %v4579_v3 = vld [vmem:[#allocation16 + $0x1198] sm:$0xff] }
 0xaec   :  { %4670 = vmatpush.msra.mxu1 %v4587_v47  ;;  %4600 = vmatpush.msra.mxu2 %v4556_v51  ;;  %v4538_v47 = vld [vmem:[#allocation16 + $0x1050] sm:$0xff]  ;;  %v4565_v51 = vld [vmem:[#allocation16 + $0x1128] sm:$0xff]  ;;  %v4563_v54 = vld [vmem:[#allocation16 + $0x1118] sm:$0xff] }
 0xaed   :  { %v4139_v6 = vadd.f32 %v4138_v5, %v4116_v4  ;;  %4646 = vmatpush.msra.mxu0 %v4557_v48  ;;  %4625 = vmatpush.msra.mxu3 %v4584_v52  ;;  %v4536_v52 = vld [vmem:[#allocation16 + $0x1040] sm:$0xff]  ;;  %v4537_v48 = vld [vmem:[#allocation16 + $0x1048] sm:$0xff] }
 0xaee   :  { %4671 = vmatpush.msra.mxu1 %v4585_v53  ;;  %4601 = vmatpush.msra.mxu2 %v4554_v55  ;;  %v4562_v53 = vld [vmem:[#allocation16 + $0x1110] sm:$0xff] }
 0xaef   :  { %v4189_v7 = vmax.f32 %v4139_v6, 0.0  ;;  %4647 = vmatpush.msra.mxu0 %v4555_v56  ;;  %4626 = vmatpush.msra.mxu3 %v4582_v58  ;;  %v4548_v6 = vld [vmem:[#allocation16 + $0x10a0] sm:$0xff]  ;;  %v4534_v55 = vld [vmem:[#allocation16 + $0x1030] sm:$0xff]  ;;  %v4535_v58 = vld [vmem:[#allocation16 + $0x1038] sm:$0xff] }
 0xaf0   :  { %4672 = vmatpush.msra.mxu1 %v4583_v59  ;;  %4602 = vmatpush.msra.mxu2 %v4552_v60  ;;  %v4560_v56 = vld [vmem:[#allocation16 + $0x1100] sm:$0xff]  ;;  %v4561_v59 = vld [vmem:[#allocation16 + $0x1108] sm:$0xff] }
 0xaf1   :  { %4282 = vmatmul.f32.gmra.mxu2 %v4189_v7  ;;  %4328 = vmatmul.f32.gmra.mxu0 %v4189_v7  ;;  %v4549_v7 = vld [vmem:[#allocation16 + $0x10a8] sm:$0xff]  ;;  %v4532_v60 = vld [vmem:[#allocation16 + $0x1020] sm:$0xff] }
 0xaf2   :  { %4648 = vmatpush.msra.mxu0 %v4553_v61  ;;  %4627 = vmatpush.msra.mxu3 %v4580_v63  ;;  %v4533_v61 = vld [vmem:[#allocation16 + $0x1028] sm:$0xff]  ;;  %v4531_v63 = vld [vmem:[#allocation16 + $0x1018] sm:$0xff] }
 0xaf3   :  { %4673 = vmatpush.msra.mxu1 %v4581_v1  ;;  %4603 = vmatpush.msra.mxu2 %v4550_v2  ;;  %v4528_v1 = vld [vmem:[#allocation16 + $0x1000] sm:$0xff]  ;;  %v4529_v2 = vld [vmem:[#allocation16 + $0x1008] sm:$0xff] }
 0xaf4   :  { %4649 = vmatpush.msra.mxu0 %v4551_v0  ;;  %4628 = vmatpush.msra.mxu3 %v4578_v57  ;;  %v5191_v0 = vld [vmem:[#allocation19 + $0xf80] sm:$0xff]  ;;  %v5192_v57 = vld [vmem:[#allocation19 + $0xf88] sm:$0xff] }
 0xaf5   :  { %4674 = vmatpush.msra.mxu1 %v4579_v3  ;;  %4604 = vmatpush.msra.mxu2 %v4548_v6  ;;  %v5175_v3 = vld [vmem:[#allocation19 + $0xf00] sm:$0xff]  ;;  %v5160_v6 = vld [vmem:[#allocation19 + $0xe88] sm:$0xff] }
 0xaf6   :  { %4650 = vmatpush.msra.mxu0 %v4549_v7  ;;  %4629 = vmatpush.msra.mxu3 %v4576_v9  ;;  %v4935_v7 = vld [vmem:[#allocation19 + $0x780] sm:$0xff] }
 0xaf7   :  { %4675 = vmatpush.msra.mxu1 %v4577_v10  ;;  %4605 = vmatpush.msra.mxu2 %v4546_v31  ;;  %v4919_v9 = vld [vmem:[#allocation19 + $0x700] sm:$0xff] }
 0xaf8   :  { %4630 = vmatpush.msra.mxu3 %v4574_v13  ;;  %4651 = vmatpush.msra.mxu0 %v4547_v33  ;;  %v5143_v10 = vld [vmem:[#allocation19 + $0xe00] sm:$0xff]  ;;  %v6781_v13 = vld [vmem:[#allocation17 + $0xe] sm:$0x3]  ;;  %v5080_v33 = vld [vmem:[#allocation19 + $0xc08] sm:$0xff] }
 0xaf9   :  { %4676 = vmatpush.msra.mxu1 %v4575_v14  ;;  %4606 = vmatpush.msra.mxu2 %v4544_v35  ;;  %v4903_v14 = vld [vmem:[#allocation19 + $0x680] sm:$0xff]  ;;  %v4840_v35 = vld [vmem:[#allocation19 + $0x488] sm:$0xff] }
 0xafa   :  { %4631 = vmatpush.msra.mxu3 %v4572_v32  ;;  %4652 = vmatpush.msra.mxu0 %v4545_v37  ;;  %v5079_v32 = vld [vmem:[#allocation19 + $0xc00] sm:$0xff]  ;;  %v4427_v37 = vperm.slane %v6781_v13, 0 }
 0xafb   :  { %4677 = vmatpush.msra.mxu1 %v4573_v34  ;;  %4607 = vmatpush.msra.mxu2 %v4542_v39  ;;  %v4839_v34 = vld [vmem:[#allocation19 + $0x480] sm:$0xff]  ;;  %v5064_v39 = vld [vmem:[#allocation19 + $0xb88] sm:$0xff] }
 0xafc   :  { %4632 = vmatpush.msra.mxu3 %v4570_v36  ;;  %4653 = vmatpush.msra.mxu0 %v4543_v41  ;;  %v5047_v41 = vld [vmem:[#allocation19 + $0xb00] sm:$0xff] }
 0xafd   :  { %4678 = vmatpush.msra.mxu1 %v4571_v38  ;;  %4608 = vmatpush.msra.mxu2 %v4540_v43  ;;  %v5063_v38 = vld [vmem:[#allocation19 + $0xb80] sm:$0xff] }
 0xafe   :  { %4633 = vmatpush.msra.mxu3 %v4568_v40  ;;  %4654 = vmatpush.msra.mxu0 %v4541_v45  ;;  %v4823_v45 = vld [vmem:[#allocation19 + $0x400] sm:$0xff] }
 0xaff   :  { %4679 = vmatpush.msra.mxu1 %v4569_v42  ;;  %4609 = vmatpush.msra.mxu2 %v4538_v47  ;;  %v5048_v42 = vld [vmem:[#allocation19 + $0xb08] sm:$0xff] }
 0xb00   :  { %4634 = vmatpush.msra.mxu3 %v4566_v44  ;;  %4655 = vmatpush.msra.mxu0 %v4539_v50  ;;  %v5032_v50 = vld [vmem:[#allocation19 + $0xa88] sm:$0xff] }
 0xb01   :  { %4680 = vmatpush.msra.mxu1 %v4567_v46  ;;  %4610 = vmatpush.msra.mxu2 %v4536_v52  ;;  %v4824_v46 = vld [vmem:[#allocation19 + $0x408] sm:$0xff]  ;;  %v4807_v52 = vld [vmem:[#allocation19 + $0x380] sm:$0xff] }
 0xb02   :  { %4635 = vmatpush.msra.mxu3 %v4564_v49  ;;  %4656 = vmatpush.msra.mxu0 %v4537_v48  ;;  %v5031_v49 = vld [vmem:[#allocation19 + $0xa80] sm:$0xff] }
 0xb03   :  { %4681 = vmatpush.msra.mxu1 %v4565_v51  ;;  %4611 = vmatpush.msra.mxu2 %v4534_v55  ;;  %v5015_v55 = vld [vmem:[#allocation19 + $0xa00] sm:$0xff] }
 0xb04   :  { %4636 = vmatpush.msra.mxu3 %v4562_v53  ;;  %4657 = vmatpush.msra.mxu0 %v4535_v58  ;;  %v4808_v53 = vld [vmem:[#allocation19 + $0x388] sm:$0xff] }
 0xb05   :  { %4682 = vmatpush.msra.mxu1 %v4563_v54  ;;  %4612 = vmatpush.msra.mxu2 %v4532_v60 }
 0xb06   :  { %4637 = vmatpush.msra.mxu3 %v4560_v56  ;;  %4658 = vmatpush.msra.mxu0 %v4533_v61  ;;  %v5016_v56 = vld [vmem:[#allocation19 + $0xa08] sm:$0xff]  ;;  %v4791_v61 = vld [vmem:[#allocation19 + $0x300] sm:$0xff] }
 0xb07   :  { %4683 = vmatpush.msra.mxu1 %v4561_v59 }
 0xb08   :  { %4659 = vmatpush.msra.mxu0 %v4531_v63 }
 0xb0a   :  { %4660 = vmatpush.msra.mxu0 %v4529_v2  ;;  %v5000_v2 = vld [vmem:[#allocation19 + $0x988] sm:$0xff] }
 0xb60   :  { %v4349_v4 = vpop.f32.mrf.mxu1 }
 0xb66   :  { %v4326_v5 = vpop.f32.mrf.mxu0  ;;  %v4303_v16 = vpop.f32.mrf.mxu3 }
 0xb67   :  { %v4327_v8 = vadd.f32 %v4326_v5, %v4260_v62  ;;  %v5159_v5 = vld [vmem:[#allocation19 + $0xe80] sm:$0xff] }
 0xb68   :  { %v4352_v22 = vpop.f32.mrf.mxu1 }
 0xb69   :  { %v4350_v11 = vadd.f32 %v4349_v4, %v4327_v8  ;;  %v5176_v4 = vld [vmem:[#allocation19 + $0xf08] sm:$0xff] }
 0xb6a   :  { %v4936_v8 = vld [vmem:[#allocation19 + $0x788] sm:$0xff] }
 0xb6b   :  { %v4356_v15 = vmax.f32 %v4350_v11, 0.0  ;;  %v5144_v11 = vld [vmem:[#allocation19 + $0xe08] sm:$0xff] }
 0xb6c   :  { %v4280_v17 = vpop.f32.mrf.mxu2 }
 0xb6d   :  { %v4281_v18 = vadd.f32 %v4280_v17, %v4259_v12  ;;  %4470 = vmatmul.f32.vlgmr.msrb.gmra.mxu3 %v4356_v15  ;;  %4516 = vmatmul.f32.vlgmr.msrb.gmra.mxu1 %v4356_v15  ;;  %v4904_v15 = vld [vmem:[#allocation19 + $0x688] sm:$0xff] }
 0xb6e   :  { %v4329_v19 = vpop.f32.mrf.mxu0  ;;  %v4306_v28 = vpop.f32.mrf.mxu3  ;;  %5266 = vmatpush.msrb.mxu3 %v5191_v0  ;;  %5312 = vmatpush.msrb.mxu1 %v5192_v57  ;;  %v5128_v17 = vld [vmem:[#allocation19 + $0xd88] sm:$0xff]  ;;  %v4775_v57 = vld [vmem:[#allocation19 + $0x280] sm:$0xff] }
 0xb6f   :  { %v4304_v20 = vadd.f32 %v4303_v16, %v4281_v18  ;;  %v4330_v21 = vadd.f32 %v4329_v19, %v4260_v62  ;;  %v4530_v62 = vld [vmem:[#allocation16 + $0x1010] sm:$0xff]  ;;  %v4888_v19 = vld [vmem:[#allocation19 + $0x608] sm:$0xff] }
 0xb70   :  { %4613 = vmatpush.msra.mxu2 %v4530_v62  ;;  %5267 = vmatpush.msrb.mxu3 %v5175_v3  ;;  %v5127_v16 = vld [vmem:[#allocation19 + $0xd80] sm:$0xff] }
 0xb71   :  { %v4355_v23 = vmax.f32 %v4304_v20, 0.0  ;;  %v4353_v24 = vadd.f32 %v4352_v22, %v4330_v21  ;;  %5313 = vmatpush.msrb.mxu1 %v5176_v4  ;;  %v4887_v18 = vld [vmem:[#allocation19 + $0x600] sm:$0xff]  ;;  %v4428_v20 = vperm.slane %v6781_v13, 1  ;;  %v5112_v22 = vld [vmem:[#allocation19 + $0xd08] sm:$0xff] }
 0xb72   :  { %4614 = vmatpush.msra.mxu2 %v4528_v1  ;;  %5268 = vmatpush.msrb.mxu3 %v5159_v5  ;;  %v5111_v21 = vld [vmem:[#allocation19 + $0xd00] sm:$0xff]  ;;  %v4792_v1 = vld [vmem:[#allocation19 + $0x308] sm:$0xff] }
 0xb73   :  { %v4358_v25 = vmax.f32 %v4353_v24, 0.0  ;;  %4447 = vmatmul.f32.vlgmr.msrb.gmra.mxu2 %v4355_v23  ;;  %4493 = vmatmul.f32.vlgmr.msrb.gmra.mxu0 %v4355_v23  ;;  %v4871_v23 = vld [vmem:[#allocation19 + $0x580] sm:$0xff]  ;;  %v4872_v24 = vld [vmem:[#allocation19 + $0x588] sm:$0xff] }
 0xb74   :  { %v4283_v26 = vpop.f32.mrf.mxu2  ;;  %5243 = vmatpush.msrb.mxu2 %v4935_v7  ;;  %5289 = vmatpush.msrb.mxu0 %v4936_v8  ;;  %v4999_v62 = vld [vmem:[#allocation19 + $0x980] sm:$0xff]  ;;  %v4776_v5 = vld [vmem:[#allocation19 + $0x288] sm:$0xff] }
 0xb75   :  { %v4284_v27 = vadd.f32 %v4283_v26, %v4259_v12  ;;  %4473 = vmatmul.f32.gmra.mxu3 %v4358_v25  ;;  %4519 = vmatmul.f32.gmra.mxu1 %v4358_v25  ;;  %v4920_v12 = vld [vmem:[#allocation19 + $0x708] sm:$0xff]  ;;  %v5095_v25 = vld [vmem:[#allocation19 + $0xc80] sm:$0xff] }
 0xb76   :  { %5314 = vmatpush.msrb.mxu1 %v5160_v6  ;;  %5244 = vmatpush.msrb.mxu2 %v4919_v9  ;;  %v5096_v26 = vld [vmem:[#allocation19 + $0xc88] sm:$0xff]  ;;  %v4983_v3 = vld [vmem:[#allocation19 + $0x900] sm:$0xff] }
 0xb77   :  { %v4307_v29 = vadd.f32 %v4306_v28, %v4284_v27  ;;  %5290 = vmatpush.msrb.mxu0 %v4920_v12  ;;  %5269 = vmatpush.msrb.mxu3 %v5143_v10  ;;  %v4984_v6 = vld [vmem:[#allocation19 + $0x908] sm:$0xff]  ;;  %v4759_v8 = vld [vmem:[#allocation19 + $0x200] sm:$0xff] }
 0xb78   :  { %5315 = vmatpush.msrb.mxu1 %v5144_v11  ;;  %5245 = vmatpush.msrb.mxu2 %v4903_v14  ;;  %v4967_v9 = vld [vmem:[#allocation19 + $0x880] sm:$0xff]  ;;  %v4760_v11 = vld [vmem:[#allocation19 + $0x208] sm:$0xff] }
 0xb79   :  { %v4357_v30 = vmax.f32 %v4307_v29, 0.0  ;;  %5291 = vmatpush.msrb.mxu0 %v4904_v15  ;;  %5270 = vmatpush.msrb.mxu3 %v5127_v16  ;;  %v4855_v29 = vld [vmem:[#allocation19 + $0x500] sm:$0xff]  ;;  %v4968_v12 = vld [vmem:[#allocation19 + $0x888] sm:$0xff] }
 0xb7a   :  { %5316 = vmatpush.msrb.mxu1 %v5128_v17  ;;  %5246 = vmatpush.msrb.mxu2 %v4887_v18  ;;  %v4743_v14 = vld [vmem:[#allocation19 + $0x180] sm:$0xff]  ;;  %v4744_v16 = vld [vmem:[#allocation19 + $0x188] sm:$0xff]  ;;  %v5193_v18 = vld [vmem:[#allocation19 + $0xf90] sm:$0xff] }
 0xb7b   :  { %4450 = vmatmul.f32.gmra.mxu2 %v4357_v30  ;;  %4496 = vmatmul.f32.gmra.mxu0 %v4357_v30  ;;  %v4856_v30 = vld [vmem:[#allocation19 + $0x508] sm:$0xff]  ;;  %v4951_v15 = vld [vmem:[#allocation19 + $0x800] sm:$0xff] }
 0xb7c   :  { %5292 = vmatpush.msrb.mxu0 %v4888_v19  ;;  %5271 = vmatpush.msrb.mxu3 %v5111_v21  ;;  %v4952_v17 = vld [vmem:[#allocation19 + $0x808] sm:$0xff]  ;;  %v5194_v19 = vld [vmem:[#allocation19 + $0xf98] sm:$0xff] }
 0xb7d   :  { %5317 = vmatpush.msrb.mxu1 %v5112_v22  ;;  %5247 = vmatpush.msrb.mxu2 %v4871_v23  ;;  %v4728_v21 = vld [vmem:[#allocation19 + $0x108] sm:$0xff]  ;;  %v5177_v22 = vld [vmem:[#allocation19 + $0xf10] sm:$0xff]  ;;  %v5178_v23 = vld [vmem:[#allocation19 + $0xf18] sm:$0xff] }
 0xb7e   :  { %5293 = vmatpush.msrb.mxu0 %v4872_v24  ;;  %5272 = vmatpush.msrb.mxu3 %v5095_v25  ;;  %v4711_v24 = vld [vmem:[#allocation19 + $0x80] sm:$0xff]  ;;  %v4712_v25 = vld [vmem:[#allocation19 + $0x88] sm:$0xff] }
 0xb7f   :  { %5318 = vmatpush.msrb.mxu1 %v5096_v26  ;;  %5248 = vmatpush.msrb.mxu2 %v4855_v29  ;;  %v5161_v26 = vld [vmem:[#allocation19 + $0xe90] sm:$0xff]  ;;  %v4696_v29 = vld [vmem:[#allocation19 + $0x8] sm:$0xff] }
 0xb80   :  { %5294 = vmatpush.msrb.mxu0 %v4856_v30  ;;  %5273 = vmatpush.msrb.mxu3 %v5079_v32  ;;  %v4937_v30 = vld [vmem:[#allocation19 + $0x790] sm:$0xff]  ;;  %v4938_v32 = vld [vmem:[#allocation19 + $0x798] sm:$0xff] }
 0xb81   :  { %5319 = vmatpush.msrb.mxu1 %v5080_v33  ;;  %5249 = vmatpush.msrb.mxu2 %v4839_v34  ;;  %v5146_v33 = vld [vmem:[#allocation19 + $0xe18] sm:$0xff]  ;;  %v4921_v34 = vld [vmem:[#allocation19 + $0x710] sm:$0xff] }
 0xb82   :  { %5295 = vmatpush.msrb.mxu0 %v4840_v35  ;;  %5274 = vmatpush.msrb.mxu3 %v5063_v38  ;;  %v5129_v35 = vld [vmem:[#allocation19 + $0xd90] sm:$0xff] }
 0xb83   :  { %5320 = vmatpush.msrb.mxu1 %v5064_v39  ;;  %5250 = vmatpush.msrb.mxu2 %v4823_v45  ;;  %v4905_v38 = vld [vmem:[#allocation19 + $0x690] sm:$0xff]  ;;  %v5098_v45 = vld [vmem:[#allocation19 + $0xc98] sm:$0xff] }
 0xb84   :  { %5275 = vmatpush.msrb.mxu3 %v5047_v41  ;;  %5296 = vmatpush.msrb.mxu0 %v4824_v46  ;;  %v5113_v39 = vld [vmem:[#allocation19 + $0xd10] sm:$0xff]  ;;  %v5114_v41 = vld [vmem:[#allocation19 + $0xd18] sm:$0xff] }
 0xb85   :  { %5321 = vmatpush.msrb.mxu1 %v5048_v42  ;;  %5251 = vmatpush.msrb.mxu2 %v4807_v52  ;;  %v4889_v42 = vld [vmem:[#allocation19 + $0x610] sm:$0xff] }
 0xb86   :  { %5276 = vmatpush.msrb.mxu3 %v5031_v49  ;;  %5297 = vmatpush.msrb.mxu0 %v4808_v53  ;;  %v4873_v46 = vld [vmem:[#allocation19 + $0x590] sm:$0xff]  ;;  %v4874_v49 = vld [vmem:[#allocation19 + $0x598] sm:$0xff] }
 0xb87   :  { %5322 = vmatpush.msrb.mxu1 %v5032_v50  ;;  %5252 = vmatpush.msrb.mxu2 %v4791_v61  ;;  %v5082_v50 = vld [vmem:[#allocation19 + $0xc18] sm:$0xff]  ;;  %v5065_v52 = vld [vmem:[#allocation19 + $0xb90] sm:$0xff] }
 0xb88   :  { %5277 = vmatpush.msrb.mxu3 %v5015_v55  ;;  %5298 = vmatpush.msrb.mxu0 %v4792_v1  ;;  %v4858_v53 = vld [vmem:[#allocation19 + $0x518] sm:$0xff]  ;;  %v5049_v55 = vld [vmem:[#allocation19 + $0xb10] sm:$0xff] }
 0xb89   :  { %5323 = vmatpush.msrb.mxu1 %v5016_v56  ;;  %5253 = vmatpush.msrb.mxu2 %v4775_v57  ;;  %v4842_v56 = vld [vmem:[#allocation19 + $0x498] sm:$0xff]  ;;  %v5017_v1 = vld [vmem:[#allocation19 + $0xa10] sm:$0xff] }
 0xb8a   :  { %5278 = vmatpush.msrb.mxu3 %v4999_v62  ;;  %5299 = vmatpush.msrb.mxu0 %v4776_v5  ;;  %v4826_v61 = vld [vmem:[#allocation19 + $0x418] sm:$0xff]  ;;  %v4793_v57 = vld [vmem:[#allocation19 + $0x310] sm:$0xff] }
 0xb8b   :  { %5324 = vmatpush.msrb.mxu1 %v5000_v2  ;;  %5254 = vmatpush.msrb.mxu2 %v4759_v8  ;;  %v5034_v62 = vld [vmem:[#allocation19 + $0xa98] sm:$0xff] }
 0xb8c   :  { %5279 = vmatpush.msrb.mxu3 %v4983_v3  ;;  %5300 = vmatpush.msrb.mxu0 %v4760_v11  ;;  %v4810_v2 = vld [vmem:[#allocation19 + $0x398] sm:$0xff]  ;;  %v5001_v3 = vld [vmem:[#allocation19 + $0x990] sm:$0xff] }
 0xb8d   :  { %5325 = vmatpush.msrb.mxu1 %v4984_v6  ;;  %5255 = vmatpush.msrb.mxu2 %v4743_v14  ;;  %v5002_v5 = vld [vmem:[#allocation19 + $0x998] sm:$0xff]  ;;  %v4777_v6 = vld [vmem:[#allocation19 + $0x290] sm:$0xff] }
 0xb8e   :  { %5280 = vmatpush.msrb.mxu3 %v4967_v9  ;;  %5301 = vmatpush.msrb.mxu0 %v4744_v16  ;;  %v4778_v8 = vld [vmem:[#allocation19 + $0x298] sm:$0xff]  ;;  %v4969_v11 = vld [vmem:[#allocation19 + $0x890] sm:$0xff] }
 0xb8f   :  { %5326 = vmatpush.msrb.mxu1 %v4968_v12  ;;  %v4986_v9 = vld [vmem:[#allocation19 + $0x918] sm:$0xff]  ;;  %v4745_v14 = vld [vmem:[#allocation19 + $0x190] sm:$0xff] }
 0xb90   :  { %5281 = vmatpush.msrb.mxu3 %v4951_v15  ;;  %5302 = vmatpush.msrb.mxu0 %v4728_v21  ;;  %v4762_v12 = vld [vmem:[#allocation19 + $0x218] sm:$0xff]  ;;  %v4953_v15 = vld [vmem:[#allocation19 + $0x810] sm:$0xff] }
 0xb91   :  { %5327 = vmatpush.msrb.mxu1 %v4952_v17  ;;  %v4746_v16 = vld [vmem:[#allocation19 + $0x198] sm:$0xff] }
 0xb92   :  { %5303 = vmatpush.msrb.mxu0 %v4712_v25  ;;  %v4954_v17 = vld [vmem:[#allocation19 + $0x818] sm:$0xff] }
 0xb93   :  { %v4714_v21 = vld [vmem:[#allocation19 + $0x98] sm:$0xff] }
 0xb94   :  { %5304 = vmatpush.msrb.mxu0 %v4696_v29 }
 0xbea   :  { %v4517_v27 = vpop.f32.mrf.mxu1 }
 0xbf0   :  { %v4494_v28 = vpop.f32.mrf.mxu0  ;;  %v4471_v43 = vpop.f32.mrf.mxu3 }
 0xbf1   :  { %v4495_v31 = vadd.f32 %v4494_v28, %v4428_v20  ;;  %v4695_v28 = vld [vmem:[#allocation19] sm:$0xff] }
 0xbf2   :  { %v4520_v58 = vpop.f32.mrf.mxu1 }
 0xbf3   :  { %v4518_v36 = vadd.f32 %v4517_v27, %v4495_v31  ;;  %v5162_v27 = vld [vmem:[#allocation19 + $0xe98] sm:$0xff]  ;;  %v5145_v31 = vld [vmem:[#allocation19 + $0xe10] sm:$0xff] }
 0xbf5   :  { %v4524_v40 = vmax.f32 %v4518_v36, 0.0  ;;  %v4922_v36 = vld [vmem:[#allocation19 + $0x718] sm:$0xff] }
 0xbf6   :  { %v4448_v44 = vpop.f32.mrf.mxu2 }
 0xbf7   :  { %v4449_v47 = vadd.f32 %v4448_v44, %v4427_v37  ;;  %4638 = vmatmul.f32.vlgmr.msra.gmra.mxu3 %v4524_v40  ;;  %4684 = vmatmul.f32.vlgmr.msra.gmra.mxu1 %v4524_v40  ;;  %v4906_v40 = vld [vmem:[#allocation19 + $0x698] sm:$0xff] }
 0xbf8   :  { %v4497_v51 = vpop.f32.mrf.mxu0  ;;  %v4474_v7 = vpop.f32.mrf.mxu3  ;;  %5358 = vmatpush.msra.mxu3 %v5193_v18  ;;  %5404 = vmatpush.msra.mxu1 %v5194_v19  ;;  %v4890_v44 = vld [vmem:[#allocation19 + $0x618] sm:$0xff]  ;;  %v4729_v18 = vld [vmem:[#allocation19 + $0x110] sm:$0xff] }
 0xbf9   :  { %v4472_v48 = vadd.f32 %v4471_v43, %v4449_v47  ;;  %v4498_v54 = vadd.f32 %v4497_v51, %v4428_v20  ;;  %v4727_v20 = vld [vmem:[#allocation19 + $0x100] sm:$0xff]  ;;  %v5097_v43 = vld [vmem:[#allocation19 + $0xc90] sm:$0xff]  ;;  %v4730_v19 = vld [vmem:[#allocation19 + $0x118] sm:$0xff] }
 0xbfa   :  { %5256 = vmatpush.msrb.mxu2 %v4727_v20  ;;  %5359 = vmatpush.msra.mxu3 %v5177_v22  ;;  %v5081_v47 = vld [vmem:[#allocation19 + $0xc10] sm:$0xff] }
 0xbfb   :  { %v4523_v59 = vmax.f32 %v4472_v48, 0.0  ;;  %v4521_v60 = vadd.f32 %v4520_v58, %v4498_v54  ;;  %5405 = vmatpush.msra.mxu1 %v5178_v23  ;;  %v4857_v51 = vld [vmem:[#allocation19 + $0x510] sm:$0xff]  ;;  %v5066_v48 = vld [vmem:[#allocation19 + $0xb98] sm:$0xff] }
 0xbfc   :  { %5257 = vmatpush.msrb.mxu2 %v4711_v24  ;;  %5360 = vmatpush.msra.mxu3 %v5161_v26  ;;  %v4841_v54 = vld [vmem:[#allocation19 + $0x490] sm:$0xff]  ;;  %v5050_v58 = vld [vmem:[#allocation19 + $0xb18] sm:$0xff] }
 0xbfd   :  { %v4526_v63 = vmax.f32 %v4521_v60, 0.0  ;;  %4615 = vmatmul.f32.vlgmr.msra.gmra.mxu2 %v4523_v59  ;;  %4661 = vmatmul.f32.vlgmr.msra.gmra.mxu0 %v4523_v59  ;;  %v4825_v59 = vld [vmem:[#allocation19 + $0x410] sm:$0xff]  ;;  %v4698_v23 = vld [vmem:[#allocation19 + $0x18] sm:$0xff] }
 0xbfe   :  { %v4451_v0 = vpop.f32.mrf.mxu2  ;;  %5406 = vmatpush.msra.mxu1 %v5162_v27  ;;  %5258 = vmatpush.msrb.mxu2 %v4695_v28  ;;  %v5033_v60 = vld [vmem:[#allocation19 + $0xa90] sm:$0xff]  ;;  %v4593_v24 = vld [vmem:[#allocation17 + $0x10] sm:$0x3] }
 0xbff   :  { %v4452_v4 = vadd.f32 %v4451_v0, %v4427_v37  ;;  %4641 = vmatmul.f32.gmra.mxu3 %v4526_v63  ;;  %4687 = vmatmul.f32.gmra.mxu1 %v4526_v63  ;;  %v5130_v37 = vld [vmem:[#allocation19 + $0xd98] sm:$0xff]  ;;  %v4809_v63 = vld [vmem:[#allocation19 + $0x390] sm:$0xff]  ;;  %v4596_v25 = vperm.slane %v4593_v24, 1 }
 0xc00   :  { %5335 = vmatpush.msra.mxu2 %v4937_v30  ;;  %5361 = vmatpush.msra.mxu3 %v5145_v31  ;;  %v5018_v0 = vld [vmem:[#allocation19 + $0xa18] sm:$0xff]  ;;  %v4713_v20 = vld [vmem:[#allocation19 + $0x90] sm:$0xff]  ;;  %v4595_v30 = vperm.slane %v4593_v24, 0  ;;  %v5020_v24 = vld [vmem:[#allocation19 + $0xa28] sm:$0xff] }
 0xc01   :  { %v4475_v10 = vadd.f32 %v4474_v7, %v4452_v4  ;;  %5381 = vmatpush.msra.mxu0 %v4938_v32  ;;  %5407 = vmatpush.msra.mxu1 %v5146_v33  ;;  %v4794_v4 = vld [vmem:[#allocation19 + $0x318] sm:$0xff]  ;;  %v4985_v7 = vld [vmem:[#allocation19 + $0x910] sm:$0xff]  ;;  %v5195_v32 = vld [vmem:[#allocation19 + $0xfa0] sm:$0xff] }
 0xc02   :  { %5336 = vmatpush.msra.mxu2 %v4921_v34  ;;  %5362 = vmatpush.msra.mxu3 %v5129_v35  ;;  %v4697_v22 = vld [vmem:[#allocation19 + $0x10] sm:$0xff]  ;;  %v5196_v33 = vld [vmem:[#allocation19 + $0xfa8] sm:$0xff] }
 0xc03   :  { %v4525_v13 = vmax.f32 %v4475_v10, 0.0  ;;  %5382 = vmatpush.msra.mxu0 %v4922_v36  ;;  %5408 = vmatpush.msra.mxu1 %v5130_v37  ;;  %v4761_v10 = vld [vmem:[#allocation19 + $0x210] sm:$0xff]  ;;  %v5179_v37 = vld [vmem:[#allocation19 + $0xf20] sm:$0xff] }
 0xc04   :  { %5337 = vmatpush.msra.mxu2 %v4905_v38  ;;  %5363 = vmatpush.msra.mxu3 %v5113_v39  ;;  %v5180_v38 = vld [vmem:[#allocation19 + $0xf28] sm:$0xff] }
 0xc05   :  { %4618 = vmatmul.f32.gmra.mxu2 %v4525_v13  ;;  %4664 = vmatmul.f32.gmra.mxu0 %v4525_v13  ;;  %v4970_v13 = vld [vmem:[#allocation19 + $0x898] sm:$0xff] }
 0xc06   :  { %5383 = vmatpush.msra.mxu0 %v4906_v40  ;;  %5409 = vmatpush.msra.mxu1 %v5114_v41 }
 0xc07   :  { %5338 = vmatpush.msra.mxu2 %v4889_v42  ;;  %5364 = vmatpush.msra.mxu3 %v5097_v43  ;;  %v5163_v42 = vld [vmem:[#allocation19 + $0xea0] sm:$0xff]  ;;  %v5164_v43 = vld [vmem:[#allocation19 + $0xea8] sm:$0xff] }
 0xc08   :  { %5384 = vmatpush.msra.mxu0 %v4890_v44  ;;  %5410 = vmatpush.msra.mxu1 %v5098_v45 }
 0xc09   :  { %5339 = vmatpush.msra.mxu2 %v4873_v46  ;;  %5365 = vmatpush.msra.mxu3 %v5081_v47  ;;  %v4939_v47 = vld [vmem:[#allocation19 + $0x7a0] sm:$0xff] }
 0xc0a   :  { %5385 = vmatpush.msra.mxu0 %v4874_v49  ;;  %5411 = vmatpush.msra.mxu1 %v5082_v50  ;;  %v5147_v49 = vld [vmem:[#allocation19 + $0xe20] sm:$0xff]  ;;  %v4940_v50 = vld [vmem:[#allocation19 + $0x7a8] sm:$0xff] }
 0xc0b   :  { %5340 = vmatpush.msra.mxu2 %v4857_v51  ;;  %5366 = vmatpush.msra.mxu3 %v5065_v52  ;;  %v5148_v51 = vld [vmem:[#allocation19 + $0xe28] sm:$0xff] }
 0xc0c   :  { %5386 = vmatpush.msra.mxu0 %v4858_v53  ;;  %5412 = vmatpush.msra.mxu1 %v5066_v48  ;;  %v4923_v48 = vld [vmem:[#allocation19 + $0x720] sm:$0xff] }
 0xc0d   :  { %5341 = vmatpush.msra.mxu2 %v4841_v54  ;;  %5367 = vmatpush.msra.mxu3 %v5049_v55  ;;  %v5131_v54 = vld [vmem:[#allocation19 + $0xda0] sm:$0xff] }
 0xc0e   :  { %5387 = vmatpush.msra.mxu0 %v4842_v56  ;;  %5413 = vmatpush.msra.mxu1 %v5050_v58  ;;  %v4924_v56 = vld [vmem:[#allocation19 + $0x728] sm:$0xff] }
 0xc0f   :  { %5342 = vmatpush.msra.mxu2 %v4825_v59  ;;  %5368 = vmatpush.msra.mxu3 %v5033_v60  ;;  %v5132_v58 = vld [vmem:[#allocation19 + $0xda8] sm:$0xff]  ;;  %v4907_v60 = vld [vmem:[#allocation19 + $0x6a0] sm:$0xff] }
 0xc10   :  { %5388 = vmatpush.msra.mxu0 %v4826_v61  ;;  %5414 = vmatpush.msra.mxu1 %v5034_v62  ;;  %v5115_v61 = vld [vmem:[#allocation19 + $0xd20] sm:$0xff] }
 0xc11   :  { %5343 = vmatpush.msra.mxu2 %v4809_v63  ;;  %5369 = vmatpush.msra.mxu3 %v5017_v1  ;;  %v4908_v63 = vld [vmem:[#allocation19 + $0x6a8] sm:$0xff] }
 0xc12   :  { %5389 = vmatpush.msra.mxu0 %v4810_v2  ;;  %5415 = vmatpush.msra.mxu1 %v5018_v0  ;;  %v5116_v1 = vld [vmem:[#allocation19 + $0xd28] sm:$0xff]  ;;  %v4891_v2 = vld [vmem:[#allocation19 + $0x620] sm:$0xff] }
 0xc13   :  { %5344 = vmatpush.msra.mxu2 %v4793_v57  ;;  %5370 = vmatpush.msra.mxu3 %v5001_v3  ;;  %v5099_v0 = vld [vmem:[#allocation19 + $0xca0] sm:$0xff]  ;;  %v4892_v3 = vld [vmem:[#allocation19 + $0x628] sm:$0xff] }
 0xc14   :  { %5390 = vmatpush.msra.mxu0 %v4794_v4  ;;  %5416 = vmatpush.msra.mxu1 %v5002_v5  ;;  %v5100_v4 = vld [vmem:[#allocation19 + $0xca8] sm:$0xff]  ;;  %v4875_v5 = vld [vmem:[#allocation19 + $0x5a0] sm:$0xff] }
 0xc15   :  { %5345 = vmatpush.msra.mxu2 %v4777_v6  ;;  %5371 = vmatpush.msra.mxu3 %v4985_v7  ;;  %v5083_v6 = vld [vmem:[#allocation19 + $0xc20] sm:$0xff]  ;;  %v4876_v7 = vld [vmem:[#allocation19 + $0x5a8] sm:$0xff] }
 0xc16   :  { %5391 = vmatpush.msra.mxu0 %v4778_v8  ;;  %5417 = vmatpush.msra.mxu1 %v4986_v9  ;;  %v5084_v8 = vld [vmem:[#allocation19 + $0xc28] sm:$0xff]  ;;  %v4859_v9 = vld [vmem:[#allocation19 + $0x520] sm:$0xff] }
 0xc17   :  { %5346 = vmatpush.msra.mxu2 %v4761_v10  ;;  %5372 = vmatpush.msra.mxu3 %v4969_v11  ;;  %v5067_v10 = vld [vmem:[#allocation19 + $0xba0] sm:$0xff]  ;;  %v4860_v11 = vld [vmem:[#allocation19 + $0x528] sm:$0xff] }
 0xc18   :  { %5392 = vmatpush.msra.mxu0 %v4762_v12  ;;  %5418 = vmatpush.msra.mxu1 %v4970_v13  ;;  %v5068_v12 = vld [vmem:[#allocation19 + $0xba8] sm:$0xff]  ;;  %v4843_v13 = vld [vmem:[#allocation19 + $0x4a0] sm:$0xff] }
 0xc19   :  { %5347 = vmatpush.msra.mxu2 %v4745_v14  ;;  %5373 = vmatpush.msra.mxu3 %v4953_v15  ;;  %v5051_v14 = vld [vmem:[#allocation19 + $0xb20] sm:$0xff]  ;;  %v4844_v15 = vld [vmem:[#allocation19 + $0x4a8] sm:$0xff] }
 0xc1a   :  { %5393 = vmatpush.msra.mxu0 %v4746_v16  ;;  %5419 = vmatpush.msra.mxu1 %v4954_v17  ;;  %v5052_v16 = vld [vmem:[#allocation19 + $0xb28] sm:$0xff]  ;;  %v4827_v17 = vld [vmem:[#allocation19 + $0x420] sm:$0xff] }
 0xc1b   :  { %5348 = vmatpush.msra.mxu2 %v4729_v18  ;;  %v5035_v18 = vld [vmem:[#allocation19 + $0xaa0] sm:$0xff] }
 0xc1c   :  { %5394 = vmatpush.msra.mxu0 %v4730_v19  ;;  %v4828_v19 = vld [vmem:[#allocation19 + $0x428] sm:$0xff] }
 0xc1d   :  { %5349 = vmatpush.msra.mxu2 %v4713_v20  ;;  %v5036_v20 = vld [vmem:[#allocation19 + $0xaa8] sm:$0xff] }
 0xc1e   :  { %5395 = vmatpush.msra.mxu0 %v4714_v21  ;;  %v4811_v21 = vld [vmem:[#allocation19 + $0x3a0] sm:$0xff] }
 0xc1f   :  { %5350 = vmatpush.msra.mxu2 %v4697_v22  ;;  %v5019_v22 = vld [vmem:[#allocation19 + $0xa20] sm:$0xff] }
 0xc20   :  { %5396 = vmatpush.msra.mxu0 %v4698_v23  ;;  %v4812_v23 = vld [vmem:[#allocation19 + $0x3a8] sm:$0xff] }
 0xc74   :  { %v4685_v26 = vpop.f32.mrf.mxu1 }
 0xc7a   :  { %v4662_v27 = vpop.f32.mrf.mxu0  ;;  %v4639_v34 = vpop.f32.mrf.mxu3 }
 0xc7b   :  { %v4663_v28 = vadd.f32 %v4662_v27, %v4596_v25  ;;  %v4796_v27 = vld [vmem:[#allocation19 + $0x328] sm:$0xff] }
 0xc7c   :  { %v4688_v44 = vpop.f32.mrf.mxu1 }
 0xc7d   :  { %v4686_v29 = vadd.f32 %v4685_v26, %v4663_v28  ;;  %v5003_v26 = vld [vmem:[#allocation19 + $0x9a0] sm:$0xff]  ;;  %v5004_v28 = vld [vmem:[#allocation19 + $0x9a8] sm:$0xff] }
 0xc7f   :  { %v6785_v31 = vmax.f32 %v4686_v29, 0.0  ;;  %v4779_v29 = vld [vmem:[#allocation19 + $0x2a0] sm:$0xff] }
 0xc80   :  { %v4616_v35 = vpop.f32.mrf.mxu2 }
 0xc81   :  { %v4617_v36 = vadd.f32 %v4616_v35, %v4595_v30  ;;  %5282 = vmatmul.f32.vlgmr.msrb.gmra.mxu3 %v6785_v31  ;;  %5328 = vmatmul.f32.vlgmr.msrb.gmra.mxu1 %v6785_v31  ;;  %v4971_v35 = vld [vmem:[#allocation19 + $0x8a0] sm:$0xff] }
 0xc82   :  { %5450 = vmatpush.msrb.mxu3 %v5195_v32  ;;  %5496 = vmatpush.msrb.mxu1 %v5196_v33  ;;  %v4665_v39 = vpop.f32.mrf.mxu0  ;;  %v4642_v59 = vpop.f32.mrf.mxu3  ;;  %v4780_v32 = vld [vmem:[#allocation19 + $0x2a8] sm:$0xff] }
 0xc83   :  { %v4640_v40 = vadd.f32 %v4639_v34, %v4617_v36  ;;  %v4666_v41 = vadd.f32 %v4665_v39, %v4596_v25  ;;  %v4795_v25 = vld [vmem:[#allocation19 + $0x320] sm:$0xff]  ;;  %v4988_v33 = vld [vmem:[#allocation19 + $0x928] sm:$0xff] }
 0xc84   :  { %5451 = vmatpush.msrb.mxu3 %v5179_v37  ;;  %5497 = vmatpush.msrb.mxu1 %v5180_v38  ;;  %v4763_v34 = vld [vmem:[#allocation19 + $0x220] sm:$0xff]  ;;  %v4764_v36 = vld [vmem:[#allocation19 + $0x228] sm:$0xff] }
 0xc85   :  { %v6789_v45 = vmax.f32 %v4640_v40, 0.0  ;;  %v4689_v46 = vadd.f32 %v4688_v44, %v4666_v41  ;;  %v4972_v37 = vld [vmem:[#allocation19 + $0x8a8] sm:$0xff]  ;;  %v4747_v38 = vld [vmem:[#allocation19 + $0x1a0] sm:$0xff] }
 0xc86   :  { %5452 = vmatpush.msrb.mxu3 %v5163_v42  ;;  %5498 = vmatpush.msrb.mxu1 %v5164_v43  ;;  %v4955_v39 = vld [vmem:[#allocation19 + $0x820] sm:$0xff]  ;;  %v4748_v40 = vld [vmem:[#allocation19 + $0x1a8] sm:$0xff]  ;;  %v5197_v42 = vld [vmem:[#allocation19 + $0xfb0] sm:$0xff] }
 0xc87   :  { %v6791_v52 = vmax.f32 %v4689_v46, 0.0  ;;  %5259 = vmatmul.f32.vlgmr.msrb.gmra.mxu2 %v6789_v45  ;;  %5305 = vmatmul.f32.vlgmr.msrb.gmra.mxu0 %v6789_v45  ;;  %v4956_v41 = vld [vmem:[#allocation19 + $0x828] sm:$0xff]  ;;  %v5198_v43 = vld [vmem:[#allocation19 + $0xfb8] sm:$0xff]  ;;  %v4731_v44 = vld [vmem:[#allocation19 + $0x120] sm:$0xff] }
 0xc88   :  { %5427 = vmatpush.msrb.mxu2 %v4939_v47  ;;  %5453 = vmatpush.msrb.mxu3 %v5147_v49  ;;  %v4619_v53 = vpop.f32.mrf.mxu2  ;;  %v4732_v46 = vld [vmem:[#allocation19 + $0x128] sm:$0xff]  ;;  %v5181_v47 = vld [vmem:[#allocation19 + $0xf30] sm:$0xff]  ;;  %v5182_v49 = vld [vmem:[#allocation19 + $0xf38] sm:$0xff] }
 0xc89   :  { %5473 = vmatpush.msrb.mxu0 %v4940_v50  ;;  %5499 = vmatpush.msrb.mxu1 %v5148_v51  ;;  %v4620_v55 = vadd.f32 %v4619_v53, %v4595_v30  ;;  %v4987_v30 = vld [vmem:[#allocation19 + $0x920] sm:$0xff]  ;;  %v4716_v51 = vld [vmem:[#allocation19 + $0xa8] sm:$0xff]  ;;  %v5165_v53 = vld [vmem:[#allocation19 + $0xeb0] sm:$0xff] }
 0xc8a   :  { %5285 = vmatmul.f32.gmra.mxu3 %v6791_v52  ;;  %5331 = vmatmul.f32.gmra.mxu1 %v6791_v52  ;;  %v4715_v50 = vld [vmem:[#allocation19 + $0xa0] sm:$0xff] }
 0xc8b   :  { %v4643_v62 = vadd.f32 %v4642_v59, %v4620_v55  ;;  %5428 = vmatpush.msrb.mxu2 %v4923_v48  ;;  %5454 = vmatpush.msrb.mxu3 %v5131_v54  ;;  %v5166_v48 = vld [vmem:[#allocation19 + $0xeb8] sm:$0xff]  ;;  %v4699_v54 = vld [vmem:[#allocation19 + $0x20] sm:$0xff]  ;;  %v4700_v55 = vld [vmem:[#allocation19 + $0x28] sm:$0xff] }
 0xc8c   :  { %5474 = vmatpush.msrb.mxu0 %v4924_v56  ;;  %5500 = vmatpush.msrb.mxu1 %v5132_v58  ;;  %v4941_v56 = vld [vmem:[#allocation19 + $0x7b0] sm:$0xff]  ;;  %v4942_v59 = vld [vmem:[#allocation19 + $0x7b8] sm:$0xff] }
 0xc8d   :  { %v6797_v57 = vmax.f32 %v4643_v62, 0.0  ;;  %5429 = vmatpush.msrb.mxu2 %v4907_v60  ;;  %5455 = vmatpush.msrb.mxu3 %v5115_v61  ;;  %v5149_v58 = vld [vmem:[#allocation19 + $0xe30] sm:$0xff]  ;;  %v5150_v60 = vld [vmem:[#allocation19 + $0xe38] sm:$0xff] }
 0xc8e   :  { %5475 = vmatpush.msrb.mxu0 %v4908_v63  ;;  %5501 = vmatpush.msrb.mxu1 %v5116_v1  ;;  %v4925_v61 = vld [vmem:[#allocation19 + $0x730] sm:$0xff]  ;;  %v4926_v63 = vld [vmem:[#allocation19 + $0x738] sm:$0xff] }
 0xc8f   :  { %5430 = vmatpush.msrb.mxu2 %v4891_v2  ;;  %5456 = vmatpush.msrb.mxu3 %v5099_v0  ;;  %v5133_v62 = vld [vmem:[#allocation19 + $0xdb0] sm:$0xff]  ;;  %v5134_v1 = vld [vmem:[#allocation19 + $0xdb8] sm:$0xff] }
 0xc90   :  { %5476 = vmatpush.msrb.mxu0 %v4892_v3  ;;  %5502 = vmatpush.msrb.mxu1 %v5100_v4  ;;  %v4909_v2 = vld [vmem:[#allocation19 + $0x6b0] sm:$0xff]  ;;  %v4910_v3 = vld [vmem:[#allocation19 + $0x6b8] sm:$0xff] }
 0xc91   :  { %5262 = vmatmul.f32.gmra.mxu2 %v6797_v57  ;;  %5308 = vmatmul.f32.gmra.mxu0 %v6797_v57  ;;  %v5117_v0 = vld [vmem:[#allocation19 + $0xd30] sm:$0xff]  ;;  %v5118_v4 = vld [vmem:[#allocation19 + $0xd38] sm:$0xff] }
 0xc92   :  { %5431 = vmatpush.msrb.mxu2 %v4875_v5  ;;  %5457 = vmatpush.msrb.mxu3 %v5083_v6  ;;  %v4893_v5 = vld [vmem:[#allocation19 + $0x630] sm:$0xff] }
 0xc93   :  { %5477 = vmatpush.msrb.mxu0 %v4876_v7  ;;  %5503 = vmatpush.msrb.mxu1 %v5084_v8  ;;  %v5101_v6 = vld [vmem:[#allocation19 + $0xcb0] sm:$0xff]  ;;  %v4894_v7 = vld [vmem:[#allocation19 + $0x638] sm:$0xff] }
 0xc94   :  { %5374 = vmatmul.f32.vlgmr.msra.gmra.mxu3 %v6785_v31  ;;  %5420 = vmatmul.f32.vlgmr.msra.gmra.mxu1 %v6785_v31  ;;  %v5102_v8 = vld [vmem:[#allocation19 + $0xcb8] sm:$0xff] }
 0xc95   :  { %5432 = vmatpush.msrb.mxu2 %v4859_v9  ;;  %5458 = vmatpush.msrb.mxu3 %v5067_v10  ;;  %v4877_v9 = vld [vmem:[#allocation19 + $0x5b0] sm:$0xff] }
 0xc96   :  { %5478 = vmatpush.msrb.mxu0 %v4860_v11  ;;  %5504 = vmatpush.msrb.mxu1 %v5068_v12  ;;  %v5085_v10 = vld [vmem:[#allocation19 + $0xc30] sm:$0xff]  ;;  %v4878_v11 = vld [vmem:[#allocation19 + $0x5b8] sm:$0xff] }
 0xc97   :  { %5433 = vmatpush.msrb.mxu2 %v4843_v13  ;;  %5459 = vmatpush.msrb.mxu3 %v5051_v14  ;;  %v5086_v12 = vld [vmem:[#allocation19 + $0xc38] sm:$0xff]  ;;  %v4861_v13 = vld [vmem:[#allocation19 + $0x530] sm:$0xff] }
 0xc98   :  { %5479 = vmatpush.msrb.mxu0 %v4844_v15  ;;  %5505 = vmatpush.msrb.mxu1 %v5052_v16  ;;  %v5069_v14 = vld [vmem:[#allocation19 + $0xbb0] sm:$0xff]  ;;  %v4862_v15 = vld [vmem:[#allocation19 + $0x538] sm:$0xff] }
 0xc99   :  { %5434 = vmatpush.msrb.mxu2 %v4827_v17  ;;  %5460 = vmatpush.msrb.mxu3 %v5035_v18  ;;  %v5070_v16 = vld [vmem:[#allocation19 + $0xbb8] sm:$0xff]  ;;  %v4845_v17 = vld [vmem:[#allocation19 + $0x4b0] sm:$0xff] }
 0xc9a   :  { %5480 = vmatpush.msrb.mxu0 %v4828_v19  ;;  %5506 = vmatpush.msrb.mxu1 %v5036_v20  ;;  %v5053_v18 = vld [vmem:[#allocation19 + $0xb30] sm:$0xff]  ;;  %v4846_v19 = vld [vmem:[#allocation19 + $0x4b8] sm:$0xff] }
 0xc9b   :  { %5351 = vmatmul.f32.vlgmr.msra.gmra.mxu2 %v6789_v45  ;;  %5397 = vmatmul.f32.vlgmr.msra.gmra.mxu0 %v6789_v45  ;;  %v5054_v20 = vld [vmem:[#allocation19 + $0xb38] sm:$0xff] }
 0xc9c   :  { %5435 = vmatpush.msrb.mxu2 %v4811_v21  ;;  %5461 = vmatpush.msrb.mxu3 %v5019_v22  ;;  %v4829_v21 = vld [vmem:[#allocation19 + $0x430] sm:$0xff] }
 0xc9d   :  { %5481 = vmatpush.msrb.mxu0 %v4812_v23  ;;  %5507 = vmatpush.msrb.mxu1 %v5020_v24  ;;  %v5037_v22 = vld [vmem:[#allocation19 + $0xab0] sm:$0xff]  ;;  %v4830_v23 = vld [vmem:[#allocation19 + $0x438] sm:$0xff] }
 0xc9e   :  { %5377 = vmatmul.f32.gmra.mxu3 %v6791_v52  ;;  %5423 = vmatmul.f32.gmra.mxu1 %v6791_v52  ;;  %v5038_v24 = vld [vmem:[#allocation19 + $0xab8] sm:$0xff] }
 0xc9f   :  { %5436 = vmatpush.msrb.mxu2 %v4795_v25  ;;  %5462 = vmatpush.msrb.mxu3 %v5003_v26  ;;  %v4813_v25 = vld [vmem:[#allocation19 + $0x3b0] sm:$0xff] }
 0xca0   :  { %5482 = vmatpush.msrb.mxu0 %v4796_v27  ;;  %5508 = vmatpush.msrb.mxu1 %v5004_v28  ;;  %v5021_v26 = vld [vmem:[#allocation19 + $0xa30] sm:$0xff]  ;;  %v4814_v27 = vld [vmem:[#allocation19 + $0x3b8] sm:$0xff] }
 0xca1   :  { %5437 = vmatpush.msrb.mxu2 %v4779_v29  ;;  %5463 = vmatpush.msrb.mxu3 %v4987_v30  ;;  %v5022_v28 = vld [vmem:[#allocation19 + $0xa38] sm:$0xff]  ;;  %v4797_v29 = vld [vmem:[#allocation19 + $0x330] sm:$0xff] }
 0xca2   :  { %5483 = vmatpush.msrb.mxu0 %v4780_v32  ;;  %5509 = vmatpush.msrb.mxu1 %v4988_v33  ;;  %v5005_v30 = vld [vmem:[#allocation19 + $0x9b0] sm:$0xff]  ;;  %v4798_v32 = vld [vmem:[#allocation19 + $0x338] sm:$0xff] }
 0xca3   :  { %5438 = vmatpush.msrb.mxu2 %v4763_v34  ;;  %5464 = vmatpush.msrb.mxu3 %v4971_v35  ;;  %v5006_v33 = vld [vmem:[#allocation19 + $0x9b8] sm:$0xff]  ;;  %v4781_v34 = vld [vmem:[#allocation19 + $0x2b0] sm:$0xff] }
 0xca4   :  { %5484 = vmatpush.msrb.mxu0 %v4764_v36  ;;  %5510 = vmatpush.msrb.mxu1 %v4972_v37  ;;  %v4989_v35 = vld [vmem:[#allocation19 + $0x930] sm:$0xff]  ;;  %v4782_v36 = vld [vmem:[#allocation19 + $0x2b8] sm:$0xff] }
 0xca5   :  { %5354 = vmatmul.f32.gmra.mxu2 %v6797_v57  ;;  %5400 = vmatmul.f32.gmra.mxu0 %v6797_v57  ;;  %v4990_v37 = vld [vmem:[#allocation19 + $0x938] sm:$0xff] }
 0xca6   :  { %5439 = vmatpush.msrb.mxu2 %v4747_v38  ;;  %5465 = vmatpush.msrb.mxu3 %v4955_v39  ;;  %v4765_v38 = vld [vmem:[#allocation19 + $0x230] sm:$0xff] }
 0xca7   :  { %5485 = vmatpush.msrb.mxu0 %v4748_v40  ;;  %5511 = vmatpush.msrb.mxu1 %v4956_v41  ;;  %v4973_v39 = vld [vmem:[#allocation19 + $0x8b0] sm:$0xff]  ;;  %v4766_v40 = vld [vmem:[#allocation19 + $0x238] sm:$0xff] }
 0xca8   :  { %5542 = vmatpush.msra.mxu3 %v5197_v42  ;;  %5440 = vmatpush.msrb.mxu2 %v4731_v44  ;;  %v4974_v41 = vld [vmem:[#allocation19 + $0x8b8] sm:$0xff]  ;;  %v4749_v42 = vld [vmem:[#allocation19 + $0x1b0] sm:$0xff] }
 0xca9   :  { %5588 = vmatpush.msra.mxu1 %v5198_v43  ;;  %5466 = vmatmul.f32.vlgmr.msrb.gmra.mxu3 %v6785_v31  ;;  %v4957_v43 = vld [vmem:[#allocation19 + $0x830] sm:$0xff]  ;;  %v4750_v44 = vld [vmem:[#allocation19 + $0x1b8] sm:$0xff] }
 0xcaa   :  { %5486 = vmatpush.msrb.mxu0 %v4732_v46  ;;  %5512 = vmatmul.f32.vlgmr.msrb.gmra.mxu1 %v6785_v31  ;;  %v4958_v46 = vld [vmem:[#allocation19 + $0x838] sm:$0xff] }
 0xcab   :  { %5543 = vmatpush.msra.mxu3 %v5181_v47  ;;  %5589 = vmatpush.msra.mxu1 %v5182_v49  ;;  %v5199_v47 = vld [vmem:[#allocation19 + $0xfc0] sm:$0xff]  ;;  %v5200_v49 = vld [vmem:[#allocation19 + $0xfc8] sm:$0xff] }
 0xcac   :  { %5441 = vmatpush.msrb.mxu2 %v4715_v50  ;;  %5487 = vmatpush.msrb.mxu0 %v4716_v51  ;;  %v4733_v50 = vld [vmem:[#allocation19 + $0x130] sm:$0xff]  ;;  %v4734_v51 = vld [vmem:[#allocation19 + $0x138] sm:$0xff] }
 0xcad   :  { %5544 = vmatpush.msra.mxu3 %v5165_v53  ;;  %5590 = vmatpush.msra.mxu1 %v5166_v48  ;;  %v5183_v53 = vld [vmem:[#allocation19 + $0xf40] sm:$0xff]  ;;  %v5184_v48 = vld [vmem:[#allocation19 + $0xf48] sm:$0xff] }
 0xcae   :  { %5442 = vmatpush.msrb.mxu2 %v4699_v54  ;;  %5488 = vmatpush.msrb.mxu0 %v4700_v55  ;;  %v4717_v54 = vld [vmem:[#allocation19 + $0xb0] sm:$0xff]  ;;  %v4718_v55 = vld [vmem:[#allocation19 + $0xb8] sm:$0xff] }
 0xcaf   :  { %5545 = vmatpush.msra.mxu3 %v5149_v58  ;;  %5591 = vmatpush.msra.mxu1 %v5150_v60  ;;  %v5168_v58 = vld [vmem:[#allocation19 + $0xec8] sm:$0xff]  ;;  %v4702_v60 = vld [vmem:[#allocation19 + $0x38] sm:$0xff] }
 0xcb0   :  { %5519 = vmatpush.msra.mxu2 %v4941_v56  ;;  %5565 = vmatpush.msra.mxu0 %v4942_v59  ;;  %v5167_v56 = vld [vmem:[#allocation19 + $0xec0] sm:$0xff]  ;;  %v4701_v59 = vld [vmem:[#allocation19 + $0x30] sm:$0xff] }
 0xcb1   :  { %5443 = vmatmul.f32.vlgmr.msrb.gmra.mxu2 %v6789_v45  ;;  %5489 = vmatmul.f32.vlgmr.msrb.gmra.mxu0 %v6789_v45 }
 0xcb2   :  { %5520 = vmatpush.msra.mxu2 %v4925_v61  ;;  %5546 = vmatpush.msra.mxu3 %v5133_v62  ;;  %v4943_v61 = vld [vmem:[#allocation19 + $0x7c0] sm:$0xff] }
 0xcb3   :  { %5566 = vmatpush.msra.mxu0 %v4926_v63  ;;  %5592 = vmatpush.msra.mxu1 %v5134_v1  ;;  %v5151_v62 = vld [vmem:[#allocation19 + $0xe40] sm:$0xff]  ;;  %v4944_v63 = vld [vmem:[#allocation19 + $0x7c8] sm:$0xff] }
 0xcb4   :  { %5469 = vmatmul.f32.gmra.mxu3 %v6791_v52  ;;  %5515 = vmatmul.f32.gmra.mxu1 %v6791_v52  ;;  %v5152_v1 = vld [vmem:[#allocation19 + $0xe48] sm:$0xff] }
 0xcb5   :  { %5521 = vmatpush.msra.mxu2 %v4909_v2  ;;  %5547 = vmatpush.msra.mxu3 %v5117_v0  ;;  %v4927_v2 = vld [vmem:[#allocation19 + $0x740] sm:$0xff] }
 0xcb6   :  { %5567 = vmatpush.msra.mxu0 %v4910_v3  ;;  %5593 = vmatpush.msra.mxu1 %v5118_v4  ;;  %v5135_v0 = vld [vmem:[#allocation19 + $0xdc0] sm:$0xff]  ;;  %v4928_v3 = vld [vmem:[#allocation19 + $0x748] sm:$0xff] }
 0xcb7   :  { %5522 = vmatpush.msra.mxu2 %v4893_v5  ;;  %5548 = vmatpush.msra.mxu3 %v5101_v6  ;;  %v5136_v4 = vld [vmem:[#allocation19 + $0xdc8] sm:$0xff]  ;;  %v4911_v5 = vld [vmem:[#allocation19 + $0x6c0] sm:$0xff] }
 0xcb8   :  { %5568 = vmatpush.msra.mxu0 %v4894_v7  ;;  %5594 = vmatpush.msra.mxu1 %v5102_v8  ;;  %v5119_v6 = vld [vmem:[#allocation19 + $0xd40] sm:$0xff]  ;;  %v4912_v7 = vld [vmem:[#allocation19 + $0x6c8] sm:$0xff] }
 0xcb9   :  { %5523 = vmatpush.msra.mxu2 %v4877_v9  ;;  %5549 = vmatpush.msra.mxu3 %v5085_v10  ;;  %v5120_v8 = vld [vmem:[#allocation19 + $0xd48] sm:$0xff]  ;;  %v4895_v9 = vld [vmem:[#allocation19 + $0x640] sm:$0xff] }
 0xcba   :  { %5569 = vmatpush.msra.mxu0 %v4878_v11  ;;  %5595 = vmatpush.msra.mxu1 %v5086_v12  ;;  %v5103_v10 = vld [vmem:[#allocation19 + $0xcc0] sm:$0xff]  ;;  %v4896_v11 = vld [vmem:[#allocation19 + $0x648] sm:$0xff] }
 0xcbb   :  { %5446 = vmatmul.f32.gmra.mxu2 %v6797_v57  ;;  %5492 = vmatmul.f32.gmra.mxu0 %v6797_v57  ;;  %v5104_v12 = vld [vmem:[#allocation19 + $0xcc8] sm:$0xff] }
 0xcbc   :  { %5524 = vmatpush.msra.mxu2 %v4861_v13  ;;  %5550 = vmatpush.msra.mxu3 %v5069_v14  ;;  %v4879_v13 = vld [vmem:[#allocation19 + $0x5c0] sm:$0xff] }
 0xcbd   :  { %5570 = vmatpush.msra.mxu0 %v4862_v15  ;;  %5596 = vmatpush.msra.mxu1 %v5070_v16  ;;  %v5087_v14 = vld [vmem:[#allocation19 + $0xc40] sm:$0xff]  ;;  %v4880_v15 = vld [vmem:[#allocation19 + $0x5c8] sm:$0xff] }
 0xcbe   :  { %5525 = vmatpush.msra.mxu2 %v4845_v17  ;;  %5551 = vmatpush.msra.mxu3 %v5053_v18  ;;  %v5088_v16 = vld [vmem:[#allocation19 + $0xc48] sm:$0xff]  ;;  %v4863_v17 = vld [vmem:[#allocation19 + $0x540] sm:$0xff] }
 0xcbf   :  { %5571 = vmatpush.msra.mxu0 %v4846_v19  ;;  %5597 = vmatpush.msra.mxu1 %v5054_v20  ;;  %v5071_v18 = vld [vmem:[#allocation19 + $0xbc0] sm:$0xff]  ;;  %v4864_v19 = vld [vmem:[#allocation19 + $0x548] sm:$0xff] }
 0xcc0   :  { %5526 = vmatpush.msra.mxu2 %v4829_v21  ;;  %5552 = vmatpush.msra.mxu3 %v5037_v22  ;;  %v5072_v20 = vld [vmem:[#allocation19 + $0xbc8] sm:$0xff]  ;;  %v4847_v21 = vld [vmem:[#allocation19 + $0x4c0] sm:$0xff] }
 0xcc1   :  { %5572 = vmatpush.msra.mxu0 %v4830_v23  ;;  %5598 = vmatpush.msra.mxu1 %v5038_v24  ;;  %v5055_v22 = vld [vmem:[#allocation19 + $0xb40] sm:$0xff]  ;;  %v4848_v23 = vld [vmem:[#allocation19 + $0x4c8] sm:$0xff] }
 0xcc2   :  { %5527 = vmatpush.msra.mxu2 %v4813_v25  ;;  %5553 = vmatpush.msra.mxu3 %v5021_v26  ;;  %v5056_v24 = vld [vmem:[#allocation19 + $0xb48] sm:$0xff]  ;;  %v4831_v25 = vld [vmem:[#allocation19 + $0x440] sm:$0xff] }
 0xcc3   :  { %5573 = vmatpush.msra.mxu0 %v4814_v27  ;;  %5599 = vmatpush.msra.mxu1 %v5022_v28  ;;  %v5039_v26 = vld [vmem:[#allocation19 + $0xac0] sm:$0xff]  ;;  %v4832_v27 = vld [vmem:[#allocation19 + $0x448] sm:$0xff] }
 0xcc4   :  { %5528 = vmatpush.msra.mxu2 %v4797_v29  ;;  %5554 = vmatpush.msra.mxu3 %v5005_v30  ;;  %v5040_v28 = vld [vmem:[#allocation19 + $0xac8] sm:$0xff]  ;;  %v4815_v29 = vld [vmem:[#allocation19 + $0x3c0] sm:$0xff] }
 0xcc5   :  { %5574 = vmatpush.msra.mxu0 %v4798_v32  ;;  %5600 = vmatpush.msra.mxu1 %v5006_v33  ;;  %v5023_v30 = vld [vmem:[#allocation19 + $0xa40] sm:$0xff]  ;;  %v4816_v32 = vld [vmem:[#allocation19 + $0x3c8] sm:$0xff] }
 0xcc6   :  { %5529 = vmatpush.msra.mxu2 %v4781_v34  ;;  %5555 = vmatpush.msra.mxu3 %v4989_v35  ;;  %v5024_v33 = vld [vmem:[#allocation19 + $0xa48] sm:$0xff]  ;;  %v4799_v34 = vld [vmem:[#allocation19 + $0x340] sm:$0xff] }
 0xcc7   :  { %5575 = vmatpush.msra.mxu0 %v4782_v36  ;;  %5601 = vmatpush.msra.mxu1 %v4990_v37  ;;  %v5007_v35 = vld [vmem:[#allocation19 + $0x9c0] sm:$0xff]  ;;  %v4800_v36 = vld [vmem:[#allocation19 + $0x348] sm:$0xff] }
 0xcc8   :  { %5530 = vmatpush.msra.mxu2 %v4765_v38  ;;  %5556 = vmatpush.msra.mxu3 %v4973_v39  ;;  %v5008_v37 = vld [vmem:[#allocation19 + $0x9c8] sm:$0xff]  ;;  %v4783_v38 = vld [vmem:[#allocation19 + $0x2c0] sm:$0xff] }
 0xcc9   :  { %5576 = vmatpush.msra.mxu0 %v4766_v40  ;;  %5602 = vmatpush.msra.mxu1 %v4974_v41  ;;  %v4991_v39 = vld [vmem:[#allocation19 + $0x940] sm:$0xff]  ;;  %v4784_v40 = vld [vmem:[#allocation19 + $0x2c8] sm:$0xff] }
 0xcca   :  { %5531 = vmatpush.msra.mxu2 %v4749_v42  ;;  %5557 = vmatpush.msra.mxu3 %v4957_v43  ;;  %v4992_v41 = vld [vmem:[#allocation19 + $0x948] sm:$0xff]  ;;  %v4767_v42 = vld [vmem:[#allocation19 + $0x240] sm:$0xff] }
 0xccb   :  { %5577 = vmatpush.msra.mxu0 %v4750_v44  ;;  %5603 = vmatpush.msra.mxu1 %v4958_v46  ;;  %v4975_v43 = vld [vmem:[#allocation19 + $0x8c0] sm:$0xff]  ;;  %v4768_v44 = vld [vmem:[#allocation19 + $0x248] sm:$0xff] }
 0xccc   :  { %5558 = vmatmul.f32.vlgmr.msra.gmra.mxu3 %v6785_v31  ;;  %5604 = vmatmul.f32.vlgmr.msra.gmra.mxu1 %v6785_v31  ;;  %v4976_v46 = vld [vmem:[#allocation19 + $0x8c8] sm:$0xff] }
 0xccd   :  { %5634 = vmatpush.msrb.mxu3 %v5199_v47  ;;  %5680 = vmatpush.msrb.mxu1 %v5200_v49  ;;  %v4751_v47 = vld [vmem:[#allocation19 + $0x1c0] sm:$0xff] }
 0xcce   :  { %5532 = vmatpush.msra.mxu2 %v4733_v50  ;;  %5578 = vmatpush.msra.mxu0 %v4734_v51  ;;  %v4959_v49 = vld [vmem:[#allocation19 + $0x840] sm:$0xff]  ;;  %v4752_v50 = vld [vmem:[#allocation19 + $0x1c8] sm:$0xff] }
 0xccf   :  { %5635 = vmatpush.msrb.mxu3 %v5183_v53  ;;  %5681 = vmatpush.msrb.mxu1 %v5184_v48  ;;  %v4960_v51 = vld [vmem:[#allocation19 + $0x848] sm:$0xff]  ;;  %v5201_v53 = vld [vmem:[#allocation19 + $0xfd0] sm:$0xff]  ;;  %v5202_v48 = vld [vmem:[#allocation19 + $0xfd8] sm:$0xff] }
 0xcd0   :  { %5533 = vmatpush.msra.mxu2 %v4717_v54  ;;  %5579 = vmatpush.msra.mxu0 %v4718_v55  ;;  %v4735_v54 = vld [vmem:[#allocation19 + $0x140] sm:$0xff]  ;;  %v4736_v55 = vld [vmem:[#allocation19 + $0x148] sm:$0xff] }
 0xcd1   :  { %5636 = vmatpush.msrb.mxu3 %v5167_v56  ;;  %5682 = vmatpush.msrb.mxu1 %v5168_v58  ;;  %v5185_v56 = vld [vmem:[#allocation19 + $0xf50] sm:$0xff]  ;;  %v5186_v58 = vld [vmem:[#allocation19 + $0xf58] sm:$0xff] }
 0xcd2   :  { %5534 = vmatpush.msra.mxu2 %v4701_v59  ;;  %5580 = vmatpush.msra.mxu0 %v4702_v60  ;;  %v4719_v59 = vld [vmem:[#allocation19 + $0xc0] sm:$0xff]  ;;  %v4720_v60 = vld [vmem:[#allocation19 + $0xc8] sm:$0xff] }
 0xcd3   :  { %5535 = vmatmul.f32.vlgmr.msra.gmra.mxu2 %v6789_v45  ;;  %5581 = vmatmul.f32.vlgmr.msra.gmra.mxu0 %v6789_v45 }
 0xcd4   :  { %5611 = vmatpush.msrb.mxu2 %v4943_v61  ;;  %5637 = vmatpush.msrb.mxu3 %v5151_v62  ;;  %v5169_v61 = vld [vmem:[#allocation19 + $0xed0] sm:$0xff]  ;;  %v5170_v62 = vld [vmem:[#allocation19 + $0xed8] sm:$0xff] }
 0xcd5   :  { %5657 = vmatpush.msrb.mxu0 %v4944_v63  ;;  %5683 = vmatpush.msrb.mxu1 %v5152_v1  ;;  %v4703_v63 = vld [vmem:[#allocation19 + $0x40] sm:$0xff]  ;;  %v4704_v1 = vld [vmem:[#allocation19 + $0x48] sm:$0xff] }
 0xcd6   :  { %5561 = vmatmul.f32.gmra.mxu3 %v6791_v52  ;;  %5607 = vmatmul.f32.gmra.mxu1 %v6791_v52 }
 0xcd7   :  { %5612 = vmatpush.msrb.mxu2 %v4927_v2  ;;  %5638 = vmatpush.msrb.mxu3 %v5135_v0  ;;  %v4945_v2 = vld [vmem:[#allocation19 + $0x7d0] sm:$0xff] }
 0xcd8   :  { %5658 = vmatpush.msrb.mxu0 %v4928_v3  ;;  %5684 = vmatpush.msrb.mxu1 %v5136_v4  ;;  %v5153_v0 = vld [vmem:[#allocation19 + $0xe50] sm:$0xff]  ;;  %v4946_v3 = vld [vmem:[#allocation19 + $0x7d8] sm:$0xff] }
 0xcd9   :  { %5613 = vmatpush.msrb.mxu2 %v4911_v5  ;;  %5639 = vmatpush.msrb.mxu3 %v5119_v6  ;;  %v5154_v4 = vld [vmem:[#allocation19 + $0xe58] sm:$0xff]  ;;  %v4929_v5 = vld [vmem:[#allocation19 + $0x750] sm:$0xff] }
 0xcda   :  { %5659 = vmatpush.msrb.mxu0 %v4912_v7  ;;  %5685 = vmatpush.msrb.mxu1 %v5120_v8  ;;  %v5137_v6 = vld [vmem:[#allocation19 + $0xdd0] sm:$0xff]  ;;  %v4930_v7 = vld [vmem:[#allocation19 + $0x758] sm:$0xff] }
 0xcdb   :  { %5614 = vmatpush.msrb.mxu2 %v4895_v9  ;;  %5640 = vmatpush.msrb.mxu3 %v5103_v10  ;;  %v5138_v8 = vld [vmem:[#allocation19 + $0xdd8] sm:$0xff]  ;;  %v4913_v9 = vld [vmem:[#allocation19 + $0x6d0] sm:$0xff] }
 0xcdc   :  { %5660 = vmatpush.msrb.mxu0 %v4896_v11  ;;  %5686 = vmatpush.msrb.mxu1 %v5104_v12  ;;  %v5121_v10 = vld [vmem:[#allocation19 + $0xd50] sm:$0xff]  ;;  %v4914_v11 = vld [vmem:[#allocation19 + $0x6d8] sm:$0xff] }
 0xcdd   :  { %5538 = vmatmul.f32.gmra.mxu2 %v6797_v57  ;;  %5584 = vmatmul.f32.gmra.mxu0 %v6797_v57  ;;  %v5122_v12 = vld [vmem:[#allocation19 + $0xd58] sm:$0xff] }
 0xcde   :  { %5615 = vmatpush.msrb.mxu2 %v4879_v13  ;;  %5641 = vmatpush.msrb.mxu3 %v5087_v14  ;;  %v4897_v13 = vld [vmem:[#allocation19 + $0x650] sm:$0xff] }
 0xcdf   :  { %5661 = vmatpush.msrb.mxu0 %v4880_v15  ;;  %5687 = vmatpush.msrb.mxu1 %v5088_v16  ;;  %v5105_v14 = vld [vmem:[#allocation19 + $0xcd0] sm:$0xff]  ;;  %v4898_v15 = vld [vmem:[#allocation19 + $0x658] sm:$0xff] }
 0xce0   :  { %5616 = vmatpush.msrb.mxu2 %v4863_v17  ;;  %5642 = vmatpush.msrb.mxu3 %v5071_v18  ;;  %v5106_v16 = vld [vmem:[#allocation19 + $0xcd8] sm:$0xff]  ;;  %v6831_v17 = vld [vmem:[#allocation20] sm:$0xff]  ;;  %v4881_v18 = vld [vmem:[#allocation19 + $0x5d0] sm:$0xff] }
 0xce1   :  { %5662 = vmatpush.msrb.mxu0 %v4864_v19  ;;  %5688 = vmatpush.msrb.mxu1 %v5072_v20  ;;  %v5089_v19 = vld [vmem:[#allocation19 + $0xc50] sm:$0xff]  ;;  %v4882_v20 = vld [vmem:[#allocation19 + $0x5d8] sm:$0xff] }
 0xce2   :  { %5617 = vmatpush.msrb.mxu2 %v4847_v21  ;;  %5643 = vmatpush.msrb.mxu3 %v5055_v22  ;;  %v5090_v21 = vld [vmem:[#allocation19 + $0xc58] sm:$0xff]  ;;  %v4865_v22 = vld [vmem:[#allocation19 + $0x550] sm:$0xff] }
 0xce3   :  { %5663 = vmatpush.msrb.mxu0 %v4848_v23  ;;  %5689 = vmatpush.msrb.mxu1 %v5056_v24  ;;  %v5073_v23 = vld [vmem:[#allocation19 + $0xbd0] sm:$0xff]  ;;  %v5212_v24 = vperm.slane %v6831_v17, 1 }
 0xce4   :  { %5618 = vmatpush.msrb.mxu2 %v4831_v25  ;;  %5644 = vmatpush.msrb.mxu3 %v5039_v26  ;;  %v4866_v25 = vld [vmem:[#allocation19 + $0x558] sm:$0xff] }
 0xce5   :  { %5664 = vmatpush.msrb.mxu0 %v4832_v27  ;;  %5690 = vmatpush.msrb.mxu1 %v5040_v28  ;;  %v5074_v26 = vld [vmem:[#allocation19 + $0xbd8] sm:$0xff]  ;;  %v4849_v27 = vld [vmem:[#allocation19 + $0x4d0] sm:$0xff] }
 0xce6   :  { %5619 = vmatpush.msrb.mxu2 %v4815_v29  ;;  %5645 = vmatpush.msrb.mxu3 %v5023_v30  ;;  %v5057_v28 = vld [vmem:[#allocation19 + $0xb50] sm:$0xff]  ;;  %v4850_v29 = vld [vmem:[#allocation19 + $0x4d8] sm:$0xff] }
 0xce7   :  { %5665 = vmatpush.msrb.mxu0 %v4816_v32  ;;  %5691 = vmatpush.msrb.mxu1 %v5024_v33  ;;  %v5058_v30 = vld [vmem:[#allocation19 + $0xb58] sm:$0xff]  ;;  %v4833_v33 = vld [vmem:[#allocation19 + $0x450] sm:$0xff] }
 0xce8   :  { %5620 = vmatpush.msrb.mxu2 %v4799_v34  ;;  %5646 = vmatpush.msrb.mxu3 %v5007_v35  ;;  %v5041_v34 = vld [vmem:[#allocation19 + $0xad0] sm:$0xff] }
 0xce9   :  { %5666 = vmatpush.msrb.mxu0 %v4800_v36  ;;  %5692 = vmatpush.msrb.mxu1 %v5008_v37  ;;  %v4834_v36 = vld [vmem:[#allocation19 + $0x458] sm:$0xff] }
 0xcea   :  { %5621 = vmatpush.msrb.mxu2 %v4783_v38  ;;  %5647 = vmatpush.msrb.mxu3 %v4991_v39  ;;  %v5042_v37 = vld [vmem:[#allocation19 + $0xad8] sm:$0xff]  ;;  %v4817_v39 = vld [vmem:[#allocation19 + $0x3d0] sm:$0xff] }
 0xceb   :  { %5667 = vmatpush.msrb.mxu0 %v4784_v40  ;;  %5693 = vmatpush.msrb.mxu1 %v4992_v41  ;;  %v5025_v40 = vld [vmem:[#allocation19 + $0xa50] sm:$0xff] }
 0xcec   :  { %5622 = vmatpush.msrb.mxu2 %v4767_v42  ;;  %5648 = vmatpush.msrb.mxu3 %v4975_v43  ;;  %v5211_v42 = vperm.slane %v6831_v17, 0  ;;  %v4818_v43 = vld [vmem:[#allocation19 + $0x3d8] sm:$0xff] }
 0xced   :  { %5668 = vmatpush.msrb.mxu0 %v4768_v44  ;;  %5694 = vmatpush.msrb.mxu1 %v4976_v46  ;;  %v5026_v44 = vld [vmem:[#allocation19 + $0xa58] sm:$0xff]  ;;  %v4801_v46 = vld [vmem:[#allocation19 + $0x350] sm:$0xff] }
 0xcee   :  { %5623 = vmatpush.msrb.mxu2 %v4751_v47  ;;  %5649 = vmatpush.msrb.mxu3 %v4959_v49  ;;  %v5009_v47 = vld [vmem:[#allocation19 + $0x9d0] sm:$0xff] }
 0xcef   :  { %5669 = vmatpush.msrb.mxu0 %v4752_v50  ;;  %5695 = vmatpush.msrb.mxu1 %v4960_v51  ;;  %v4802_v50 = vld [vmem:[#allocation19 + $0x358] sm:$0xff] }
 0xcf0   :  { %5650 = vmatmul.f32.vlgmr.msrb.gmra.mxu3 %v6785_v31  ;;  %5696 = vmatmul.f32.vlgmr.msrb.gmra.mxu1 %v6785_v31  ;;  %v5010_v51 = vld [vmem:[#allocation19 + $0x9d8] sm:$0xff] }
 0xcf1   :  { %5726 = vmatpush.msra.mxu3 %v5201_v53  ;;  %5772 = vmatpush.msra.mxu1 %v5202_v48  ;;  %v4785_v48 = vld [vmem:[#allocation19 + $0x2d0] sm:$0xff] }
 0xcf2   :  { %5624 = vmatpush.msrb.mxu2 %v4735_v54  ;;  %5670 = vmatpush.msrb.mxu0 %v4736_v55  ;;  %v4993_v54 = vld [vmem:[#allocation19 + $0x950] sm:$0xff] }
 0xcf3   :  { %5727 = vmatpush.msra.mxu3 %v5185_v56  ;;  %5773 = vmatpush.msra.mxu1 %v5186_v58  ;;  %v4786_v56 = vld [vmem:[#allocation19 + $0x2d8] sm:$0xff] }
 0xcf4   :  { %5625 = vmatpush.msrb.mxu2 %v4719_v59  ;;  %5671 = vmatpush.msrb.mxu0 %v4720_v60  ;;  %v4994_v58 = vld [vmem:[#allocation19 + $0x958] sm:$0xff]  ;;  %v4769_v60 = vld [vmem:[#allocation19 + $0x250] sm:$0xff] }
 0xcf5   :  { %5728 = vmatpush.msra.mxu3 %v5169_v61  ;;  %5774 = vmatpush.msra.mxu1 %v5170_v62  ;;  %v4977_v61 = vld [vmem:[#allocation19 + $0x8d0] sm:$0xff] }
 0xcf6   :  { %5626 = vmatpush.msrb.mxu2 %v4703_v63  ;;  %5672 = vmatpush.msrb.mxu0 %v4704_v1  ;;  %v4770_v63 = vld [vmem:[#allocation19 + $0x258] sm:$0xff] }
 0xcf7   :  { %5627 = vmatmul.f32.vlgmr.msrb.gmra.mxu2 %v6789_v45  ;;  %5673 = vmatmul.f32.vlgmr.msrb.gmra.mxu0 %v6789_v45  ;;  %v4978_v1 = vld [vmem:[#allocation19 + $0x8d8] sm:$0xff] }
 0xcf8   :  { %5703 = vmatpush.msra.mxu2 %v4945_v2  ;;  %5729 = vmatpush.msra.mxu3 %v5153_v0  ;;  %v4753_v0 = vld [vmem:[#allocation19 + $0x1d0] sm:$0xff] }
 0xcf9   :  { %5749 = vmatpush.msra.mxu0 %v4946_v3  ;;  %5775 = vmatpush.msra.mxu1 %v5154_v4  ;;  %v4961_v3 = vld [vmem:[#allocation19 + $0x850] sm:$0xff] }
 0xcfa   :  { %5653 = vmatmul.f32.gmra.mxu3 %v6791_v52  ;;  %5699 = vmatmul.f32.gmra.mxu1 %v6791_v52 }
 0xcfb   :  { %5704 = vmatpush.msra.mxu2 %v4929_v5  ;;  %5730 = vmatpush.msra.mxu3 %v5137_v6  ;;  %v4754_v6 = vld [vmem:[#allocation19 + $0x1d8] sm:$0xff] }
 0xcfc   :  { %5750 = vmatpush.msra.mxu0 %v4930_v7  ;;  %5776 = vmatpush.msra.mxu1 %v5138_v8  ;;  %v4962_v7 = vld [vmem:[#allocation19 + $0x858] sm:$0xff] }
 0xcfd   :  { %5705 = vmatpush.msra.mxu2 %v4913_v9  ;;  %5731 = vmatpush.msra.mxu3 %v5121_v10  ;;  %v5203_v10 = vld [vmem:[#allocation19 + $0xfe0] sm:$0xff] }
 0xcfe   :  { %5751 = vmatpush.msra.mxu0 %v4914_v11  ;;  %5777 = vmatpush.msra.mxu1 %v5122_v12  ;;  %v5329_v38 = vpop.f32.mrf.mxu1  ;;  %v5204_v11 = vld [vmem:[#allocation19 + $0xfe8] sm:$0xff]  ;;  %v4737_v12 = vld [vmem:[#allocation19 + $0x150] sm:$0xff] }
 0xcff   :  { %5706 = vmatpush.msra.mxu2 %v4897_v13  ;;  %5732 = vmatpush.msra.mxu3 %v5105_v14  ;;  %v4738_v13 = vld [vmem:[#allocation19 + $0x158] sm:$0xff] }
 0xd00   :  { %5752 = vmatpush.msra.mxu0 %v4898_v15  ;;  %5778 = vmatpush.msra.mxu1 %v5106_v16  ;;  %v5187_v15 = vld [vmem:[#allocation19 + $0xf60] sm:$0xff]  ;;  %v5188_v16 = vld [vmem:[#allocation19 + $0xf68] sm:$0xff] }
 0xd01   :  { %5630 = vmatmul.f32.gmra.mxu2 %v6797_v57  ;;  %5676 = vmatmul.f32.gmra.mxu0 %v6797_v57 }
 0xd02   :  { %5707 = vmatpush.msra.mxu2 %v4881_v18  ;;  %5733 = vmatpush.msra.mxu3 %v5089_v19  ;;  %v4721_v19 = vld [vmem:[#allocation19 + $0xd0] sm:$0xff] }
 0xd03   :  { %5753 = vmatpush.msra.mxu0 %v4882_v20  ;;  %5779 = vmatpush.msra.mxu1 %v5090_v21  ;;  %v4722_v20 = vld [vmem:[#allocation19 + $0xd8] sm:$0xff] }
 0xd04   :  { %5708 = vmatpush.msra.mxu2 %v4865_v22  ;;  %5734 = vmatpush.msra.mxu3 %v5073_v23  ;;  %v5306_v32 = vpop.f32.mrf.mxu0  ;;  %v5283_v59 = vpop.f32.mrf.mxu3  ;;  %v5214_v22 = vperm.slane %v6831_v17, 3  ;;  %v5171_v23 = vld [vmem:[#allocation19 + $0xee0] sm:$0xff] }
 0xd05   :  { %5754 = vmatpush.msra.mxu0 %v4866_v25  ;;  %5780 = vmatpush.msra.mxu1 %v5074_v26  ;;  %v5307_v35 = vadd.f32 %v5306_v32, %v5212_v24  ;;  %v4705_v26 = vld [vmem:[#allocation19 + $0x50] sm:$0xff]  ;;  %v5155_v32 = vld [vmem:[#allocation19 + $0xe60] sm:$0xff] }
 0xd06   :  { %5709 = vmatpush.msra.mxu2 %v4849_v27  ;;  %5735 = vmatpush.msra.mxu3 %v5057_v28  ;;  %v4706_v27 = vld [vmem:[#allocation19 + $0x58] sm:$0xff] }
 0xd07   :  { %5755 = vmatpush.msra.mxu0 %v4850_v29  ;;  %5781 = vmatpush.msra.mxu1 %v5058_v30  ;;  %v5330_v41 = vadd.f32 %v5329_v38, %v5307_v35  ;;  %v5332_v8 = vpop.f32.mrf.mxu1  ;;  %v4947_v30 = vld [vmem:[#allocation19 + $0x7e0] sm:$0xff]  ;;  %v4948_v35 = vld [vmem:[#allocation19 + $0x7e8] sm:$0xff] }
 0xd08   :  { %5710 = vmatpush.msra.mxu2 %v4833_v33  ;;  %5736 = vmatpush.msra.mxu3 %v5041_v34 }
 0xd09   :  { %5756 = vmatpush.msra.mxu0 %v4834_v36  ;;  %5782 = vmatpush.msra.mxu1 %v5042_v37  ;;  %v5980_v49 = vmax.f32 %v5330_v41, 0.0  ;;  %v5156_v36 = vld [vmem:[#allocation19 + $0xe68] sm:$0xff]  ;;  %v5139_v41 = vld [vmem:[#allocation19 + $0xde0] sm:$0xff] }
 0xd0a   :  { %5711 = vmatpush.msra.mxu2 %v4817_v39  ;;  %5737 = vmatpush.msra.mxu3 %v5025_v40  ;;  %v5260_v53 = vpop.f32.mrf.mxu2  ;;  %v5213_v39 = vperm.slane %v6831_v17, 2  ;;  %v4931_v40 = vld [vmem:[#allocation19 + $0x760] sm:$0xff] }
 0xd0b   :  { %5757 = vmatpush.msra.mxu0 %v4818_v43  ;;  %5783 = vmatpush.msra.mxu1 %v5026_v44  ;;  %6012 = vst [vmem:[#allocation22 + $0x8] sm:$0xff] %v5980_v49  ;;  %v5261_v55 = vadd.f32 %v5260_v53, %v5211_v42  ;;  %v5140_v43 = vld [vmem:[#allocation19 + $0xde8] sm:$0xff] }
 0xd0c   :  { %5712 = vmatpush.msra.mxu2 %v4801_v46  ;;  %5738 = vmatpush.msra.mxu3 %v5009_v47  ;;  %v4915_v46 = vld [vmem:[#allocation19 + $0x6e0] sm:$0xff] }
 0xd0d   :  { %5758 = vmatpush.msra.mxu0 %v4802_v50  ;;  %5784 = vmatpush.msra.mxu1 %v5010_v51  ;;  %v5284_v62 = vadd.f32 %v5283_v59, %v5261_v55  ;;  %v5286_v25 = vpop.f32.mrf.mxu3  ;;  %v5123_v47 = vld [vmem:[#allocation19 + $0xd60] sm:$0xff]  ;;  %v4916_v50 = vld [vmem:[#allocation19 + $0x6e8] sm:$0xff] }
 0xd0e   :  { %5713 = vmatpush.msra.mxu2 %v4785_v48  ;;  %5739 = vmatpush.msra.mxu3 %v4993_v54  ;;  %v5309_v2 = vpop.f32.mrf.mxu0  ;;  %v5124_v51 = vld [vmem:[#allocation19 + $0xd68] sm:$0xff]  ;;  %v4899_v48 = vld [vmem:[#allocation19 + $0x660] sm:$0xff] }
 0xd0f   :  { %5759 = vmatpush.msra.mxu0 %v4786_v56  ;;  %5785 = vmatpush.msra.mxu1 %v4994_v58  ;;  %v5979_v4 = vmax.f32 %v5284_v62, 0.0  ;;  %v5310_v5 = vadd.f32 %v5309_v2, %v5212_v24  ;;  %v5172_v24 = vld [vmem:[#allocation19 + $0xee8] sm:$0xff]  ;;  %v5107_v54 = vld [vmem:[#allocation19 + $0xce0] sm:$0xff] }
 0xd10   :  { %5714 = vmatpush.msra.mxu2 %v4769_v60  ;;  %5740 = vmatpush.msra.mxu3 %v4977_v61  ;;  %v4900_v56 = vld [vmem:[#allocation19 + $0x668] sm:$0xff]  ;;  %v4883_v61 = vld [vmem:[#allocation19 + $0x5e0] sm:$0xff] }
 0xd11   :  { %5760 = vmatpush.msra.mxu0 %v4770_v63  ;;  %5786 = vmatpush.msra.mxu1 %v4978_v1  ;;  %6011 = vst [vmem:[#allocation22] sm:$0xff] %v5979_v4  ;;  %v5333_v9 = vadd.f32 %v5332_v8, %v5310_v5  ;;  %v5421_v37 = vpop.f32.mrf.mxu1  ;;  %v5108_v58 = vld [vmem:[#allocation19 + $0xce8] sm:$0xff]  ;;  %v5091_v62 = vld [vmem:[#allocation19 + $0xc60] sm:$0xff] }
 0xd12   :  { %5715 = vmatpush.msra.mxu2 %v4753_v0  ;;  %5741 = vmatpush.msra.mxu3 %v4961_v3  ;;  %v4884_v2 = vld [vmem:[#allocation19 + $0x5e8] sm:$0xff]  ;;  %v4867_v4 = vld [vmem:[#allocation19 + $0x560] sm:$0xff] }
 0xd13   :  { %5761 = vmatpush.msra.mxu0 %v4754_v6  ;;  %5787 = vmatpush.msra.mxu1 %v4962_v7  ;;  %v5996_v14 = vmax.f32 %v5333_v9, 0.0  ;;  %v5092_v0 = vld [vmem:[#allocation19 + $0xc68] sm:$0xff]  ;;  %v5075_v5 = vld [vmem:[#allocation19 + $0xbe0] sm:$0xff] }
 0xd14   :  { %5742 = vmatmul.f32.vlgmr.msra.gmra.mxu3 %v6785_v31  ;;  %5788 = vmatmul.f32.vlgmr.msra.gmra.mxu1 %v6785_v31  ;;  %v5263_v18 = vpop.f32.mrf.mxu2  ;;  %v4868_v7 = vld [vmem:[#allocation19 + $0x568] sm:$0xff]  ;;  %v4851_v9 = vld [vmem:[#allocation19 + $0x4e0] sm:$0xff] }
 0xd15   :  { %5818 = vmatpush.msrb.mxu3 %v5203_v10  ;;  %5864 = vmatpush.msrb.mxu1 %v5204_v11  ;;  %6028 = vst [vmem:[#allocation22 + $0x88] sm:$0xff] %v5996_v14  ;;  %v5264_v21 = vadd.f32 %v5263_v18, %v5211_v42  ;;  %v4932_v42 = vld [vmem:[#allocation19 + $0x768] sm:$0xff]  ;;  %v5059_v10 = vld [vmem:[#allocation19 + $0xb60] sm:$0xff] }
 0xd16   :  { %5716 = vmatpush.msra.mxu2 %v4737_v12  ;;  %5762 = vmatpush.msra.mxu0 %v4738_v13  ;;  %v5076_v8 = vld [vmem:[#allocation19 + $0xbe8] sm:$0xff] }
 0xd17   :  { %5819 = vmatpush.msrb.mxu3 %v5187_v15  ;;  %5865 = vmatpush.msrb.mxu1 %v5188_v16  ;;  %v5287_v28 = vadd.f32 %v5286_v25, %v5264_v21  ;;  %v5375_v55 = vpop.f32.mrf.mxu3  ;;  %v4852_v12 = vld [vmem:[#allocation19 + $0x4e8] sm:$0xff]  ;;  %v4835_v15 = vld [vmem:[#allocation19 + $0x460] sm:$0xff]  ;;  %v5216_v25 = vperm.slane %v6831_v17, 5 }
 0xd18   :  { %5717 = vmatpush.msra.mxu2 %v4721_v19  ;;  %5763 = vmatpush.msra.mxu0 %v4722_v20  ;;  %v5398_v29 = vpop.f32.mrf.mxu0  ;;  %v5060_v13 = vld [vmem:[#allocation19 + $0xb68] sm:$0xff]  ;;  %v5043_v16 = vld [vmem:[#allocation19 + $0xae0] sm:$0xff] }
 0xd19   :  { %5820 = vmatpush.msrb.mxu3 %v5171_v23  ;;  %5866 = vmatpush.msrb.mxu1 %v5172_v24  ;;  %v5995_v33 = vmax.f32 %v5287_v28, 0.0  ;;  %v5399_v34 = vadd.f32 %v5398_v29, %v5214_v22  ;;  %v4836_v19 = vld [vmem:[#allocation19 + $0x468] sm:$0xff]  ;;  %v5027_v23 = vld [vmem:[#allocation19 + $0xa60] sm:$0xff] }
 0xd1a   :  { %5718 = vmatpush.msra.mxu2 %v4705_v26  ;;  %5764 = vmatpush.msra.mxu0 %v4706_v27  ;;  %v5044_v20 = vld [vmem:[#allocation19 + $0xae8] sm:$0xff]  ;;  %v4803_v28 = vld [vmem:[#allocation19 + $0x360] sm:$0xff] }
 0xd1b   :  { %5719 = vmatmul.f32.vlgmr.msra.gmra.mxu2 %v6789_v45  ;;  %5765 = vmatmul.f32.vlgmr.msra.gmra.mxu0 %v6789_v45  ;;  %6027 = vst [vmem:[#allocation22 + $0x80] sm:$0xff] %v5995_v33  ;;  %v5422_v38 = vadd.f32 %v5421_v37, %v5399_v34  ;;  %v5424_v3 = vpop.f32.mrf.mxu1  ;;  %v4820_v26 = vld [vmem:[#allocation19 + $0x3e8] sm:$0xff]  ;;  %v5011_v29 = vld [vmem:[#allocation19 + $0x9e0] sm:$0xff] }
 0xd1c   :  { %5795 = vmatpush.msrb.mxu2 %v4947_v30  ;;  %5821 = vmatpush.msrb.mxu3 %v5155_v32  ;;  %v5028_v27 = vld [vmem:[#allocation19 + $0xa68] sm:$0xff] }
 0xd1d   :  { %5841 = vmatpush.msrb.mxu0 %v4948_v35  ;;  %5867 = vmatpush.msrb.mxu1 %v5156_v36  ;;  %v5982_v44 = vmax.f32 %v5422_v38, 0.0  ;;  %v4804_v32 = vld [vmem:[#allocation19 + $0x368] sm:$0xff]  ;;  %v4787_v35 = vld [vmem:[#allocation19 + $0x2e0] sm:$0xff] }
 0xd1e   :  { %5745 = vmatmul.f32.gmra.mxu3 %v6791_v52  ;;  %5791 = vmatmul.f32.gmra.mxu1 %v6791_v52  ;;  %v5352_v49 = vpop.f32.mrf.mxu2  ;;  %v5012_v33 = vld [vmem:[#allocation19 + $0x9e8] sm:$0xff]  ;;  %v4995_v36 = vld [vmem:[#allocation19 + $0x960] sm:$0xff] }
 0xd1f   :  { %5796 = vmatpush.msrb.mxu2 %v4931_v40  ;;  %5822 = vmatpush.msrb.mxu3 %v5139_v41  ;;  %6014 = vst [vmem:[#allocation22 + $0x18] sm:$0xff] %v5982_v44  ;;  %v5353_v53 = vadd.f32 %v5352_v49, %v5213_v39  ;;  %v4788_v38 = vld [vmem:[#allocation19 + $0x2e8] sm:$0xff]  ;;  %v4771_v41 = vld [vmem:[#allocation19 + $0x260] sm:$0xff]  ;;  %v5215_v44 = vperm.slane %v6831_v17, 4 }
 0xd20   :  { %5842 = vmatpush.msrb.mxu0 %v4932_v42  ;;  %5868 = vmatpush.msrb.mxu1 %v5140_v43  ;;  %v4979_v42 = vld [vmem:[#allocation19 + $0x8e0] sm:$0xff] }
 0xd21   :  { %5797 = vmatpush.msrb.mxu2 %v4915_v46  ;;  %5823 = vmatpush.msrb.mxu3 %v5123_v47  ;;  %v5376_v59 = vadd.f32 %v5375_v55, %v5353_v53  ;;  %v5378_v21 = vpop.f32.mrf.mxu3  ;;  %v4772_v46 = vld [vmem:[#allocation19 + $0x268] sm:$0xff]  ;;  %v4755_v49 = vld [vmem:[#allocation19 + $0x1e0] sm:$0xff] }
 0xd22   :  { %5843 = vmatpush.msrb.mxu0 %v4916_v50  ;;  %5869 = vmatpush.msrb.mxu1 %v5124_v51  ;;  %v5401_v60 = vpop.f32.mrf.mxu0  ;;  %v4980_v47 = vld [vmem:[#allocation19 + $0x8e8] sm:$0xff]  ;;  %v4963_v50 = vld [vmem:[#allocation19 + $0x860] sm:$0xff] }
 0xd23   :  { %5798 = vmatpush.msrb.mxu2 %v4899_v48  ;;  %5824 = vmatpush.msrb.mxu3 %v5107_v54  ;;  %v5981_v63 = vmax.f32 %v5376_v59, 0.0  ;;  %v5402_v1 = vadd.f32 %v5401_v60, %v5214_v22  ;;  %v4819_v22 = vld [vmem:[#allocation19 + $0x3e0] sm:$0xff]  ;;  %v4756_v53 = vld [vmem:[#allocation19 + $0x1e8] sm:$0xff] }
 0xd24   :  { %5844 = vmatpush.msrb.mxu0 %v4900_v56  ;;  %5870 = vmatpush.msrb.mxu1 %v5108_v58  ;;  %v4964_v48 = vld [vmem:[#allocation19 + $0x868] sm:$0xff]  ;;  %v5205_v56 = vld [vmem:[#allocation19 + $0xff0] sm:$0xff]  ;;  %v5206_v58 = vld [vmem:[#allocation19 + $0xff8] sm:$0xff] }
 0xd25   :  { %5722 = vmatmul.f32.gmra.mxu2 %v6797_v57  ;;  %5768 = vmatmul.f32.gmra.mxu0 %v6797_v57  ;;  %6013 = vst [vmem:[#allocation22 + $0x10] sm:$0xff] %v5981_v63  ;;  %v5425_v6 = vadd.f32 %v5424_v3, %v5402_v1  ;;  %v4739_v60 = vld [vmem:[#allocation19 + $0x160] sm:$0xff]  ;;  %v5189_v63 = vld [vmem:[#allocation19 + $0xf70] sm:$0xff]  ;;  %v5190_v1 = vld [vmem:[#allocation19 + $0xf78] sm:$0xff] }
 0xd26   :  { %5799 = vmatpush.msrb.mxu2 %v4883_v61  ;;  %5825 = vmatpush.msrb.mxu3 %v5091_v62  ;;  %v4740_v61 = vld [vmem:[#allocation19 + $0x168] sm:$0xff] }
 0xd27   :  { %5845 = vmatpush.msrb.mxu0 %v4884_v2  ;;  %5871 = vmatpush.msrb.mxu1 %v5092_v0  ;;  %v5998_v11 = vmax.f32 %v5425_v6, 0.0  ;;  %v5513_v40 = vpop.f32.mrf.mxu1  ;;  %v4723_v0 = vld [vmem:[#allocation19 + $0xe0] sm:$0xff]  ;;  %v4724_v3 = vld [vmem:[#allocation19 + $0xe8] sm:$0xff]  ;;  %v5173_v6 = vld [vmem:[#allocation19 + $0xef0] sm:$0xff] }
 0xd28   :  { %5800 = vmatpush.msrb.mxu2 %v4867_v4  ;;  %5826 = vmatpush.msrb.mxu3 %v5075_v5  ;;  %v5355_v14 = vpop.f32.mrf.mxu2 }
 0xd29   :  { %5846 = vmatpush.msrb.mxu0 %v4868_v7  ;;  %5872 = vmatpush.msrb.mxu1 %v5076_v8  ;;  %6030 = vst [vmem:[#allocation22 + $0x98] sm:$0xff] %v5998_v11  ;;  %v5356_v18 = vadd.f32 %v5355_v14, %v5213_v39  ;;  %v4996_v39 = vld [vmem:[#allocation19 + $0x968] sm:$0xff]  ;;  %v5174_v7 = vld [vmem:[#allocation19 + $0xef8] sm:$0xff] }
 0xd2a   :  { %5801 = vmatpush.msrb.mxu2 %v4851_v9  ;;  %5827 = vmatpush.msrb.mxu3 %v5059_v10  ;;  %v4707_v9 = vld [vmem:[#allocation19 + $0x60] sm:$0xff]  ;;  %v4708_v10 = vld [vmem:[#allocation19 + $0x68] sm:$0xff] }
 0xd2b   :  { %5847 = vmatpush.msrb.mxu0 %v4852_v12  ;;  %5873 = vmatpush.msrb.mxu1 %v5060_v13  ;;  %v5379_v24 = vadd.f32 %v5378_v21, %v5356_v18  ;;  %v4949_v12 = vld [vmem:[#allocation19 + $0x7f0] sm:$0xff] }
 0xd2c   :  { %5802 = vmatpush.msrb.mxu2 %v4835_v15  ;;  %5828 = vmatpush.msrb.mxu3 %v5043_v16  ;;  %v5467_v59 = vpop.f32.mrf.mxu3  ;;  %v5157_v13 = vld [vmem:[#allocation19 + $0xe70] sm:$0xff]  ;;  %v4950_v15 = vld [vmem:[#allocation19 + $0x7f8] sm:$0xff] }
 0xd2d   :  { %5848 = vmatpush.msrb.mxu0 %v4836_v19  ;;  %5874 = vmatpush.msrb.mxu1 %v5044_v20  ;;  %v5997_v30 = vmax.f32 %v5379_v24, 0.0  ;;  %v5158_v16 = vld [vmem:[#allocation19 + $0xe78] sm:$0xff]  ;;  %v4933_v20 = vld [vmem:[#allocation19 + $0x770] sm:$0xff] }
 0xd2e   :  { %5803 = vmatpush.msrb.mxu2 %v4819_v22  ;;  %5829 = vmatpush.msrb.mxu3 %v5027_v23  ;;  %v5490_v34 = vpop.f32.mrf.mxu0  ;;  %v5141_v21 = vld [vmem:[#allocation19 + $0xdf0] sm:$0xff]  ;;  %v4934_v23 = vld [vmem:[#allocation19 + $0x778] sm:$0xff] }
 0xd2f   :  { %5849 = vmatpush.msrb.mxu0 %v4820_v26  ;;  %5875 = vmatpush.msrb.mxu1 %v5028_v27  ;;  %6029 = vst [vmem:[#allocation22 + $0x90] sm:$0xff] %v5997_v30  ;;  %v5491_v37 = vadd.f32 %v5490_v34, %v5216_v25  ;;  %v5142_v24 = vld [vmem:[#allocation19 + $0xdf8] sm:$0xff]  ;;  %v4917_v26 = vld [vmem:[#allocation19 + $0x6f0] sm:$0xff] }
 0xd30   :  { %5804 = vmatpush.msrb.mxu2 %v4803_v28  ;;  %5830 = vmatpush.msrb.mxu3 %v5011_v29  ;;  %v5125_v27 = vld [vmem:[#allocation19 + $0xd70] sm:$0xff]  ;;  %v4918_v28 = vld [vmem:[#allocation19 + $0x6f8] sm:$0xff] }
 0xd31   :  { %5850 = vmatpush.msrb.mxu0 %v4804_v32  ;;  %5876 = vmatpush.msrb.mxu1 %v5012_v33  ;;  %v5514_v43 = vadd.f32 %v5513_v40, %v5491_v37  ;;  %v5516_v8 = vpop.f32.mrf.mxu1  ;;  %v5126_v29 = vld [vmem:[#allocation19 + $0xd78] sm:$0xff]  ;;  %v4901_v32 = vld [vmem:[#allocation19 + $0x670] sm:$0xff] }
 0xd32   :  { %5805 = vmatpush.msrb.mxu2 %v4787_v35  ;;  %5831 = vmatpush.msrb.mxu3 %v4995_v36  ;;  %v5109_v33 = vld [vmem:[#allocation19 + $0xcf0] sm:$0xff]  ;;  %v4902_v34 = vld [vmem:[#allocation19 + $0x678] sm:$0xff] }
 0xd33   :  { %5851 = vmatpush.msrb.mxu0 %v4788_v38  ;;  %5877 = vmatpush.msrb.mxu1 %v4996_v39  ;;  %v5984_v51 = vmax.f32 %v5514_v43, 0.0  ;;  %v5110_v35 = vld [vmem:[#allocation19 + $0xcf8] sm:$0xff]  ;;  %v4885_v36 = vld [vmem:[#allocation19 + $0x5f0] sm:$0xff] }
 0xd34   :  { %5806 = vmatpush.msrb.mxu2 %v4771_v41  ;;  %5832 = vmatpush.msrb.mxu3 %v4979_v42  ;;  %v5444_v54 = vpop.f32.mrf.mxu2  ;;  %v5093_v37 = vld [vmem:[#allocation19 + $0xc70] sm:$0xff]  ;;  %v4886_v38 = vld [vmem:[#allocation19 + $0x5f8] sm:$0xff] }
 0xd35   :  { %5852 = vmatpush.msrb.mxu0 %v4772_v46  ;;  %5878 = vmatpush.msrb.mxu1 %v4980_v47  ;;  %6016 = vst [vmem:[#allocation22 + $0x28] sm:$0xff] %v5984_v51  ;;  %v5445_v55 = vadd.f32 %v5444_v54, %v5215_v44  ;;  %v5094_v39 = vld [vmem:[#allocation19 + $0xc78] sm:$0xff]  ;;  %v4869_v40 = vld [vmem:[#allocation19 + $0x570] sm:$0xff] }
 0xd36   :  { %5807 = vmatpush.msrb.mxu2 %v4755_v49  ;;  %5833 = vmatpush.msrb.mxu3 %v4963_v50  ;;  %v5077_v41 = vld [vmem:[#allocation19 + $0xbf0] sm:$0xff]  ;;  %v4870_v42 = vld [vmem:[#allocation19 + $0x578] sm:$0xff] }
 0xd37   :  { %5853 = vmatpush.msrb.mxu0 %v4756_v53  ;;  %5879 = vmatpush.msrb.mxu1 %v4964_v48  ;;  %v5468_v62 = vadd.f32 %v5467_v59, %v5445_v55  ;;  %v5470_v22 = vpop.f32.mrf.mxu3  ;;  %v5078_v43 = vld [vmem:[#allocation19 + $0xbf8] sm:$0xff]  ;;  %v5061_v46 = vld [vmem:[#allocation19 + $0xb70] sm:$0xff]  ;;  %v5218_v53 = vperm.slane %v6831_v17, 7 }
 0xd38   :  { %5834 = vmatmul.f32.vlgmr.msrb.gmra.mxu3 %v6785_v31  ;;  %5880 = vmatmul.f32.vlgmr.msrb.gmra.mxu1 %v6785_v31  ;;  %v5493_v2 = vpop.f32.mrf.mxu0  ;;  %v4854_v47 = vld [vmem:[#allocation19 + $0x4f8] sm:$0xff]  ;;  %v4837_v50 = vld [vmem:[#allocation19 + $0x470] sm:$0xff] }
 0xd39   :  { %5910 = vmatpush.msra.mxu3 %v5205_v56  ;;  %5956 = vmatpush.msra.mxu1 %v5206_v58  ;;  %v5983_v4 = vmax.f32 %v5468_v62, 0.0  ;;  %v5494_v5 = vadd.f32 %v5493_v2, %v5216_v25  ;;  %v5062_v49 = vld [vmem:[#allocation19 + $0xb78] sm:$0xff]  ;;  %v5045_v51 = vld [vmem:[#allocation19 + $0xaf0] sm:$0xff] }
 0xd3a   :  { %5808 = vmatpush.msrb.mxu2 %v4739_v60  ;;  %5854 = vmatpush.msrb.mxu0 %v4740_v61  ;;  %v4838_v48 = vld [vmem:[#allocation19 + $0x478] sm:$0xff]  ;;  %v4821_v55 = vld [vmem:[#allocation19 + $0x3f0] sm:$0xff] }
 0xd3b   :  { %5911 = vmatpush.msra.mxu3 %v5189_v63  ;;  %5957 = vmatpush.msra.mxu1 %v5190_v1  ;;  %6015 = vst [vmem:[#allocation22 + $0x20] sm:$0xff] %v5983_v4  ;;  %v5517_v11 = vadd.f32 %v5516_v8, %v5494_v5  ;;  %v5046_v54 = vld [vmem:[#allocation19 + $0xaf8] sm:$0xff]  ;;  %v5029_v56 = vld [vmem:[#allocation19 + $0xa70] sm:$0xff] }
 0xd3c   :  { %5809 = vmatpush.msrb.mxu2 %v4723_v0  ;;  %5855 = vmatpush.msrb.mxu0 %v4724_v3  ;;  %v4822_v58 = vld [vmem:[#allocation19 + $0x3f8] sm:$0xff]  ;;  %v4805_v61 = vld [vmem:[#allocation19 + $0x370] sm:$0xff] }
 0xd3d   :  { %5912 = vmatpush.msra.mxu3 %v5173_v6  ;;  %5958 = vmatpush.msra.mxu1 %v5174_v7  ;;  %v6000_v14 = vmax.f32 %v5517_v11, 0.0  ;;  %v5030_v59 = vld [vmem:[#allocation19 + $0xa78] sm:$0xff]  ;;  %v5013_v62 = vld [vmem:[#allocation19 + $0x9f0] sm:$0xff]  ;;  %v5217_v6 = vperm.slane %v6831_v17, 6 }
 0xd3e   :  { %5810 = vmatpush.msrb.mxu2 %v4707_v9  ;;  %5856 = vmatpush.msrb.mxu0 %v4708_v10  ;;  %v5447_v18 = vpop.f32.mrf.mxu2  ;;  %v4806_v1 = vld [vmem:[#allocation19 + $0x378] sm:$0xff]  ;;  %v4789_v3 = vld [vmem:[#allocation19 + $0x2f0] sm:$0xff] }
 0xd3f   :  { %5811 = vmatmul.f32.vlgmr.msrb.gmra.mxu2 %v6789_v45  ;;  %5857 = vmatmul.f32.vlgmr.msrb.gmra.mxu0 %v6789_v45  ;;  %6032 = vst [vmem:[#allocation22 + $0xa8] sm:$0xff] %v6000_v14  ;;  %v5448_v19 = vadd.f32 %v5447_v18, %v5215_v44  ;;  %v4853_v44 = vld [vmem:[#allocation19 + $0x4f0] sm:$0xff]  ;;  %v5014_v2 = vld [vmem:[#allocation19 + $0x9f8] sm:$0xff] }
 0xd40   :  { %5887 = vmatpush.msra.mxu2 %v4949_v12  ;;  %5913 = vmatpush.msra.mxu3 %v5157_v13  ;;  %v4997_v4 = vld [vmem:[#allocation19 + $0x970] sm:$0xff]  ;;  %v4790_v7 = vld [vmem:[#allocation19 + $0x2f8] sm:$0xff] }
 0xd41   :  { %5933 = vmatpush.msra.mxu0 %v4950_v15  ;;  %5959 = vmatpush.msra.mxu1 %v5158_v16  ;;  %v5471_v25 = vadd.f32 %v5470_v22, %v5448_v19  ;;  %v4998_v8 = vld [vmem:[#allocation19 + $0x978] sm:$0xff]  ;;  %v4773_v9 = vld [vmem:[#allocation19 + $0x270] sm:$0xff] }
 0xd42   :  { %5837 = vmatmul.f32.gmra.mxu3 %v6791_v52  ;;  %5883 = vmatmul.f32.gmra.mxu1 %v6791_v52  ;;  %v4981_v10 = vld [vmem:[#allocation19 + $0x8f0] sm:$0xff]  ;;  %v4774_v12 = vld [vmem:[#allocation19 + $0x278] sm:$0xff] }
 0xd43   :  { %5888 = vmatpush.msra.mxu2 %v4933_v20  ;;  %5914 = vmatpush.msra.mxu3 %v5141_v21  ;;  %v5999_v30 = vmax.f32 %v5471_v25, 0.0  ;;  %v4982_v13 = vld [vmem:[#allocation19 + $0x8f8] sm:$0xff]  ;;  %v4757_v15 = vld [vmem:[#allocation19 + $0x1f0] sm:$0xff] }
 0xd44   :  { %5934 = vmatpush.msra.mxu0 %v4934_v23  ;;  %5960 = vmatpush.msra.mxu1 %v5142_v24  ;;  %v4965_v16 = vld [vmem:[#allocation19 + $0x870] sm:$0xff]  ;;  %v4758_v19 = vld [vmem:[#allocation19 + $0x1f8] sm:$0xff] }
 0xd45   :  { %5889 = vmatpush.msra.mxu2 %v4917_v26  ;;  %5915 = vmatpush.msra.mxu3 %v5125_v27  ;;  %6031 = vst [vmem:[#allocation22 + $0xa0] sm:$0xff] %v5999_v30  ;;  %v4966_v20 = vld [vmem:[#allocation19 + $0x878] sm:$0xff]  ;;  %v4741_v23 = vld [vmem:[#allocation19 + $0x170] sm:$0xff] }
 0xd46   :  { %5935 = vmatpush.msra.mxu0 %v4918_v28  ;;  %5961 = vmatpush.msra.mxu1 %v5126_v29  ;;  %v4742_v24 = vld [vmem:[#allocation19 + $0x178] sm:$0xff]  ;;  %v4725_v28 = vld [vmem:[#allocation19 + $0xf0] sm:$0xff] }
 0xd47   :  { %5890 = vmatpush.msra.mxu2 %v4901_v32  ;;  %5916 = vmatpush.msra.mxu3 %v5109_v33  ;;  %v4726_v29 = vld [vmem:[#allocation19 + $0xf8] sm:$0xff]  ;;  %v4709_v33 = vld [vmem:[#allocation19 + $0x70] sm:$0xff] }
 0xd48   :  { %5936 = vmatpush.msra.mxu0 %v4902_v34  ;;  %5962 = vmatpush.msra.mxu1 %v5110_v35  ;;  %v4710_v34 = vld [vmem:[#allocation19 + $0x78] sm:$0xff] }
 0xd49   :  { %5814 = vmatmul.f32.gmra.mxu2 %v6797_v57  ;;  %5860 = vmatmul.f32.gmra.mxu0 %v6797_v57  ;;  %v5605_v0 = vpop.f32.mrf.mxu1 }
 0xd4a   :  { %5891 = vmatpush.msra.mxu2 %v4885_v36  ;;  %5917 = vmatpush.msra.mxu3 %v5093_v37 }
 0xd4b   :  { %5937 = vmatpush.msra.mxu0 %v4886_v38  ;;  %5963 = vmatpush.msra.mxu1 %v5094_v39  ;;  %v6895_v39 = vld [vmem:[#allocation20 + $0x8] sm:$0xff] }
 0xd4c   :  { %5892 = vmatpush.msra.mxu2 %v4869_v40  ;;  %5918 = vmatpush.msra.mxu3 %v5077_v41  ;;  %v5220_v40 = vperm.slane %v6895_v39, 1 }
 0xd4d   :  { %5938 = vmatpush.msra.mxu0 %v4870_v42  ;;  %5964 = vmatpush.msra.mxu1 %v5078_v43 }
 0xd4e   :  { %5893 = vmatpush.msra.mxu2 %v4853_v44  ;;  %5919 = vmatpush.msra.mxu3 %v5061_v46  ;;  %v5219_v44 = vperm.slane %v6895_v39, 0 }
 0xd4f   :  { %5939 = vmatpush.msra.mxu0 %v4854_v47  ;;  %5965 = vmatpush.msra.mxu1 %v5062_v49  ;;  %v5559_v21 = vpop.f32.mrf.mxu3 }
 0xd50   :  { %5894 = vmatpush.msra.mxu2 %v4837_v50  ;;  %5920 = vmatpush.msra.mxu3 %v5045_v51  ;;  %v5582_v60 = vpop.f32.mrf.mxu0 }
 0xd51   :  { %5940 = vmatpush.msra.mxu0 %v4838_v48  ;;  %5966 = vmatpush.msra.mxu1 %v5046_v54  ;;  %v5583_v63 = vadd.f32 %v5582_v60, %v5218_v53 }
 0xd52   :  { %5895 = vmatpush.msra.mxu2 %v4821_v55  ;;  %5921 = vmatpush.msra.mxu3 %v5029_v56 }
 0xd53   :  { %5941 = vmatpush.msra.mxu0 %v4822_v58  ;;  %5967 = vmatpush.msra.mxu1 %v5030_v59  ;;  %v5606_v5 = vadd.f32 %v5605_v0, %v5583_v63  ;;  %v5608_v30 = vpop.f32.mrf.mxu1 }
 0xd54   :  { %5896 = vmatpush.msra.mxu2 %v4805_v61  ;;  %5922 = vmatpush.msra.mxu3 %v5013_v62  ;;  %v5222_v62 = vperm.slane %v6895_v39, 3 }
 0xd55   :  { %5942 = vmatpush.msra.mxu0 %v4806_v1  ;;  %5968 = vmatpush.msra.mxu1 %v5014_v2  ;;  %v5986_v11 = vmax.f32 %v5606_v5, 0.0 }
 0xd56   :  { %5897 = vmatpush.msra.mxu2 %v4789_v3  ;;  %5923 = vmatpush.msra.mxu3 %v4997_v4  ;;  %v5536_v14 = vpop.f32.mrf.mxu2  ;;  %v5221_v3 = vperm.slane %v6895_v39, 2 }
 0xd57   :  { %5943 = vmatpush.msra.mxu0 %v4790_v7  ;;  %5969 = vmatpush.msra.mxu1 %v4998_v8  ;;  %6018 = vst [vmem:[#allocation22 + $0x38] sm:$0xff] %v5986_v11  ;;  %v5537_v18 = vadd.f32 %v5536_v14, %v5217_v6 }
 0xd58   :  { %5898 = vmatpush.msra.mxu2 %v4773_v9  ;;  %5924 = vmatpush.msra.mxu3 %v4981_v10 }
 0xd59   :  { %5944 = vmatpush.msra.mxu0 %v4774_v12  ;;  %5970 = vmatpush.msra.mxu1 %v4982_v13  ;;  %v5560_v22 = vadd.f32 %v5559_v21, %v5537_v18  ;;  %v5224_v21 = vperm.slane %v6895_v39, 5 }
 0xd5a   :  { %5899 = vmatpush.msra.mxu2 %v4757_v15  ;;  %5925 = vmatpush.msra.mxu3 %v4965_v16  ;;  %v5585_v25 = vpop.f32.mrf.mxu0 }
 0xd5b   :  { %5945 = vmatpush.msra.mxu0 %v4758_v19  ;;  %5971 = vmatpush.msra.mxu1 %v4966_v20  ;;  %v5985_v26 = vmax.f32 %v5560_v22, 0.0  ;;  %v5586_v27 = vadd.f32 %v5585_v25, %v5218_v53 }
 0xd5c   :  { %5926 = vmatmul.f32.vlgmr.msra.gmra.mxu3 %v6785_v31  ;;  %5972 = vmatmul.f32.vlgmr.msra.gmra.mxu1 %v6785_v31  ;;  %v5562_v31 = vpop.f32.mrf.mxu3 }
 0xd5d   :  { %5900 = vmatpush.msra.mxu2 %v4741_v23  ;;  %5946 = vmatpush.msra.mxu0 %v4742_v24  ;;  %6017 = vst [vmem:[#allocation22 + $0x30] sm:$0xff] %v5985_v26  ;;  %v5609_v32 = vadd.f32 %v5608_v30, %v5586_v27  ;;  %v5223_v26 = vperm.slane %v6895_v39, 4 }
 0xd5f   :  { %5901 = vmatpush.msra.mxu2 %v4725_v28  ;;  %5947 = vmatpush.msra.mxu0 %v4726_v29  ;;  %v6002_v35 = vmax.f32 %v5609_v32, 0.0 }
 0xd60   :  { %v5539_v36 = vpop.f32.mrf.mxu2 }
 0xd61   :  { %5902 = vmatpush.msra.mxu2 %v4709_v33  ;;  %5948 = vmatpush.msra.mxu0 %v4710_v34  ;;  %6034 = vst [vmem:[#allocation22 + $0xb8] sm:$0xff] %v6002_v35  ;;  %v5540_v17 = vadd.f32 %v5539_v36, %v5217_v6 }
 0xd62   :  { %5903 = vmatmul.f32.vlgmr.msra.gmra.mxu2 %v6789_v45  ;;  %5949 = vmatmul.f32.vlgmr.msra.gmra.mxu0 %v6789_v45 }
 0xd63   :  { %v5563_v37 = vadd.f32 %v5562_v31, %v5540_v17 }
 0xd64   :  { %5929 = vmatmul.f32.gmra.mxu3 %v6791_v52  ;;  %5975 = vmatmul.f32.gmra.mxu1 %v6791_v52 }
 0xd65   :  { %v6001_v38 = vmax.f32 %v5563_v37, 0.0 }
 0xd67   :  { %6033 = vst [vmem:[#allocation22 + $0xb0] sm:$0xff] %v6001_v38 }
 0xd6a   :  { %5906 = vmatmul.f32.gmra.mxu2 %v6797_v57  ;;  %5952 = vmatmul.f32.gmra.mxu0 %v6797_v57 }
 0xd6d   :  { %v5697_v43 = vpop.f32.mrf.mxu1 }
 0xd73   :  { %v5651_v49 = vpop.f32.mrf.mxu3 }
 0xd74   :  { %v5674_v41 = vpop.f32.mrf.mxu0 }
 0xd75   :  { %v5675_v42 = vadd.f32 %v5674_v41, %v5220_v40 }
 0xd77   :  { %v5698_v45 = vadd.f32 %v5697_v43, %v5675_v42  ;;  %v5700_v57 = vpop.f32.mrf.mxu1  ;;  %v5226_v43 = vperm.slane %v6895_v39, 7 }
 0xd79   :  { %v5988_v46 = vmax.f32 %v5698_v45, 0.0 }
 0xd7a   :  { %v5628_v47 = vpop.f32.mrf.mxu2 }
 0xd7b   :  { %6020 = vst [vmem:[#allocation22 + $0x48] sm:$0xff] %v5988_v46  ;;  %v5629_v52 = vadd.f32 %v5628_v47, %v5219_v44 }
 0xd7d   :  { %v5652_v50 = vadd.f32 %v5651_v49, %v5629_v52  ;;  %v5654_v59 = vpop.f32.mrf.mxu3  ;;  %v5225_v52 = vperm.slane %v6895_v39, 6 }
 0xd7e   :  { %v5677_v51 = vpop.f32.mrf.mxu0 }
 0xd7f   :  { %v5987_v53 = vmax.f32 %v5652_v50, 0.0  ;;  %v5678_v48 = vadd.f32 %v5677_v51, %v5220_v40 }
 0xd81   :  { %6019 = vst [vmem:[#allocation22 + $0x40] sm:$0xff] %v5987_v53  ;;  %v5701_v54 = vadd.f32 %v5700_v57, %v5678_v48 }
 0xd83   :  { %v6004_v55 = vmax.f32 %v5701_v54, 0.0 }
 0xd84   :  { %v5631_v56 = vpop.f32.mrf.mxu2 }
 0xd85   :  { %6036 = vst [vmem:[#allocation22 + $0xc8] sm:$0xff] %v6004_v55  ;;  %v5632_v58 = vadd.f32 %v5631_v56, %v5219_v44 }
 0xd87   :  { %v5655_v60 = vadd.f32 %v5654_v59, %v5632_v58 }
 0xd89   :  { %v6003_v61 = vmax.f32 %v5655_v60, 0.0 }
 0xd8b   :  { %6035 = vst [vmem:[#allocation22 + $0xc0] sm:$0xff] %v6003_v61 }
 0xd91   :  { %v5789_v2 = vpop.f32.mrf.mxu1 }
 0xd97   :  { %v5743_v7 = vpop.f32.mrf.mxu3 }
 0xd98   :  { %v5766_v63 = vpop.f32.mrf.mxu0 }
 0xd99   :  { %v5767_v1 = vadd.f32 %v5766_v63, %v5222_v62 }
 0xd9b   :  { %v5790_v0 = vadd.f32 %v5789_v2, %v5767_v1  ;;  %v5792_v12 = vpop.f32.mrf.mxu1 }
 0xd9d   :  { %v5990_v4 = vmax.f32 %v5790_v0, 0.0 }
 0xd9e   :  { %v5720_v5 = vpop.f32.mrf.mxu2 }
 0xd9f   :  { %6022 = vst [vmem:[#allocation22 + $0x58] sm:$0xff] %v5990_v4  ;;  %v5721_v6 = vadd.f32 %v5720_v5, %v5221_v3 }
 0xda1   :  { %v5744_v8 = vadd.f32 %v5743_v7, %v5721_v6  ;;  %v5746_v18 = vpop.f32.mrf.mxu3 }
 0xda2   :  { %v5769_v9 = vpop.f32.mrf.mxu0 }
 0xda3   :  { %v5989_v10 = vmax.f32 %v5744_v8, 0.0  ;;  %v5770_v11 = vadd.f32 %v5769_v9, %v5222_v62 }
 0xda5   :  { %6021 = vst [vmem:[#allocation22 + $0x50] sm:$0xff] %v5989_v10  ;;  %v5793_v13 = vadd.f32 %v5792_v12, %v5770_v11 }
 0xda7   :  { %v6006_v14 = vmax.f32 %v5793_v13, 0.0 }
 0xda8   :  { %v5723_v15 = vpop.f32.mrf.mxu2 }
 0xda9   :  { %6038 = vst [vmem:[#allocation22 + $0xd8] sm:$0xff] %v6006_v14  ;;  %v5724_v16 = vadd.f32 %v5723_v15, %v5221_v3 }
 0xdab   :  { %v5747_v19 = vadd.f32 %v5746_v18, %v5724_v16 }
 0xdad   :  { %v6005_v20 = vmax.f32 %v5747_v19, 0.0 }
 0xdaf   :  { %6037 = vst [vmem:[#allocation22 + $0xd0] sm:$0xff] %v6005_v20 }
 0xdb5   :  { %v5881_v24 = vpop.f32.mrf.mxu1 }
 0xdbb   :  { %v5835_v30 = vpop.f32.mrf.mxu3 }
 0xdbc   :  { %v5858_v22 = vpop.f32.mrf.mxu0 }
 0xdbd   :  { %v5859_v23 = vadd.f32 %v5858_v22, %v5224_v21 }
 0xdbf   :  { %v5882_v25 = vadd.f32 %v5881_v24, %v5859_v23  ;;  %v5884_v36 = vpop.f32.mrf.mxu1 }
 0xdc1   :  { %v5992_v27 = vmax.f32 %v5882_v25, 0.0 }
 0xdc2   :  { %v5812_v28 = vpop.f32.mrf.mxu2 }
 0xdc3   :  { %6024 = vst [vmem:[#allocation22 + $0x68] sm:$0xff] %v5992_v27  ;;  %v5813_v29 = vadd.f32 %v5812_v28, %v5223_v26 }
 0xdc5   :  { %v5836_v32 = vadd.f32 %v5835_v30, %v5813_v29  ;;  %v5838_v40 = vpop.f32.mrf.mxu3 }
 0xdc6   :  { %v5861_v33 = vpop.f32.mrf.mxu0 }
 0xdc7   :  { %v5991_v34 = vmax.f32 %v5836_v32, 0.0  ;;  %v5862_v35 = vadd.f32 %v5861_v33, %v5224_v21 }
 0xdc9   :  { %6023 = vst [vmem:[#allocation22 + $0x60] sm:$0xff] %v5991_v34  ;;  %v5885_v17 = vadd.f32 %v5884_v36, %v5862_v35 }
 0xdcb   :  { %v6008_v31 = vmax.f32 %v5885_v17, 0.0 }
 0xdcc   :  { %v5815_v37 = vpop.f32.mrf.mxu2 }
 0xdcd   :  { %6040 = vst [vmem:[#allocation22 + $0xe8] sm:$0xff] %v6008_v31  ;;  %v5816_v38 = vadd.f32 %v5815_v37, %v5223_v26 }
 0xdcf   :  { %v5839_v41 = vadd.f32 %v5838_v40, %v5816_v38 }
 0xdd1   :  { %v6007_v42 = vmax.f32 %v5839_v41, 0.0 }
 0xdd3   :  { %6039 = vst [vmem:[#allocation22 + $0xe0] sm:$0xff] %v6007_v42 }
 0xdd9   :  { %v5973_v45 = vpop.f32.mrf.mxu1 }
 0xddf   :  { %v5950_v44 = vpop.f32.mrf.mxu0  ;;  %v5927_v50 = vpop.f32.mrf.mxu3 }
 0xde0   :  { %v5951_v46 = vadd.f32 %v5950_v44, %v5226_v43 }
 0xde1   :  { %v5976_v55 = vpop.f32.mrf.mxu1 }
 0xde2   :  { %v5974_v47 = vadd.f32 %v5973_v45, %v5951_v46 }
 0xde4   :  { %v5994_v49 = vmax.f32 %v5974_v47, 0.0 }
 0xde5   :  { %v5904_v51 = vpop.f32.mrf.mxu2 }
 0xde6   :  { %6026 = vst [vmem:[#allocation22 + $0x78] sm:$0xff] %v5994_v49  ;;  %v5905_v53 = vadd.f32 %v5904_v51, %v5225_v52 }
 0xde7   :  { %v5953_v48 = vpop.f32.mrf.mxu0  ;;  %v5930_v62 = vpop.f32.mrf.mxu3 }
 0xde8   :  { %v5928_v57 = vadd.f32 %v5927_v50, %v5905_v53  ;;  %v5954_v54 = vadd.f32 %v5953_v48, %v5226_v43 }
 0xdea   :  { %v5993_v56 = vmax.f32 %v5928_v57, 0.0  ;;  %v5977_v58 = vadd.f32 %v5976_v55, %v5954_v54 }
 0xdec   :  { %6025 = vst [vmem:[#allocation22 + $0x70] sm:$0xff] %v5993_v56  ;;  %v6010_v59 = vmax.f32 %v5977_v58, 0.0 }
 0xded   :  { %v5907_v60 = vpop.f32.mrf.mxu2 }
 0xdee   :  { %6042 = vst [vmem:[#allocation22 + $0xf8] sm:$0xff] %v6010_v59  ;;  %v5908_v61 = vadd.f32 %v5907_v60, %v5225_v52 }
 0xdf0   :  { %v5931_v39 = vadd.f32 %v5930_v62, %v5908_v61 }
 0xdf2   :  { %v6009_v63 = vmax.f32 %v5931_v39, 0.0 }
 0xdf4   :  { %6041 = vst [vmem:[#allocation22 + $0xf0] sm:$0xff] %v6009_v63 }
 0xdf5   :  { %6055 = dma.vmem_to_hbm [thread:$0]  %s6048_s2, 4096, %s6050_s1, [#allocation4], %s6462_s3, %s6462_s3, %s6463_s22  }
 0xdf6   :  { %6450 = dma.done.wait [#allocation4], 4096  }
 0xdf7   :  { %6451 = vsyncadd [#allocation4], 4294963200 }
 0xdf8   :  { %6060 = vsyncpa [#allocation3], 1 }
 0xdf9   :  { %6061 = vsyncpa [#allocation6], 1 }
 0xdfa   :  { %6062 = vsyncpa [#allocation9], 1 }
 0xdfb   :  { %6063 = vsyncpa [#allocation12], 1 }
 0xdfc   :  { %6064 = vsyncpa [#allocation15], 1 }
 0xdfd   :  { %6065 = vsyncpa [#allocation18], 1 }
 0xdfe   :  { %6066 = vsyncpa [#allocation21], 1 }
 0xdff   :  { %6067 = vsyncpa [#allocation4], 1 }

</bundles_post_ra>
